<compile_context>
chip_gen: v5e
topology: v5e:2x2
jax: 0.10.0
libtpu: 0.0.40
codegen_flags: <defaults>
</compile_context>

<pallas_src>
import jax
import jax.numpy as jnp
from jax.experimental import pallas as pl
from jax.experimental.pallas import tpu as pltpu

EPS = 1e-5  # nn.InstanceNorm2d default


# ---------------------------------------------------------------------------
# Fused Pallas kernel (one batch element per grid step)
# ---------------------------------------------------------------------------
def _res_block_kernel(x_ref, xres_ref, w1_ref, w2_ref, aff_ref, o_ref):
    # x_ref   : (Hp, Wa, Cp) bf16  reflection-padded, W/C zero-padded input
    # xres_ref: (C, H*W)     f32   original x, channel-major (residual)
    # w1/w2   : (9*Cp, Cp)   bf16  rows ordered [(ky*3+kx)*Cp + cin], cols cout
    # aff_ref : (4, Cp)      f32   rows = gamma1, beta1, gamma2, beta2
    # o_ref   : (C, H*W)     f32
    Hp, Wa, Cp = x_ref.shape
    H = Hp - 2
    C, HW = o_ref.shape
    W = HW // H
    mxu_dtype = w1_ref.dtype

    def conv3x3(xpad, w_ref):
        # xpad: (Hp, Wa, Cp) padded activation in MXU dtype.
        # Single K = 9*Cp matmul over an im2col built from row-slices of two
        # column-shifted copies of the slab (Wa % 8 == 0 keeps slices/reshapes
        # layout-preserving). Only output columns w < W are valid.
        z1 = jnp.zeros((Hp, 1, Cp), xpad.dtype)
        sh = [xpad,
              jnp.concatenate([xpad[:, 1:, :], z1], axis=1),
              jnp.concatenate([xpad[:, 2:, :], z1, z1], axis=1)]
        blocks = [sh[kx][ky:ky + H] for ky in range(3) for kx in range(3)]
        lhs = jnp.concatenate(blocks, axis=-1).reshape(H * Wa, 9 * Cp)
        y = jnp.dot(lhs, w_ref[...], preferred_element_type=jnp.float32)
        # keep only the W valid output columns (aligned slice, then merge dims)
        return y.reshape(H, Wa, Cp)[:, :W, :].reshape(H * W, Cp)

    def instance_norm(y, gamma, beta):
        # two-pass statistics in f32 (safer than E[x^2]-mean^2)
        mean = jnp.mean(y, axis=0, keepdims=True)
        cen = y - mean
        var = jnp.mean(cen * cen, axis=0, keepdims=True)
        return cen * jax.lax.rsqrt(var + EPS) * gamma + beta

    g1, b1 = aff_ref[0:1, :], aff_ref[1:2, :]
    g2, b2 = aff_ref[2:3, :], aff_ref[3:4, :]

    # ---- stage 1: conv1 -> InstanceNorm -> ReLU (conv bias cancelled by IN)
    h1 = jnp.maximum(instance_norm(conv3x3(x_ref[...], w1_ref), g1, b1), 0.0)
    h1 = h1.astype(mxu_dtype).reshape(H, W, Cp)

    # ---- reflection-pad h1 (pad=1) into an 8-aligned (Hp, Wa, Cp) slab
    pieces = [h1[:, 1:2, :], h1, h1[:, W - 2:W - 1, :]]
    if Wa > W + 2:
        pieces.append(jnp.zeros((H, Wa - (W + 2), Cp), mxu_dtype))
    rows = jnp.concatenate(pieces, axis=1)                        # (H, Wa, Cp)
    h1p = jnp.concatenate([rows[1:2], rows, rows[H - 2:H - 1]], axis=0)

    # ---- stage 2: conv2 -> InstanceNorm
    r = instance_norm(conv3x3(h1p, w2_ref), g2, b2)               # (H*W, Cp)

    # ---- channel-major output + residual: only the C real channels hit HBM
    rt = jnp.transpose(r, (1, 0))                                 # (Cp, H*W)
    o_ref[...] = (rt[:C, :] + xres_ref[...]).astype(o_ref.dtype)


# ---------------------------------------------------------------------------
# Wrapper
# ---------------------------------------------------------------------------
def _round_up(v, m):
    return (v + m - 1) // m * m


def _vmem_limit(Hp, Wa, Cp, H, W, C, compute_dtype):
    bpe = jnp.dtype(compute_dtype).itemsize
    HW = H * W
    x_blk = Hp * Wa * Cp * bpe
    io_blk = 2 * C * HW * 4                        # residual in + output
    w_blk = 2 * 9 * Cp * Cp * bpe
    aff_blk = 4 * Cp * 4
    pipeline = 2 * (x_blk + io_blk + w_blk + aff_blk)   # double-buffered blocks
    temps = ((3 * Hp * Wa * Cp + 9 * H * Wa * Cp) * bpe   # shifts + im2col
             + 8 * HW * Cp * 4 + 2 * H * Wa * Cp * 4)     # f32 slabs
    need = pipeline + temps + (8 << 20)
    try:
        cap = int(pltpu.get_tpu_info().vmem_capacity_bytes)
    except Exception:
        cap = 64 << 20                             # conservative fallback
    # per-generation cap (128 MiB on v5e/v6e, 64 MiB on v7x) with ~25% headroom
    return int(min(max(need, 32 << 20), cap * 3 // 4))


def residual_block_forward(x_nchw, params, *, compute_dtype=jnp.bfloat16):
    N, C, H, W = x_nchw.shape
    assert H >= 2 and W >= 2, "ReflectionPad2d(1) requires spatial dims >= 2"
    Cp = _round_up(max(C, 128), 128)               # lane-dense channels for MXU
    Hp = H + 2
    Wa = _round_up(W + 2, 8)                       # 8-aligned padded width
    HW = H * W

    xf = x_nchw.astype(jnp.float32)
    x_res = xf.reshape(N, C, HW)                   # residual side input (free)

    # conv input: NHWC, reflection-pad, zero-pad W -> Wa and C -> Cp, bf16 HBM
    xh = jnp.transpose(xf, (0, 2, 3, 1))
    xh = jnp.pad(xh, ((0, 0), (1, 1), (1, 1), (0, 0)), mode="reflect")
    xh = jnp.pad(xh, ((0, 0), (0, 0), (0, Wa - (W + 2)), (0, Cp - C)))
    xh = xh.astype(compute_dtype)

    def prep_w(w):   # (Cout, Cin, 3, 3) -> (9*Cp, Cp), rows = (ky, kx, cin)
        w = jnp.transpose(w, (2, 3, 1, 0))
        w = jnp.pad(w, ((0, 0), (0, 0), (0, Cp - C), (0, Cp - C)))
        return w.reshape(9 * Cp, Cp).astype(compute_dtype)

    def prep_v(v):
        return jnp.pad(v.astype(jnp.float32), (0, Cp - C))

    w1, w2 = prep_w(params["w1"]), prep_w(params["w2"])
    # conv biases are mathematically removed by InstanceNorm -> not passed.
    affine = jnp.stack([prep_v(params["g1"]), prep_v(params["be1"]),
                        prep_v(params["g2"]), prep_v(params["be2"])])  # (4, Cp)

    out = pl.pallas_call(
        _res_block_kernel,
        out_shape=jax.ShapeDtypeStruct((N, C, HW), jnp.float32),
        grid_spec=pltpu.PrefetchScalarGridSpec(
            num_scalar_prefetch=0,
            grid=(N,),
            in_specs=[
                pl.BlockSpec((pl.Squeezed(), Hp, Wa, Cp),
                             lambda n: (n, 0, 0, 0)),
                pl.BlockSpec((pl.Squeezed(), C, HW), lambda n: (n, 0, 0)),
                # NOTE: weights/affine are grid-invariant; at Cp >= 256 mark
                # them pipeline_mode=pl.Buffered(1) to drop the second buffer.
                pl.BlockSpec((9 * Cp, Cp), lambda n: (0, 0)),
                pl.BlockSpec((9 * Cp, Cp), lambda n: (0, 0)),
                pl.BlockSpec((4, Cp), lambda n: (0, 0)),
            ],
            out_specs=pl.BlockSpec((pl.Squeezed(), C, HW),
                                   lambda n: (n, 0, 0)),
        ),
        compiler_params=pltpu.CompilerParams(
            dimension_semantics=("parallel",),
            vmem_limit_bytes=_vmem_limit(Hp, Wa, Cp, H, W, C, compute_dtype),
        ),
    )(xh, x_res, w1, w2, affine)

    return out.reshape(N, C, H, W)                 # pure reshape, no transpose


# ---------------------------------------------------------------------------
# Pure-JAX f32 reference (faithful to the PyTorch module)
# ---------------------------------------------------------------------------
def _reference(x_nchw, params):
    def conv(x, w, b):
        xp = jnp.pad(x, ((0, 0), (0, 0), (1, 1), (1, 1)), mode="reflect")
        y = jax.lax.conv_general_dilated(
            xp, w, window_strides=(1, 1), padding="VALID",
            dimension_numbers=("NCHW", "OIHW", "NCHW"))
        return y + b[None, :, None, None]

    def inorm(x, g, b):
        m = jnp.mean(x, axis=(2, 3), keepdims=True)
        v = jnp.mean((x - m) ** 2, axis=(2, 3), keepdims=True)
        return (x - m) * jax.lax.rsqrt(v + EPS) * g[None, :, None, None] \
               + b[None, :, None, None]

    r = jax.nn.relu(inorm(conv(x_nchw, params["w1"], params["b1"]),
                          params["g1"], params["be1"]))
    r = inorm(conv(r, params["w2"], params["b2"]), params["g2"], params["be2"])
    return r + x_nchw


# ---------------------------------------------------------------------------
if __name__ == "__main__":
    N, C, H, W = 2, 4, 16, 16

    key = jax.random.PRNGKey(0)
    ks = jax.random.split(key, 9)
    params = {
        "w1": 0.1 * jax.random.normal(ks[0], (C, C, 3, 3), jnp.float32),
        "b1": 0.1 * jax.random.normal(ks[1], (C,), jnp.float32),
        "g1": 1.0 + 0.1 * jax.random.normal(ks[2], (C,), jnp.float32),
        "be1": 0.1 * jax.random.normal(ks[3], (C,), jnp.float32),
        "w2": 0.1 * jax.random.normal(ks[4], (C, C, 3, 3), jnp.float32),
        "b2": 0.1 * jax.random.normal(ks[5], (C,), jnp.float32),
        "g2": 1.0 + 0.1 * jax.random.normal(ks[6], (C,), jnp.float32),
        "be2": 0.1 * jax.random.normal(ks[7], (C,), jnp.float32),
    }
    x = jax.random.normal(ks[8], (N, C, H, W), jnp.float32)

    fwd = jax.jit(lambda xx: residual_block_forward(xx, params))
    out = jax.block_until_ready(fwd(x))

    ref = _reference(x, params)
    assert out.shape == (N, C, H, W)
    # bf16 MXU operands with f32 accumulation -> relaxed tolerance vs f32 ref
    assert jnp.allclose(out, ref, atol=5e-2, rtol=5e-2), "mismatch vs reference"

    print("KERNEL_OK")
</pallas_src>

<mosaic_0001>
module attributes {stable_mosaic.version = 11 : i64} {
  func.func @_res_block_kernel(%arg0: i32, %arg1: memref<1x18x24x128xbf16, #tpu.memory_space<vmem>>, %arg2: memref<1x4x256xf32, #tpu.memory_space<vmem>>, %arg3: memref<1152x128xbf16, #tpu.memory_space<vmem>>, %arg4: memref<1152x128xbf16, #tpu.memory_space<vmem>>, %arg5: memref<4x128xf32, #tpu.memory_space<vmem>>, %arg6: memref<1x4x256xf32, #tpu.memory_space<vmem>>) attributes {dimension_semantics = [#tpu.dimension_semantics<parallel>], iteration_bounds = array<i64: 2>, scalar_prefetch = 0 : i64, scratch_operands = 0 : i64, tpu.core_type = #tpu.core_type<tc>, window_params = [{transform_indices = @transform_0, window_bounds = array<i64: 1, 18, 24, 128>}, {transform_indices = @transform_1, window_bounds = array<i64: 1, 4, 256>}, {pipeline_mode = #tpu.pipeline_mode<synchronous>, transform_indices = @transform_2, window_bounds = array<i64: 1152, 128>}, {pipeline_mode = #tpu.pipeline_mode<synchronous>, transform_indices = @transform_3, window_bounds = array<i64: 1152, 128>}, {pipeline_mode = #tpu.pipeline_mode<synchronous>, transform_indices = @transform_4, window_bounds = array<i64: 4, 128>}, {transform_indices = @transform_5, window_bounds = array<i64: 1, 4, 256>}]} {
    %c0 = arith.constant 0 : index
    %c0_0 = arith.constant 0 : index
    %0 = vector.load %arg5[%c0, %c0_0] : memref<4x128xf32, #tpu.memory_space<vmem>>, vector<1x128xf32>
    %c1 = arith.constant 1 : index
    %c0_1 = arith.constant 0 : index
    %1 = vector.load %arg5[%c1, %c0_1] : memref<4x128xf32, #tpu.memory_space<vmem>>, vector<1x128xf32>
    %c2 = arith.constant 2 : index
    %c0_2 = arith.constant 0 : index
    %2 = vector.load %arg5[%c2, %c0_2] : memref<4x128xf32, #tpu.memory_space<vmem>>, vector<1x128xf32>
    %c3 = arith.constant 3 : index
    %c0_3 = arith.constant 0 : index
    %3 = vector.load %arg5[%c3, %c0_3] : memref<4x128xf32, #tpu.memory_space<vmem>>, vector<1x128xf32>
    %c0_4 = arith.constant 0 : index
    %c0_5 = arith.constant 0 : index
    %c0_6 = arith.constant 0 : index
    %c0_7 = arith.constant 0 : index
    %4 = vector.load %arg1[%c0_4, %c0_5, %c0_6, %c0_7] : memref<1x18x24x128xbf16, #tpu.memory_space<vmem>>, vector<1x18x24x128xbf16>
    %5 = vector.shape_cast %4 : vector<1x18x24x128xbf16> to vector<18x24x128xbf16>
    %cst = arith.constant 0.000000e+00 : bf16
    %6 = vector.broadcast %cst : bf16 to vector<18x1x128xbf16>
    %7 = vector.extract_strided_slice %5 {offsets = [0, 1, 0], sizes = [18, 23, 128], strides = [1, 1, 1]} : vector<18x24x128xbf16> to vector<18x23x128xbf16>
    %8 = tpu.concatenate %7, %6 in 1 : vector<18x23x128xbf16>, vector<18x1x128xbf16> -> vector<18x24x128xbf16>
    %9 = vector.extract_strided_slice %5 {offsets = [0, 2, 0], sizes = [18, 22, 128], strides = [1, 1, 1]} : vector<18x24x128xbf16> to vector<18x22x128xbf16>
    %10 = tpu.concatenate %9, %6, %6 in 1 : vector<18x22x128xbf16>, vector<18x1x128xbf16>, vector<18x1x128xbf16> -> vector<18x24x128xbf16>
    %11 = vector.extract_strided_slice %5 {offsets = [0, 0, 0], sizes = [16, 24, 128], strides = [1, 1, 1]} : vector<18x24x128xbf16> to vector<16x24x128xbf16>
    %12 = vector.extract_strided_slice %8 {offsets = [0, 0, 0], sizes = [16, 24, 128], strides = [1, 1, 1]} : vector<18x24x128xbf16> to vector<16x24x128xbf16>
    %13 = vector.extract_strided_slice %10 {offsets = [0, 0, 0], sizes = [16, 24, 128], strides = [1, 1, 1]} : vector<18x24x128xbf16> to vector<16x24x128xbf16>
    %14 = vector.extract_strided_slice %5 {offsets = [1, 0, 0], sizes = [16, 24, 128], strides = [1, 1, 1]} : vector<18x24x128xbf16> to vector<16x24x128xbf16>
    %15 = vector.extract_strided_slice %8 {offsets = [1, 0, 0], sizes = [16, 24, 128], strides = [1, 1, 1]} : vector<18x24x128xbf16> to vector<16x24x128xbf16>
    %16 = vector.extract_strided_slice %10 {offsets = [1, 0, 0], sizes = [16, 24, 128], strides = [1, 1, 1]} : vector<18x24x128xbf16> to vector<16x24x128xbf16>
    %17 = vector.extract_strided_slice %5 {offsets = [2, 0, 0], sizes = [16, 24, 128], strides = [1, 1, 1]} : vector<18x24x128xbf16> to vector<16x24x128xbf16>
    %18 = vector.extract_strided_slice %8 {offsets = [2, 0, 0], sizes = [16, 24, 128], strides = [1, 1, 1]} : vector<18x24x128xbf16> to vector<16x24x128xbf16>
    %19 = vector.extract_strided_slice %10 {offsets = [2, 0, 0], sizes = [16, 24, 128], strides = [1, 1, 1]} : vector<18x24x128xbf16> to vector<16x24x128xbf16>
    %20 = tpu.concatenate %11, %12, %13, %14, %15, %16, %17, %18, %19 in 2 : vector<16x24x128xbf16>, vector<16x24x128xbf16>, vector<16x24x128xbf16>, vector<16x24x128xbf16>, vector<16x24x128xbf16>, vector<16x24x128xbf16>, vector<16x24x128xbf16>, vector<16x24x128xbf16>, vector<16x24x128xbf16> -> vector<16x24x1152xbf16>
    %21 = vector.shape_cast %20 : vector<16x24x1152xbf16> to vector<384x1152xbf16>
    %c0_8 = arith.constant 0 : index
    %c0_9 = arith.constant 0 : index
    %22 = vector.load %arg3[%c0_8, %c0_9] : memref<1152x128xbf16, #tpu.memory_space<vmem>>, vector<1152x128xbf16>
    %cst_10 = arith.constant dense<0.000000e+00> : vector<384x128xf32>
    %23 = tpu.matmul %21, %22, %cst_10 {dimension_numbers = #tpu.dot_dimension_numbers<[1], [0], [0], [1], [0, 0, 1, 1], [], []>} : vector<384x1152xbf16>, vector<1152x128xbf16>, vector<384x128xf32> -> vector<384x128xf32>
    %24 = vector.shape_cast %23 : vector<384x128xf32> to vector<16x24x128xf32>
    %25 = vector.extract_strided_slice %24 {offsets = [0, 0, 0], sizes = [16, 16, 128], strides = [1, 1, 1]} : vector<16x24x128xf32> to vector<16x16x128xf32>
    %26 = vector.shape_cast %25 : vector<16x16x128xf32> to vector<256x128xf32>
    %cst_11 = arith.constant dense<0.000000e+00> : vector<128xf32>
    %27 = vector.multi_reduction <add>, %26, %cst_11 [0] : vector<256x128xf32> to vector<128xf32>
    %28 = vector.shape_cast %27 : vector<128xf32> to vector<1x128xf32>
    %cst_12 = arith.constant 2.560000e+02 : f32
    %29 = vector.broadcast %cst_12 : f32 to vector<1x128xf32>
    %30 = arith.divf %28, %29 : vector<1x128xf32>
    %31 = vector.broadcast %30 : vector<1x128xf32> to vector<256x128xf32>
    %32 = arith.subf %26, %31 : vector<256x128xf32>
    %33 = arith.mulf %32, %32 : vector<256x128xf32>
    %cst_13 = arith.constant dense<0.000000e+00> : vector<128xf32>
    %34 = vector.multi_reduction <add>, %33, %cst_13 [0] : vector<256x128xf32> to vector<128xf32>
    %35 = vector.shape_cast %34 : vector<128xf32> to vector<1x128xf32>
    %cst_14 = arith.constant 2.560000e+02 : f32
    %36 = vector.broadcast %cst_14 : f32 to vector<1x128xf32>
    %37 = arith.divf %35, %36 : vector<1x128xf32>
    %cst_15 = arith.constant 9.99999974E-6 : f32
    %38 = vector.broadcast %cst_15 : f32 to vector<1x128xf32>
    %39 = arith.addf %37, %38 : vector<1x128xf32>
    %40 = math.rsqrt %39 : vector<1x128xf32>
    %41 = vector.broadcast %40 : vector<1x128xf32> to vector<256x128xf32>
    %42 = arith.mulf %32, %41 : vector<256x128xf32>
    %43 = vector.broadcast %0 : vector<1x128xf32> to vector<256x128xf32>
    %44 = arith.mulf %42, %43 : vector<256x128xf32>
    %45 = vector.broadcast %1 : vector<1x128xf32> to vector<256x128xf32>
    %46 = arith.addf %44, %45 : vector<256x128xf32>
    %cst_16 = arith.constant 0.000000e+00 : f32
    %47 = vector.broadcast %cst_16 : f32 to vector<256x128xf32>
    %48 = arith.maximumf %46, %47 : vector<256x128xf32>
    %49 = arith.truncf %48 : vector<256x128xf32> to vector<256x128xbf16>
    %50 = vector.shape_cast %49 : vector<256x128xbf16> to vector<16x16x128xbf16>
    %51 = vector.extract_strided_slice %50 {offsets = [0, 1, 0], sizes = [16, 1, 128], strides = [1, 1, 1]} : vector<16x16x128xbf16> to vector<16x1x128xbf16>
    %52 = vector.extract_strided_slice %50 {offsets = [0, 14, 0], sizes = [16, 1, 128], strides = [1, 1, 1]} : vector<16x16x128xbf16> to vector<16x1x128xbf16>
    %cst_17 = arith.constant 0.000000e+00 : bf16
    %53 = vector.broadcast %cst_17 : bf16 to vector<16x6x128xbf16>
    %54 = tpu.concatenate %51, %50, %52, %53 in 1 : vector<16x1x128xbf16>, vector<16x16x128xbf16>, vector<16x1x128xbf16>, vector<16x6x128xbf16> -> vector<16x24x128xbf16>
    %55 = vector.extract_strided_slice %54 {offsets = [1, 0, 0], sizes = [1, 24, 128], strides = [1, 1, 1]} : vector<16x24x128xbf16> to vector<1x24x128xbf16>
    %56 = vector.extract_strided_slice %54 {offsets = [14, 0, 0], sizes = [1, 24, 128], strides = [1, 1, 1]} : vector<16x24x128xbf16> to vector<1x24x128xbf16>
    %57 = tpu.concatenate %55, %54, %56 in 0 : vector<1x24x128xbf16>, vector<16x24x128xbf16>, vector<1x24x128xbf16> -> vector<18x24x128xbf16>
    %cst_18 = arith.constant 0.000000e+00 : bf16
    %58 = vector.broadcast %cst_18 : bf16 to vector<18x1x128xbf16>
    %59 = vector.extract_strided_slice %57 {offsets = [0, 1, 0], sizes = [18, 23, 128], strides = [1, 1, 1]} : vector<18x24x128xbf16> to vector<18x23x128xbf16>
    %60 = tpu.concatenate %59, %58 in 1 : vector<18x23x128xbf16>, vector<18x1x128xbf16> -> vector<18x24x128xbf16>
    %61 = vector.extract_strided_slice %57 {offsets = [0, 2, 0], sizes = [18, 22, 128], strides = [1, 1, 1]} : vector<18x24x128xbf16> to vector<18x22x128xbf16>
    %62 = tpu.concatenate %61, %58, %58 in 1 : vector<18x22x128xbf16>, vector<18x1x128xbf16>, vector<18x1x128xbf16> -> vector<18x24x128xbf16>
    %63 = vector.extract_strided_slice %57 {offsets = [0, 0, 0], sizes = [16, 24, 128], strides = [1, 1, 1]} : vector<18x24x128xbf16> to vector<16x24x128xbf16>
    %64 = vector.extract_strided_slice %60 {offsets = [0, 0, 0], sizes = [16, 24, 128], strides = [1, 1, 1]} : vector<18x24x128xbf16> to vector<16x24x128xbf16>
    %65 = vector.extract_strided_slice %62 {offsets = [0, 0, 0], sizes = [16, 24, 128], strides = [1, 1, 1]} : vector<18x24x128xbf16> to vector<16x24x128xbf16>
    %66 = vector.extract_strided_slice %57 {offsets = [1, 0, 0], sizes = [16, 24, 128], strides = [1, 1, 1]} : vector<18x24x128xbf16> to vector<16x24x128xbf16>
    %67 = vector.extract_strided_slice %60 {offsets = [1, 0, 0], sizes = [16, 24, 128], strides = [1, 1, 1]} : vector<18x24x128xbf16> to vector<16x24x128xbf16>
    %68 = vector.extract_strided_slice %62 {offsets = [1, 0, 0], sizes = [16, 24, 128], strides = [1, 1, 1]} : vector<18x24x128xbf16> to vector<16x24x128xbf16>
    %69 = vector.extract_strided_slice %57 {offsets = [2, 0, 0], sizes = [16, 24, 128], strides = [1, 1, 1]} : vector<18x24x128xbf16> to vector<16x24x128xbf16>
    %70 = vector.extract_strided_slice %60 {offsets = [2, 0, 0], sizes = [16, 24, 128], strides = [1, 1, 1]} : vector<18x24x128xbf16> to vector<16x24x128xbf16>
    %71 = vector.extract_strided_slice %62 {offsets = [2, 0, 0], sizes = [16, 24, 128], strides = [1, 1, 1]} : vector<18x24x128xbf16> to vector<16x24x128xbf16>
    %72 = tpu.concatenate %63, %64, %65, %66, %67, %68, %69, %70, %71 in 2 : vector<16x24x128xbf16>, vector<16x24x128xbf16>, vector<16x24x128xbf16>, vector<16x24x128xbf16>, vector<16x24x128xbf16>, vector<16x24x128xbf16>, vector<16x24x128xbf16>, vector<16x24x128xbf16>, vector<16x24x128xbf16> -> vector<16x24x1152xbf16>
    %73 = vector.shape_cast %72 : vector<16x24x1152xbf16> to vector<384x1152xbf16>
    %c0_19 = arith.constant 0 : index
    %c0_20 = arith.constant 0 : index
    %74 = vector.load %arg4[%c0_19, %c0_20] : memref<1152x128xbf16, #tpu.memory_space<vmem>>, vector<1152x128xbf16>
    %cst_21 = arith.constant dense<0.000000e+00> : vector<384x128xf32>
    %75 = tpu.matmul %73, %74, %cst_21 {dimension_numbers = #tpu.dot_dimension_numbers<[1], [0], [0], [1], [0, 0, 1, 1], [], []>} : vector<384x1152xbf16>, vector<1152x128xbf16>, vector<384x128xf32> -> vector<384x128xf32>
    %76 = vector.shape_cast %75 : vector<384x128xf32> to vector<16x24x128xf32>
    %77 = vector.extract_strided_slice %76 {offsets = [0, 0, 0], sizes = [16, 16, 128], strides = [1, 1, 1]} : vector<16x24x128xf32> to vector<16x16x128xf32>
    %78 = vector.shape_cast %77 : vector<16x16x128xf32> to vector<256x128xf32>
    %cst_22 = arith.constant dense<0.000000e+00> : vector<128xf32>
    %79 = vector.multi_reduction <add>, %78, %cst_22 [0] : vector<256x128xf32> to vector<128xf32>
    %80 = vector.shape_cast %79 : vector<128xf32> to vector<1x128xf32>
    %cst_23 = arith.constant 2.560000e+02 : f32
    %81 = vector.broadcast %cst_23 : f32 to vector<1x128xf32>
    %82 = arith.divf %80, %81 : vector<1x128xf32>
    %83 = vector.broadcast %82 : vector<1x128xf32> to vector<256x128xf32>
    %84 = arith.subf %78, %83 : vector<256x128xf32>
    %85 = arith.mulf %84, %84 : vector<256x128xf32>
    %cst_24 = arith.constant dense<0.000000e+00> : vector<128xf32>
    %86 = vector.multi_reduction <add>, %85, %cst_24 [0] : vector<256x128xf32> to vector<128xf32>
    %87 = vector.shape_cast %86 : vector<128xf32> to vector<1x128xf32>
    %cst_25 = arith.constant 2.560000e+02 : f32
    %88 = vector.broadcast %cst_25 : f32 to vector<1x128xf32>
    %89 = arith.divf %87, %88 : vector<1x128xf32>
    %cst_26 = arith.constant 9.99999974E-6 : f32
    %90 = vector.broadcast %cst_26 : f32 to vector<1x128xf32>
    %91 = arith.addf %89, %90 : vector<1x128xf32>
    %92 = math.rsqrt %91 : vector<1x128xf32>
    %93 = vector.broadcast %92 : vector<1x128xf32> to vector<256x128xf32>
    %94 = arith.mulf %84, %93 : vector<256x128xf32>
    %95 = vector.broadcast %2 : vector<1x128xf32> to vector<256x128xf32>
    %96 = arith.mulf %94, %95 : vector<256x128xf32>
    %97 = vector.broadcast %3 : vector<1x128xf32> to vector<256x128xf32>
    %98 = arith.addf %96, %97 : vector<256x128xf32>
    %99 = tpu.transpose %98, [1, 0] : vector<256x128xf32> -> vector<128x256xf32>
    %100 = vector.extract_strided_slice %99 {offsets = [0, 0], sizes = [4, 256], strides = [1, 1]} : vector<128x256xf32> to vector<4x256xf32>
    %c0_27 = arith.constant 0 : index
    %c0_28 = arith.constant 0 : index
    %c0_29 = arith.constant 0 : index
    %101 = vector.load %arg2[%c0_27, %c0_28, %c0_29] : memref<1x4x256xf32, #tpu.memory_space<vmem>>, vector<1x4x256xf32>
    %102 = vector.shape_cast %101 : vector<1x4x256xf32> to vector<4x256xf32>
    %103 = arith.addf %100, %102 : vector<4x256xf32>
    %c0_30 = arith.constant 0 : index
    %c0_31 = arith.constant 0 : index
    %c0_32 = arith.constant 0 : index
    %104 = vector.load %arg6[%c0_30, %c0_31, %c0_32] : memref<1x4x256xf32, #tpu.memory_space<vmem>>, vector<1x4x256xf32>
    %105 = vector.shape_cast %104 : vector<1x4x256xf32> to vector<4x256xf32>
    %106 = vector.shape_cast %103 : vector<4x256xf32> to vector<1x4x256xf32>
    tpu.vector_store %arg6[%c0_30, %c0_31, %c0_32], %106 {strides = array<i32>} : memref<1x4x256xf32, #tpu.memory_space<vmem>>, vector<1x4x256xf32>,
    return
  }
  func.func @transform_0(%arg0: i32) -> (i32, i32, i32, i32) {
    %c0_i32 = arith.constant 0 : i32
    %c0_i32_0 = arith.constant 0 : i32
    %c0_i32_1 = arith.constant 0 : i32
    %c0_i32_2 = arith.constant 0 : i32
    return %arg0, %c0_i32, %c0_i32_0, %c0_i32_1 : i32, i32, i32, i32
  }
  func.func @transform_1(%arg0: i32) -> (i32, i32, i32) {
    %c0_i32 = arith.constant 0 : i32
    %c0_i32_0 = arith.constant 0 : i32
    %c0_i32_1 = arith.constant 0 : i32
    return %arg0, %c0_i32, %c0_i32_0 : i32, i32, i32
  }
  func.func @transform_2(%arg0: i32) -> (i32, i32) {
    %c0_i32 = arith.constant 0 : i32
    %c0_i32_0 = arith.constant 0 : i32
    %c0_i32_1 = arith.constant 0 : i32
    return %c0_i32, %c0_i32_0 : i32, i32
  }
  func.func @transform_3(%arg0: i32) -> (i32, i32) {
    %c0_i32 = arith.constant 0 : i32
    %c0_i32_0 = arith.constant 0 : i32
    %c0_i32_1 = arith.constant 0 : i32
    return %c0_i32, %c0_i32_0 : i32, i32
  }
  func.func @transform_4(%arg0: i32) -> (i32, i32) {
    %c0_i32 = arith.constant 0 : i32
    %c0_i32_0 = arith.constant 0 : i32
    %c0_i32_1 = arith.constant 0 : i32
    return %c0_i32, %c0_i32_0 : i32, i32
  }
  func.func @transform_5(%arg0: i32) -> (i32, i32, i32) {
    %c0_i32 = arith.constant 0 : i32
    %c0_i32_0 = arith.constant 0 : i32
    %c0_i32_1 = arith.constant 0 : i32
    return %arg0, %c0_i32, %c0_i32_0 : i32, i32, i32
  }
}

</mosaic_0001>

<bundles_post_ra>
// kernel: _lambda_.1
= control target key start
LH: loop header
LB: loop body
LE: loop exit
PB: predicated region body
PF: predicated region fallthrough
CT: control target
= control target key end

     0   :  { %s7594_s18 = smov 0   ;;  %s11642_s0 = inlined_call_operand.vmem [shape: bf16[2,18,24,128], index: 0, kind: input, shape index: {}]   ;;  %s11643_s1 = inlined_call_operand.vmem [shape: f32[2,4,256], index: 1, kind: input, shape index: {}]   ;;  %s11644_s2 = inlined_call_operand.vmem [shape: bf16[1152,128], index: 2, kind: input, shape index: {}]   ;;  %s11645_s3 = inlined_call_operand.vmem [shape: bf16[1152,128], index: 3, kind: input, shape index: {}]   ;;  %s11646_s4 = inlined_call_operand.vmem [shape: f32[4,128], index: 4, kind: input, shape index: {}]   ;;  %s11647_s5 = inlined_call_operand.vmem [shape: f32[2,4,256], index: 5, kind: output, shape index: {}]  }
   0x1 LB: > { %s6560_s19 = sadd.s32 4294967295, %s7561_s18   ;;  %p6564_p0 = scmp.ge.s32.totalorder %s7561_s18, 1  ;;  %s7561_s18 = sphi %s7594_s18, %s15_s18  }
   0x2   : > { %p197_p1 = scmp.lt.s32.totalorder %s7561_s18, 3 }
   0x4   : > { %p198_p2 = pnand %p6564_p0, %p197_p1 }
   0x6   : > { %201 = sbr.rel (%p198_p2) target bundleno = 2856 (0xb28), region = 40 }
   0xb   : > { %v7162_v0 = vld [vmem:[%s11644_s2 + $0x38] sm:$0xff]  ;;  %p230_p3 = scmp.lt.s32.totalorder %s6560_s19, 1  ;;  %v7161_v2 = vld [vmem:[%s11644_s2 + $0x30] sm:$0xff]  ;;  %v7160_v4 = vld [vmem:[%s11644_s2 + $0x28] sm:$0xff]  ;;  %vm448_vm0 = vsmask.f32 7424 }
   0xc   : > { %v7170_v1 = vld [vmem:[%s11644_s2 + $0x78] sm:$0xff]  ;;  %7474 = vmatpush.bf16.msra.mxu2 %v7162_v0  ;;  %v7169_v3 = vld [vmem:[%s11644_s2 + $0x70] sm:$0xff]  ;;  %1896 = vmatpush.bf16.msra.mxu0 %v7162_v0  ;;  %v7168_v5 = vld [vmem:[%s11644_s2 + $0x68] sm:$0xff]  ;;  %vm737_vm1 = vcmask 1043456   ;;  %vm738_vm2 = vsmask.f32 3328 }
   0xd   : > { %7482 = vmatpush.bf16.msra.mxu3 %v7170_v1  ;;  %s12339_s19 = smov (!%p230_p3, %s6560_s19), 1  ;;  %2009 = vmatpush.bf16.msra.mxu1 %v7170_v1  ;;  %v7159_v6 = vld [vmem:[%s11644_s2 + $0x20] sm:$0xff]  ;;  %v7158_v10 = vld [vmem:[%s11644_s2 + $0x18] sm:$0xff]  ;;  %v7157_v16 = vld [vmem:[%s11644_s2 + $0x10] sm:$0xff]  ;;  %v11823_v0 = vmov 0  ;;  %vm758_vm4 = vcmask 1046528  }
   0xe   : > { %s7508_s28 = smul.u32 216, %s12339_s19  ;;  %v7167_v7 = vld [vmem:[%s11644_s2 + $0x60] sm:$0xff]  ;;  %v7166_v11 = vld [vmem:[%s11644_s2 + $0x58] sm:$0xff]  ;;  %v7165_v17 = vld [vmem:[%s11644_s2 + $0x50] sm:$0xff]  ;;  %vm813_vm5 = vcmask 1042432   ;;  %vm3633_vm10 = vcmask 1040384  }
   0xf   : > { %v7156_v24 = vld [vmem:[%s11644_s2 + $0x8] sm:$0xff]  ;;  %v7155_v36 = vld [vmem:[%s11644_s2] sm:$0xff]  ;;  %v7178_v46 = vld [vmem:[%s11644_s2 + $0xb8] sm:$0xff]  ;;  %vm3634_vm11 = vsmask.f32 256  ;;  %s7152_s26 = sshll.u32 %s12339_s19, 3 }
  0x10   : > { %7475 = vmatpush.bf16.msra.mxu2 %v7161_v2  ;;  %1897 = vmatpush.bf16.msra.mxu0 %v7161_v2  ;;  %s7626_s10 = scalar_lea.vmem %s11642_s0, %s7508_s28  ;;  %v7164_v25 = vld [vmem:[%s11644_s2 + $0x48] sm:$0xff]  ;;  %v7163_v37 = vld [vmem:[%s11644_s2 + $0x40] sm:$0xff]  ;;  %v7186_v47 = vld [vmem:[%s11644_s2 + $0xf8] sm:$0xff]  ;;  %s239_s29 = scalar_lea.vmem %s11643_s1, %s7152_s26 }
  0x11   : > { %7483 = vmatpush.bf16.msra.mxu3 %v7169_v3  ;;  %2010 = vmatpush.bf16.msra.mxu1 %v7169_v3  ;;  %v7635_v8 = vld [vmem:[%s7626_s10 + $0x68] sm:$0xff]   ;;  %v7650_v13 = vld [vmem:[%s7626_s10 + $0x60] sm:$0xff]   ;;  %v7671_v22 = vld [vmem:[%s7626_s10 + $0x70] sm:$0xff]   ;;  %s244_s7 = scalar_lea.vmem %s11647_s5, %s7152_s26 }
  0x12   : > { %v7638_v9 = vld [vmem:[%s7626_s10 + $0x8] sm:$0xff]   ;;  %v7647_v12 = vunpack.c.l.b16 %v7635_v8  ;;  %v7653_v14 = vld [vmem:[%s7626_s10] sm:$0xff]  ;;  %v572_v19 = vshll.u32 %v7650_v13, 16  ;;  %v7674_v23 = vld [vmem:[%s7626_s10 + $0x10] sm:$0xff]   ;;  %v570_v26 = vshrl.u32 %v7650_v13, 16  ;;  %v7686_v30 = vunpack.c.h.b16 %v7671_v22 }
  0x13   : > { %v7301_v15 = vunpack.c.l.b16 %v7638_v9  ;;  %v452_v21 = vshll.u32 %v7653_v14, 16  ;;  %v7499_v29 = vld [vmem:[%s7626_s10 + $0x6c] sm:$0xff]   ;;  %v450_v31 = vshrl.u32 %v7653_v14, 16  ;;  %v7694_v35 = vunpack.c.h.b16 %v7674_v23  ;;  %v7194_v55 = vld [vmem:[%s11644_s2 + $0x138] sm:$0xff]  ;;  %vm7739_vm3 = vmand %vm737_vm1, %vm738_vm2 }
  0x14   : > { %7476 = vmatpush.bf16.msra.mxu2 %v7160_v4  ;;  %1898 = vmatpush.bf16.msra.mxu0 %v7160_v4  ;;  %11819 = vst [vmem:[#allocation2_spill] sm:$0xff] %v7647_v12  ;;  %v7664_v18 = vpack.c.b16 %v7647_v12, %v7647_v12  ;;  %v574_v27 = vrot.slane %v572_v19, 1  ;;  %v7691_v34 = vld [vmem:[%s7626_s10 + $0xc] sm:$0xff]   ;;  %v7704_v40 = vpack.c.b16 %v7686_v30, %v7686_v30  ;;  %v587_v41 = vshll.u32 %v7499_v29, 16  ;;  %vm9597_vm12 = vmand %vm3633_vm10, %vm3634_vm11 }
  0x15   : > { %7484 = vmatpush.bf16.msra.mxu3 %v7168_v5  ;;  %2011 = vmatpush.bf16.msra.mxu1 %v7168_v5  ;;  %v7667_v20 = vpack.c.b16 %v7301_v15, %v7301_v15  ;;  %11820 = vst [vmem:[#allocation3_spill] sm:$0xff] %v7686_v30  ;;  %v454_v32 = vrot.slane %v452_v21, 1  ;;  %v7708_v44 = vpack.c.b16 %v7694_v35, %v7694_v35  ;;  %v467_v45 = vshll.u32 %v7691_v34, 16  ;;  %v7177_v59 = vld [vmem:[%s11644_s2 + $0xb0] sm:$0xff] }
  0x16   : > { %v577_v28 = vshll.u32 %v7664_v18, 16  ;;  %v575_v38 = vor.u32 %v574_v27, %v570_v26  ;;  %11821 = vst [vmem:[#allocation4_spill] sm:$0xff] %v7704_v40  ;;  %v581_v48 = vshrl.u32 %v7664_v18, 16  ;;  %v585_v49 = vshrl.u32 %v7499_v29, 16  ;;  %v7185_v60 = vld [vmem:[%s11644_s2 + $0xf0] sm:$0xff]  ;;  %v7184_v27 = vld [vmem:[%s11644_s2 + $0xe8] sm:$0xff] }
  0x17   : > { %v457_v33 = vshll.u32 %v7667_v20, 16  ;;  %v455_v42 = vor.u32 %v454_v32, %v450_v31  ;;  %v589_v51 = vrot.slane %v587_v41, 1  ;;  %v592_v52 = vshll.u32 %v7704_v40, 16  ;;  %v7193_v4 = vld [vmem:[%s11644_s2 + $0x130] sm:$0xff]  ;;  %v7417_v41 = vld [vmem:[%s7626_s10 + $0x78] sm:$0xff]  }
  0x18   : > { %7477 = vmatpush.bf16.msra.mxu2 %v7159_v6  ;;  %1899 = vmatpush.bf16.msra.mxu0 %v7159_v6  ;;  %v579_v39 = vrot.slane %v577_v28, 1  ;;  %v461_v53 = vshrl.u32 %v7667_v20, 16  ;;  %v465_v56 = vshrl.u32 %v7691_v34, 16  ;;  %v469_v57 = vrot.slane %v467_v45, 1 }
  0x19   : > { %7485 = vmatpush.bf16.msra.mxu3 %v7167_v7  ;;  %2012 = vmatpush.bf16.msra.mxu1 %v7167_v7  ;;  %v459_v43 = vrot.slane %v457_v33, 1  ;;  %v472_v58 = vshll.u32 %v7708_v44, 16  ;;  %v590_v62 = vor.u32 %v589_v51, %v585_v49  ;;  %v594_v63 = vrot.slane %v592_v52, 1  ;;  %v7183_v52 = vld [vmem:[%s11644_s2 + $0xe0] sm:$0xff] }
  0x1a   : > { %v7719_v50 = vsel %vm448_vm0, %v575_v38, %v579_v39  ;;  %v583_v61 = vor.u32 %v581_v48, %v579_v39  ;;  %v11824_v0 = vsel %vm7739_vm3, 4294967295, %v11823_v0  ;;  %v470_v2 = vor.u32 %v469_v57, %v465_v56  ;;  %v7791_v38 = vld [vmem:[%s7626_s10 + $0x20] sm:$0xff]   ;;  %v7829_v56 = vld [vmem:[%s7626_s10 + $0x28] sm:$0xff]  }
  0x1b   : > { %11822 = vst [vmem:[#allocation5_spill] sm:$0xff] %v7719_v50  ;;  %v460_v54 = vsel %vm448_vm0, %v455_v42, %v459_v43  ;;  %v463_v1 = vor.u32 %v461_v53, %v459_v43  ;;  %v474_v3 = vrot.slane %v472_v58, 1  ;;  %v7747_v5 = vsel %vm448_vm0, %v590_v62, %v594_v63  ;;  %v7826_v53 = vld [vmem:[%s7626_s10 + $0x88] sm:$0xff]  }
  0x1c   : > { %7478 = vmatpush.bf16.msra.mxu2 %v7158_v10  ;;  %1900 = vmatpush.bf16.msra.mxu0 %v7158_v10  ;;  %11825 = vst [vmem:[#allocation6_spill] sm:$0xff] %v11824_v0  ;;  %v748_v6 = vsel %vm7739_vm3, %v583_v61, 0  ;;  %v596_v21 = vshrl.u32 %v7704_v40, 16  ;;  %v979_v31 = vunpack.c.h.b16 %v7747_v5  ;;  %v7801_v43 = vunpack.c.l.b16 %v7791_v38  ;;  %v7839_v62 = vld [vmem:[%s7626_s10 + $0x24] sm:$0xff]  }
  0x1d   : > { %7486 = vmatpush.bf16.msra.mxu3 %v7166_v11  ;;  %2013 = vmatpush.bf16.msra.mxu1 %v7166_v11  ;;  %11826 = vst [vmem:[#allocation7_spill] sm:$0xff] %v7747_v5  ;;  %v7752_v7 = vsel %vm448_vm0, %v470_v2, %v474_v3  ;;  %v740_v10 = vsel %vm7739_vm3, %v463_v1, 0  ;;  %v7756_v11 = vunpack.c.l.b16 %v748_v6  ;;  %v7836_v61 = vunpack.c.h.b16 %v7826_v53 }
  0x1e   : > { %v925_v15 = vunpack.c.l.b16 %v7752_v7  ;;  %v598_v26 = vor.u32 %v596_v21, %v594_v63  ;;  %v931_v33 = vunpack.c.h.b16 %v7752_v7  ;;  %v7815_v49 = vpack.c.b16 %v7801_v43, %v7801_v43 }
  0x1f   : > { %11827 = vst [vmem:[#allocation8_spill] sm:$0xff] %v7756_v11  ;;  %v7842_v63 = vunpack.c.h.b16 %v7829_v56  ;;  %v7846_v6 = vpack.c.b16 %v7836_v61, %v7836_v61 }
  0x20   : > { %7479 = vmatpush.bf16.msra.mxu2 %v7157_v16  ;;  %1901 = vmatpush.bf16.msra.mxu0 %v7157_v16  ;;  %v935_v16 = vunpack.c.l.b16 %v740_v10  ;;  %11833 = vst [vmem:[#allocation14_spill] sm:$0xff] %v7836_v61 }
  0x21   : > { %7487 = vmatpush.bf16.msra.mxu3 %v7165_v17  ;;  %2014 = vmatpush.bf16.msra.mxu1 %v7165_v17  ;;  %11834 = vst [vmem:[#allocation15_spill] sm:$0xff] %v7846_v6 }
  0x22   : > { %v1182_v19 = vpack.c.b16 %v925_v15, %v935_v16  ;;  %v497_v15 = vshll.u32 %v7839_v62, 16 }
  0x24   : > { %7480 = vmatpush.bf16.msra.mxu2 %v7156_v24  ;;  %1902 = vmatpush.bf16.msra.mxu0 %v7156_v24  ;;  %v476_v24 = vshrl.u32 %v7708_v44, 16 }
  0x25   : > { %7488 = vmatpush.bf16.msra.mxu3 %v7164_v25  ;;  %2015 = vmatpush.bf16.msra.mxu1 %v7164_v25  ;;  %v7176_v25 = vld [vmem:[%s11644_s2 + $0xa8] sm:$0xff] }
  0x26   : > { %v478_v28 = vor.u32 %v476_v24, %v474_v3 }
  0x28   : > { %7481 = vmatpush.bf16.msra.mxu2 %v7155_v36  ;;  %1903 = vmatpush.bf16.msra.mxu0 %v7155_v36  ;;  %v741_v29 = vsel %vm7739_vm3, %v478_v28, 0  ;;  %v499_v28 = vrot.slane %v497_v15, 1  ;;  %v7182_v15 = vld [vmem:[%s11644_s2 + $0xd8] sm:$0xff] }
  0x29   : > { %7489 = vmatpush.bf16.msra.mxu3 %v7163_v37  ;;  %2016 = vmatpush.bf16.msra.mxu1 %v7163_v37  ;;  %v7785_v36 = vunpack.c.l.b16 %v741_v29  ;;  %v7788_v37 = vld [vmem:[%s7626_s10 + $0x80] sm:$0xff]  }
  0x2a   : > { %v7798_v42 = vunpack.c.l.b16 %v7788_v37 }
  0x2b   : > { %1956 = vmatmul.bf16.vlgmr.msra.gmra.mxu2 %v7650_v13  ;;  %1904 = vmatmul.bf16.vlgmr.msra.gmra.mxu0 %v7653_v14  ;;  %v977_v13 = vunpack.c.l.b16 %v7747_v5  ;;  %v1191_v45 = vpack.c.b16 %v7785_v36, %v931_v33 }
  0x2c   : > { %2122 = vmatpush.bf16.msrb.mxu2 %v7178_v46  ;;  %2069 = vmatmul.bf16.vlgmr.msra.gmra.mxu3 %v7719_v50  ;;  %11831 = vst [vmem:[#allocation12_spill] sm:$0xff] %v7798_v42  ;;  %v7805_v46 = vld [vmem:[%s7626_s10 + $0x18] sm:$0xff]   ;;  %v7811_v48 = vpack.c.b16 %v7798_v42, %v7798_v42 }
  0x2d   : > { %2235 = vmatpush.bf16.msrb.mxu3 %v7186_v47  ;;  %2017 = vmatmul.bf16.vlgmr.msra.gmra.mxu1 %v460_v54  ;;  %v7761_v17 = vpack.c.b16 %v977_v13, %v7756_v11  ;;  %v602_v47 = vshll.u32 %v7417_v41, 16  ;;  %v482_v51 = vshll.u32 %v7805_v46, 16  ;;  %v600_v54 = vshrl.u32 %v7417_v41, 16  ;;  %v8103_v42 = vld [vmem:[%s7626_s10 + $0x54] sm:$0xff]  }
  0x2e   : > { %2348 = vmatpush.bf16.msrb.mxu0 %v7194_v55  ;;  %11832 = vst [vmem:[#allocation13_spill] sm:$0xff] %v7811_v48  ;;  %v480_v57 = vshrl.u32 %v7805_v46, 16  ;;  %v7850_v13 = vpack.c.b16 %v7842_v63, %v7842_v63  ;;  %v611_v21 = vshrl.u32 %v7811_v48, 16  ;;  %v557_v11 = vshll.u32 %v8103_v42, 16 }
  0x2f   : > { %11828 = vst [vmem:[#allocation9_spill] sm:$0xff] %v7761_v17  ;;  %v604_v55 = vrot.slane %v602_v47, 1  ;;  %v484_v58 = vrot.slane %v482_v51, 1 }
  0x30   : > { %2123 = vmatpush.bf16.msrb.mxu2 %v7177_v59  ;;  %v487_v59 = vshll.u32 %v7815_v49, 16 }
  0x31   : > { %2236 = vmatpush.bf16.msrb.mxu3 %v7185_v60  ;;  %v7501_v60 = vld [vmem:[%s7626_s10 + $0x84] sm:$0xff]   ;;  %v605_v1 = vor.u32 %v604_v55, %v600_v54  ;;  %v485_v3 = vor.u32 %v484_v58, %v480_v57 }
  0x32   : > { %2349 = vmatpush.bf16.msrb.mxu0 %v7193_v4  ;;  %v489_v4 = vrot.slane %v487_v59, 1  ;;  %v617_v10 = vshll.u32 %v7501_v60, 16  ;;  %v615_v24 = vshrl.u32 %v7501_v60, 16 }
  0x34   : > { %2124 = vmatpush.bf16.msrb.mxu2 %v7176_v25  ;;  %v619_v25 = vrot.slane %v617_v10, 1 }
  0x35   : > { %2237 = vmatpush.bf16.msrb.mxu3 %v7184_v27  ;;  %v491_v27 = vshrl.u32 %v7815_v49, 16 }
  0x37   : > { %v493_v47 = vor.u32 %v491_v27, %v489_v4 }
  0x39   : > { %2238 = vmatpush.bf16.msrb.mxu3 %v7183_v52  ;;  %v742_v55 = vsel %vm7739_vm3, %v493_v47, 0 }
  0x3a   : > { %v7883_v58 = vunpack.c.l.b16 %v742_v55 }
  0x3b   : > { %1961 = vmatmul.bf16.gmra.mxu2 %v7635_v8  ;;  %1909 = vmatmul.bf16.gmra.mxu0 %v7638_v9  ;;  %v7192_v8 = vld [vmem:[%s11644_s2 + $0x128] sm:$0xff]  ;;  %v749_v9 = vsel %vm7739_vm3, %v598_v26, 0  ;;  %v622_v26 = vshll.u32 %v7846_v6, 16 }
  0x3c   : > { %2074 = vmatmul.bf16.gmra.mxu3 %v7761_v17  ;;  %2350 = vmatpush.bf16.msrb.mxu0 %v7192_v8  ;;  %v7782_v32 = vunpack.c.l.b16 %v749_v9  ;;  %v495_v8 = vshrl.u32 %v7839_v62, 16  ;;  %v502_v9 = vshll.u32 %v7850_v13, 16 }
  0x3d   : > { %2022 = vmatmul.bf16.gmra.mxu1 %v1182_v19  ;;  %v7857_v19 = vsel %vm448_vm0, %v485_v3, %v489_v4  ;;  %v624_v33 = vrot.slane %v622_v26, 1  ;;  %v506_v3 = vshrl.u32 %v7850_v13, 16  ;;  %v7174_v4 = vld [vmem:[%s11644_s2 + $0x98] sm:$0xff]  ;;  %2239 = vmatpush.bf16.msrb.mxu3 %v7182_v15 }
  0x3e   : > { %11829 = vst [vmem:[#allocation10_spill] sm:$0xff] %v7782_v32  ;;  %v7794_v39 = vpack.c.b16 %v7782_v32, %v979_v31  ;;  %v620_v31 = vor.u32 %v619_v25, %v615_v24  ;;  %v500_v51 = vor.u32 %v499_v28, %v495_v8  ;;  %v7918_v28 = vld [vmem:[%s7626_s10 + $0x98] sm:$0xff]  }
  0x40   : > { %11830 = vst [vmem:[#allocation11_spill] sm:$0xff] %v7794_v39  ;;  %v7871_v52 = vsel %vm448_vm0, %v620_v31, %v624_v33  ;;  %v7420_v31 = vld [vmem:[%s7626_s10 + $0x90] sm:$0xff]  }
  0x41   : > { %11836 = vst [vmem:[#allocation17_spill] sm:$0xff] %v7871_v52  ;;  %v989_v57 = vunpack.c.l.b16 %v7871_v52  ;;  %v991_v25 = vunpack.c.h.b16 %v7871_v52  ;;  %v7505_v52 = vld [vmem:[%s7626_s10 + $0xb4] sm:$0xff]  }
  0x42   : > { %v677_v5 = vshll.u32 %v7505_v52, 16 }
  0x4b   : > { %1965 = vmatmul.bf16.gmra.mxu2 %v7671_v22  ;;  %1913 = vmatmul.bf16.gmra.mxu0 %v7674_v23  ;;  %v7175_v22 = vld [vmem:[%s11644_s2 + $0xa0] sm:$0xff]  ;;  %v607_v23 = vshll.u32 %v7811_v48, 16 }
  0x4c   : > { %2078 = vmatmul.bf16.gmra.mxu3 %v7794_v39  ;;  %2125 = vmatpush.bf16.msrb.mxu2 %v7175_v22  ;;  %v504_v22 = vrot.slane %v502_v9, 1  ;;  %v7921_v9 = vld [vmem:[%s7626_s10 + $0x38] sm:$0xff]  }
  0x4d   : > { %2026 = vmatmul.bf16.gmra.mxu1 %v1191_v45  ;;  %v609_v2 = vrot.slane %v607_v23, 1  ;;  %v7191_v45 = vld [vmem:[%s11644_s2 + $0x120] sm:$0xff] }
  0x4e   : > { %2351 = vmatpush.bf16.msrb.mxu0 %v7191_v45  ;;  %v7876_v54 = vsel %vm448_vm0, %v500_v51, %v504_v22  ;;  %v7931_v45 = vunpack.c.l.b16 %v7921_v9  ;;  %v7937_v51 = vld [vmem:[%s7626_s10 + $0x30] sm:$0xff]  }
  0x4f   : > { %v7854_v16 = vsel %vm448_vm0, %v605_v1, %v609_v2  ;;  %v613_v29 = vor.u32 %v611_v21, %v609_v2  ;;  %v941_v59 = vunpack.c.l.b16 %v7876_v54  ;;  %v626_v2 = vshrl.u32 %v7846_v6, 16 }
  0x50   : > { %11835 = vst [vmem:[#allocation16_spill] sm:$0xff] %v7854_v16  ;;  %v508_v21 = vor.u32 %v506_v3, %v504_v22  ;;  %2126 = vmatpush.bf16.msrb.mxu2 %v7174_v4  ;;  %v943_v27 = vunpack.c.h.b16 %v7876_v54  ;;  %v632_v22 = vshll.u32 %v7420_v31, 16  ;;  %v7947_v55 = vpack.c.b16 %v7931_v45, %v7931_v45 }
  0x51   : > { %v7890_v1 = vpack.c.b16 %v941_v59, %v7883_v58  ;;  %v628_v10 = vor.u32 %v626_v2, %v624_v33  ;;  %v7928_v33 = vunpack.c.l.b16 %v7918_v28  ;;  %v7181_v59 = vld [vmem:[%s11644_s2 + $0xd0] sm:$0xff]  ;;  %v7959_v2 = vld [vmem:[%s7626_s10 + $0xa0] sm:$0xff]   ;;  %v630_v3 = vshrl.u32 %v7420_v31, 16 }
  0x52   : > { %v743_v24 = vsel %vm7739_vm3, %v508_v21, 0  ;;  %v634_v4 = vrot.slane %v632_v22, 1  ;;  %2240 = vmatpush.bf16.msrb.mxu3 %v7181_v59  ;;  %v510_v15 = vshrl.u32 %v7937_v51, 16  ;;  %v517_v21 = vshll.u32 %v7947_v55, 16 }
  0x53   : > { %11839 = vst [vmem:[#allocation20_spill] sm:$0xff] %v7890_v1  ;;  %v7915_v8 = vunpack.c.l.b16 %v743_v24  ;;  %v7969_v24 = vunpack.c.h.b16 %v7959_v2 }
  0x54   : > { %11842 = vst [vmem:[#allocation23_spill] sm:$0xff] %v7928_v33  ;;  %v635_v22 = vor.u32 %v634_v4, %v630_v3  ;;  %v519_v59 = vrot.slane %v517_v21, 1 }
  0x55   : > { %v7934_v47 = vpack.c.b16 %v7915_v8, %v943_v27  ;;  %11845 = vst [vmem:[#allocation26_spill] sm:$0xff] %v7969_v24 }
  0x57   : > { %11843 = vst [vmem:[#allocation24_spill] sm:$0xff] %v7934_v47 }
  0x5b   : > { %1969 = vmatmul.bf16.gmra.mxu2 %v7417_v41  ;;  %1917 = vmatmul.bf16.gmra.mxu0 %v7805_v46  ;;  %v750_v41 = vsel %vm7739_vm3, %v613_v29, 0 }
  0x5c   : > { %2082 = vmatmul.bf16.gmra.mxu3 %v7854_v16  ;;  %v7880_v23 = vunpack.c.l.b16 %v750_v41  ;;  %v7943_v41 = vpack.c.b16 %v7928_v33, %v7928_v33 }
  0x5d   : > { %2030 = vmatmul.bf16.gmra.mxu1 %v7857_v19 }
  0x5e   : > { %11837 = vst [vmem:[#allocation18_spill] sm:$0xff] %v7880_v23  ;;  %v7887_v60 = vpack.c.b16 %v989_v57, %v7880_v23  ;;  %v512_v57 = vshll.u32 %v7937_v51, 16  ;;  %v641_v3 = vshrl.u32 %v7943_v41, 16 }
  0x5f   : > { %11844 = vst [vmem:[#allocation25_spill] sm:$0xff] %v7943_v41 }
  0x60   : > { %11838 = vst [vmem:[#allocation19_spill] sm:$0xff] %v7887_v60 }
  0x6b   : > { %1974 = vmatmul.bf16.gmra.mxu2 %v7788_v37  ;;  %1922 = vmatmul.bf16.gmra.mxu0 %v7791_v38  ;;  %v7190_v37 = vld [vmem:[%s11644_s2 + $0x118] sm:$0xff]  ;;  %v751_v38 = vsel %vm7739_vm3, %v628_v10, 0  ;;  %v7962_v10 = vld [vmem:[%s7626_s10 + $0x40] sm:$0xff]  }
  0x6c   : > { %2087 = vmatmul.bf16.gmra.mxu3 %v7887_v60  ;;  %2352 = vmatpush.bf16.msrb.mxu0 %v7190_v37  ;;  %v7912_v26 = vunpack.c.l.b16 %v751_v38  ;;  %v514_v37 = vrot.slane %v512_v57, 1  ;;  %v7503_v38 = vld [vmem:[%s7626_s10 + $0x9c] sm:$0xff]   ;;  %v7975_v27 = vunpack.c.h.b16 %v7962_v10  ;;  %v7979_v60 = vpack.c.b16 %v7969_v24, %v7969_v24 }
  0x6d   : > { %2035 = vmatmul.bf16.gmra.mxu1 %v7890_v1  ;;  %v647_v57 = vshll.u32 %v7503_v38, 16  ;;  %v645_v4 = vshrl.u32 %v7503_v38, 16 }
  0x6e   : > { %11840 = vst [vmem:[#allocation21_spill] sm:$0xff] %v7912_v26  ;;  %v7924_v29 = vpack.c.b16 %v7912_v26, %v991_v25  ;;  %v7972_v25 = vld [vmem:[%s7626_s10 + $0x3c] sm:$0xff]   ;;  %v7983_v39 = vpack.c.b16 %v7975_v27, %v7975_v27 }
  0x6f   : > { %11846 = vst [vmem:[#allocation27_spill] sm:$0xff] %v7979_v60  ;;  %v527_v17 = vshll.u32 %v7972_v25, 16  ;;  %v525_v21 = vshrl.u32 %v7972_v25, 16 }
  0x70   : > { %11841 = vst [vmem:[#allocation22_spill] sm:$0xff] %v7924_v29  ;;  %v532_v33 = vshll.u32 %v7983_v39, 16 }
  0x71   : > { %v529_v24 = vrot.slane %v527_v17, 1 }
  0x73   : > { %v530_v61 = vor.u32 %v529_v24, %v525_v21  ;;  %v7180_v21 = vld [vmem:[%s11644_s2 + $0xc8] sm:$0xff] }
  0x74   : > { %2241 = vmatpush.bf16.msrb.mxu3 %v7180_v21  ;;  %v8070_v21 = vld [vmem:[%s7626_s10 + $0x48] sm:$0xff]  }
  0x7b   : > { %1978 = vmatmul.bf16.gmra.mxu2 %v7826_v53  ;;  %1926 = vmatmul.bf16.gmra.mxu0 %v7829_v56  ;;  %v7173_v53 = vld [vmem:[%s11644_s2 + $0x90] sm:$0xff]  ;;  %v637_v56 = vshll.u32 %v7943_v41, 16  ;;  %v534_v41 = vrot.slane %v532_v33, 1 }
  0x7c   : > { %2091 = vmatmul.bf16.gmra.mxu3 %v7924_v29  ;;  %2127 = vmatpush.bf16.msrb.mxu2 %v7173_v53  ;;  %v515_v53 = vor.u32 %v514_v37, %v510_v15  ;;  %v652_v15 = vshll.u32 %v7979_v60, 16  ;;  %v521_v37 = vshrl.u32 %v7947_v55, 16 }
  0x7d   : > { %2039 = vmatmul.bf16.gmra.mxu1 %v7934_v47  ;;  %v639_v29 = vrot.slane %v637_v56, 1  ;;  %v649_v56 = vrot.slane %v647_v57, 1  ;;  %v7189_v57 = vld [vmem:[%s11644_s2 + $0x110] sm:$0xff] }
  0x7e   : > { %v7990_v1 = vsel %vm448_vm0, %v515_v53, %v519_v59  ;;  %v654_v38 = vrot.slane %v652_v15, 1  ;;  %v523_v26 = vor.u32 %v521_v37, %v519_v59  ;;  %2353 = vmatpush.bf16.msrb.mxu0 %v7189_v57  ;;  %v536_v15 = vshrl.u32 %v7983_v39, 16 }
  0x7f   : > { %v7987_v47 = vsel %vm448_vm0, %v635_v22, %v639_v29  ;;  %v643_v22 = vor.u32 %v641_v3, %v639_v29  ;;  %v650_v53 = vor.u32 %v649_v56, %v645_v4 }
  0x80   : > { %11847 = vst [vmem:[#allocation28_spill] sm:$0xff] %v7987_v47  ;;  %v744_v29 = vsel %vm7739_vm3, %v523_v26, 0  ;;  %v7172_v26 = vld [vmem:[%s11644_s2 + $0x88] sm:$0xff] }
  0x81   : > { %v8004_v17 = vsel %vm448_vm0, %v650_v53, %v654_v38  ;;  %v8016_v59 = vunpack.c.l.b16 %v744_v29  ;;  %2128 = vmatpush.bf16.msrb.mxu2 %v7172_v26 }
  0x82   : > { %11848 = vst [vmem:[#allocation29_spill] sm:$0xff] %v8004_v17  ;;  %v1001_v4 = vunpack.c.l.b16 %v8004_v17 }
  0x8b   : > { %1982 = vmatmul.bf16.gmra.mxu2 %v7420_v31  ;;  %1930 = vmatmul.bf16.gmra.mxu0 %v7937_v51  ;;  %v752_v31 = vsel %vm7739_vm3, %v643_v22, 0  ;;  %v538_v22 = vor.u32 %v536_v15, %v534_v41  ;;  %v7423_v15 = vld [vmem:[%s7626_s10 + $0xa8] sm:$0xff]  }
  0x8c   : > { %2095 = vmatmul.bf16.gmra.mxu3 %v7987_v47  ;;  %v8009_v47 = vsel %vm448_vm0, %v530_v61, %v534_v41  ;;  %v8013_v3 = vunpack.c.l.b16 %v752_v31  ;;  %v656_v61 = vshrl.u32 %v7979_v60, 16  ;;  %v8048_v31 = vld [vmem:[%s7626_s10 + $0xb0] sm:$0xff]   ;;  %v540_v60 = vshrl.u32 %v8070_v21, 16 }
  0x8d   : > { %2043 = vmatmul.bf16.gmra.mxu1 %v7990_v1  ;;  %v953_v33 = vunpack.c.l.b16 %v8009_v47  ;;  %v745_v53 = vsel %vm7739_vm3, %v538_v22, 0  ;;  %v955_v41 = vunpack.c.h.b16 %v8009_v47 }
  0x8e   : > { %11849 = vst [vmem:[#allocation30_spill] sm:$0xff] %v8013_v3  ;;  %v8020_v24 = vpack.c.b16 %v1001_v4, %v8013_v3  ;;  %v658_v37 = vor.u32 %v656_v61, %v654_v38  ;;  %v1003_v38 = vunpack.c.h.b16 %v8004_v17  ;;  %v8051_v29 = vunpack.c.l.b16 %v745_v53  ;;  %v8054_v4 = vld [vmem:[%s7626_s10 + $0x50] sm:$0xff]  }
  0x8f   : > { %v8023_v56 = vpack.c.b16 %v953_v33, %v8016_v59  ;;  %v8057_v33 = vunpack.c.l.b16 %v8048_v31  ;;  %v8064_v26 = vunpack.c.l.b16 %v8054_v4 }
  0x90   : > { %11850 = vst [vmem:[#allocation31_spill] sm:$0xff] %v8020_v24 }
  0x91   : > { %11851 = vst [vmem:[#allocation32_spill] sm:$0xff] %v8023_v56 }
  0x92   : > { %11853 = vst [vmem:[#allocation34_spill] sm:$0xff] %v8057_v33 }
  0x9b   : > { %1987 = vmatmul.bf16.gmra.mxu2 %v7918_v28  ;;  %1935 = vmatmul.bf16.gmra.mxu0 %v7921_v9  ;;  %v753_v28 = vsel %vm7739_vm3, %v658_v37, 0  ;;  %v7188_v9 = vld [vmem:[%s11644_s2 + $0x108] sm:$0xff]  ;;  %v8067_v37 = vpack.c.b16 %v8051_v29, %v955_v41  ;;  %v8082_v41 = vpack.c.b16 %v8064_v26, %v8064_v26 }
  0x9c   : > { %2100 = vmatmul.bf16.gmra.mxu3 %v8020_v24  ;;  %v8045_v57 = vunpack.c.l.b16 %v753_v28  ;;  %2354 = vmatpush.bf16.msrb.mxu0 %v7188_v9  ;;  %v8076_v9 = vpack.c.b16 %v8057_v33, %v8057_v33  ;;  %v542_v24 = vshll.u32 %v8070_v21, 16  ;;  %v660_v33 = vshrl.u32 %v7423_v15, 16 }
  0x9d   : > { %2048 = vmatmul.bf16.gmra.mxu1 %v8023_v56  ;;  %11855 = vst [vmem:[#allocation36_spill] sm:$0xff] %v8067_v37 }
  0x9e   : > { %11852 = vst [vmem:[#allocation33_spill] sm:$0xff] %v8045_v57  ;;  %v8060_v61 = vpack.c.b16 %v8045_v57, %v1003_v38  ;;  %v662_v38 = vshll.u32 %v7423_v15, 16  ;;  %v8092_v57 = vld [vmem:[%s7626_s10 + $0x58] sm:$0xff]   ;;  %v544_v3 = vrot.slane %v542_v24, 1  ;;  %v7179_v24 = vld [vmem:[%s11644_s2 + $0xc0] sm:$0xff] }
  0x9f   : > { %11856 = vst [vmem:[#allocation37_spill] sm:$0xff] %v8076_v9  ;;  %2242 = vmatpush.bf16.msrb.mxu3 %v7179_v24 }
  0xa0   : > { %11854 = vst [vmem:[#allocation35_spill] sm:$0xff] %v8060_v61  ;;  %v545_v30 = vor.u32 %v544_v3, %v540_v60 }
  0xa8   : > { %v1905_v22 = vpop.f32.mrf.mxu0 }
  0xaa   : > { %v2018_v28 = vpop.f32.mrf.mxu1 }
  0xab   : > { %v8072_v53 = vadd.f32 %v2018_v28, %v1905_v22  ;;  %1991 = vmatmul.bf16.gmra.mxu2 %v7959_v2  ;;  %1939 = vmatmul.bf16.gmra.mxu0 %v7962_v10  ;;  %v8088_v22 = vld [vmem:[%s7626_s10 + $0xb8] sm:$0xff]   ;;  %v664_v2 = vrot.slane %v662_v38, 1  ;;  %v547_v10 = vshll.u32 %v8082_v41, 16  ;;  %v8106_v38 = vunpack.c.h.b16 %v8092_v57 }
  0xac   : > { %2104 = vmatmul.bf16.gmra.mxu3 %v8060_v61  ;;  %v667_v61 = vshll.u32 %v8076_v9, 16 }
  0xad   : > { %2052 = vmatmul.bf16.gmra.mxu1 %v8067_v37  ;;  %v8100_v37 = vunpack.c.h.b16 %v8088_v22  ;;  %11859 = vst [vmem:[#allocation40_spill] sm:$0xff] %v8106_v38  ;;  %v549_v16 = vrot.slane %v547_v10, 1  ;;  %v8122_v40 = vpack.c.b16 %v8106_v38, %v8106_v38  ;;  %v679_v10 = vrot.slane %v677_v5, 1 }
  0xae   : > { %v1957_v28 = vpop.f32.mrf.mxu2  ;;  %v669_v32 = vrot.slane %v667_v61, 1  ;;  %v671_v61 = vshrl.u32 %v8076_v9, 16  ;;  %v551_v38 = vshrl.u32 %v8082_v41, 16 }
  0xaf   : > { %v2070_v56 = vpop.f32.mrf.mxu3  ;;  %11858 = vst [vmem:[#allocation39_spill] sm:$0xff] %v8100_v37  ;;  %v8118_v48 = vpack.c.b16 %v8100_v37, %v8100_v37 }
  0xb0   : > { %v8094_v17 = vadd.f32 %v2070_v56, %v1957_v28  ;;  %v1907_v6 = vpop.f32.mrf.mxu0  ;;  %v7171_v56 = vld [vmem:[%s11644_s2 + $0x80] sm:$0xff]  ;;  %v673_v5 = vor.u32 %v671_v61, %v669_v32 }
  0xb1   : > { %2129 = vmatpush.bf16.msrb.mxu2 %v7171_v56  ;;  %v682_v56 = vshll.u32 %v8118_v48, 16 }
  0xb2   : > { %11857 = vst [vmem:[#allocation38_spill] sm:$0xff] %v8094_v17  ;;  %v2020_v23 = vpop.f32.mrf.mxu1  ;;  %v665_v17 = vor.u32 %v664_v2, %v660_v33  ;;  %v8134_v33 = vsel %vm448_vm0, %v545_v30, %v549_v16  ;;  %v675_v2 = vshrl.u32 %v7505_v52, 16  ;;  %v7201_v30 = vld [vmem:[%s11644_s2 + $0x170] sm:$0xff] }
  0xb3   : > { %v8114_v28 = vadd.f32 %v2020_v23, %v1907_v6  ;;  %v7202_v23 = vld [vmem:[%s11644_s2 + $0x178] sm:$0xff] }
  0xb4   : > { %v8131_v3 = vsel %vm448_vm0, %v665_v17, %v669_v32  ;;  %2461 = vmatpush.bf16.msrb.mxu1 %v7202_v23  ;;  %v562_v17 = vshll.u32 %v8122_v40, 16  ;;  %v680_v52 = vor.u32 %v679_v10, %v675_v2  ;;  %v553_v23 = vor.u32 %v551_v38, %v549_v16  ;;  %v7199_v38 = vld [vmem:[%s11644_s2 + $0x160] sm:$0xff] }
  0xb5   : > { %11861 = vst [vmem:[#allocation42_spill] sm:$0xff] %v8131_v3  ;;  %v754_v32 = vsel %vm7739_vm3, %v673_v5, 0  ;;  %v7198_v5 = vld [vmem:[%s11644_s2 + $0x158] sm:$0xff] }
  0xb6   : > { %v1959_v12 = vpop.f32.mrf.mxu2  ;;  %v8168_v10 = vunpack.c.l.b16 %v754_v32 }
  0xb7   : > { %v2072_v6 = vpop.f32.mrf.mxu3 }
  0xb8   : > { %v8128_v60 = vadd.f32 %v2072_v6, %v1959_v12  ;;  %v1910_v24 = vpop.f32.mrf.mxu0  ;;  %v555_v12 = vshrl.u32 %v8103_v42, 16  ;;  %v559_v6 = vrot.slane %v557_v11, 1  ;;  %v7187_v11 = vld [vmem:[%s11644_s2 + $0x100] sm:$0xff]  ;;  %2462 = vmatpush.bf16.msrb.mxu1 %v7201_v30 }
  0xb9   : > { %2355 = vmatpush.bf16.msrb.mxu0 %v7187_v11 }
  0xba   : > { %11860 = vst [vmem:[#allocation41_spill] sm:$0xff] %v8128_v60  ;;  %v2023_v37 = vpop.f32.mrf.mxu1  ;;  %v560_v24 = vor.u32 %v559_v6, %v555_v12  ;;  %v564_v60 = vrot.slane %v562_v17, 1 }
  0xbb   : > { %1995 = vmatmul.bf16.gmra.mxu2 %v7423_v15  ;;  %1943 = vmatmul.bf16.gmra.mxu0 %v8070_v21  ;;  %v684_v37 = vrot.slane %v682_v56, 1  ;;  %v7200_v15 = vld [vmem:[%s11644_s2 + $0x168] sm:$0xff] }
  0xbc   : > { %2108 = vmatmul.bf16.gmra.mxu3 %v8131_v3  ;;  %v8159_v16 = vsel %vm448_vm0, %v560_v24, %v564_v60  ;;  %2463 = vmatpush.bf16.msrb.mxu1 %v7200_v15  ;;  %v686_v24 = vshrl.u32 %v8118_v48, 16 }
  0xbd   : > { %2056 = vmatmul.bf16.gmra.mxu1 %v8134_v33  ;;  %v8154_v3 = vsel %vm448_vm0, %v680_v52, %v684_v37  ;;  %v965_v6 = vunpack.c.l.b16 %v8159_v16 }
  0xbe   : > { %v1962_v9 = vpop.f32.mrf.mxu2  ;;  %v1013_v56 = vunpack.c.l.b16 %v8154_v3 }
  0xbf   : > { %v2075_v50 = vpop.f32.mrf.mxu3  ;;  %v746_v9 = vsel %vm7739_vm3, %v553_v23, 0 }
  0xc0   : > { %v1911_v61 = vpop.f32.mrf.mxu0  ;;  %v8171_v12 = vunpack.c.l.b16 %v746_v9  ;;  %2464 = vmatpush.bf16.msrb.mxu1 %v7199_v38  ;;  %v8180_v11 = vpack.c.b16 %v1013_v56, %v8168_v10  ;;  %v7197_v9 = vld [vmem:[%s11644_s2 + $0x150] sm:$0xff]  ;;  %v7210_v38 = vld [vmem:[%s11644_s2 + $0x1b8] sm:$0xff]  ;;  %v688_v56 = vor.u32 %v686_v24, %v684_v37 }
  0xc1   : > { %2574 = vmatpush.bf16.msra.mxu2 %v7210_v38 }
  0xc2   : > { %v2024_v2 = vpop.f32.mrf.mxu1  ;;  %11862 = vst [vmem:[#allocation43_spill] sm:$0xff] %v8180_v11  ;;  %v8183_v23 = vpack.c.b16 %v965_v6, %v8171_v12  ;;  %v7218_v6 = vld [vmem:[%s11644_s2 + $0x1f8] sm:$0xff] }
  0xc3   : > { %v8163_v50 = vadd.f32 %v2024_v2, %v1911_v61  ;;  %v566_v61 = vshrl.u32 %v8122_v40, 16  ;;  %2687 = vmatpush.bf16.msra.mxu3 %v7218_v6 }
  0xc4   : > { %11863 = vst [vmem:[#allocation44_spill] sm:$0xff] %v8183_v23  ;;  %2465 = vmatpush.bf16.msrb.mxu1 %v7198_v5  ;;  %v7196_v5 = vld [vmem:[%s11644_s2 + $0x148] sm:$0xff] }
  0xc6   : > { %v1963_v17 = vpop.f32.mrf.mxu2 }
  0xc7   : > { %v2076_v30 = vpop.f32.mrf.mxu3 }
  0xc8   : > { %v8177_v52 = vadd.f32 %v2076_v30, %v1963_v17  ;;  %v1914_v15 = vpop.f32.mrf.mxu0  ;;  %v568_v17 = vor.u32 %v566_v61, %v564_v60  ;;  %2466 = vmatpush.bf16.msrb.mxu1 %v7197_v9  ;;  %v7195_v60 = vld [vmem:[%s11644_s2 + $0x140] sm:$0xff]  ;;  %v7226_v61 = vld [vmem:[%s11644_s2 + $0x238] sm:$0xff]  ;;  %v1015_v9 = vunpack.c.h.b16 %v8154_v3 }
  0xc9   : > { %2800 = vmatpush.bf16.msra.mxu0 %v7226_v61 }
  0xca   : > { %v2027_v32 = vpop.f32.mrf.mxu1 }
  0xcb   : > { %v8187_v2 = vadd.f32 %v2027_v32, %v1914_v15  ;;  %2000 = vmatmul.bf16.gmra.mxu2 %v8048_v31  ;;  %1948 = vmatmul.bf16.gmra.mxu0 %v8054_v4  ;;  %v755_v4 = vsel %vm7739_vm3, %v688_v56, 0  ;;  %v747_v32 = vsel %vm7739_vm3, %v568_v17, 0  ;;  %v967_v56 = vunpack.c.h.b16 %v8159_v16 }
  0xcc   : > { %2113 = vmatmul.bf16.gmra.mxu3 %v8180_v11  ;;  %2467 = vmatpush.bf16.msrb.mxu1 %v7196_v5  ;;  %v8218_v38 = vunpack.c.l.b16 %v755_v4  ;;  %v8221_v6 = vunpack.c.l.b16 %v747_v32 }
  0xcd   : > { %2061 = vmatmul.bf16.gmra.mxu1 %v8183_v23 }
  0xce   : > { %v1966_v30 = vpop.f32.mrf.mxu2  ;;  %v8227_v5 = vpack.c.b16 %v8221_v6, %v967_v56 }
  0xcf   : > { %v2079_v31 = vpop.f32.mrf.mxu3 }
  0xd0   : > { %v8205_v15 = vadd.f32 %v2079_v31, %v1966_v30  ;;  %v1916_v37 = vpop.f32.mrf.mxu0  ;;  %2468 = vmatpush.bf16.msrb.mxu1 %v7195_v60  ;;  %v8224_v31 = vpack.c.b16 %v8218_v38, %v1015_v9  ;;  %11866 = vst [vmem:[#allocation47_spill] sm:$0xff] %v8227_v5 }
  0xd2   : > { %11864 = vst [vmem:[#allocation45_spill] sm:$0xff] %v8205_v15  ;;  %v2029_v24 = vpop.f32.mrf.mxu1 }
  0xd3   : > { %11865 = vst [vmem:[#allocation46_spill] sm:$0xff] %v8224_v31 }
  0xd6   : > { %v1968_v17 = vpop.f32.mrf.mxu2 }
  0xd7   : > { %v2081_v30 = vpop.f32.mrf.mxu3  ;;  %v759_v17 = vrot.slane %v7653_v14, 1 }
  0xd8   : > { %v1918_v37 = vpop.f32.mrf.mxu0  ;;  %v760_v30 = vrot.slane %v7667_v20, 1  ;;  %v765_v20 = vrot.slane %v7805_v46, 1 }
  0xda   : > { %v2031_v24 = vpop.f32.mrf.mxu1  ;;  %v816_v14 = vsel %vm813_vm5, %v760_v30, 0 }
  0xdb   : > { %v8229_v11 = vadd.f32 %v2031_v24, %v1918_v37  ;;  %2004 = vmatmul.bf16.gmra.mxu2 %v8088_v22  ;;  %1952 = vmatmul.bf16.gmra.mxu0 %v8092_v57  ;;  %v762_v22 = vrot.slane %v7691_v34, 1  ;;  %v763_v37 = vrot.slane %v7708_v44, 1  ;;  %v766_v44 = vrot.slane %v7815_v49, 1 }
  0xdc   : > { %2117 = vmatmul.bf16.gmra.mxu3 %v8224_v31  ;;  %v7309_v49 = vunpack.c.l.b16 %v7805_v46 }
  0xdd   : > { %2065 = vmatmul.bf16.gmra.mxu1 %v8227_v5 }
  0xde   : > { %v1970_v4 = vpop.f32.mrf.mxu2 }
  0xdf   : > { %v2083_v32 = vpop.f32.mrf.mxu3 }
  0xe0   : > { %v8235_v60 = vadd.f32 %v2083_v32, %v1970_v4  ;;  %v1920_v61 = vpop.f32.mrf.mxu0  ;;  %v761_v4 = vsel %vm758_vm4, %v759_v17, %v760_v30  ;;  %v819_v17 = vsel %vm813_vm5, %v763_v37, 0 }
  0xe2   : > { %11867 = vst [vmem:[#allocation48_spill] sm:$0xff] %v8235_v60  ;;  %v2033_v9 = vpop.f32.mrf.mxu1  ;;  %v1184_v60 = vpack.c.b16 %v7309_v49, %v7694_v35 }
  0xe3   : > { %v8237_v56 = vadd.f32 %v2033_v9, %v1920_v61  ;;  %v764_v61 = vsel %vm758_vm4, %v762_v22, %v763_v37 }
  0xe6   : > { %v1972_v57 = vpop.f32.mrf.mxu2 }
  0xe7   : > { %v2085_v24 = vpop.f32.mrf.mxu3 }
  0xe8   : > { %v8243_v31 = vadd.f32 %v2085_v24, %v1972_v57  ;;  %v1923_v32 = vpop.f32.mrf.mxu0 }
  0xea   : > { %11868 = vst [vmem:[#allocation49_spill] sm:$0xff] %v8243_v31  ;;  %v2036_v5 = vpop.f32.mrf.mxu1 }
  0xeb   : > { %2130 = vmatmul.bf16.vlgmr.msrb.gmra.mxu2 %v761_v4  ;;  %2356 = vmatmul.bf16.vlgmr.msrb.gmra.mxu0 %v7752_v7  ;;  %v869_v5 = vsel %vm7739_vm3, %v816_v14, 0  ;;  %v870_v7 = vsel %vm7739_vm3, %v819_v17, 0  ;;  %v926_v4 = vunpack.c.l.b16 %v764_v61 }
  0xec   : > { %2243 = vmatmul.bf16.vlgmr.msrb.gmra.mxu3 %v7691_v34  ;;  %v8256_v34 = vsel %vm758_vm4, %v765_v20, %v766_v44  ;;  %v936_v32 = vunpack.c.l.b16 %v869_v5 }
  0xed   : > { %2469 = vmatmul.bf16.vlgmr.msrb.gmra.mxu1 %v764_v61  ;;  %v928_v37 = vunpack.c.l.b16 %v8256_v34 }
  0xee   : > { %v1975_v9 = vpop.f32.mrf.mxu2  ;;  %v1183_v20 = vpack.c.b16 %v926_v4, %v936_v32  ;;  %v822_v4 = vsel %vm813_vm5, %v766_v44, 0 }
  0xef   : > { %v2088_v57 = vpop.f32.mrf.mxu3  ;;  %v927_v9 = vunpack.c.l.b16 %v7857_v19  ;;  %v871_v49 = vsel %vm7739_vm3, %v822_v4, 0 }
  0xf0   : > { %v1924_v22 = vpop.f32.mrf.mxu0  ;;  %v938_v57 = vunpack.c.l.b16 %v870_v7  ;;  %v7209_v7 = vld [vmem:[%s11644_s2 + $0x1b0] sm:$0xff]  ;;  %v940_v44 = vunpack.c.l.b16 %v871_v49 }
  0xf1   : > { %v1185_v17 = vpack.c.b16 %v927_v9, %v7785_v36  ;;  %2575 = vmatpush.bf16.msra.mxu2 %v7209_v7  ;;  %v7225_v9 = vld [vmem:[%s11644_s2 + $0x230] sm:$0xff] }
  0xf2   : > { %v2037_v24 = vpop.f32.mrf.mxu1  ;;  %2801 = vmatpush.bf16.msra.mxu0 %v7225_v9 }
  0xf3   : > { %v8260_v30 = vadd.f32 %v2037_v24, %v1924_v22  ;;  %v1186_v22 = vpack.c.b16 %v928_v37, %v938_v57  ;;  %v932_v37 = vunpack.c.h.b16 %v764_v61 }
  0xf5   : > { %v1192_v7 = vpack.c.b16 %v938_v57, %v932_v37 }
  0xf6   : > { %v1976_v14 = vpop.f32.mrf.mxu2 }
  0xf7   : > { %v2089_v23 = vpop.f32.mrf.mxu3 }
  0xf8   : > { %v8265_v31 = vadd.f32 %v2089_v23, %v1976_v14  ;;  %v1927_v24 = vpop.f32.mrf.mxu0  ;;  %v7217_v23 = vld [vmem:[%s11644_s2 + $0x1f0] sm:$0xff]  ;;  %v7310_v14 = vunpack.c.h.b16 %v7805_v46 }
  0xf9   : > { %2688 = vmatpush.bf16.msra.mxu3 %v7217_v23 }
  0xfa   : > { %v2040_v15 = vpop.f32.mrf.mxu1  ;;  %v1193_v23 = vpack.c.b16 %v7801_v43, %v7310_v14  ;;  %v768_v43 = vrot.slane %v7839_v62, 1 }
  0xfb   : > { %v8269_v5 = vadd.f32 %v2040_v15, %v1927_v24  ;;  %2135 = vmatmul.bf16.gmra.mxu2 %v1183_v20  ;;  %2361 = vmatmul.bf16.gmra.mxu0 %v1185_v17  ;;  %v933_v20 = vunpack.c.h.b16 %v7857_v19  ;;  %v934_v17 = vunpack.c.h.b16 %v8256_v34 }
  0xfc   : > { %2248 = vmatmul.bf16.gmra.mxu3 %v1184_v60 }
  0xfd   : > { %2474 = vmatmul.bf16.gmra.mxu1 %v1186_v22 }
  0xfe   : > { %v1979_v35 = vpop.f32.mrf.mxu2 }
  0xff   : > { %v2092_v36 = vpop.f32.mrf.mxu3 }
 0x100   : > { %v8278_v15 = vadd.f32 %v2092_v36, %v1979_v35  ;;  %v1929_v32 = vpop.f32.mrf.mxu0  ;;  %v1194_v35 = vpack.c.b16 %v7883_v58, %v933_v20  ;;  %v1195_v36 = vpack.c.b16 %v940_v44, %v934_v17  ;;  %v769_v58 = vrot.slane %v7850_v13, 1 }
 0x102   : > { %v2042_v60 = vpop.f32.mrf.mxu1 }
 0x106   : > { %v1981_v22 = vpop.f32.mrf.mxu2 }
 0x107   : > { %v2094_v24 = vpop.f32.mrf.mxu3 }
 0x108   : > { %v1931_v4 = vpop.f32.mrf.mxu0 }
 0x10a   : > { %v2044_v32 = vpop.f32.mrf.mxu1 }
 0x10b   : > { %v8290_v60 = vadd.f32 %v2044_v32, %v1931_v4  ;;  %2139 = vmatmul.bf16.gmra.mxu2 %v1192_v7  ;;  %2365 = vmatmul.bf16.gmra.mxu0 %v1194_v35  ;;  %v770_v7 = vsel %vm758_vm4, %v768_v43, %v769_v58  ;;  %v772_v35 = vrot.slane %v7947_v55, 1  ;;  %v825_v4 = vsel %vm813_vm5, %v769_v58, 0 }
 0x10c   : > { %2252 = vmatmul.bf16.gmra.mxu3 %v1193_v23  ;;  %v771_v23 = vrot.slane %v7937_v51, 1  ;;  %v947_v43 = vunpack.c.l.b16 %v7990_v1 }
 0x10d   : > { %2478 = vmatmul.bf16.gmra.mxu1 %v1195_v36 }
 0x10e   : > { %v1983_v46 = vpop.f32.mrf.mxu2 }
 0x10f   : > { %v2096_v61 = vpop.f32.mrf.mxu3 }
 0x110   : > { %v8292_v49 = vadd.f32 %v2096_v61, %v1983_v46  ;;  %v1933_v9 = vpop.f32.mrf.mxu0  ;;  %v8308_v61 = vsel %vm758_vm4, %v771_v23, %v772_v35 }
 0x112   : > { %v2046_v22 = vpop.f32.mrf.mxu1 }
 0x113   : > { %v8294_v57 = vadd.f32 %v2046_v22, %v1933_v9  ;;  %v872_v9 = vsel %vm7739_vm3, %v825_v4, 0  ;;  %v7321_v22 = vunpack.c.l.b16 %v7937_v51 }
 0x114   : > { %v946_v55 = vunpack.c.l.b16 %v872_v9  ;;  %v7208_v9 = vld [vmem:[%s11644_s2 + $0x1a8] sm:$0xff] }
 0x115   : > { %v1203_v23 = vpack.c.b16 %v7321_v22, %v7842_v63  ;;  %v7216_v63 = vld [vmem:[%s11644_s2 + $0x1e8] sm:$0xff]  ;;  %2576 = vmatpush.bf16.msra.mxu2 %v7208_v9 }
 0x116   : > { %v1985_v37 = vpop.f32.mrf.mxu2  ;;  %2689 = vmatpush.bf16.msra.mxu3 %v7216_v63 }
 0x117   : > { %v2098_v14 = vpop.f32.mrf.mxu3 }
 0x118   : > { %v8298_v20 = vadd.f32 %v2098_v14, %v1985_v37  ;;  %v1936_v17 = vpop.f32.mrf.mxu0  ;;  %v948_v37 = vunpack.c.l.b16 %v8308_v61 }
 0x11a   : > { %v2049_v24 = vpop.f32.mrf.mxu1 }
 0x11b   : > { %2143 = vmatmul.bf16.gmra.mxu2 %v8256_v34  ;;  %2369 = vmatmul.bf16.gmra.mxu0 %v7876_v54  ;;  %v942_v54 = vunpack.c.l.b16 %v770_v7 }
 0x11c   : > { %2256 = vmatmul.bf16.gmra.mxu3 %v7839_v62 }
 0x11d   : > { %2482 = vmatmul.bf16.gmra.mxu1 %v770_v7  ;;  %v8319_v24 = vpack.c.b16 %v942_v54, %v940_v44  ;;  %v828_v54 = vsel %vm813_vm5, %v772_v35, 0 }
 0x11e   : > { %v1988_v13 = vpop.f32.mrf.mxu2 }
 0x11f   : > { %v2101_v36 = vpop.f32.mrf.mxu3  ;;  %v1204_v13 = vpack.c.b16 %v947_v43, %v7915_v8 }
 0x120   : > { %v1937_v32 = vpop.f32.mrf.mxu0  ;;  %v1205_v36 = vpack.c.b16 %v948_v37, %v946_v55 }
 0x122   : > { %v2050_v46 = vpop.f32.mrf.mxu1 }
 0x123   : > { %v8312_v62 = vadd.f32 %v2050_v46, %v1937_v32 }
 0x126   : > { %v1989_v14 = vpop.f32.mrf.mxu2 }
 0x127   : > { %v2102_v58 = vpop.f32.mrf.mxu3 }
 0x128   : > { %v8317_v17 = vadd.f32 %v2102_v58, %v1989_v14  ;;  %v1940_v4 = vpop.f32.mrf.mxu0  ;;  %v873_v14 = vsel %vm7739_vm3, %v828_v54, 0  ;;  %v7224_v58 = vld [vmem:[%s11644_s2 + $0x228] sm:$0xff] }
 0x129   : > { %v952_v35 = vunpack.c.l.b16 %v873_v14  ;;  %2802 = vmatpush.bf16.msra.mxu0 %v7224_v58 }
 0x12a   : > { %v2053_v32 = vpop.f32.mrf.mxu1 }
 0x12b   : > { %v8323_v46 = vadd.f32 %v2053_v32, %v1940_v4  ;;  %2148 = vmatmul.bf16.gmra.mxu2 %v8319_v24  ;;  %2374 = vmatmul.bf16.gmra.mxu0 %v1204_v13  ;;  %v7322_v13 = vunpack.c.h.b16 %v7937_v51  ;;  %v950_v4 = vunpack.c.h.b16 %v8308_v61 }
 0x12c   : > { %2261 = vmatmul.bf16.gmra.mxu3 %v1203_v23  ;;  %v944_v23 = vunpack.c.h.b16 %v770_v7 }
 0x12d   : > { %2487 = vmatmul.bf16.gmra.mxu1 %v1205_v36  ;;  %v949_v36 = vunpack.c.h.b16 %v7990_v1  ;;  %v1211_v54 = vpack.c.b16 %v952_v35, %v950_v4 }
 0x12e   : > { %v1992_v8 = vpop.f32.mrf.mxu2  ;;  %v8343_v63 = vpack.c.b16 %v946_v55, %v944_v23 }
 0x12f   : > { %v2105_v44 = vpop.f32.mrf.mxu3 }
 0x130   : > { %v8333_v22 = vadd.f32 %v2105_v44, %v1992_v8  ;;  %v1942_v43 = vpop.f32.mrf.mxu0  ;;  %v1209_v8 = vpack.c.b16 %v7931_v45, %v7322_v13  ;;  %v1210_v44 = vpack.c.b16 %v8016_v59, %v949_v36  ;;  %v774_v45 = vrot.slane %v7972_v25, 1 }
 0x131   : > { %v775_v59 = vrot.slane %v7983_v39, 1 }
 0x132   : > { %v2055_v37 = vpop.f32.mrf.mxu1 }
 0x136   : > { %v1994_v32 = vpop.f32.mrf.mxu2 }
 0x137   : > { %v2107_v9 = vpop.f32.mrf.mxu3 }
 0x138   : > { %v1944_v43 = vpop.f32.mrf.mxu0 }
 0x13a   : > { %v2057_v37 = vpop.f32.mrf.mxu1 }
 0x13b   : > { %v8347_v7 = vadd.f32 %v2057_v37, %v1944_v43  ;;  %2152 = vmatmul.bf16.gmra.mxu2 %v8343_v63  ;;  %2378 = vmatmul.bf16.gmra.mxu0 %v1210_v44  ;;  %v776_v44 = vsel %vm758_vm4, %v774_v45, %v775_v59  ;;  %v778_v43 = vrot.slane %v8082_v41, 1 }
 0x13c   : > { %2265 = vmatmul.bf16.gmra.mxu3 %v1209_v8 }
 0x13d   : > { %2491 = vmatmul.bf16.gmra.mxu1 %v1211_v54  ;;  %v777_v54 = vrot.slane %v8070_v21, 1 }
 0x13e   : > { %v1996_v51 = vpop.f32.mrf.mxu2 }
 0x13f   : > { %v2109_v14 = vpop.f32.mrf.mxu3 }
 0x140   : > { %v8350_v58 = vadd.f32 %v2109_v14, %v1996_v51  ;;  %v1946_v55 = vpop.f32.mrf.mxu0  ;;  %v831_v51 = vsel %vm813_vm5, %v775_v59, 0 }
 0x141   : > { %v874_v45 = vsel %vm7739_vm3, %v831_v51, 0 }
 0x142   : > { %11869 = vst [vmem:[#allocation50_spill] sm:$0xff] %v8350_v58  ;;  %v2059_v23 = vpop.f32.mrf.mxu1  ;;  %v958_v41 = vunpack.c.l.b16 %v874_v45  ;;  %v7207_v45 = vld [vmem:[%s11644_s2 + $0x1a0] sm:$0xff] }
 0x143   : > { %v8352_v32 = vadd.f32 %v2059_v23, %v1946_v55  ;;  %v8366_v23 = vsel %vm758_vm4, %v777_v54, %v778_v43  ;;  %2577 = vmatpush.bf16.msra.mxu2 %v7207_v45 }
 0x146   : > { %v1998_v13 = vpop.f32.mrf.mxu2 }
 0x147   : > { %v2111_v36 = vpop.f32.mrf.mxu3 }
 0x148   : > { %v8356_v4 = vadd.f32 %v2111_v36, %v1998_v13  ;;  %v1949_v9 = vpop.f32.mrf.mxu0  ;;  %v7333_v13 = vunpack.c.l.b16 %v8070_v21  ;;  %v959_v36 = vunpack.c.l.b16 %v8134_v33 }
 0x149   : > { %v960_v9 = vunpack.c.l.b16 %v8366_v23 }
 0x14a   : > { %11870 = vst [vmem:[#allocation51_spill] sm:$0xff] %v8356_v4  ;;  %v2062_v8 = vpop.f32.mrf.mxu1  ;;  %v1219_v54 = vpack.c.b16 %v7333_v13, %v7975_v27  ;;  %v1220_v51 = vpack.c.b16 %v959_v36, %v8051_v29  ;;  %v7215_v27 = vld [vmem:[%s11644_s2 + $0x1e0] sm:$0xff] }
 0x14b   : > { %2156 = vmatmul.bf16.gmra.mxu2 %v8308_v61  ;;  %2382 = vmatmul.bf16.gmra.mxu0 %v8009_v47  ;;  %v954_v47 = vunpack.c.l.b16 %v776_v44 }
 0x14c   : > { %2269 = vmatmul.bf16.gmra.mxu3 %v7972_v25 }
 0x14d   : > { %2495 = vmatmul.bf16.gmra.mxu1 %v776_v44  ;;  %2690 = vmatpush.bf16.msra.mxu3 %v7215_v27 }
 0x14e   : > { %v2001_v39 = vpop.f32.mrf.mxu2 }
 0x14f   : > { %v2114_v37 = vpop.f32.mrf.mxu3 }
 0x150   : > { %v1950_v14 = vpop.f32.mrf.mxu0  ;;  %v8377_v37 = vpack.c.b16 %v954_v47, %v952_v35  ;;  %v834_v47 = vsel %vm813_vm5, %v778_v43, 0  ;;  %v962_v43 = vunpack.c.h.b16 %v8366_v23 }
 0x152   : > { %v2063_v55 = vpop.f32.mrf.mxu1 }
 0x153   : > { %v8370_v25 = vadd.f32 %v2063_v55, %v1950_v14  ;;  %v1221_v14 = vpack.c.b16 %v960_v9, %v958_v41  ;;  %v875_v9 = vsel %vm7739_vm3, %v834_v47, 0 }
 0x156   : > { %v2002_v8 = vpop.f32.mrf.mxu2 }
 0x157   : > { %v2115_v59 = vpop.f32.mrf.mxu3 }
 0x158   : > { %v8375_v39 = vadd.f32 %v2115_v59, %v2002_v8  ;;  %v1953_v55 = vpop.f32.mrf.mxu0  ;;  %v7223_v8 = vld [vmem:[%s11644_s2 + $0x220] sm:$0xff]  ;;  %v956_v59 = vunpack.c.h.b16 %v776_v44 }
 0x159   : > { %2803 = vmatpush.bf16.msra.mxu0 %v7223_v8 }
 0x15a   : > { %v2066_v4 = vpop.f32.mrf.mxu1  ;;  %v8401_v27 = vpack.c.b16 %v958_v41, %v956_v59 }
 0x15b   : > { %v8381_v58 = vadd.f32 %v2066_v4, %v1953_v55  ;;  %2161 = vmatmul.bf16.gmra.mxu2 %v8377_v37  ;;  %2387 = vmatmul.bf16.gmra.mxu0 %v1220_v51  ;;  %v961_v51 = vunpack.c.h.b16 %v8134_v33 }
 0x15c   : > { %2274 = vmatmul.bf16.gmra.mxu3 %v1219_v54  ;;  %v7334_v54 = vunpack.c.h.b16 %v8070_v21 }
 0x15d   : > { %2500 = vmatmul.bf16.gmra.mxu1 %v1221_v14  ;;  %v964_v14 = vunpack.c.l.b16 %v875_v9 }
 0x15e   : > { %v2005_v29 = vpop.f32.mrf.mxu2 }
 0x15f   : > { %v2118_v35 = vpop.f32.mrf.mxu3  ;;  %v1227_v47 = vpack.c.b16 %v964_v14, %v962_v43 }
 0x160   : > { %v8391_v4 = vadd.f32 %v2118_v35, %v2005_v29  ;;  %v1955_v13 = vpop.f32.mrf.mxu0  ;;  %v1225_v29 = vpack.c.b16 %v8064_v26, %v7334_v54  ;;  %v1226_v35 = vpack.c.b16 %v8171_v12, %v961_v51  ;;  %v780_v26 = vrot.slane %v8103_v42, 1 }
 0x161   : > { %v781_v12 = vrot.slane %v8122_v40, 1  ;;  %v7528_v40 = vld [vmem:[%s7626_s10 + $0x60] sm:$0xff]  }
 0x162   : > { %11871 = vst [vmem:[#allocation52_spill] sm:$0xff] %v8391_v4  ;;  %v2068_v36 = vpop.f32.mrf.mxu1  ;;  %v7206_v4 = vld [vmem:[%s11644_s2 + $0x198] sm:$0xff] }
 0x163   : > { %2578 = vmatpush.bf16.msra.mxu2 %v7206_v4  ;;  %v7222_v4 = vld [vmem:[%s11644_s2 + $0x218] sm:$0xff] }
 0x164   : > { %2804 = vmatpush.bf16.msra.mxu0 %v7222_v4 }
 0x166   : > { %v2007_v55 = vpop.f32.mrf.mxu2 }
 0x167   : > { %v2120_v45 = vpop.f32.mrf.mxu3 }
 0x168   : > { %v2357_v13 = vpop.f32.mrf.mxu0 }
 0x16a   : > { %v2470_v36 = vpop.f32.mrf.mxu1 }
 0x16b   : > { %2165 = vmatmul.bf16.gmra.mxu2 %v8401_v27  ;;  %2391 = vmatmul.bf16.gmra.mxu0 %v1226_v35 }
 0x16c   : > { %2278 = vmatmul.bf16.gmra.mxu3 %v1225_v29 }
 0x16d   : > { %2504 = vmatmul.bf16.gmra.mxu1 %v1227_v47 }
 0x16e   : > { %v2131_v21 = vpop.f32.mrf.mxu2 }
 0x16f   : > { %v2244_v44 = vpop.f32.mrf.mxu3  ;;  %v2132_v9 = vadd.f32 %v2131_v21, %v8072_v53  ;;  %v782_v53 = vsel %vm758_vm4, %v780_v26, %v781_v12  ;;  %v783_v21 = vrot.slane %v7528_v40, 1 }
 0x170   : > { %v2359_v55 = vpop.f32.mrf.mxu0 }
 0x171   : > { %v2245_v8 = vadd.f32 %v2244_v44, %v2132_v9  ;;  %v784_v44 = vrot.slane %v7664_v18, 1 }
 0x172   : > { %v2472_v41 = vpop.f32.mrf.mxu1 }
 0x173   : > { %v2358_v59 = vadd.f32 %v2357_v13, %v2245_v8  ;;  %v837_v8 = vsel %vm813_vm5, %v781_v12, 0 }
 0x175   : > { %v8407_v45 = vadd.f32 %v2470_v36, %v2358_v59 }
 0x176   : > { %v2133_v54 = vpop.f32.mrf.mxu2 }
 0x177   : > { %11872 = vst [vmem:[#allocation53_spill] sm:$0xff] %v8407_v45  ;;  %v2246_v51 = vpop.f32.mrf.mxu3  ;;  %v2134_v43 = vadd.f32 %v2133_v54, %v8114_v28  ;;  %v8422_v54 = vsel %vm758_vm4, %v783_v21, %v784_v44 }
 0x178   : > { %v2362_v35 = vpop.f32.mrf.mxu0 }
 0x179   : > { %v2247_v29 = vadd.f32 %v2246_v51, %v2134_v43 }
 0x17a   : > { %v2475_v47 = vpop.f32.mrf.mxu1 }
 0x17b   : > { %2169 = vmatmul.bf16.gmra.mxu2 %v8366_v23  ;;  %v2360_v13 = vadd.f32 %v2359_v55, %v2247_v29  ;;  %2395 = vmatmul.bf16.gmra.mxu0 %v8159_v16  ;;  %v966_v16 = vunpack.c.l.b16 %v782_v53  ;;  %v7345_v55 = vunpack.c.l.b16 %v7528_v40  ;;  %v972_v29 = vunpack.c.l.b16 %v8422_v54 }
 0x17c   : > { %2282 = vmatmul.bf16.gmra.mxu3 %v8103_v42  ;;  %v876_v42 = vsel %vm7739_vm3, %v837_v8, 0 }
 0x17d   : > { %2508 = vmatmul.bf16.gmra.mxu1 %v782_v53  ;;  %v8416_v36 = vadd.f32 %v2472_v41, %v2360_v13  ;;  %v11874_v41 = vld [vmem:[#allocation5_spill] sm:$0xff]  ;;  %v970_v43 = vunpack.c.l.b16 %v876_v42  ;;  %v8429_v12 = vpack.c.b16 %v966_v16, %v964_v14  ;;  %v11875_v13 = vld [vmem:[#allocation40_spill] sm:$0xff] }
 0x17e   : > { %v2136_v28 = vpop.f32.mrf.mxu2  ;;  %v971_v51 = vunpack.c.l.b16 %v11874_v41 }
 0x17f   : > { %11873 = vst [vmem:[#allocation54_spill] sm:$0xff] %v8416_v36  ;;  %v2249_v9 = vpop.f32.mrf.mxu3  ;;  %v1235_v28 = vpack.c.b16 %v7345_v55, %v11875_v13  ;;  %v840_v55 = vsel %vm813_vm5, %v784_v44, 0  ;;  %v973_v13 = vunpack.c.h.b16 %v11874_v41  ;;  %v974_v44 = vunpack.c.h.b16 %v8422_v54 }
 0x180   : > { %v2363_v59 = vpop.f32.mrf.mxu0  ;;  %v1236_v21 = vpack.c.b16 %v971_v51, %v8221_v6  ;;  %v1237_v9 = vpack.c.b16 %v972_v29, %v970_v43  ;;  %v7214_v6 = vld [vmem:[%s11644_s2 + $0x1d8] sm:$0xff] }
 0x181   : > { %2691 = vmatpush.bf16.msra.mxu3 %v7214_v6  ;;  %v11878_v6 = vld [vmem:[#allocation2_spill] sm:$0xff] }
 0x182   : > { %v2476_v26 = vpop.f32.mrf.mxu1 }
 0x186   : > { %v2137_v18 = vpop.f32.mrf.mxu2 }
 0x187   : > { %v2250_v35 = vpop.f32.mrf.mxu3  ;;  %v2138_v47 = vadd.f32 %v2137_v18, %v8163_v50  ;;  %v877_v18 = vsel %vm7739_vm3, %v840_v55, 0 }
 0x188   : > { %v2366_v8 = vpop.f32.mrf.mxu0 }
 0x189   : > { %v2251_v36 = vadd.f32 %v2250_v35, %v2138_v47  ;;  %v7346_v47 = vunpack.c.h.b16 %v7528_v40 }
 0x18a   : > { %v2479_v45 = vpop.f32.mrf.mxu1 }
 0x18b   : > { %2174 = vmatmul.bf16.gmra.mxu2 %v8429_v12  ;;  %v2364_v42 = vadd.f32 %v2363_v59, %v2251_v36  ;;  %2400 = vmatmul.bf16.gmra.mxu0 %v1236_v21 }
 0x18c   : > { %2287 = vmatmul.bf16.gmra.mxu3 %v1235_v28 }
 0x18d   : > { %2513 = vmatmul.bf16.gmra.mxu1 %v1237_v9  ;;  %v8437_v50 = vadd.f32 %v2476_v26, %v2364_v42  ;;  %v968_v26 = vunpack.c.h.b16 %v782_v53 }
 0x18e   : > { %v2140_v14 = vpop.f32.mrf.mxu2 }
 0x18f   : > { %11876 = vst [vmem:[#allocation5_spill] sm:$0xff] %v8437_v50  ;;  %v2253_v16 = vpop.f32.mrf.mxu3  ;;  %v2141_v51 = vadd.f32 %v2140_v14, %v8187_v2  ;;  %v976_v2 = vunpack.c.l.b16 %v877_v18  ;;  %v8453_v42 = vpack.c.b16 %v970_v43, %v968_v26  ;;  %v1241_v14 = vpack.c.b16 %v11878_v6, %v7346_v47  ;;  %v7529_v26 = vld [vmem:[%s7626_s10 + $0x6c] sm:$0xff]   ;;  %v11881_v47 = vld [vmem:[#allocation4_spill] sm:$0xff] }
 0x190   : > { %v2368_v59 = vpop.f32.mrf.mxu0  ;;  %v7205_v50 = vld [vmem:[%s11644_s2 + $0x190] sm:$0xff] }
 0x191   : > { %v2254_v36 = vadd.f32 %v2253_v16, %v2141_v51  ;;  %v11879_v16 = vld [vmem:[#allocation8_spill] sm:$0xff]  ;;  %v1243_v53 = vpack.c.b16 %v976_v2, %v974_v44  ;;  %2579 = vmatpush.bf16.msra.mxu2 %v7205_v50  ;;  %v7221_v50 = vld [vmem:[%s11644_s2 + $0x210] sm:$0xff] }
 0x192   : > { %v2481_v29 = vpop.f32.mrf.mxu1  ;;  %v1242_v55 = vpack.c.b16 %v11879_v16, %v973_v13  ;;  %v787_v13 = vrot.slane %v11881_v47, 1  ;;  %2805 = vmatpush.bf16.msra.mxu0 %v7221_v50 }
 0x193   : > { %v2367_v35 = vadd.f32 %v2366_v8, %v2254_v36 }
 0x195   : > { %v8451_v28 = vadd.f32 %v2479_v45, %v2367_v35  ;;  %v786_v35 = vrot.slane %v7529_v26, 1 }
 0x196   : > { %v2142_v21 = vpop.f32.mrf.mxu2 }
 0x197   : > { %11877 = vst [vmem:[#allocation40_spill] sm:$0xff] %v8451_v28  ;;  %v2255_v9 = vpop.f32.mrf.mxu3 }
 0x198   : > { %v2370_v8 = vpop.f32.mrf.mxu0 }
 0x19a   : > { %v2483_v40 = vpop.f32.mrf.mxu1 }
 0x19b   : > { %2178 = vmatmul.bf16.gmra.mxu2 %v8453_v42  ;;  %2404 = vmatmul.bf16.gmra.mxu0 %v1242_v55 }
 0x19c   : > { %2291 = vmatmul.bf16.gmra.mxu3 %v1241_v14 }
 0x19d   : > { %2517 = vmatmul.bf16.gmra.mxu1 %v1243_v53  ;;  %v11882_v53 = vld [vmem:[#allocation7_spill] sm:$0xff] }
 0x19e   : > { %v2144_v51 = vpop.f32.mrf.mxu2 }
 0x19f   : > { %v2257_v45 = vpop.f32.mrf.mxu3  ;;  %v2145_v36 = vadd.f32 %v2144_v51, %v8229_v11  ;;  %v788_v11 = vsel %vm758_vm4, %v786_v35, %v787_v13 }
 0x1a0   : > { %v2372_v43 = vpop.f32.mrf.mxu0 }
 0x1a1   : > { %v2258_v59 = vadd.f32 %v2257_v45, %v2145_v36  ;;  %v11884_v45 = vld [vmem:[#allocation13_spill] sm:$0xff] }
 0x1a2   : > { %v2485_v29 = vpop.f32.mrf.mxu1  ;;  %v790_v36 = vrot.slane %v11884_v45, 1  ;;  %v11886_v45 = vld [vmem:[#allocation3_spill] sm:$0xff] }
 0x1a3   : > { %v2371_v18 = vadd.f32 %v2370_v8, %v2258_v59 }
 0x1a5   : > { %v8459_v4 = vadd.f32 %v2483_v40, %v2371_v18  ;;  %v7530_v40 = vld [vmem:[%s7626_s10 + $0x78] sm:$0xff]   ;;  %v843_v18 = vsel %vm813_vm5, %v787_v13, 0 }
 0x1a6   : > { %v2146_v44 = vpop.f32.mrf.mxu2  ;;  %v789_v51 = vrot.slane %v7530_v40, 1 }
 0x1a7   : > { %11880 = vst [vmem:[#allocation2_spill] sm:$0xff] %v8459_v4  ;;  %v2259_v21 = vpop.f32.mrf.mxu3  ;;  %v2147_v9 = vadd.f32 %v2146_v44, %v8237_v56 }
 0x1a8   : > { %v2375_v14 = vpop.f32.mrf.mxu0  ;;  %v8473_v35 = vsel %vm758_vm4, %v789_v51, %v790_v36  ;;  %v11887_v51 = vld [vmem:[#allocation10_spill] sm:$0xff] }
 0x1a9   : > { %v2260_v6 = vadd.f32 %v2259_v21, %v2147_v9  ;;  %v7357_v21 = vunpack.c.l.b16 %v7530_v40  ;;  %v984_v14 = vunpack.c.l.b16 %v8473_v35 }
 0x1aa   : > { %v2488_v16 = vpop.f32.mrf.mxu1 }
 0x1ab   : > { %2182 = vmatmul.bf16.gmra.mxu2 %v8422_v54  ;;  %v2373_v55 = vadd.f32 %v2372_v43, %v2260_v6  ;;  %2408 = vmatmul.bf16.gmra.mxu0 %v11882_v53  ;;  %v878_v43 = vsel %vm7739_vm3, %v843_v18, 0 }
 0x1ac   : > { %2295 = vmatmul.bf16.gmra.mxu3 %v7529_v26  ;;  %v978_v26 = vunpack.c.l.b16 %v788_v11  ;;  %v982_v6 = vunpack.c.l.b16 %v878_v43 }
 0x1ad   : > { %2521 = vmatmul.bf16.gmra.mxu1 %v788_v11  ;;  %v8467_v8 = vadd.f32 %v2485_v29, %v2373_v55  ;;  %v11885_v29 = vld [vmem:[#allocation16_spill] sm:$0xff] }
 0x1ae   : > { %v2149_v59 = vpop.f32.mrf.mxu2  ;;  %v983_v9 = vunpack.c.l.b16 %v11885_v29  ;;  %v8480_v13 = vpack.c.b16 %v978_v26, %v976_v2  ;;  %v7213_v2 = vld [vmem:[%s11644_s2 + $0x1d0] sm:$0xff] }
 0x1af   : > { %11883 = vst [vmem:[#allocation8_spill] sm:$0xff] %v8467_v8  ;;  %v2262_v56 = vpop.f32.mrf.mxu3  ;;  %v1251_v59 = vpack.c.b16 %v7357_v21, %v11886_v45  ;;  %v1253_v8 = vpack.c.b16 %v984_v14, %v982_v6  ;;  %2692 = vmatpush.bf16.msra.mxu3 %v7213_v2  ;;  %v985_v45 = vunpack.c.h.b16 %v11885_v29  ;;  %v11890_v2 = vld [vmem:[#allocation12_spill] sm:$0xff] }
 0x1b0   : > { %v2376_v47 = vpop.f32.mrf.mxu0  ;;  %v1252_v56 = vpack.c.b16 %v983_v9, %v11887_v51  ;;  %v846_v9 = vsel %vm813_vm5, %v790_v36, 0  ;;  %v986_v36 = vunpack.c.h.b16 %v8473_v35 }
 0x1b2   : > { %v2489_v44 = vpop.f32.mrf.mxu1 }
 0x1b6   : > { %v2150_v16 = vpop.f32.mrf.mxu2 }
 0x1b7   : > { %v2263_v55 = vpop.f32.mrf.mxu3  ;;  %v2151_v53 = vadd.f32 %v2150_v16, %v8260_v30 }
 0x1b8   : > { %v2379_v18 = vpop.f32.mrf.mxu0 }
 0x1b9   : > { %v2264_v4 = vadd.f32 %v2263_v55, %v2151_v53  ;;  %v7358_v53 = vunpack.c.h.b16 %v7530_v40 }
 0x1ba   : > { %v2492_v28 = vpop.f32.mrf.mxu1 }
 0x1bb   : > { %2187 = vmatmul.bf16.gmra.mxu2 %v8480_v13  ;;  %v2377_v43 = vadd.f32 %v2376_v47, %v2264_v4  ;;  %2413 = vmatmul.bf16.gmra.mxu0 %v1252_v56 }
 0x1bc   : > { %2300 = vmatmul.bf16.gmra.mxu3 %v1251_v59 }
 0x1bd   : > { %2526 = vmatmul.bf16.gmra.mxu1 %v1253_v8  ;;  %v8488_v30 = vadd.f32 %v2489_v44, %v2377_v43  ;;  %v879_v8 = vsel %vm7739_vm3, %v846_v9, 0  ;;  %v980_v44 = vunpack.c.h.b16 %v788_v11 }
 0x1be   : > { %v2153_v26 = vpop.f32.mrf.mxu2 }
 0x1bf   : > { %11888 = vst [vmem:[#allocation4_spill] sm:$0xff] %v8488_v30  ;;  %v2266_v21 = vpop.f32.mrf.mxu3  ;;  %v2154_v14 = vadd.f32 %v2153_v26, %v8269_v5  ;;  %v988_v5 = vunpack.c.l.b16 %v879_v8  ;;  %v8504_v43 = vpack.c.b16 %v982_v6, %v980_v44  ;;  %v1257_v26 = vpack.c.b16 %v11890_v2, %v7358_v53  ;;  %v7531_v44 = vld [vmem:[%s7626_s10 + $0x84] sm:$0xff]   ;;  %v11893_v53 = vld [vmem:[#allocation15_spill] sm:$0xff] }
 0x1c0   : > { %v2381_v47 = vpop.f32.mrf.mxu0  ;;  %v7204_v30 = vld [vmem:[%s11644_s2 + $0x188] sm:$0xff] }
 0x1c1   : > { %v2267_v4 = vadd.f32 %v2266_v21, %v2154_v14  ;;  %v11891_v21 = vld [vmem:[#allocation18_spill] sm:$0xff]  ;;  %v1259_v11 = vpack.c.b16 %v988_v5, %v986_v36  ;;  %2580 = vmatpush.bf16.msra.mxu2 %v7204_v30 }
 0x1c2   : > { %v2494_v16 = vpop.f32.mrf.mxu1  ;;  %v1258_v9 = vpack.c.b16 %v11891_v21, %v985_v45  ;;  %v793_v45 = vrot.slane %v11893_v53, 1  ;;  %v7220_v30 = vld [vmem:[%s11644_s2 + $0x208] sm:$0xff] }
 0x1c3   : > { %v2380_v55 = vadd.f32 %v2379_v18, %v2267_v4  ;;  %2806 = vmatpush.bf16.msra.mxu0 %v7220_v30 }
 0x1c5   : > { %v8502_v59 = vadd.f32 %v2492_v28, %v2380_v55  ;;  %v792_v55 = vrot.slane %v7531_v44, 1 }
 0x1c6   : > { %v2155_v51 = vpop.f32.mrf.mxu2 }
 0x1c7   : > { %11889 = vst [vmem:[#allocation7_spill] sm:$0xff] %v8502_v59  ;;  %v2268_v56 = vpop.f32.mrf.mxu3 }
 0x1c8   : > { %v2383_v18 = vpop.f32.mrf.mxu0 }
 0x1ca   : > { %v2496_v40 = vpop.f32.mrf.mxu1 }
 0x1cb   : > { %2191 = vmatmul.bf16.gmra.mxu2 %v8504_v43  ;;  %2417 = vmatmul.bf16.gmra.mxu0 %v1258_v9 }
 0x1cc   : > { %2304 = vmatmul.bf16.gmra.mxu3 %v1257_v26 }
 0x1cd   : > { %2530 = vmatmul.bf16.gmra.mxu1 %v1259_v11  ;;  %v11894_v11 = vld [vmem:[#allocation17_spill] sm:$0xff] }
 0x1ce   : > { %v2157_v14 = vpop.f32.mrf.mxu2 }
 0x1cf   : > { %v2270_v28 = vpop.f32.mrf.mxu3  ;;  %v2158_v4 = vadd.f32 %v2157_v14, %v8290_v60  ;;  %v794_v60 = vsel %vm758_vm4, %v792_v55, %v793_v45 }
 0x1d0   : > { %v2385_v6 = vpop.f32.mrf.mxu0 }
 0x1d1   : > { %v2271_v47 = vadd.f32 %v2270_v28, %v2158_v4  ;;  %v11896_v28 = vld [vmem:[#allocation25_spill] sm:$0xff] }
 0x1d2   : > { %v2498_v16 = vpop.f32.mrf.mxu1 }
 0x1d3   : > { %v2384_v8 = vadd.f32 %v2383_v18, %v2271_v47 }
 0x1d5   : > { %v8510_v50 = vadd.f32 %v2496_v40, %v2384_v8  ;;  %v8521_v40 = vld [vmem:[%s7626_s10 + $0x90] sm:$0xff]   ;;  %v849_v8 = vsel %vm813_vm5, %v793_v45, 0 }
 0x1d6   : > { %v2159_v36 = vpop.f32.mrf.mxu2  ;;  %v795_v14 = vrot.slane %v8521_v40, 1 }
 0x1d7   : > { %11892 = vst [vmem:[#allocation13_spill] sm:$0xff] %v8510_v50  ;;  %v2272_v51 = vpop.f32.mrf.mxu3  ;;  %v2160_v56 = vadd.f32 %v2159_v36, %v8294_v57  ;;  %v796_v57 = vrot.slane %v11896_v28, 1  ;;  %v7369_v36 = vunpack.c.l.b16 %v8521_v40  ;;  %v11899_v28 = vld [vmem:[#allocation14_spill] sm:$0xff] }
 0x1d8   : > { %v2388_v26 = vpop.f32.mrf.mxu0 }
 0x1d9   : > { %v2273_v2 = vadd.f32 %v2272_v51, %v2160_v56  ;;  %v11898_v51 = vld [vmem:[#allocation28_spill] sm:$0xff] }
 0x1da   : > { %v2501_v21 = vpop.f32.mrf.mxu1  ;;  %v995_v56 = vunpack.c.l.b16 %v11898_v51 }
 0x1db   : > { %2195 = vmatmul.bf16.gmra.mxu2 %v8473_v35  ;;  %v2386_v9 = vadd.f32 %v2385_v6, %v2273_v2  ;;  %2421 = vmatmul.bf16.gmra.mxu0 %v11894_v11  ;;  %v880_v6 = vsel %vm7739_vm3, %v849_v8, 0 }
 0x1dc   : > { %2308 = vmatmul.bf16.gmra.mxu3 %v7531_v44  ;;  %v8527_v44 = vsel %vm758_vm4, %v795_v14, %v796_v57  ;;  %v994_v2 = vunpack.c.l.b16 %v880_v6  ;;  %v1267_v14 = vpack.c.b16 %v7369_v36, %v11899_v28  ;;  %v7370_v28 = vunpack.c.h.b16 %v8521_v40 }
 0x1dd   : > { %2534 = vmatmul.bf16.gmra.mxu1 %v794_v60  ;;  %v8518_v18 = vadd.f32 %v2498_v16, %v2386_v9  ;;  %11897 = vst [vmem:[#allocation3_spill] sm:$0xff] %v8527_v44  ;;  %v990_v16 = vunpack.c.l.b16 %v794_v60  ;;  %v996_v26 = vunpack.c.l.b16 %v8527_v44 }
 0x1de   : > { %v2162_v4 = vpop.f32.mrf.mxu2 }
 0x1df   : > { %11895 = vst [vmem:[#allocation16_spill] sm:$0xff] %v8518_v18  ;;  %v2275_v47 = vpop.f32.mrf.mxu3  ;;  %v8535_v11 = vpack.c.b16 %v990_v16, %v988_v5  ;;  %v11900_v4 = vld [vmem:[#allocation21_spill] sm:$0xff]  ;;  %v1269_v18 = vpack.c.b16 %v996_v26, %v994_v2  ;;  %v7212_v5 = vld [vmem:[%s11644_s2 + $0x1c8] sm:$0xff] }
 0x1e0   : > { %v2389_v55 = vpop.f32.mrf.mxu0  ;;  %v1268_v47 = vpack.c.b16 %v995_v56, %v11900_v4  ;;  %v852_v56 = vsel %vm813_vm5, %v796_v57, 0  ;;  %2693 = vmatpush.bf16.msra.mxu3 %v7212_v5  ;;  %v997_v57 = vunpack.c.h.b16 %v11898_v51  ;;  %v11903_v5 = vld [vmem:[#allocation23_spill] sm:$0xff] }
 0x1e2   : > { %v2502_v53 = vpop.f32.mrf.mxu1 }
 0x1e6   : > { %v2163_v21 = vpop.f32.mrf.mxu2 }
 0x1e7   : > { %v2276_v9 = vpop.f32.mrf.mxu3  ;;  %v2164_v45 = vadd.f32 %v2163_v21, %v8312_v62 }
 0x1e8   : > { %v2392_v50 = vpop.f32.mrf.mxu0 }
 0x1e9   : > { %v2277_v8 = vadd.f32 %v2276_v9, %v2164_v45 }
 0x1ea   : > { %v2505_v59 = vpop.f32.mrf.mxu1 }
 0x1eb   : > { %2200 = vmatmul.bf16.gmra.mxu2 %v8535_v11  ;;  %v2390_v6 = vadd.f32 %v2389_v55, %v2277_v8  ;;  %2426 = vmatmul.bf16.gmra.mxu0 %v1268_v47 }
 0x1ec   : > { %2313 = vmatmul.bf16.gmra.mxu3 %v1267_v14 }
 0x1ed   : > { %2539 = vmatmul.bf16.gmra.mxu1 %v1269_v18  ;;  %v8543_v62 = vadd.f32 %v2502_v53, %v2390_v6  ;;  %v881_v18 = vsel %vm7739_vm3, %v852_v56, 0  ;;  %v992_v53 = vunpack.c.h.b16 %v794_v60 }
 0x1ee   : > { %v2166_v16 = vpop.f32.mrf.mxu2  ;;  %v1000_v14 = vunpack.c.l.b16 %v881_v18 }
 0x1ef   : > { %11901 = vst [vmem:[#allocation10_spill] sm:$0xff] %v8543_v62  ;;  %v2279_v36 = vpop.f32.mrf.mxu3  ;;  %v2167_v26 = vadd.f32 %v2166_v16, %v8323_v46  ;;  %v998_v46 = vunpack.c.h.b16 %v8527_v44  ;;  %v8560_v6 = vpack.c.b16 %v994_v2, %v992_v53  ;;  %v1273_v16 = vpack.c.b16 %v11903_v5, %v7370_v28 }
 0x1f0   : > { %v2394_v21 = vpop.f32.mrf.mxu0 }
 0x1f1   : > { %v2280_v55 = vadd.f32 %v2279_v36, %v2167_v26  ;;  %v11904_v36 = vld [vmem:[#allocation30_spill] sm:$0xff] }
 0x1f2   : > { %v2507_v9 = vpop.f32.mrf.mxu1  ;;  %v1274_v56 = vpack.c.b16 %v11904_v36, %v997_v57  ;;  %v11906_v57 = vld [vmem:[#allocation27_spill] sm:$0xff] }
 0x1f3   : > { %v2393_v45 = vadd.f32 %v2392_v50, %v2280_v55  ;;  %v1275_v50 = vpack.c.b16 %v1000_v14, %v998_v46  ;;  %v799_v46 = vrot.slane %v11906_v57, 1 }
 0x1f5   : > { %v8558_v4 = vadd.f32 %v2505_v59, %v2393_v45  ;;  %v7533_v45 = vld [vmem:[%s7626_s10 + $0x9c] sm:$0xff]   ;;  %v855_v57 = vsel %vm813_vm5, %v799_v46, 0 }
 0x1f6   : > { %v2168_v47 = vpop.f32.mrf.mxu2  ;;  %v798_v28 = vrot.slane %v7533_v45, 1 }
 0x1f7   : > { %11902 = vst [vmem:[#allocation12_spill] sm:$0xff] %v8558_v4  ;;  %v2281_v8 = vpop.f32.mrf.mxu3 }
 0x1f8   : > { %v2396_v60 = vpop.f32.mrf.mxu0 }
 0x1fa   : > { %v2509_v26 = vpop.f32.mrf.mxu1 }
 0x1fb   : > { %2204 = vmatmul.bf16.gmra.mxu2 %v8560_v6  ;;  %2430 = vmatmul.bf16.gmra.mxu0 %v1274_v56 }
 0x1fc   : > { %2317 = vmatmul.bf16.gmra.mxu3 %v1273_v16 }
 0x1fd   : > { %2543 = vmatmul.bf16.gmra.mxu1 %v1275_v50 }
 0x1fe   : > { %v2170_v55 = vpop.f32.mrf.mxu2 }
 0x1ff   : > { %v2283_v59 = vpop.f32.mrf.mxu3  ;;  %v2171_v21 = vadd.f32 %v2170_v55, %v8347_v7  ;;  %v800_v7 = vsel %vm758_vm4, %v798_v28, %v799_v46  ;;  %v8577_v55 = vld [vmem:[%s7626_s10 + $0xa8] sm:$0xff]  }
 0x200   : > { %v2398_v2 = vpop.f32.mrf.mxu0 }
 0x201   : > { %v2284_v9 = vadd.f32 %v2283_v59, %v2171_v21  ;;  %v801_v59 = vrot.slane %v8577_v55, 1  ;;  %v11909_v21 = vld [vmem:[#allocation37_spill] sm:$0xff] }
 0x202   : > { %v2511_v18 = vpop.f32.mrf.mxu1 }
 0x203   : > { %v2397_v30 = vadd.f32 %v2396_v60, %v2284_v9  ;;  %v11907_v60 = vld [vmem:[#allocation29_spill] sm:$0xff] }
 0x205   : > { %v8566_v53 = vadd.f32 %v2509_v26, %v2397_v30 }
 0x206   : > { %v2172_v47 = vpop.f32.mrf.mxu2 }
 0x207   : > { %11905 = vst [vmem:[#allocation18_spill] sm:$0xff] %v8566_v53  ;;  %v2285_v8 = vpop.f32.mrf.mxu3  ;;  %v2173_v5 = vadd.f32 %v2172_v47, %v8352_v32  ;;  %v802_v32 = vrot.slane %v11909_v21, 1 }
 0x208   : > { %v2401_v36 = vpop.f32.mrf.mxu0 }
 0x209   : > { %v2286_v16 = vadd.f32 %v2285_v8, %v2173_v5  ;;  %v7381_v8 = vunpack.c.l.b16 %v8577_v55  ;;  %v11911_v5 = vld [vmem:[#allocation42_spill] sm:$0xff] }
 0x20a   : > { %v2514_v56 = vpop.f32.mrf.mxu1 }
 0x20b   : > { %2208 = vmatmul.bf16.gmra.mxu2 %v8527_v44  ;;  %v2399_v50 = vadd.f32 %v2398_v2, %v2286_v16  ;;  %2434 = vmatmul.bf16.gmra.mxu0 %v11907_v60  ;;  %v882_v2 = vsel %vm7739_vm3, %v855_v57, 0  ;;  %v1007_v16 = vunpack.c.l.b16 %v11911_v5  ;;  %v7203_v44 = vld [vmem:[%s11644_s2 + $0x180] sm:$0xff] }
 0x20c   : > { %2321 = vmatmul.bf16.gmra.mxu3 %v7533_v45  ;;  %v8583_v45 = vsel %vm758_vm4, %v801_v59, %v802_v32  ;;  %v1006_v36 = vunpack.c.l.b16 %v882_v2  ;;  %2581 = vmatpush.bf16.msra.mxu2 %v7203_v44  ;;  %v7219_v44 = vld [vmem:[%s11644_s2 + $0x200] sm:$0xff] }
 0x20d   : > { %2547 = vmatmul.bf16.gmra.mxu1 %v800_v7  ;;  %v8574_v26 = vadd.f32 %v2511_v18, %v2399_v50  ;;  %11910 = vst [vmem:[#allocation17_spill] sm:$0xff] %v8583_v45  ;;  %v1002_v18 = vunpack.c.l.b16 %v800_v7  ;;  %v1008_v56 = vunpack.c.l.b16 %v8583_v45  ;;  %2807 = vmatpush.bf16.msra.mxu0 %v7219_v44 }
 0x20e   : > { %v2175_v9 = vpop.f32.mrf.mxu2 }
 0x20f   : > { %11908 = vst [vmem:[#allocation15_spill] sm:$0xff] %v8574_v26  ;;  %v2288_v30 = vpop.f32.mrf.mxu3  ;;  %v8591_v21 = vpack.c.b16 %v1002_v18, %v1000_v14  ;;  %v11912_v9 = vld [vmem:[#allocation26_spill] sm:$0xff]  ;;  %v1285_v53 = vpack.c.b16 %v1008_v56, %v1006_v36  ;;  %v7211_v14 = vld [vmem:[%s11644_s2 + $0x1c0] sm:$0xff] }
 0x210   : > { %v2402_v28 = vpop.f32.mrf.mxu0  ;;  %v1283_v59 = vpack.c.b16 %v7381_v8, %v11912_v9  ;;  %v11913_v30 = vld [vmem:[#allocation33_spill] sm:$0xff]  ;;  %2694 = vmatpush.bf16.msra.mxu3 %v7211_v14  ;;  %v11916_v14 = vld [vmem:[#allocation34_spill] sm:$0xff] }
 0x211   : > { %v1284_v26 = vpack.c.b16 %v1007_v16, %v11913_v30  ;;  %v858_v16 = vsel %vm813_vm5, %v802_v32, 0  ;;  %v1009_v32 = vunpack.c.h.b16 %v11911_v5 }
 0x212   : > { %v2515_v47 = vpop.f32.mrf.mxu1 }
 0x216   : > { %v2176_v50 = vpop.f32.mrf.mxu2 }
 0x217   : > { %v2289_v60 = vpop.f32.mrf.mxu3  ;;  %v2177_v46 = vadd.f32 %v2176_v50, %v8370_v25 }
 0x218   : > { %v2405_v4 = vpop.f32.mrf.mxu0 }
 0x219   : > { %v2290_v57 = vadd.f32 %v2289_v60, %v2177_v46  ;;  %v7382_v46 = vunpack.c.h.b16 %v8577_v55 }
 0x21a   : > { %v2518_v62 = vpop.f32.mrf.mxu1 }
 0x21b   : > { %2213 = vmatmul.bf16.gmra.mxu2 %v8591_v21  ;;  %v2403_v2 = vadd.f32 %v2402_v28, %v2290_v57  ;;  %2439 = vmatmul.bf16.gmra.mxu0 %v1284_v26  ;;  %v1004_v26 = vunpack.c.h.b16 %v800_v7 }
 0x21c   : > { %2326 = vmatmul.bf16.gmra.mxu3 %v1283_v59 }
 0x21d   : > { %2552 = vmatmul.bf16.gmra.mxu1 %v1285_v53  ;;  %v8599_v25 = vadd.f32 %v2515_v47, %v2403_v2  ;;  %v883_v53 = vsel %vm7739_vm3, %v858_v16, 0  ;;  %v8618_v2 = vpack.c.b16 %v1006_v36, %v1004_v26  ;;  %v8634_v26 = vld [vmem:[%s7626_s10 + $0xc0] sm:$0xff]  }
 0x21e   : > { %v2179_v18 = vpop.f32.mrf.mxu2  ;;  %v8614_v9 = vunpack.c.l.b16 %v883_v53 }
 0x21f   : > { %11914 = vst [vmem:[#allocation25_spill] sm:$0xff] %v8599_v25  ;;  %v2292_v8 = vpop.f32.mrf.mxu3  ;;  %v2180_v56 = vadd.f32 %v2179_v18, %v8381_v58  ;;  %v1010_v58 = vunpack.c.h.b16 %v8583_v45  ;;  %v1289_v18 = vpack.c.b16 %v11916_v14, %v7382_v46  ;;  %v692_v14 = vshll.u32 %v8634_v26, 16 }
 0x220   : > { %v2407_v50 = vpop.f32.mrf.mxu0 }
 0x221   : > { %v2293_v28 = vadd.f32 %v2292_v8, %v2180_v56  ;;  %v1291_v7 = vpack.c.b16 %v8614_v9, %v1010_v58  ;;  %v7535_v58 = vld [vmem:[%s7626_s10 + $0xb4] sm:$0xff]  }
 0x222   : > { %v2520_v60 = vpop.f32.mrf.mxu1 }
 0x223   : > { %v2406_v47 = vadd.f32 %v2405_v4, %v2293_v28  ;;  %v1290_v4 = vpack.c.b16 %v8168_v10, %v1009_v32  ;;  %v11918_v28 = vld [vmem:[#allocation38_spill] sm:$0xff] }
 0x225   : > { %v8616_v59 = vadd.f32 %v2518_v62, %v2406_v47  ;;  %v8625_v62 = vld [vmem:[%s7626_s10 + $0xc8] sm:$0xff]  }
 0x226   : > { %v2181_v30 = vpop.f32.mrf.mxu2  ;;  %11917 = vst [vmem:[#allocation14_spill] sm:$0xff] %v8625_v62  ;;  %v8629_v60 = vunpack.c.l.b16 %v8625_v62 }
 0x227   : > { %11915 = vst [vmem:[#allocation28_spill] sm:$0xff] %v8616_v59  ;;  %v2294_v57 = vpop.f32.mrf.mxu3  ;;  %v804_v30 = vrot.slane %v7535_v58, 1 }
 0x228   : > { %v2409_v8 = vpop.f32.mrf.mxu0  ;;  %v445_v46 = vpack.c.b16 %v8629_v60, %v8629_v60  ;;  %v805_v57 = vrot.slane %v8118_v48, 1 }
 0x22a   : > { %v2522_v16 = vpop.f32.mrf.mxu1 }
 0x22b   : > { %2217 = vmatmul.bf16.gmra.mxu2 %v8618_v2  ;;  %2443 = vmatmul.bf16.gmra.mxu0 %v1290_v4 }
 0x22c   : > { %2330 = vmatmul.bf16.gmra.mxu3 %v1289_v18 }
 0x22d   : > { %2556 = vmatmul.bf16.gmra.mxu1 %v1291_v7  ;;  %v11921_v7 = vld [vmem:[#allocation41_spill] sm:$0xff] }
 0x22e   : > { %v2183_v56 = vpop.f32.mrf.mxu2 }
 0x22f   : > { %v2296_v36 = vpop.f32.mrf.mxu3  ;;  %v2184_v50 = vadd.f32 %v2183_v56, %v11918_v28 }
 0x230   : > { %v2411_v53 = vpop.f32.mrf.mxu0 }
 0x231   : > { %v2297_v10 = vadd.f32 %v2296_v36, %v2184_v50  ;;  %v690_v36 = vshrl.u32 %v8634_v26, 16 }
 0x232   : > { %v8631_v44 = vpop.f32.mrf.mxu1 }
 0x233   : > { %11919 = vst [vmem:[#allocation21_spill] sm:$0xff] %v8631_v44  ;;  %v2410_v47 = vadd.f32 %v2409_v8, %v2297_v10  ;;  %v806_v10 = vsel %vm758_vm4, %v804_v30, %v805_v57  ;;  %v694_v44 = vrot.slane %v692_v14, 1 }
 0x235   : > { %v8638_v32 = vadd.f32 %v2522_v16, %v2410_v47  ;;  %v697_v16 = vshll.u32 %v445_v46, 16  ;;  %v695_v48 = vor.u32 %v694_v44, %v690_v36  ;;  %v1014_v44 = vunpack.c.l.b16 %v806_v10 }
 0x236   : > { %v2185_v18 = vpop.f32.mrf.mxu2 }
 0x237   : > { %11920 = vst [vmem:[#allocation23_spill] sm:$0xff] %v8638_v32  ;;  %v2298_v4 = vpop.f32.mrf.mxu3  ;;  %v2186_v56 = vadd.f32 %v2185_v18, %v11921_v7  ;;  %v699_v62 = vrot.slane %v697_v16, 1  ;;  %v807_v18 = vrot.slane %v8634_v26, 1  ;;  %v808_v7 = vrot.slane %v445_v46, 1 }
 0x238   : > { %v2414_v50 = vpop.f32.mrf.mxu0 }
 0x239   : > { %v2299_v28 = vadd.f32 %v2298_v4, %v2186_v56  ;;  %v861_v50 = vsel %vm813_vm5, %v805_v57, 0 }
 0x23a   : > { %v2527_v8 = vpop.f32.mrf.mxu1 }
 0x23b   : > { %2221 = vmatmul.bf16.gmra.mxu2 %v8583_v45  ;;  %v8647_v47 = vadd.f32 %v2411_v53, %v2299_v28  ;;  %2447 = vmatmul.bf16.gmra.mxu0 %v8154_v3  ;;  %v8655_v8 = vsel %vm448_vm0, %v695_v48, %v699_v62  ;;  %v8658_v53 = vsel %vm758_vm4, %v807_v18, %v808_v7  ;;  %v884_v3 = vsel %vm7739_vm3, %v861_v50, 0  ;;  %v11924_v18 = vld [vmem:[#allocation39_spill] sm:$0xff] }
 0x23c   : > { %2334 = vmatmul.bf16.gmra.mxu3 %v7535_v58  ;;  %v7393_v58 = vunpack.c.l.b16 %v8634_v26  ;;  %v1019_v36 = vunpack.c.l.b16 %v8655_v8  ;;  %v1018_v28 = vunpack.c.l.b16 %v884_v3  ;;  %v1020_v57 = vunpack.c.l.b16 %v8658_v53 }
 0x23d   : > { %11922 = vst [vmem:[#allocation30_spill] sm:$0xff] %v8647_v47  ;;  %2560 = vmatmul.bf16.gmra.mxu1 %v806_v10  ;;  %v8667_v48 = vpack.c.b16 %v1014_v44, %v8614_v9  ;;  %v701_v45 = vshrl.u32 %v445_v46, 16  ;;  %v864_v44 = vsel %vm813_vm5, %v808_v7, 0  ;;  %v1022_v7 = vunpack.c.h.b16 %v8658_v53 }
 0x23e   : > { %v2188_v4 = vpop.f32.mrf.mxu2  ;;  %v1300_v47 = vpack.c.b16 %v1019_v36, %v8218_v38  ;;  %v1301_v50 = vpack.c.b16 %v1020_v57, %v1018_v28 }
 0x23f   : > { %v2301_v56 = vpop.f32.mrf.mxu3 }
 0x240   : > { %v2415_v30 = vpop.f32.mrf.mxu0 }
 0x242   : > { %v8652_v14 = vpop.f32.mrf.mxu1 }
 0x243   : > { %11923 = vst [vmem:[#allocation27_spill] sm:$0xff] %v8652_v14  ;;  %v1299_v14 = vpack.c.b16 %v7393_v58, %v11924_v18  ;;  %v11925_v58 = vld [vmem:[#allocation45_spill] sm:$0xff] }
 0x244   : > { %v11971_v0 = vld [vmem:[#allocation30_spill] sm:$0xff] }
 0x246   : > { %v2189_v16 = vpop.f32.mrf.mxu2 }
 0x247   : > { %v2302_v4 = vpop.f32.mrf.mxu3  ;;  %v2190_v56 = vadd.f32 %v2189_v16, %v8177_v52  ;;  %v703_v52 = vor.u32 %v701_v45, %v699_v62  ;;  %v1021_v45 = vunpack.c.h.b16 %v8655_v8 }
 0x248   : > { %v2418_v59 = vpop.f32.mrf.mxu0 }
 0x249   : > { %v2303_v32 = vadd.f32 %v2302_v4, %v2190_v56  ;;  %v756_v46 = vsel %vm7739_vm3, %v703_v52, 0 }
 0x24a   : > { %v2531_v25 = vpop.f32.mrf.mxu1  ;;  %v8682_v62 = vunpack.c.l.b16 %v756_v46 }
 0x24b   : > { %2226 = vmatmul.bf16.gmra.mxu2 %v8667_v48  ;;  %v8672_v3 = vadd.f32 %v2415_v30, %v2303_v32  ;;  %2452 = vmatmul.bf16.gmra.mxu0 %v1300_v47  ;;  %v1016_v32 = vunpack.c.h.b16 %v806_v10  ;;  %v7394_v47 = vunpack.c.h.b16 %v8634_v26 }
 0x24c   : > { %2339 = vmatmul.bf16.gmra.mxu3 %v1299_v14  ;;  %v885_v14 = vsel %vm7739_vm3, %v864_v44, 0 }
 0x24d   : > { %2565 = vmatmul.bf16.gmra.mxu1 %v1301_v50  ;;  %v8685_v4 = vunpack.c.l.b16 %v885_v14  ;;  %v8689_v52 = vpack.c.b16 %v1018_v28, %v1016_v32 }
 0x24e   : > { %v2192_v16 = vpop.f32.mrf.mxu2 }
 0x24f   : > { %v2305_v9 = vpop.f32.mrf.mxu3  ;;  %v2193_v18 = vadd.f32 %v2192_v16, %v11925_v58  ;;  %v1307_v10 = vpack.c.b16 %v8685_v4, %v1022_v7 }
 0x250   : > { %v2420_v36 = vpop.f32.mrf.mxu0 }
 0x251   : > { %v2306_v38 = vadd.f32 %v2305_v9, %v2193_v18  ;;  %v1305_v9 = vpack.c.b16 %v8629_v60, %v7394_v47  ;;  %v11927_v47 = vld [vmem:[#allocation49_spill] sm:$0xff] }
 0x252   : > { %v2533_v57 = vpop.f32.mrf.mxu1 }
 0x253   : > { %v2419_v30 = vadd.f32 %v2418_v59, %v2306_v38  ;;  %v1306_v59 = vpack.c.b16 %v8682_v62, %v1021_v45  ;;  %v11926_v38 = vld [vmem:[#allocation48_spill] sm:$0xff] }
 0x255   : > { %v8687_v56 = vadd.f32 %v2531_v25, %v2419_v30 }
 0x256   : > { %v2194_v50 = vpop.f32.mrf.mxu2 }
 0x257   : > { %v2307_v16 = vpop.f32.mrf.mxu3 }
 0x258   : > { %v2422_v44 = vpop.f32.mrf.mxu0 }
 0x25a   : > { %v2535_v58 = vpop.f32.mrf.mxu1 }
 0x25b   : > { %2230 = vmatmul.bf16.gmra.mxu2 %v8689_v52  ;;  %2456 = vmatmul.bf16.gmra.mxu0 %v1306_v59 }
 0x25c   : > { %2343 = vmatmul.bf16.gmra.mxu3 %v1305_v9  ;;  %v7536_v9 = vld [vmem:[%s7626_s10 + $0x18] sm:$0xff]  }
 0x25d   : > { %2569 = vmatmul.bf16.gmra.mxu1 %v1307_v10 }
 0x25e   : > { %v2196_v25 = vpop.f32.mrf.mxu2 }
 0x25f   : > { %v2309_v18 = vpop.f32.mrf.mxu3  ;;  %v2197_v36 = vadd.f32 %v2196_v25, %v11926_v38 }
 0x260   : > { %v2424_v57 = vpop.f32.mrf.mxu0 }
 0x261   : > { %v2310_v28 = vadd.f32 %v2309_v18, %v2197_v36 }
 0x262   : > { %v8696_v46 = vpop.f32.mrf.mxu1 }
 0x263   : > { %v2423_v60 = vadd.f32 %v2422_v44, %v2310_v28 }
 0x265   : > { %v8698_v14 = vadd.f32 %v2535_v58, %v2423_v60 }
 0x266   : > { %v2198_v32 = vpop.f32.mrf.mxu2 }
 0x267   : > { %v2311_v30 = vpop.f32.mrf.mxu3  ;;  %v2199_v45 = vadd.f32 %v2198_v32, %v11927_v47  ;;  %v11928_v47 = vld [vmem:[#allocation20_spill] sm:$0xff] }
 0x268   : > { %v2427_v50 = vpop.f32.mrf.mxu0 }
 0x269   : > { %v2312_v7 = vadd.f32 %v2311_v30, %v2199_v45  ;;  %v7537_v30 = vld [vmem:[%s7626_s10 + $0x20] sm:$0xff]  }
 0x26a   : > { %v2540_v16 = vpop.f32.mrf.mxu1 }
 0x26b   : > { %2582 = vmatmul.bf16.vlgmr.msra.gmra.mxu2 %v7536_v9  ;;  %v8703_v59 = vadd.f32 %v2424_v57, %v2312_v7  ;;  %2808 = vmatmul.bf16.vlgmr.msra.gmra.mxu0 %v8256_v34 }
 0x26c   : > { %2695 = vmatmul.bf16.vlgmr.msra.gmra.mxu3 %v7857_v19 }
 0x26e   : > { %v2201_v10 = vpop.f32.mrf.mxu2 }
 0x26f   : > { %v2314_v44 = vpop.f32.mrf.mxu3 }
 0x270   : > { %v2428_v58 = vpop.f32.mrf.mxu0 }
 0x272   : > { %v8706_v25 = vpop.f32.mrf.mxu1 }
 0x276   : > { %v2202_v18 = vpop.f32.mrf.mxu2 }
 0x277   : > { %v2315_v38 = vpop.f32.mrf.mxu3  ;;  %v2203_v36 = vadd.f32 %v2202_v18, %v8265_v31 }
 0x278   : > { %v2431_v60 = vpop.f32.mrf.mxu0 }
 0x279   : > { %v2316_v28 = vadd.f32 %v2315_v38, %v2203_v36  ;;  %v7538_v36 = vld [vmem:[%s7626_s10 + $0x28] sm:$0xff]  }
 0x27a   : > { %v2544_v32 = vpop.f32.mrf.mxu1 }
 0x27b   : > { %2587 = vmatmul.bf16.gmra.mxu2 %v7537_v30  ;;  %v8711_v19 = vadd.f32 %v2428_v58, %v2316_v28  ;;  %2813 = vmatmul.bf16.gmra.mxu0 %v8319_v24  ;;  %v11929_v58 = vld [vmem:[#allocation24_spill] sm:$0xff] }
 0x27c   : > { %2700 = vmatmul.bf16.gmra.mxu3 %v11928_v47 }
 0x27e   : > { %v2205_v34 = vpop.f32.mrf.mxu2 }
 0x27f   : > { %v2318_v57 = vpop.f32.mrf.mxu3  ;;  %v2206_v45 = vadd.f32 %v2205_v34, %v8278_v15 }
 0x280   : > { %v2433_v50 = vpop.f32.mrf.mxu0 }
 0x281   : > { %v2319_v7 = vadd.f32 %v2318_v57, %v2206_v45 }
 0x282   : > { %v2546_v16 = vpop.f32.mrf.mxu1 }
 0x283   : > { %v2432_v31 = vadd.f32 %v2431_v60, %v2319_v7 }
 0x285   : > { %v8715_v9 = vadd.f32 %v2544_v32, %v2432_v31 }
 0x286   : > { %v2207_v10 = vpop.f32.mrf.mxu2 }
 0x287   : > { %v2320_v44 = vpop.f32.mrf.mxu3 }
 0x288   : > { %v2435_v18 = vpop.f32.mrf.mxu0 }
 0x28a   : > { %v2548_v38 = vpop.f32.mrf.mxu1 }
 0x28b   : > { %2591 = vmatmul.bf16.gmra.mxu2 %v7538_v36  ;;  %2817 = vmatmul.bf16.gmra.mxu0 %v8343_v63  ;;  %v7539_v63 = vld [vmem:[%s7626_s10 + $0x30] sm:$0xff]  }
 0x28c   : > { %2704 = vmatmul.bf16.gmra.mxu3 %v11929_v58 }
 0x28e   : > { %v2209_v24 = vpop.f32.mrf.mxu2 }
 0x28f   : > { %v2322_v28 = vpop.f32.mrf.mxu3  ;;  %v2210_v15 = vadd.f32 %v2209_v24, %v8292_v49 }
 0x290   : > { %v2437_v47 = vpop.f32.mrf.mxu0 }
 0x291   : > { %v2323_v30 = vadd.f32 %v2322_v28, %v2210_v15 }
 0x292   : > { %v8721_v60 = vpop.f32.mrf.mxu1 }
 0x293   : > { %v2436_v32 = vadd.f32 %v2435_v18, %v2323_v30  ;;  %v7540_v30 = vld [vmem:[%s7626_s10 + $0x38] sm:$0xff]  }
 0x295   : > { %v8723_v34 = vadd.f32 %v2548_v38, %v2436_v32  ;;  %v11930_v32 = vld [vmem:[#allocation32_spill] sm:$0xff] }
 0x296   : > { %v2211_v57 = vpop.f32.mrf.mxu2 }
 0x297   : > { %v2324_v45 = vpop.f32.mrf.mxu3  ;;  %v2212_v7 = vadd.f32 %v2211_v57, %v8298_v20 }
 0x298   : > { %v2440_v16 = vpop.f32.mrf.mxu0 }
 0x299   : > { %v2325_v50 = vadd.f32 %v2324_v45, %v2212_v7 }
 0x29a   : > { %v2553_v31 = vpop.f32.mrf.mxu1 }
 0x29b   : > { %2595 = vmatmul.bf16.gmra.mxu2 %v7539_v63  ;;  %v8728_v49 = vadd.f32 %v2437_v47, %v2325_v50  ;;  %2821 = vmatmul.bf16.gmra.mxu0 %v8308_v61 }
 0x29c   : > { %2708 = vmatmul.bf16.gmra.mxu3 %v7990_v1 }
 0x29e   : > { %v2214_v10 = vpop.f32.mrf.mxu2 }
 0x29f   : > { %v2327_v44 = vpop.f32.mrf.mxu3 }
 0x2a0   : > { %v2441_v18 = vpop.f32.mrf.mxu0 }
 0x2a2   : > { %v8731_v38 = vpop.f32.mrf.mxu1 }
 0x2a6   : > { %v2215_v36 = vpop.f32.mrf.mxu2 }
 0x2a7   : > { %v2328_v58 = vpop.f32.mrf.mxu3  ;;  %v2216_v20 = vadd.f32 %v2215_v36, %v8317_v17  ;;  %v7541_v36 = vld [vmem:[%s7626_s10 + $0x40] sm:$0xff]  }
 0x2a8   : > { %v2444_v28 = vpop.f32.mrf.mxu0 }
 0x2a9   : > { %v2329_v24 = vadd.f32 %v2328_v58, %v2216_v20 }
 0x2aa   : > { %v2557_v15 = vpop.f32.mrf.mxu1 }
 0x2ab   : > { %2600 = vmatmul.bf16.gmra.mxu2 %v7540_v30  ;;  %v8736_v1 = vadd.f32 %v2441_v18, %v2329_v24  ;;  %2826 = vmatmul.bf16.gmra.mxu0 %v8377_v37  ;;  %v11931_v18 = vld [vmem:[#allocation36_spill] sm:$0xff] }
 0x2ac   : > { %2713 = vmatmul.bf16.gmra.mxu3 %v11930_v32 }
 0x2ae   : > { %v2218_v61 = vpop.f32.mrf.mxu2 }
 0x2af   : > { %v2331_v47 = vpop.f32.mrf.mxu3  ;;  %v2219_v57 = vadd.f32 %v2218_v61, %v8333_v22  ;;  %v11932_v22 = vld [vmem:[#allocation50_spill] sm:$0xff] }
 0x2b0   : > { %v2446_v7 = vpop.f32.mrf.mxu0 }
 0x2b1   : > { %v2332_v45 = vadd.f32 %v2331_v47, %v2219_v57  ;;  %v11933_v57 = vld [vmem:[#allocation51_spill] sm:$0xff] }
 0x2b2   : > { %v2559_v50 = vpop.f32.mrf.mxu1 }
 0x2b3   : > { %v2445_v17 = vadd.f32 %v2444_v28, %v2332_v45 }
 0x2b5   : > { %v8740_v16 = vadd.f32 %v2557_v15, %v2445_v17 }
 0x2b6   : > { %v2220_v31 = vpop.f32.mrf.mxu2 }
 0x2b7   : > { %v2333_v63 = vpop.f32.mrf.mxu3 }
 0x2b8   : > { %v2448_v10 = vpop.f32.mrf.mxu0 }
 0x2ba   : > { %v2561_v44 = vpop.f32.mrf.mxu1 }
 0x2bb   : > { %2604 = vmatmul.bf16.gmra.mxu2 %v7541_v36  ;;  %2830 = vmatmul.bf16.gmra.mxu0 %v8401_v27  ;;  %v7542_v27 = vld [vmem:[%s7626_s10 + $0x48] sm:$0xff]  }
 0x2bc   : > { %2717 = vmatmul.bf16.gmra.mxu3 %v11931_v18 }
 0x2be   : > { %v2222_v37 = vpop.f32.mrf.mxu2 }
 0x2bf   : > { %v2335_v58 = vpop.f32.mrf.mxu3  ;;  %v2223_v20 = vadd.f32 %v2222_v37, %v11932_v22 }
 0x2c0   : > { %v2450_v30 = vpop.f32.mrf.mxu0 }
 0x2c1   : > { %v2336_v24 = vadd.f32 %v2335_v58, %v2223_v20 }
 0x2c2   : > { %v8746_v28 = vpop.f32.mrf.mxu1 }
 0x2c3   : > { %v2449_v15 = vadd.f32 %v2448_v10, %v2336_v24 }
 0x2c5   : > { %v8748_v32 = vadd.f32 %v2561_v44, %v2449_v15  ;;  %v7543_v15 = vld [vmem:[%s7626_s10 + $0x50] sm:$0xff]  }
 0x2c6   : > { %v2224_v61 = vpop.f32.mrf.mxu2 }
 0x2c7   : > { %v2337_v47 = vpop.f32.mrf.mxu3  ;;  %v2225_v45 = vadd.f32 %v2224_v61, %v11933_v57 }
 0x2c8   : > { %v2453_v50 = vpop.f32.mrf.mxu0 }
 0x2c9   : > { %v2338_v7 = vadd.f32 %v2337_v47, %v2225_v45  ;;  %v11937_v47 = vld [vmem:[#allocation52_spill] sm:$0xff] }
 0x2ca   : > { %v2566_v17 = vpop.f32.mrf.mxu1 }
 0x2cb   : > { %2608 = vmatmul.bf16.gmra.mxu2 %v7542_v27  ;;  %v8753_v31 = vadd.f32 %v2450_v30, %v2338_v7  ;;  %2834 = vmatmul.bf16.gmra.mxu0 %v8366_v23 }
 0x2cc   : > { %2721 = vmatmul.bf16.gmra.mxu3 %v8134_v33  ;;  %v11935_v33 = vld [vmem:[#allocation44_spill] sm:$0xff] }
 0x2ce   : > { %v2227_v63 = vpop.f32.mrf.mxu2 }
 0x2cf   : > { %v2340_v10 = vpop.f32.mrf.mxu3 }
 0x2d0   : > { %v2454_v44 = vpop.f32.mrf.mxu0 }
 0x2d2   : > { %v8756_v36 = vpop.f32.mrf.mxu1 }
 0x2d3   : > { %11934 = vst [vmem:[#allocation29_spill] sm:$0xff] %v8756_v36 }
 0x2d6   : > { %v2228_v18 = vpop.f32.mrf.mxu2 }
 0x2d7   : > { %v2341_v37 = vpop.f32.mrf.mxu3  ;;  %v2229_v58 = vadd.f32 %v2228_v18, %v8375_v39  ;;  %v7544_v18 = vld [vmem:[%s7626_s10 + $0x58] sm:$0xff]  }
 0x2d8   : > { %v2457_v20 = vpop.f32.mrf.mxu0 }
 0x2d9   : > { %v2342_v22 = vadd.f32 %v2341_v37, %v2229_v58  ;;  %v11940_v58 = vld [vmem:[#allocation53_spill] sm:$0xff] }
 0x2da   : > { %v2570_v24 = vpop.f32.mrf.mxu1 }
 0x2db   : > { %2613 = vmatmul.bf16.gmra.mxu2 %v7543_v15  ;;  %v8761_v30 = vadd.f32 %v2454_v44, %v2342_v22  ;;  %2839 = vmatmul.bf16.gmra.mxu0 %v8429_v12  ;;  %v11939_v44 = vld [vmem:[#allocation47_spill] sm:$0xff] }
 0x2dc   : > { %2726 = vmatmul.bf16.gmra.mxu3 %v11935_v33 }
 0x2dd   : > { %11936 = vst [vmem:[#allocation37_spill] sm:$0xff] %v8761_v30 }
 0x2de   : > { %v2231_v23 = vpop.f32.mrf.mxu2 }
 0x2df   : > { %v2344_v61 = vpop.f32.mrf.mxu3  ;;  %v2232_v57 = vadd.f32 %v2231_v23, %v11937_v47 }
 0x2e0   : > { %v2459_v7 = vpop.f32.mrf.mxu0 }
 0x2e1   : > { %v2345_v45 = vadd.f32 %v2344_v61, %v2232_v57  ;;  %v11941_v61 = vld [vmem:[#allocation54_spill] sm:$0xff] }
 0x2e2   : > { %v2572_v50 = vpop.f32.mrf.mxu1 }
 0x2e3   : > { %v2458_v39 = vadd.f32 %v2457_v20, %v2345_v45  ;;  %v7545_v50 = vld [vmem:[%s7626_s10 + $0x60] sm:$0xff]  }
 0x2e5   : > { %v8765_v17 = vadd.f32 %v2570_v24, %v2458_v39 }
 0x2e6   : > { %v2233_v27 = vpop.f32.mrf.mxu2 }
 0x2e7   : > { %11938 = vst [vmem:[#allocation42_spill] sm:$0xff] %v8765_v17  ;;  %v2346_v63 = vpop.f32.mrf.mxu3 }
 0x2e8   : > { %v2809_v10 = vpop.f32.mrf.mxu0 }
 0x2eb   : > { %2617 = vmatmul.bf16.gmra.mxu2 %v7544_v18  ;;  %2843 = vmatmul.bf16.gmra.mxu0 %v8453_v42  ;;  %v11942_v18 = vld [vmem:[#allocation5_spill] sm:$0xff] }
 0x2ec   : > { %2730 = vmatmul.bf16.gmra.mxu3 %v11939_v44 }
 0x2ee   : > { %v2583_v12 = vpop.f32.mrf.mxu2 }
 0x2ef   : > { %v2696_v37 = vpop.f32.mrf.mxu3  ;;  %v2584_v22 = vadd.f32 %v2583_v12, %v11940_v58 }
 0x2f0   : > { %v2811_v33 = vpop.f32.mrf.mxu0 }
 0x2f1   : > { %v2697_v15 = vadd.f32 %v2696_v37, %v2584_v22  ;;  %v7546_v22 = vld [vmem:[%s7626_s10 + $0x68] sm:$0xff]  }
 0x2f3   : > { %v8771_v23 = vadd.f32 %v2809_v10, %v2697_v15  ;;  %v11943_v15 = vld [vmem:[#allocation9_spill] sm:$0xff] }
 0x2f6   : > { %v2585_v20 = vpop.f32.mrf.mxu2 }
 0x2f7   : > { %v2698_v24 = vpop.f32.mrf.mxu3  ;;  %v2586_v47 = vadd.f32 %v2585_v20, %v11941_v61 }
 0x2f8   : > { %v2814_v45 = vpop.f32.mrf.mxu0 }
 0x2f9   : > { %v2699_v57 = vadd.f32 %v2698_v24, %v2586_v47 }
 0x2fb   : > { %v8774_v7 = vadd.f32 %v2811_v33, %v2699_v57  ;;  %2621 = vmatmul.bf16.gmra.mxu2 %v7545_v50  ;;  %2847 = vmatmul.bf16.gmra.mxu0 %v8422_v54  ;;  %v11944_v33 = vld [vmem:[#allocation40_spill] sm:$0xff] }
 0x2fc   : > { %2734 = vmatmul.bf16.gmra.mxu3 %v11874_v41 }
 0x2fe   : > { %v2588_v42 = vpop.f32.mrf.mxu2 }
 0x2ff   : > { %v2701_v39 = vpop.f32.mrf.mxu3  ;;  %v7547_v42 = vld [vmem:[%s7626_s10 + $0x70] sm:$0xff]  }
 0x300   : > { %v2815_v27 = vpop.f32.mrf.mxu0  ;;  %v11945_v39 = vld [vmem:[#allocation11_spill] sm:$0xff] }
 0x306   : > { %v2589_v63 = vpop.f32.mrf.mxu2 }
 0x307   : > { %v2702_v10 = vpop.f32.mrf.mxu3  ;;  %v2590_v44 = vadd.f32 %v2589_v63, %v11942_v18  ;;  %v11946_v63 = vld [vmem:[#allocation2_spill] sm:$0xff] }
 0x308   : > { %v2818_v37 = vpop.f32.mrf.mxu0 }
 0x309   : > { %v2703_v12 = vadd.f32 %v2702_v10, %v2590_v44 }
 0x30b   : > { %v8780_v58 = vadd.f32 %v2815_v27, %v2703_v12  ;;  %2626 = vmatmul.bf16.gmra.mxu2 %v7546_v22  ;;  %2852 = vmatmul.bf16.gmra.mxu0 %v8480_v13 }
 0x30c   : > { %2739 = vmatmul.bf16.gmra.mxu3 %v11943_v15  ;;  %v11947_v15 = vld [vmem:[#allocation8_spill] sm:$0xff] }
 0x30e   : > { %v2592_v41 = vpop.f32.mrf.mxu2 }
 0x30f   : > { %v2705_v54 = vpop.f32.mrf.mxu3  ;;  %v2593_v20 = vadd.f32 %v2592_v41, %v11944_v33 }
 0x310   : > { %v2820_v61 = vpop.f32.mrf.mxu0 }
 0x311   : > { %v2706_v24 = vadd.f32 %v2705_v54, %v2593_v20 }
 0x313   : > { %v8786_v47 = vadd.f32 %v2818_v37, %v2706_v24  ;;  %v7548_v24 = vld [vmem:[%s7626_s10 + $0x78] sm:$0xff]  }
 0x316   : > { %v2594_v57 = vpop.f32.mrf.mxu2 }
 0x317   : > { %v2707_v45 = vpop.f32.mrf.mxu3 }
 0x318   : > { %v2822_v50 = vpop.f32.mrf.mxu0 }
 0x31b   : > { %2630 = vmatmul.bf16.gmra.mxu2 %v7547_v42  ;;  %2856 = vmatmul.bf16.gmra.mxu0 %v8504_v43  ;;  %v11948_v42 = vld [vmem:[#allocation4_spill] sm:$0xff] }
 0x31c   : > { %2743 = vmatmul.bf16.gmra.mxu3 %v11945_v39 }
 0x31e   : > { %v2596_v27 = vpop.f32.mrf.mxu2 }
 0x31f   : > { %v2709_v13 = vpop.f32.mrf.mxu3  ;;  %v2597_v10 = vadd.f32 %v2596_v27, %v11946_v63 }
 0x320   : > { %v2824_v44 = vpop.f32.mrf.mxu0 }
 0x321   : > { %v2710_v18 = vadd.f32 %v2709_v13, %v2597_v10  ;;  %v7549_v10 = vld [vmem:[%s7626_s10 + $0x80] sm:$0xff]  }
 0x323   : > { %v8792_v12 = vadd.f32 %v2822_v50, %v2710_v18  ;;  %v11949_v18 = vld [vmem:[#allocation19_spill] sm:$0xff] }
 0x326   : > { %v2598_v37 = vpop.f32.mrf.mxu2 }
 0x327   : > { %v2711_v22 = vpop.f32.mrf.mxu3  ;;  %v2599_v41 = vadd.f32 %v2598_v37, %v11947_v15 }
 0x328   : > { %v2827_v33 = vpop.f32.mrf.mxu0 }
 0x329   : > { %v2712_v54 = vadd.f32 %v2711_v22, %v2599_v41 }
 0x32b   : > { %v8795_v20 = vadd.f32 %v2824_v44, %v2712_v54  ;;  %2634 = vmatmul.bf16.gmra.mxu2 %v7548_v24  ;;  %2860 = vmatmul.bf16.gmra.mxu0 %v8473_v35  ;;  %v11950_v44 = vld [vmem:[#allocation7_spill] sm:$0xff] }
 0x32c   : > { %2747 = vmatmul.bf16.gmra.mxu3 %v11885_v29 }
 0x32e   : > { %v2601_v43 = vpop.f32.mrf.mxu2 }
 0x32f   : > { %v2714_v61 = vpop.f32.mrf.mxu3  ;;  %v7550_v43 = vld [vmem:[%s7626_s10 + $0x88] sm:$0xff]  }
 0x330   : > { %v2828_v57 = vpop.f32.mrf.mxu0  ;;  %v11952_v61 = vld [vmem:[#allocation22_spill] sm:$0xff] }
 0x336   : > { %v2602_v45 = vpop.f32.mrf.mxu2 }
 0x337   : > { %v2715_v50 = vpop.f32.mrf.mxu3  ;;  %v2603_v39 = vadd.f32 %v2602_v45, %v11948_v42 }
 0x338   : > { %v2831_v13 = vpop.f32.mrf.mxu0 }
 0x339   : > { %v2716_v27 = vadd.f32 %v2715_v50, %v2603_v39 }
 0x33b   : > { %v8801_v63 = vadd.f32 %v2828_v57, %v2716_v27  ;;  %2639 = vmatmul.bf16.gmra.mxu2 %v7549_v10  ;;  %2865 = vmatmul.bf16.gmra.mxu0 %v8535_v11  ;;  %v11953_v11 = vld [vmem:[#allocation13_spill] sm:$0xff] }
 0x33c   : > { %2752 = vmatmul.bf16.gmra.mxu3 %v11949_v18 }
 0x33e   : > { %v2605_v29 = vpop.f32.mrf.mxu2 }
 0x33f   : > { %v2718_v35 = vpop.f32.mrf.mxu3  ;;  %v2606_v37 = vadd.f32 %v2605_v29, %v11950_v44  ;;  %v11955_v29 = vld [vmem:[#allocation16_spill] sm:$0xff] }
 0x340   : > { %v2833_v15 = vpop.f32.mrf.mxu0 }
 0x341   : > { %v2719_v22 = vadd.f32 %v2718_v35, %v2606_v37 }
 0x343   : > { %v8807_v41 = vadd.f32 %v2831_v13, %v2719_v22  ;;  %v7234_v13 = vld [vmem:[%s11645_s3 + $0x38] sm:$0xff]  ;;  %v11957_v22 = vld [vmem:[#allocation3_spill] sm:$0xff] }
 0x344   : > { %5147 = vmatpush.bf16.msra.mxu1 %v7234_v13  ;;  %v11960_v13 = vld [vmem:[#allocation12_spill] sm:$0xff] }
 0x345   : > { %11951 = vst [vmem:[#allocation26_spill] sm:$0xff] %v8807_v41 }
 0x346   : > { %v2607_v54 = vpop.f32.mrf.mxu2 }
 0x347   : > { %v2720_v33 = vpop.f32.mrf.mxu3 }
 0x348   : > { %v2835_v24 = vpop.f32.mrf.mxu0 }
 0x34b   : > { %2643 = vmatmul.bf16.gmra.mxu2 %v7550_v43  ;;  %2869 = vmatmul.bf16.gmra.mxu0 %v8560_v6 }
 0x34c   : > { %2756 = vmatmul.bf16.gmra.mxu3 %v11952_v61  ;;  %v11958_v61 = vld [vmem:[#allocation10_spill] sm:$0xff] }
 0x34e   : > { %v2609_v57 = vpop.f32.mrf.mxu2 }
 0x34f   : > { %v2722_v45 = vpop.f32.mrf.mxu3  ;;  %v2610_v50 = vadd.f32 %v2609_v57, %v11953_v11 }
 0x350   : > { %v2837_v39 = vpop.f32.mrf.mxu0 }
 0x351   : > { %v2723_v42 = vadd.f32 %v2722_v45, %v2610_v50 }
 0x353   : > { %v8813_v27 = vadd.f32 %v2835_v24, %v2723_v42  ;;  %v7551_v42 = vld [vmem:[%s7626_s10 + $0x98] sm:$0xff]  }
 0x355   : > { %11954 = vst [vmem:[#allocation33_spill] sm:$0xff] %v8813_v27 }
 0x356   : > { %v2611_v10 = vpop.f32.mrf.mxu2 }
 0x357   : > { %v2724_v18 = vpop.f32.mrf.mxu3  ;;  %v2612_v35 = vadd.f32 %v2611_v10, %v11955_v29 }
 0x358   : > { %v2840_v6 = vpop.f32.mrf.mxu0 }
 0x359   : > { %v2725_v44 = vadd.f32 %v2724_v18, %v2612_v35 }
 0x35b   : > { %v8819_v37 = vadd.f32 %v2837_v39, %v2725_v44  ;;  %2647 = vmatmul.bf16.gmra.mxu2 %v8521_v40  ;;  %2873 = vmatmul.bf16.gmra.mxu0 %v11957_v22  ;;  %v11959_v39 = vld [vmem:[#allocation31_spill] sm:$0xff] }
 0x35c   : > { %2760 = vmatmul.bf16.gmra.mxu3 %v11898_v51 }
 0x35d   : > { %11956 = vst [vmem:[#allocation34_spill] sm:$0xff] %v8819_v37 }
 0x35e   : > { %v2614_v15 = vpop.f32.mrf.mxu2 }
 0x35f   : > { %v2727_v54 = vpop.f32.mrf.mxu3  ;;  %v7552_v15 = vld [vmem:[%s7626_s10 + $0xa0] sm:$0xff]  }
 0x360   : > { %v2841_v33 = vpop.f32.mrf.mxu0  ;;  %v11961_v54 = vld [vmem:[#allocation35_spill] sm:$0xff] }
 0x366   : > { %v2615_v24 = vpop.f32.mrf.mxu2 }
 0x367   : > { %v2728_v43 = vpop.f32.mrf.mxu3  ;;  %v2616_v57 = vadd.f32 %v2615_v24, %v11958_v61 }
 0x368   : > { %v2844_v11 = vpop.f32.mrf.mxu0 }
 0x369   : > { %v2729_v45 = vadd.f32 %v2728_v43, %v2616_v57 }
 0x36b   : > { %v8825_v50 = vadd.f32 %v2841_v33, %v2729_v45  ;;  %2652 = vmatmul.bf16.gmra.mxu2 %v7551_v42  ;;  %2878 = vmatmul.bf16.gmra.mxu0 %v8591_v21  ;;  %v11962_v21 = vld [vmem:[#allocation18_spill] sm:$0xff] }
 0x36c   : > { %2765 = vmatmul.bf16.gmra.mxu3 %v11959_v39 }
 0x36e   : > { %v2618_v40 = vpop.f32.mrf.mxu2 }
 0x36f   : > { %v2731_v51 = vpop.f32.mrf.mxu3  ;;  %v2619_v10 = vadd.f32 %v2618_v40, %v11960_v13  ;;  %v11963_v40 = vld [vmem:[#allocation15_spill] sm:$0xff] }
 0x370   : > { %v2846_v29 = vpop.f32.mrf.mxu0 }
 0x371   : > { %v2732_v18 = vadd.f32 %v2731_v51, %v2619_v10 }
 0x373   : > { %v8831_v35 = vadd.f32 %v2844_v11, %v2732_v18  ;;  %v7233_v11 = vld [vmem:[%s11645_s3 + $0x30] sm:$0xff]  ;;  %v11964_v18 = vld [vmem:[#allocation17_spill] sm:$0xff] }
 0x374   : > { %5148 = vmatpush.bf16.msra.mxu1 %v7233_v11  ;;  %v11967_v11 = vld [vmem:[#allocation28_spill] sm:$0xff] }
 0x376   : > { %v2620_v44 = vpop.f32.mrf.mxu2 }
 0x377   : > { %v2733_v6 = vpop.f32.mrf.mxu3 }
 0x378   : > { %v2848_v22 = vpop.f32.mrf.mxu0 }
 0x37b   : > { %2656 = vmatmul.bf16.gmra.mxu2 %v7552_v15  ;;  %2882 = vmatmul.bf16.gmra.mxu0 %v8618_v2 }
 0x37c   : > { %2769 = vmatmul.bf16.gmra.mxu3 %v11961_v54  ;;  %v11965_v54 = vld [vmem:[#allocation25_spill] sm:$0xff] }
 0x37e   : > { %v2622_v33 = vpop.f32.mrf.mxu2 }
 0x37f   : > { %v2735_v24 = vpop.f32.mrf.mxu3  ;;  %v2623_v43 = vadd.f32 %v2622_v33, %v11962_v21 }
 0x380   : > { %v2850_v57 = vpop.f32.mrf.mxu0 }
 0x381   : > { %v2736_v61 = vadd.f32 %v2735_v24, %v2623_v43 }
 0x383   : > { %v8837_v45 = vadd.f32 %v2848_v22, %v2736_v61  ;;  %v7553_v61 = vld [vmem:[%s7626_s10 + $0xb0] sm:$0xff]  }
 0x386   : > { %v2624_v42 = vpop.f32.mrf.mxu2 }
 0x387   : > { %v2737_v39 = vpop.f32.mrf.mxu3  ;;  %v2625_v51 = vadd.f32 %v2624_v42, %v11963_v40 }
 0x388   : > { %v2853_v2 = vpop.f32.mrf.mxu0 }
 0x389   : > { %v2738_v13 = vadd.f32 %v2737_v39, %v2625_v51 }
 0x38b   : > { %v8843_v10 = vadd.f32 %v2850_v57, %v2738_v13  ;;  %2660 = vmatmul.bf16.gmra.mxu2 %v8577_v55  ;;  %2886 = vmatmul.bf16.gmra.mxu0 %v11964_v18  ;;  %v11966_v57 = vld [vmem:[#allocation43_spill] sm:$0xff] }
 0x38c   : > { %2773 = vmatmul.bf16.gmra.mxu3 %v11911_v5 }
 0x38e   : > { %v2627_v29 = vpop.f32.mrf.mxu2 }
 0x38f   : > { %v2740_v44 = vpop.f32.mrf.mxu3  ;;  %v7554_v29 = vld [vmem:[%s7626_s10 + $0xb8] sm:$0xff]  }
 0x390   : > { %v2854_v6 = vpop.f32.mrf.mxu0  ;;  %v11968_v44 = vld [vmem:[#allocation46_spill] sm:$0xff] }
 0x396   : > { %v2628_v22 = vpop.f32.mrf.mxu2 }
 0x397   : > { %v2741_v15 = vpop.f32.mrf.mxu3  ;;  %v2629_v33 = vadd.f32 %v2628_v22, %v11965_v54 }
 0x398   : > { %v2857_v21 = vpop.f32.mrf.mxu0 }
 0x399   : > { %v2742_v24 = vadd.f32 %v2741_v15, %v2629_v33  ;;  %v11969_v15 = vld [vmem:[#allocation23_spill] sm:$0xff] }
 0x39a   : > { %v7507_v33 = vld [vmem:[%s7626_s10 + $0xcc] sm:$0xff]  }
 0x39b   : > { %v8849_v43 = vadd.f32 %v2854_v6, %v2742_v24  ;;  %2665 = vmatmul.bf16.gmra.mxu2 %v7553_v61  ;;  %2891 = vmatmul.bf16.gmra.mxu0 %v8667_v48  ;;  %v7428_v6 = vld [vmem:[%s7626_s10 + $0xd0] sm:$0xff]  }
 0x39c   : > { %2778 = vmatmul.bf16.gmra.mxu3 %v11966_v57  ;;  %v7402_v24 = vunpack.c.h.b16 %v7428_v6 }
 0x39e   : > { %v2631_v55 = vpop.f32.mrf.mxu2 }
 0x39f   : > { %v2744_v5 = vpop.f32.mrf.mxu3  ;;  %v2632_v42 = vadd.f32 %v2631_v55, %v11967_v11  ;;  %v447_v55 = vpack.c.b16 %v7402_v24, %v7402_v24  ;;  %v7232_v11 = vld [vmem:[%s11645_s3 + $0x28] sm:$0xff] }
 0x3a0   : > { %v2859_v40 = vpop.f32.mrf.mxu0  ;;  %5149 = vmatpush.bf16.msra.mxu1 %v7232_v11 }
 0x3a1   : > { %v2745_v39 = vadd.f32 %v2744_v5, %v2632_v42  ;;  %v707_v5 = vshll.u32 %v7507_v33, 16 }
 0x3a3   : > { %v8855_v51 = vadd.f32 %v2857_v21, %v2745_v39  ;;  %v705_v39 = vshrl.u32 %v7507_v33, 16  ;;  %v709_v40 = vrot.slane %v707_v5, 1 }
 0x3a6   : > { %v2633_v13 = vpop.f32.mrf.mxu2 }
 0x3a7   : > { %v2746_v2 = vpop.f32.mrf.mxu3  ;;  %v712_v13 = vshll.u32 %v447_v55, 16 }
 0x3a8   : > { %v2861_v18 = vpop.f32.mrf.mxu0 }
 0x3ab   : > { %2669 = vmatmul.bf16.gmra.mxu2 %v7554_v29  ;;  %2895 = vmatmul.bf16.gmra.mxu0 %v8689_v52  ;;  %v714_v29 = vrot.slane %v712_v13, 1 }
 0x3ac   : > { %2782 = vmatmul.bf16.gmra.mxu3 %v11968_v44  ;;  %v810_v44 = vrot.slane %v7507_v33, 1  ;;  %v716_v33 = vshrl.u32 %v447_v55, 16 }
 0x3ae   : > { %v2635_v48 = vpop.f32.mrf.mxu2  ;;  %v718_v13 = vor.u32 %v716_v33, %v714_v29 }
 0x3af   : > { %v2748_v22 = vpop.f32.mrf.mxu3  ;;  %v2636_v54 = vadd.f32 %v2635_v48, %v11969_v15  ;;  %v811_v48 = vrot.slane %v447_v55, 1 }
 0x3b0   : > { %v8863_v57 = vpop.f32.mrf.mxu0  ;;  %v757_v17 = vsel %vm7739_vm3, %v718_v13, 0 }
 0x3b1   : > { %v2749_v61 = vadd.f32 %v2748_v22, %v2636_v54 }
 0x3b3   : > { %v8865_v21 = vadd.f32 %v2861_v18, %v2749_v61  ;;  %v710_v18 = vor.u32 %v709_v40, %v705_v39  ;;  %v812_v61 = vsel %vm758_vm4, %v810_v44, %v811_v48  ;;  %v11970_v40 = vld [vmem:[#allocation14_spill] sm:$0xff]  ;;  %v867_v44 = vsel %vm813_vm5, %v811_v48, 0 }
 0x3b4   : > { %v1026_v11 = vunpack.c.l.b16 %v812_v61 }
 0x3b5   : > { %v715_v54 = vsel %vm448_vm0, %v710_v18, %v714_v29 }
 0x3b6   : > { %v8870_v42 = vpop.f32.mrf.mxu2  ;;  %v1025_v5 = vunpack.c.l.b16 %v715_v54 }
 0x3b7   : > { %v8872_v52 = vpop.f32.mrf.mxu3 }
 0x3b8   : > { %v2866_v2 = vpop.f32.mrf.mxu0 }
 0x3bb   : > { %2673 = vmatmul.bf16.gmra.mxu2 %v8634_v26  ;;  %2899 = vmatmul.bf16.gmra.mxu0 %v8658_v53  ;;  %v1304_v53 = vpack.c.b16 %v1026_v11, %v8685_v4  ;;  %v886_v4 = vsel %vm7739_vm3, %v867_v44, 0  ;;  %v1029_v11 = vunpack.c.l.b16 %v757_v17  ;;  %v7231_v17 = vld [vmem:[%s11645_s3 + $0x20] sm:$0xff] }
 0x3bc   : > { %2786 = vmatmul.bf16.gmra.mxu3 %v8655_v8  ;;  %v1303_v8 = vpack.c.b16 %v1025_v5, %v8682_v62  ;;  %v1027_v5 = vunpack.c.h.b16 %v715_v54  ;;  %v1030_v29 = vunpack.c.l.b16 %v886_v4  ;;  %5150 = vmatpush.bf16.msra.mxu1 %v7231_v17 }
 0x3be   : > { %v2640_v22 = vpop.f32.mrf.mxu2 }
 0x3bf   : > { %v2753_v15 = vpop.f32.mrf.mxu3 }
 0x3c0   : > { %v8878_v24 = vpop.f32.mrf.mxu0 }
 0x3c6   : > { %v8881_v2 = vpop.f32.mrf.mxu2 }
 0x3c7   : > { %v8883_v26 = vpop.f32.mrf.mxu3 }
 0x3c8   : > { %v2870_v39 = vpop.f32.mrf.mxu0 }
 0x3cb   : > { %2678 = vmatmul.bf16.gmra.mxu2 %v11970_v40  ;;  %2904 = vmatmul.bf16.gmra.mxu0 %v1304_v53  ;;  %v1309_v40 = vpack.c.b16 %v1029_v11, %v1027_v5 }
 0x3cc   : > { %2791 = vmatmul.bf16.gmra.mxu3 %v1303_v8  ;;  %v1028_v8 = vunpack.c.h.b16 %v812_v61 }
 0x3ce   : > { %v2644_v18 = vpop.f32.mrf.mxu2  ;;  %v1310_v48 = vpack.c.b16 %v1030_v29, %v1028_v8 }
 0x3cf   : > { %v2757_v22 = vpop.f32.mrf.mxu3  ;;  %v2645_v15 = vadd.f32 %v2644_v18, %v8687_v56 }
 0x3d0   : > { %v2872_v62 = vpop.f32.mrf.mxu0 }
 0x3d1   : > { %v2758_v36 = vadd.f32 %v2757_v22, %v2645_v15 }
 0x3d3   : > { %v8894_v55 = vadd.f32 %v2870_v39, %v2758_v36 }
 0x3d6   : > { %v2646_v53 = vpop.f32.mrf.mxu2 }
 0x3d7   : > { %v2759_v33 = vpop.f32.mrf.mxu3 }
 0x3d8   : > { %v2874_v30 = vpop.f32.mrf.mxu0 }
 0x3db   : > { %2682 = vmatmul.bf16.gmra.mxu2 %v7428_v6  ;;  %2908 = vmatmul.bf16.gmra.mxu0 %v1310_v48 }
 0x3dc   : > { %2795 = vmatmul.bf16.gmra.mxu3 %v1309_v40 }
 0x3de   : > { %v2648_v56 = vpop.f32.mrf.mxu2 }
 0x3df   : > { %v2761_v13 = vpop.f32.mrf.mxu3  ;;  %v2649_v18 = vadd.f32 %v2648_v56, %v8698_v14 }
 0x3e0   : > { %v8897_v44 = vpop.f32.mrf.mxu0 }
 0x3e1   : > { %v2762_v22 = vadd.f32 %v2761_v13, %v2649_v18 }
 0x3e3   : > { %v8899_v36 = vadd.f32 %v2874_v30, %v2762_v22 }
 0x3e6   : > { %v8904_v54 = vpop.f32.mrf.mxu2 }
 0x3e7   : > { %v8906_v61 = vpop.f32.mrf.mxu3 }
 0x3e8   : > { %v2879_v6 = vpop.f32.mrf.mxu0 }
 0x3ee   : > { %v2653_v39 = vpop.f32.mrf.mxu2 }
 0x3ef   : > { %v2766_v15 = vpop.f32.mrf.mxu3 }
 0x3f0   : > { %v8908_v62 = vpop.f32.mrf.mxu0  ;;  %v2913_v15 = vadd.f32 %v8774_v7, %v8771_v23 }
 0x3f6   : > { %v2654_v14 = vpop.f32.mrf.mxu2 }
 0x3f7   : > { %v8910_v4 = vpop.f32.mrf.mxu3 }
 0x3f8   : > { %v2883_v5 = vpop.f32.mrf.mxu0 }
 0x3fe   : > { %v2657_v30 = vpop.f32.mrf.mxu2 }
 0x3ff   : > { %v2770_v11 = vpop.f32.mrf.mxu3  ;;  %v2658_v8 = vadd.f32 %v2657_v30, %v8715_v9  ;;  %v7230_v9 = vld [vmem:[%s11645_s3 + $0x18] sm:$0xff] }
 0x400   : > { %v2885_v53 = vpop.f32.mrf.mxu0  ;;  %5151 = vmatpush.bf16.msra.mxu1 %v7230_v9 }
 0x401   : > { %v2771_v29 = vadd.f32 %v2770_v11, %v2658_v8  ;;  %v2914_v11 = vadd.f32 %v2913_v15, %v8780_v58 }
 0x403   : > { %v8913_v33 = vadd.f32 %v2883_v5, %v2771_v29  ;;  %v2915_v8 = vadd.f32 %v2914_v11, %v8786_v47  ;;  %v11972_v11 = vld [vmem:[#allocation21_spill] sm:$0xff] }
 0x405   : > { %v2916_v29 = vadd.f32 %v2915_v8, %v8792_v12 }
 0x406   : > { %v2659_v40 = vpop.f32.mrf.mxu2 }
 0x407   : > { %v2772_v48 = vpop.f32.mrf.mxu3  ;;  %v2917_v53 = vadd.f32 %v2916_v29, %v8795_v20  ;;  %v11973_v29 = vld [vmem:[#allocation27_spill] sm:$0xff] }
 0x408   : > { %v2887_v56 = vpop.f32.mrf.mxu0 }
 0x40e   : > { %v2661_v13 = vpop.f32.mrf.mxu2 }
 0x40f   : > { %v2774_v18 = vpop.f32.mrf.mxu3  ;;  %v2662_v22 = vadd.f32 %v2661_v13, %v8723_v34 }
 0x410   : > { %v8916_v6 = vpop.f32.mrf.mxu0 }
 0x411   : > { %v2775_v17 = vadd.f32 %v2774_v18, %v2662_v22 }
 0x413   : > { %v8918_v39 = vadd.f32 %v2887_v56, %v2775_v17  ;;  %v2918_v56 = vadd.f32 %v2917_v53, %v8801_v63 }
 0x415   : > { %v2919_v13 = vadd.f32 %v2918_v56, %v8807_v41 }
 0x416   : > { %v2663_v5 = vpop.f32.mrf.mxu2 }
 0x417   : > { %v2776_v30 = vpop.f32.mrf.mxu3  ;;  %v2920_v22 = vadd.f32 %v2919_v13, %v8813_v27 }
 0x418   : > { %v2892_v34 = vpop.f32.mrf.mxu0 }
 0x419   : > { %v2921_v17 = vadd.f32 %v2920_v22, %v8819_v37  ;;  %v2525_v34 = vadd.f32 %v11972_v11, %v11971_v0 }
 0x41b   : > { %v2922_v8 = vadd.f32 %v2921_v17, %v8825_v50  ;;  %v2638_v53 = vadd.f32 %v8870_v42, %v2525_v34  ;;  %v2538_v17 = vadd.f32 %v8696_v46, %v8703_v59  ;;  %v2542_v34 = vadd.f32 %v8706_v25, %v8711_v19 }
 0x41d   : > { %v2751_v37 = vadd.f32 %v8872_v52, %v2638_v53  ;;  %v2651_v52 = vadd.f32 %v8904_v54, %v2538_v17 }
 0x41e   : > { %v2666_v40 = vpop.f32.mrf.mxu2 }
 0x41f   : > { %v2779_v48 = vpop.f32.mrf.mxu3  ;;  %v2529_v40 = vadd.f32 %v11973_v29, %v8672_v3  ;;  %v2764_v25 = vadd.f32 %v8906_v61, %v2651_v52 }
 0x420   : > { %v2893_v18 = vpop.f32.mrf.mxu0  ;;  %v2923_v48 = vadd.f32 %v2922_v8, %v8831_v35 }
 0x421   : > { %v2642_v13 = vadd.f32 %v8881_v2, %v2529_v40 }
 0x422   : > { %v2924_v41 = vadd.f32 %v2923_v48, %v8837_v45  ;;  %v8972_v48 = vadd.f32 %v8897_v44, %v2764_v25 }
 0x423   : > { %v2755_v11 = vadd.f32 %v8883_v26, %v2642_v13  ;;  %v2655_v26 = vadd.f32 %v2654_v14, %v2542_v34 }
 0x424   : > { %v2925_v22 = vadd.f32 %v2924_v41, %v8843_v10  ;;  %v8953_v41 = vadd.f32 %v8863_v57, %v2751_v37  ;;  %v2551_v37 = vadd.f32 %v8721_v60, %v8728_v49 }
 0x425   : > { %v8958_v59 = vadd.f32 %v8878_v24, %v2755_v11  ;;  %v2768_v54 = vadd.f32 %v8910_v4, %v2655_v26  ;;  %v2555_v24 = vadd.f32 %v8731_v38, %v8736_v1 }
 0x426   : > { %v2667_v15 = vpop.f32.mrf.mxu2  ;;  %v2926_v3 = vadd.f32 %v2925_v22, %v8849_v43  ;;  %v2664_v53 = vadd.f32 %v2663_v5, %v2551_v37  ;;  %v11975_v37 = vld [vmem:[#allocation29_spill] sm:$0xff] }
 0x427   : > { %v2780_v9 = vpop.f32.mrf.mxu3  ;;  %v8976_v13 = vadd.f32 %v8908_v62, %v2768_v54  ;;  %v2668_v60 = vadd.f32 %v2667_v15, %v2555_v24 }
 0x428   : > { %v2896_v56 = vpop.f32.mrf.mxu0  ;;  %v2927_v2 = vadd.f32 %v2926_v3, %v8855_v51  ;;  %v2777_v22 = vadd.f32 %v2776_v30, %v2664_v53  ;;  %v2564_v30 = vadd.f32 %v8746_v28, %v8753_v31 }
 0x429   : > { %v2781_v1 = vadd.f32 %v2780_v9, %v2668_v60 }
 0x42a   : > { %v2928_v46 = vadd.f32 %v2927_v2, %v8865_v21  ;;  %v8983_v5 = vadd.f32 %v8916_v6, %v2777_v22  ;;  %v11976_v22 = vld [vmem:[#allocation42_spill] sm:$0xff] }
 0x42b   : > { %v8986_v15 = vadd.f32 %v2893_v18, %v2781_v1 }
 0x42e   : > { %v2670_v27 = vpop.f32.mrf.mxu2 }
 0x42f   : > { %v2783_v0 = vpop.f32.mrf.mxu3  ;;  %v2671_v42 = vadd.f32 %v2670_v27, %v8740_v16  ;;  %v2929_v16 = vadd.f32 %v2928_v46, %v8953_v41 }
 0x430   : > { %v2898_v29 = vpop.f32.mrf.mxu0 }
 0x431   : > { %v2784_v8 = vadd.f32 %v2783_v0, %v2671_v42  ;;  %v2930_v57 = vadd.f32 %v2929_v16, %v8958_v59 }
 0x433   : > { %v8960_v40 = vadd.f32 %v2896_v56, %v2784_v8  ;;  %v2931_v14 = vadd.f32 %v2930_v57, %v8894_v55 }
 0x435   : > { %v2932_v61 = vadd.f32 %v2931_v14, %v8899_v36 }
 0x436   : > { %v2672_v19 = vpop.f32.mrf.mxu2 }
 0x437   : > { %v2785_v27 = vpop.f32.mrf.mxu3  ;;  %v2933_v49 = vadd.f32 %v2932_v61, %v8972_v48 }
 0x438   : > { %v2900_v56 = vpop.f32.mrf.mxu0  ;;  %v11974_v27 = vld [vmem:[#allocation37_spill] sm:$0xff] }
 0x439   : > { %v2934_v38 = vadd.f32 %v2933_v49, %v8976_v13  ;;  %v2568_v28 = vadd.f32 %v11975_v37, %v11974_v27 }
 0x43b   : > { %v2935_v44 = vadd.f32 %v2934_v38, %v8913_v33 }
 0x43d   : > { %v2936_v62 = vadd.f32 %v2935_v44, %v8918_v39 }
 0x43e   : > { %v2674_v4 = vpop.f32.mrf.mxu2 }
 0x43f   : > { %v2787_v0 = vpop.f32.mrf.mxu3  ;;  %v2675_v17 = vadd.f32 %v2674_v4, %v8748_v32  ;;  %v2937_v34 = vadd.f32 %v2936_v62, %v8983_v5 }
 0x440   : > { %v2902_v11 = vpop.f32.mrf.mxu0 }
 0x441   : > { %v2788_v3 = vadd.f32 %v2787_v0, %v2675_v17  ;;  %v2938_v32 = vadd.f32 %v2937_v34, %v8986_v15 }
 0x443   : > { %v2901_v42 = vadd.f32 %v2900_v56, %v2788_v3  ;;  %v2939_v6 = vadd.f32 %v2938_v32, %v8960_v40  ;;  %v7563_v56 = vmov 256.0  }
 0x444   : > { %7522 = vrcp.f32 %v7563_v56  ;;  %v11978_v56 = vld [vmem:[#allocation26_spill] sm:$0xff] }
 0x445   : > { %v2940_v46 = vadd.f32 %v2939_v6, %v2901_v42 }
 0x446   : > { %v2676_v9 = vpop.f32.mrf.mxu2 }
 0x447   : > { %v2789_v2 = vpop.f32.mrf.mxu3  ;;  %v2677_v52 = vadd.f32 %v2676_v9, %v2564_v30 }
 0x448   : > { %v2905_v29 = vpop.f32.mrf.mxu0 }
 0x449   : > { %v2790_v8 = vadd.f32 %v2789_v2, %v2677_v52 }
 0x44a   : > { %v7523_v1 = vpop.eup %7522 }
 0x44b   : > { %v2903_v26 = vadd.f32 %v2902_v11, %v2790_v8  ;;  %v2951_v3 = vmul.f32 256.0, %v7523_v1  ;;  %vm2955_vm6 = vweird.f32 %v7523_v1 }
 0x44d   : > { %v2941_v16 = vadd.f32 %v2940_v46, %v2903_v26  ;;  %v2952_v9 = vsub.f32 1.0, %v2951_v3 }
 0x44e   : > { %v2679_v18 = vpop.f32.mrf.mxu2 }
 0x44f   : > { %v2792_v25 = vpop.f32.mrf.mxu3  ;;  %v2953_v52 = vmul.f32 %v7523_v1, %v2952_v9 }
 0x450   : > { %v2906_v19 = vpop.f32.mrf.mxu0 }
 0x451   : > { %v2954_v8 = vadd.f32 %v7523_v1, %v2953_v52 }
 0x453   : > { %v8996_v46 = vsel %vm2955_vm6, %v7523_v1, %v2954_v8 }
 0x454   : > { %11977 = vst [vmem:[#allocation38_spill] sm:$0xff] %v8996_v46 }
 0x456   : > { %v2680_v31 = vpop.f32.mrf.mxu2 }
 0x457   : > { %v2793_v57 = vpop.f32.mrf.mxu3  ;;  %v2681_v54 = vadd.f32 %v2680_v31, %v2568_v28 }
 0x458   : > { %v2909_v14 = vpop.f32.mrf.mxu0 }
 0x459   : > { %v2794_v24 = vadd.f32 %v2793_v57, %v2681_v54 }
 0x45b   : > { %v2907_v53 = vadd.f32 %v2906_v19, %v2794_v24 }
 0x45d   : > { %v2942_v61 = vadd.f32 %v2941_v16, %v2907_v53 }
 0x45e   : > { %v2683_v60 = vpop.f32.mrf.mxu2 }
 0x45f   : > { %v2796_v49 = vpop.f32.mrf.mxu3  ;;  %v2684_v4 = vadd.f32 %v2683_v60, %v11976_v22 }
 0x460   : > { %v2911_v38 = vpop.f32.mrf.mxu0 }
 0x461   : > { %v2797_v0 = vadd.f32 %v2796_v49, %v2684_v4  ;;  %v11979_v49 = vld [vmem:[#allocation33_spill] sm:$0xff] }
 0x463   : > { %v2910_v17 = vadd.f32 %v2909_v14, %v2797_v0  ;;  %v11980_v0 = vld [vmem:[#allocation34_spill] sm:$0xff] }
 0x465   : > { %v2943_v44 = vadd.f32 %v2942_v61, %v2910_v17 }
 0x466   : > { %v2685_v11 = vpop.f32.mrf.mxu2 }
 0x467   : > { %v2798_v62 = vpop.f32.mrf.mxu3  ;;  %v2944_v30 = vrot.slane %v2943_v44, 4 }
 0x469   : > { %v2945_v34 = vadd.f32 %v2944_v30, %v2943_v44 }
 0x46b   : > { %v2946_v2 = vrot.slane %v2945_v34, 2 }
 0x46d   : > { %v2947_v32 = vadd.f32 %v2946_v2, %v2945_v34 }
 0x46f   : > { %v2948_v6 = vrot.slane %v2947_v32, 1 }
 0x471   : > { %v2949_v29 = vadd.f32 %v2948_v6, %v2947_v32 }
 0x473   : > { %v8999_v16 = vmul.f32 %v8996_v46, %v2949_v29 }
 0x475   : > { %v9002_v18 = vsub.f32 %v2901_v42, %v8999_v16  ;;  %v9005_v25 = vsub.f32 %v2903_v26, %v8999_v16  ;;  %v9008_v19 = vsub.f32 %v2907_v53, %v8999_v16  ;;  %v9011_v27 = vsub.f32 %v2910_v17, %v8999_v16 }
 0x476   : > { %v9015_v37 = vsub.f32 %v8771_v23, %v8999_v16  ;;  %v9019_v28 = vsub.f32 %v8774_v7, %v8999_v16  ;;  %v9023_v42 = vsub.f32 %v8780_v58, %v8999_v16  ;;  %v9031_v57 = vsub.f32 %v8786_v47, %v8999_v16 }
 0x477   : > { %v9035_v23 = vsub.f32 %v8792_v12, %v8999_v16  ;;  %v9041_v58 = vsub.f32 %v8795_v20, %v8999_v16  ;;  %v9047_v47 = vsub.f32 %v8801_v63, %v8999_v16  ;;  %v9053_v61 = vsub.f32 %v11978_v56, %v8999_v16 }
 0x478   : > { %v2990_v26 = vmul.f32 %v9015_v37, %v9015_v37  ;;  %v2991_v31 = vmul.f32 %v9019_v28, %v9019_v28  ;;  %v2992_v7 = vmul.f32 %v9023_v42, %v9023_v42  ;;  %v2993_v24 = vmul.f32 %v9031_v57, %v9031_v57 }
 0x479   : > { %v2994_v12 = vmul.f32 %v9035_v23, %v9035_v23  ;;  %v2995_v20 = vmul.f32 %v9041_v58, %v9041_v58  ;;  %v9059_v22 = vsub.f32 %v11979_v49, %v8999_v16  ;;  %v2996_v63 = vmul.f32 %v9047_v47, %v9047_v47 }
 0x47a   : > { %v3022_v54 = vadd.f32 %v2991_v31, %v2990_v26  ;;  %v9065_v38 = vsub.f32 %v11980_v0, %v8999_v16  ;;  %v2997_v1 = vmul.f32 %v9053_v61, %v9053_v61  ;;  %v9071_v44 = vsub.f32 %v8825_v50, %v8999_v16 }
 0x47b   : > { %v2998_v3 = vmul.f32 %v9059_v22, %v9059_v22  ;;  %v9077_v62 = vsub.f32 %v8831_v35, %v8999_v16  ;;  %v9083_v9 = vsub.f32 %v8837_v45, %v8999_v16  ;;  %v9089_v32 = vsub.f32 %v8843_v10, %v8999_v16 }
 0x47c   : > { %v3023_v14 = vadd.f32 %v3022_v54, %v2992_v7  ;;  %v2999_v30 = vmul.f32 %v9065_v38, %v9065_v38  ;;  %v3000_v50 = vmul.f32 %v9071_v44, %v9071_v44  ;;  %v9095_v6 = vsub.f32 %v8849_v43, %v8999_v16 }
 0x47d   : > { %v3001_v35 = vmul.f32 %v9077_v62, %v9077_v62  ;;  %v3002_v45 = vmul.f32 %v9083_v9, %v9083_v9  ;;  %v9101_v29 = vsub.f32 %v8855_v51, %v8999_v16  ;;  %v3003_v10 = vmul.f32 %v9089_v32, %v9089_v32 }
 0x47e   : > { %v3024_v53 = vadd.f32 %v3023_v14, %v2993_v24  ;;  %v9107_v31 = vsub.f32 %v8865_v21, %v8999_v16  ;;  %v3004_v43 = vmul.f32 %v9095_v6, %v9095_v6  ;;  %v9113_v54 = vsub.f32 %v8953_v41, %v8999_v16 }
 0x47f   : > { %v3005_v51 = vmul.f32 %v9101_v29, %v9101_v29  ;;  %v9119_v14 = vsub.f32 %v8958_v59, %v8999_v16  ;;  %v9137_v49 = vsub.f32 %v8972_v48, %v8999_v16 }
 0x480   : > { %v3025_v60 = vadd.f32 %v3024_v53, %v2994_v12  ;;  %v3006_v21 = vmul.f32 %v9107_v31, %v9107_v31  ;;  %v9125_v53 = vsub.f32 %v8894_v55, %v8999_v16  ;;  %v3007_v41 = vmul.f32 %v9113_v54, %v9113_v54 }
 0x481   : > { %v3008_v59 = vmul.f32 %v9119_v14, %v9119_v14  ;;  %v3011_v48 = vmul.f32 %v9137_v49, %v9137_v49 }
 0x482   : > { %v3026_v4 = vadd.f32 %v3025_v60, %v2995_v20  ;;  %v9131_v20 = vsub.f32 %v8899_v36, %v8999_v16  ;;  %v3009_v55 = vmul.f32 %v9125_v53, %v9125_v53 }
 0x484   : > { %v3027_v17 = vadd.f32 %v3026_v4, %v2996_v63  ;;  %v9143_v4 = vsub.f32 %v8976_v13, %v8999_v16  ;;  %v3010_v36 = vmul.f32 %v9131_v20, %v9131_v20 }
 0x486   : > { %v3028_v11 = vadd.f32 %v3027_v17, %v2997_v1  ;;  %v9149_v1 = vsub.f32 %v8913_v33, %v8999_v16  ;;  %v3012_v13 = vmul.f32 %v9143_v4, %v9143_v4 }
 0x488   : > { %v3029_v34 = vadd.f32 %v3028_v11, %v2998_v3  ;;  %v9155_v3 = vsub.f32 %v8918_v39, %v8999_v16  ;;  %v3013_v33 = vmul.f32 %v9149_v1, %v9149_v1 }
 0x48a   : > { %v3030_v2 = vadd.f32 %v3029_v34, %v2999_v30  ;;  %v9161_v30 = vsub.f32 %v8983_v5, %v8999_v16  ;;  %v3014_v39 = vmul.f32 %v9155_v3, %v9155_v3 }
 0x48c   : > { %v3031_v52 = vadd.f32 %v3030_v2, %v3000_v50  ;;  %v9167_v50 = vsub.f32 %v8986_v15, %v8999_v16  ;;  %v3015_v5 = vmul.f32 %v9161_v30, %v9161_v30 }
 0x48e   : > { %v3032_v8 = vadd.f32 %v3031_v52, %v3001_v35  ;;  %v9173_v35 = vsub.f32 %v8960_v40, %v8999_v16  ;;  %v3019_v40 = vmul.f32 %v9005_v25, %v9005_v25 }
 0x490   : > { %v3033_v26 = vadd.f32 %v3032_v8, %v3002_v45  ;;  %v3016_v45 = vmul.f32 %v9167_v50, %v9167_v50  ;;  %v3017_v15 = vmul.f32 %v9173_v35, %v9173_v35 }
 0x492   : > { %v3034_v7 = vadd.f32 %v3033_v26, %v3003_v10  ;;  %v3018_v26 = vmul.f32 %v9002_v18, %v9002_v18 }
 0x494   : > { %v3035_v24 = vadd.f32 %v3034_v7, %v3004_v43  ;;  %v3020_v7 = vmul.f32 %v9008_v19, %v9008_v19 }
 0x496   : > { %v3036_v12 = vadd.f32 %v3035_v24, %v3005_v51  ;;  %v3021_v24 = vmul.f32 %v9011_v27, %v9011_v27 }
 0x498   : > { %v3037_v56 = vadd.f32 %v3036_v12, %v3006_v21 }
 0x49a   : > { %v3038_v60 = vadd.f32 %v3037_v56, %v3007_v41 }
 0x49c   : > { %v3039_v63 = vadd.f32 %v3038_v60, %v3008_v59 }
 0x49e   : > { %v3040_v0 = vadd.f32 %v3039_v63, %v3009_v55 }
 0x4a0   : > { %v3041_v17 = vadd.f32 %v3040_v0, %v3010_v36 }
 0x4a2   : > { %v3042_v11 = vadd.f32 %v3041_v17, %v3011_v48 }
 0x4a4   : > { %v3043_v34 = vadd.f32 %v3042_v11, %v3012_v13 }
 0x4a6   : > { %v3044_v2 = vadd.f32 %v3043_v34, %v3013_v33 }
 0x4a8   : > { %v3045_v52 = vadd.f32 %v3044_v2, %v3014_v39  ;;  %v9193_v39 = vld [vmem:[%s11646_s4] ss:$0 sm:$0xff] }
 0x4aa   : > { %v3046_v8 = vadd.f32 %v3045_v52, %v3015_v5  ;;  %v9200_v5 = vld [vmem:[%s11646_s4 + $0x1] ss:$0 sm:$0xff] }
 0x4ac   : > { %v3047_v10 = vadd.f32 %v3046_v8, %v3016_v45 }
 0x4ae   : > { %v3048_v43 = vadd.f32 %v3047_v10, %v3017_v15 }
 0x4b0   : > { %v3049_v16 = vadd.f32 %v3048_v43, %v3018_v26 }
 0x4b2   : > { %v3050_v51 = vadd.f32 %v3049_v16, %v3019_v40 }
 0x4b4   : > { %v3051_v21 = vadd.f32 %v3050_v51, %v3020_v7 }
 0x4b6   : > { %v3052_v12 = vadd.f32 %v3051_v21, %v3021_v24 }
 0x4b8   : > { %v3053_v41 = vrot.slane %v3052_v12, 4 }
 0x4ba   : > { %v3054_v56 = vadd.f32 %v3053_v41, %v3052_v12 }
 0x4bc   : > { %v3055_v59 = vrot.slane %v3054_v56, 2 }
 0x4be   : > { %v3056_v60 = vadd.f32 %v3055_v59, %v3054_v56 }
 0x4c0   : > { %v3057_v55 = vrot.slane %v3056_v60, 1 }
 0x4c2   : > { %v3058_v63 = vadd.f32 %v3057_v55, %v3056_v60 }
 0x4c4   : > { %v3059_v36 = vmul.f32 %v3058_v63, %v8996_v46 }
 0x4c6   : > { %v3060_v0 = vadd.f32 1e-05, %v3059_v36 }
 0x4c8   : > { %7524 = vrsqrt.f32 %v3060_v0  ;;  %vm3067_vm8 = vweird.f32 %v3060_v0 }
 0x4ce   : > { %v7525_v48 = vpop.eup %7524 }
 0x4cf   : > { %v3062_v17 = vmul.f32 %v7525_v48, %v3060_v0  ;;  %vm3068_vm7 = vweird.f32 %v7525_v48 }
 0x4d0   : > { %vm3069_vm9 = vmor %vm3067_vm8, %vm3068_vm7 }
 0x4d1   : > { %v3063_v13 = vmul.f32 %v7525_v48, %v3062_v17 }
 0x4d3   : > { %v3064_v11 = vmul.f32 0.5, %v3063_v13 }
 0x4d5   : > { %v3065_v33 = vsub.f32 1.5, %v3064_v11 }
 0x4d7   : > { %v3066_v34 = vmul.f32 %v7525_v48, %v3065_v33 }
 0x4d9   : > { %v9195_v2 = vsel %vm3069_vm9, %v7525_v48, %v3066_v34 }
 0x4da   : > { %v3101_v52 = vmul.f32 %v9195_v2, %v9008_v19  ;;  %v3102_v45 = vmul.f32 %v9195_v2, %v9011_v27  ;;  %v3077_v16 = vmul.f32 %v9195_v2, %v9047_v47  ;;  %v3078_v7 = vmul.f32 %v9195_v2, %v9053_v61 }
 0x4db   : > { %v3079_v19 = vmul.f32 %v9195_v2, %v9059_v22  ;;  %v3080_v27 = vmul.f32 %v9195_v2, %v9065_v38  ;;  %v3081_v51 = vmul.f32 %v9195_v2, %v9071_v44  ;;  %v3082_v24 = vmul.f32 %v9195_v2, %v9077_v62 }
 0x4dc   : > { %v3134_v8 = vmul.f32 %v9193_v39, %v3101_v52  ;;  %v3135_v15 = vmul.f32 %v9193_v39, %v3102_v45  ;;  %v3083_v47 = vmul.f32 %v9195_v2, %v9083_v9  ;;  %v3084_v61 = vmul.f32 %v9195_v2, %v9089_v32 }
 0x4dd   : > { %v3085_v22 = vmul.f32 %v9195_v2, %v9095_v6  ;;  %v3086_v38 = vmul.f32 %v9195_v2, %v9101_v29  ;;  %v3087_v44 = vmul.f32 %v9195_v2, %v9107_v31  ;;  %v3088_v62 = vmul.f32 %v9195_v2, %v9113_v54 }
 0x4de   : > { %v3167_v10 = vadd.f32 %v9200_v5, %v3134_v8  ;;  %v3168_v26 = vadd.f32 %v9200_v5, %v3135_v15  ;;  %v3089_v9 = vmul.f32 %v9195_v2, %v9119_v14  ;;  %v3090_v32 = vmul.f32 %v9195_v2, %v9125_v53 }
 0x4df   : > { %v3091_v6 = vmul.f32 %v9195_v2, %v9131_v20  ;;  %v3092_v29 = vmul.f32 %v9195_v2, %v9137_v49  ;;  %v3093_v31 = vmul.f32 %v9195_v2, %v9143_v4  ;;  %v3094_v54 = vmul.f32 %v9195_v2, %v9149_v1 }
 0x4e0   : > { %v3199_v43 = vmax.f32 %v3167_v10, 0.0  ;;  %v3200_v40 = vmax.f32 %v3168_v26, 0.0  ;;  %v3095_v14 = vmul.f32 %v9195_v2, %v9155_v3  ;;  %v3096_v53 = vmul.f32 %v9195_v2, %v9161_v30 }
 0x4e1   : > { %v3110_v20 = vmul.f32 %v9193_v39, %v3077_v16  ;;  %v3111_v49 = vmul.f32 %v9193_v39, %v3078_v7  ;;  %v3112_v60 = vmul.f32 %v9193_v39, %v3079_v19  ;;  %v3113_v4 = vmul.f32 %v9193_v39, %v3080_v27  ;;  %v7257_v16 = vld [vmem:[%s11645_s3 + $0xf0] sm:$0xff] }
 0x4e2   : > { %v3231_v21 = vpack.c.bf16 %v3199_v43, %v3199_v43  ;;  %v3232_v12 = vpack.c.bf16 %v3200_v40, %v3200_v40  ;;  %v3114_v1 = vmul.f32 %v9193_v39, %v3081_v51  ;;  %v3097_v55 = vmul.f32 %v9195_v2, %v9167_v50  ;;  %v7258_v50 = vld [vmem:[%s11645_s3 + $0xf8] sm:$0xff] }
 0x4e3   : > { %v3098_v63 = vmul.f32 %v9195_v2, %v9173_v35  ;;  %v3099_v3 = vmul.f32 %v9195_v2, %v9002_v18  ;;  %v3115_v30 = vmul.f32 %v9193_v39, %v3082_v24  ;;  %v3116_v36 = vmul.f32 %v9193_v39, %v3083_v47  ;;  %5486 = vmatpush.bf16.msrb.mxu0 %v7258_v50 }
 0x4e4   : > { %v9234_v41 = vunpack.c.l.b16 %v3231_v21  ;;  %v9236_v56 = vunpack.c.l.b16 %v3232_v12  ;;  %v3117_v0 = vmul.f32 %v9193_v39, %v3084_v61  ;;  %v3118_v48 = vmul.f32 %v9193_v39, %v3085_v22  ;;  %v7249_v61 = vld [vmem:[%s11645_s3 + $0xb0] sm:$0xff] }
 0x4e5   : > { %v3119_v17 = vmul.f32 %v9193_v39, %v3086_v38  ;;  %v3073_v35 = vmul.f32 %v9195_v2, %v9023_v42  ;;  %v3100_v18 = vmul.f32 %v9195_v2, %v9005_v25  ;;  %v3120_v13 = vmul.f32 %v9193_v39, %v3087_v44  ;;  %v7250_v25 = vld [vmem:[%s11645_s3 + $0xb8] sm:$0xff] }
 0x4e6   : > { %11981 = vst [vmem:[#allocation41_spill] sm:$0xff] %v9234_v41  ;;  %v9252_v59 = vpack.c.b16 %v9236_v56, %v9234_v41  ;;  %v3121_v11 = vmul.f32 %v9193_v39, %v3088_v62  ;;  %v3122_v33 = vmul.f32 %v9193_v39, %v3089_v9  ;;  %v3123_v34 = vmul.f32 %v9193_v39, %v3090_v32  ;;  %v7256_v9 = vld [vmem:[%s11645_s3 + $0xe8] sm:$0xff] }
 0x4e7   : > { %11982 = vst [vmem:[#allocation39_spill] sm:$0xff] %v9236_v56  ;;  %v3124_v52 = vmul.f32 %v9193_v39, %v3091_v6  ;;  %v3125_v45 = vmul.f32 %v9193_v39, %v3092_v29  ;;  %v3126_v8 = vmul.f32 %v9193_v39, %v3093_v31  ;;  %v3127_v42 = vmul.f32 %v9193_v39, %v3094_v54 }
 0x4e8   : > { %11983 = vst [vmem:[#allocation45_spill] sm:$0xff] %v9252_v59  ;;  %v3128_v15 = vmul.f32 %v9193_v39, %v3095_v14  ;;  %v3129_v10 = vmul.f32 %v9193_v39, %v3096_v53  ;;  %v3130_v26 = vmul.f32 %v9193_v39, %v3097_v55  ;;  %v3131_v43 = vmul.f32 %v9193_v39, %v3098_v63  ;;  %v7241_v55 = vld [vmem:[%s11645_s3 + $0x70] sm:$0xff]  ;;  %v7248_v63 = vld [vmem:[%s11645_s3 + $0xa8] sm:$0xff] }
 0x4e9   : > { %v3132_v40 = vmul.f32 %v9193_v39, %v3099_v3  ;;  %v3071_v7 = vmul.f32 %v9195_v2, %v9015_v37  ;;  %v3133_v19 = vmul.f32 %v9193_v39, %v3100_v18  ;;  %5373 = vmatpush.bf16.msrb.mxu3 %v7250_v25  ;;  %v3072_v27 = vmul.f32 %v9195_v2, %v9019_v28  ;;  %v7247_v18 = vld [vmem:[%s11645_s3 + $0xa0] sm:$0xff] }
 0x4ea   : > { %v3074_v51 = vmul.f32 %v9195_v2, %v9031_v57  ;;  %v3106_v24 = vmul.f32 %v9193_v39, %v3073_v35  ;;  %v9309_v21 = vadd.f32 %v9200_v5, %v3110_v20  ;;  %5487 = vmatpush.bf16.msrb.mxu0 %v7257_v16  ;;  %v9312_v12 = vadd.f32 %v9200_v5, %v3111_v49  ;;  %v7242_v57 = vld [vmem:[%s11645_s3 + $0x78] sm:$0xff]  ;;  %v7240_v35 = vld [vmem:[%s11645_s3 + $0x68] sm:$0xff] }
 0x4eb   : > { %v9315_v37 = vadd.f32 %v9200_v5, %v3112_v60  ;;  %v9318_v47 = vadd.f32 %v9200_v5, %v3113_v4  ;;  %v9321_v28 = vadd.f32 %v9200_v5, %v3114_v1  ;;  %v9330_v22 = vadd.f32 %v9200_v5, %v3115_v30  ;;  %5260 = vmatpush.bf16.msrb.mxu2 %v7242_v57  ;;  %v7238_v57 = vld [vmem:[%s11645_s3 + $0x58] sm:$0xff] }
 0x4ec   : > { %v9333_v38 = vadd.f32 %v9200_v5, %v3116_v36  ;;  %v9336_v44 = vadd.f32 %v9200_v5, %v3117_v0  ;;  %v9339_v62 = vadd.f32 %v9200_v5, %v3118_v48  ;;  %v9345_v32 = vadd.f32 %v9200_v5, %v3119_v17  ;;  %v7255_v48 = vld [vmem:[%s11645_s3 + $0xe0] sm:$0xff] }
 0x4ed   : > { %v9348_v6 = vadd.f32 %v9200_v5, %v3120_v13  ;;  %v9351_v29 = vadd.f32 %v9200_v5, %v3121_v11  ;;  %v9354_v31 = vadd.f32 %v9200_v5, %v3122_v33  ;;  %v9357_v54 = vadd.f32 %v9200_v5, %v3123_v34  ;;  %5374 = vmatpush.bf16.msrb.mxu3 %v7249_v61  ;;  %v7254_v33 = vld [vmem:[%s11645_s3 + $0xd8] sm:$0xff]  ;;  %v7245_v61 = vld [vmem:[%s11645_s3 + $0x90] sm:$0xff] }
 0x4ee   : > { %v9360_v14 = vadd.f32 %v9200_v5, %v3124_v52  ;;  %v9363_v53 = vadd.f32 %v9200_v5, %v3125_v45  ;;  %v9366_v20 = vadd.f32 %v9200_v5, %v3126_v8  ;;  %v9369_v49 = vadd.f32 %v9200_v5, %v3127_v42  ;;  %5488 = vmatpush.bf16.msrb.mxu0 %v7256_v9  ;;  %v7239_v45 = vld [vmem:[%s11645_s3 + $0x60] sm:$0xff]  ;;  %v7246_v8 = vld [vmem:[%s11645_s3 + $0x98] sm:$0xff]  ;;  %v7228_v9 = vld [vmem:[%s11645_s3 + $0x8] sm:$0xff] }
 0x4ef   : > { %v9372_v60 = vadd.f32 %v9200_v5, %v3128_v15  ;;  %v9375_v4 = vadd.f32 %v9200_v5, %v3129_v10  ;;  %v9378_v1 = vadd.f32 %v9200_v5, %v3130_v26  ;;  %v3107_v3 = vmul.f32 %v9193_v39, %v3074_v51  ;;  %5261 = vmatpush.bf16.msrb.mxu2 %v7241_v55  ;;  %v7229_v26 = vld [vmem:[%s11645_s3 + $0x10] sm:$0xff] }
 0x4f0   : > { %v9388_v30 = vadd.f32 %v9200_v5, %v3131_v43  ;;  %v9391_v36 = vadd.f32 %v9200_v5, %v3132_v40  ;;  %v9394_v0 = vadd.f32 %v9200_v5, %v3133_v19  ;;  %v3104_v17 = vmul.f32 %v9193_v39, %v3071_v7  ;;  %v7253_v43 = vld [vmem:[%s11645_s3 + $0xd0] sm:$0xff]  ;;  %5152 = vmatpush.bf16.msra.mxu1 %v7229_v26 }
 0x4f1   : > { %5375 = vmatpush.bf16.msrb.mxu3 %v7248_v63  ;;  %v3105_v50 = vmul.f32 %v9193_v39, %v3072_v27  ;;  %v3139_v13 = vadd.f32 %v9200_v5, %v3106_v24  ;;  %v3140_v11 = vadd.f32 %v9200_v5, %v3107_v3  ;;  %v3175_v25 = vmax.f32 %v9309_v21, 0.0 }
 0x4f2   : > { %5489 = vmatpush.bf16.msrb.mxu0 %v7255_v48  ;;  %v9413_v34 = vadd.f32 %v9200_v5, %v3104_v17  ;;  %v3176_v10 = vmax.f32 %v9312_v12, 0.0  ;;  %v3177_v40 = vmax.f32 %v9315_v37, 0.0  ;;  %v3178_v16 = vmax.f32 %v9318_v47, 0.0 }
 0x4f3   : > { %5262 = vmatpush.bf16.msrb.mxu2 %v7240_v35  ;;  %v9416_v52 = vadd.f32 %v9200_v5, %v3105_v50  ;;  %v3171_v42 = vmax.f32 %v3139_v13, 0.0  ;;  %v3172_v15 = vmax.f32 %v3140_v11, 0.0  ;;  %v3179_v7 = vmax.f32 %v9321_v28, 0.0  ;;  %v7251_v50 = vld [vmem:[%s11645_s3 + $0xc0] sm:$0xff] }
 0x4f4   : > { %v3180_v19 = vmax.f32 %v9330_v22, 0.0  ;;  %v3181_v27 = vmax.f32 %v9333_v38, 0.0  ;;  %v3182_v51 = vmax.f32 %v9336_v44, 0.0  ;;  %v3183_v24 = vmax.f32 %v9339_v62, 0.0  ;;  %5153 = vmatpush.bf16.msra.mxu1 %v7228_v9 }
 0x4f5   : > { %5376 = vmatpush.bf16.msrb.mxu3 %v7247_v18  ;;  %v3184_v21 = vmax.f32 %v9345_v32, 0.0  ;;  %v3185_v12 = vmax.f32 %v9348_v6, 0.0  ;;  %v3186_v37 = vmax.f32 %v9351_v29, 0.0  ;;  %v3187_v47 = vmax.f32 %v9354_v31, 0.0  ;;  %v7252_v32 = vld [vmem:[%s11645_s3 + $0xc8] sm:$0xff] }
 0x4f6   : > { %5490 = vmatpush.bf16.msrb.mxu0 %v7254_v33  ;;  %v3188_v28 = vmax.f32 %v9357_v54, 0.0  ;;  %v3189_v22 = vmax.f32 %v9360_v14, 0.0  ;;  %v3190_v38 = vmax.f32 %v9363_v53, 0.0  ;;  %v3191_v44 = vmax.f32 %v9366_v20, 0.0  ;;  %v7236_v33 = vld [vmem:[%s11645_s3 + $0x48] sm:$0xff] }
 0x4f7   : > { %5263 = vmatpush.bf16.msrb.mxu2 %v7239_v45  ;;  %v3192_v62 = vmax.f32 %v9369_v49, 0.0  ;;  %v3193_v6 = vmax.f32 %v9372_v60, 0.0  ;;  %v3194_v29 = vmax.f32 %v9375_v4, 0.0  ;;  %v3195_v31 = vmax.f32 %v9378_v1, 0.0  ;;  %v7227_v4 = vld [vmem:[%s11645_s3] sm:$0xff]  ;;  %v7237_v1 = vld [vmem:[%s11645_s3 + $0x50] sm:$0xff] }
 0x4f8   : > { %v3196_v54 = vmax.f32 %v9388_v30, 0.0  ;;  %v3197_v14 = vmax.f32 %v9391_v36, 0.0  ;;  %v3198_v53 = vmax.f32 %v9394_v0, 0.0  ;;  %v9466_v20 = vpack.c.bf16 %v3171_v42, %v3171_v42  ;;  %v7244_v30 = vld [vmem:[%s11645_s3 + $0x88] sm:$0xff]  ;;  %5154 = vmatpush.bf16.msra.mxu1 %v7227_v4 }
 0x4f9   : > { %5377 = vmatpush.bf16.msrb.mxu3 %v7246_v8  ;;  %v9468_v49 = vpack.c.bf16 %v3172_v15, %v3172_v15  ;;  %v3207_v55 = vpack.c.bf16 %v3175_v25, %v3175_v25  ;;  %v3208_v63 = vpack.c.bf16 %v3176_v10, %v3176_v10  ;;  %v3209_v3 = vpack.c.bf16 %v3177_v40, %v3177_v40  ;;  %v7243_v40 = vld [vmem:[%s11645_s3 + $0x80] sm:$0xff] }
 0x4fa   : > { %5491 = vmatpush.bf16.msrb.mxu0 %v7253_v43  ;;  %v3210_v60 = vpack.c.bf16 %v3178_v16, %v3178_v16  ;;  %v3211_v36 = vpack.c.bf16 %v3179_v7, %v3179_v7  ;;  %v3212_v0 = vpack.c.bf16 %v3180_v19, %v3180_v19  ;;  %v3213_v48 = vpack.c.bf16 %v3181_v27, %v3181_v27 }
 0x4fb   : > { %5264 = vmatpush.bf16.msrb.mxu2 %v7238_v57  ;;  %v3214_v17 = vpack.c.bf16 %v3182_v51, %v3182_v51  ;;  %v3215_v35 = vpack.c.bf16 %v3183_v24, %v3183_v24  ;;  %v3216_v18 = vpack.c.bf16 %v3184_v21, %v3184_v21  ;;  %v3217_v13 = vpack.c.bf16 %v3185_v12, %v3185_v12 }
 0x4fc   : > { %v3218_v11 = vpack.c.bf16 %v3186_v37, %v3186_v37  ;;  %v3219_v45 = vpack.c.bf16 %v3187_v47, %v3187_v47  ;;  %v3220_v8 = vpack.c.bf16 %v3188_v28, %v3188_v28  ;;  %v3221_v42 = vpack.c.bf16 %v3189_v22, %v3189_v22  ;;  %v7235_v22 = vld [vmem:[%s11645_s3 + $0x40] sm:$0xff] }
 0x4fd   : > { %5378 = vmatpush.bf16.msrb.mxu3 %v7245_v61  ;;  %v3222_v15 = vpack.c.bf16 %v3190_v38, %v3190_v38  ;;  %v3223_v25 = vpack.c.bf16 %v3191_v44, %v3191_v44  ;;  %v3225_v10 = vpack.c.bf16 %v3193_v6, %v3193_v6  ;;  %v3227_v26 = vpack.c.bf16 %v3195_v31, %v3195_v31  ;;  %v7266_v61 = vld [vmem:[%s11645_s3 + $0x138] sm:$0xff] }
 0x4fe   : > { %5492 = vmatpush.bf16.msrb.mxu0 %v7252_v32  ;;  %v3229_v43 = vpack.c.bf16 %v3197_v14, %v3197_v14  ;;  %v3224_v16 = vpack.c.bf16 %v3192_v62, %v3192_v62  ;;  %v3226_v7 = vpack.c.bf16 %v3194_v29, %v3194_v29  ;;  %v3228_v19 = vpack.c.bf16 %v3196_v54, %v3196_v54 }
 0x4ff   : > { %5265 = vmatpush.bf16.msrb.mxu2 %v7237_v1  ;;  %v3230_v27 = vpack.c.bf16 %v3198_v53, %v3198_v53  ;;  %v9488_v51 = vunpack.c.l.b16 %v3207_v55  ;;  %v9490_v24 = vunpack.c.l.b16 %v3209_v3  ;;  %v9492_v21 = vunpack.c.l.b16 %v3211_v36  ;;  %5599 = vmatpush.bf16.msrb.mxu1 %v7266_v61 }
 0x500   : > { %v9494_v12 = vunpack.c.l.b16 %v3213_v48  ;;  %v9496_v37 = vunpack.c.l.b16 %v3215_v35  ;;  %v9498_v47 = vunpack.c.l.b16 %v3217_v13  ;;  %v9500_v28 = vunpack.c.l.b16 %v3219_v45 }
 0x501   : > { %5379 = vmatpush.bf16.msrb.mxu3 %v7244_v30  ;;  %v9502_v57 = vunpack.c.l.b16 %v3221_v42  ;;  %v9510_v38 = vunpack.c.l.b16 %v3223_v25  ;;  %v9512_v44 = vunpack.c.l.b16 %v3225_v10  ;;  %v9514_v62 = vunpack.c.l.b16 %v3227_v26 }
 0x502   : > { %5493 = vmatpush.bf16.msrb.mxu0 %v7251_v50  ;;  %v9516_v9 = vunpack.c.l.b16 %v3229_v43  ;;  %v9518_v32 = vunpack.c.l.b16 %v3208_v63  ;;  %v9520_v6 = vunpack.c.l.b16 %v3210_v60  ;;  %v9522_v29 = vunpack.c.l.b16 %v3212_v0 }
 0x503   : > { %5266 = vmatpush.bf16.msrb.mxu2 %v7236_v33  ;;  %v9524_v31 = vunpack.c.l.b16 %v3214_v17  ;;  %v9526_v54 = vunpack.c.l.b16 %v3216_v18  ;;  %v9528_v14 = vunpack.c.l.b16 %v3218_v11  ;;  %v9530_v53 = vunpack.c.l.b16 %v3220_v8 }
 0x504   : > { %11984 = vst [vmem:[#allocation48_spill] sm:$0xff] %v9516_v9  ;;  %v9532_v55 = vunpack.c.l.b16 %v3222_v15  ;;  %v9534_v3 = vunpack.c.l.b16 %v3224_v16  ;;  %v9536_v63 = vunpack.c.l.b16 %v3226_v7  ;;  %v9538_v60 = vunpack.c.l.b16 %v3228_v19 }
 0x505   : > { %5380 = vmatpush.bf16.msrb.mxu3 %v7243_v40  ;;  %v9540_v4 = vunpack.c.l.b16 %v3230_v27  ;;  %v3170_v1 = vmax.f32 %v9416_v52, 0.0  ;;  %v3250_v30 = vunpack.c.l.b16 %v9466_v20  ;;  %v3362_v36 = vunpack.c.l.b16 %v9468_v49 }
 0x506   : > { %v9547_v0 = vpack.c.b16 %v9518_v32, %v9488_v51  ;;  %v9551_v48 = vpack.c.b16 %v9520_v6, %v9490_v24  ;;  %v9555_v17 = vpack.c.b16 %v9522_v29, %v9492_v21  ;;  %v9559_v50 = vpack.c.b16 %v9524_v31, %v9494_v12 }
 0x507   : > { %5267 = vmatpush.bf16.msrb.mxu2 %v7235_v22  ;;  %11985 = vst [vmem:[#allocation49_spill] sm:$0xff] %v9540_v4  ;;  %v9563_v52 = vpack.c.b16 %v9526_v54, %v9496_v37  ;;  %v9567_v20 = vpack.c.b16 %v9528_v14, %v9498_v47  ;;  %v9571_v49 = vpack.c.b16 %v9530_v53, %v9500_v28  ;;  %v3169_v45 = vmax.f32 %v9413_v34, 0.0 }
 0x508   : > { %v9575_v35 = vpack.c.b16 %v9532_v55, %v9502_v57  ;;  %v9579_v18 = vpack.c.b16 %v9534_v3, %v9510_v38  ;;  %v9583_v13 = vpack.c.b16 %v9536_v63, %v9512_v44  ;;  %v9587_v11 = vpack.c.b16 %v9538_v60, %v9514_v62 }
 0x509   : > { %v9591_v33 = vpack.c.b16 %v9540_v4, %v9516_v9  ;;  %v3202_v8 = vpack.c.bf16 %v3170_v1, %v3170_v1  ;;  %v3378_v42 = vpack.c.b16 %v3362_v36, %v3250_v30  ;;  %v3201_v15 = vpack.c.bf16 %v3169_v45, %v3169_v45 }
 0x50a   : > { %11986 = vst [vmem:[#allocation20_spill] sm:$0xff] %v9583_v13  ;;  %v3538_v26 = vpack.c.b16 %v3362_v36, %v3362_v36  ;;  %v3266_v19 = vpack.c.b16 %v3250_v30, %v3250_v30  ;;  %v3075_v34 = vmul.f32 %v9195_v2, %v9035_v23  ;;  %v3415_v30 = vshrl.u32 %v9547_v0, 16 }
 0x50b   : > { %11987 = vst [vmem:[#allocation24_spill] sm:$0xff] %v9591_v33  ;;  %v3361_v25 = vunpack.c.l.b16 %v3202_v8  ;;  %v3401_v10 = vshrl.u32 %v3378_v42, 16  ;;  %v3249_v43 = vunpack.c.l.b16 %v3201_v15  ;;  %v3404_v27 = vshll.u32 %v3378_v42, 16 }
 0x50c   : > { %v3558_v7 = vshll.u32 %v3538_v26, 16  ;;  %v3285_v9 = vshrl.u32 %v3266_v19, 16 }
 0x50d   : > { %v3403_v40 = vrot.slane %v3401_v10, 7  ;;  %v3537_v16 = vpack.c.b16 %v3361_v25, %v3361_v25  ;;  %v3377_v61 = vpack.c.b16 %v3361_v25, %v3249_v43  ;;  %v3265_v36 = vpack.c.b16 %v3249_v43, %v3249_v43 }
 0x50e   : > { %v3560_v41 = vrot.slane %v3558_v7, 3 }
 0x50f   : > { %v3406_v22 = vor.u32 %v3404_v27, %v3403_v40  ;;  %v3554_v46 = vshll.u32 %v3537_v16, 16  ;;  %v3394_v45 = vshrl.u32 %v3377_v61, 16  ;;  %v3397_v25 = vshll.u32 %v3377_v61, 16 }
 0x510   : > { %v3653_v42 = vsel %vm9597_vm12, %v3403_v40, %v3560_v41  ;;  %v3282_v19 = vshrl.u32 %v3265_v36, 16  ;;  %v3076_v41 = vmul.f32 %v9195_v2, %v9041_v58 }
 0x511   : > { %v9604_v8 = vsel %vm9597_vm12, %v3285_v9, %v3406_v22  ;;  %v3556_v15 = vrot.slane %v3554_v46, 3  ;;  %v3396_v23 = vrot.slane %v3394_v45, 7  ;;  %v3672_v10 = vsel %vm3633_vm10, %v3653_v42, 0 }
 0x512   : > { %11990 = vst [vmem:[#allocation32_spill] sm:$0xff] %v9604_v8  ;;  %5155 = vmatmul.bf16.vlgmr.msra.gmra.mxu1 %v9604_v8  ;;  %v3989_v26 = vrot.slane %v9604_v8, 1  ;;  %v3990_v43 = vrot.slane %v3672_v10, 1  ;;  %v3704_v16 = vshll.u32 %v9604_v8, 16  ;;  %v3708_v7 = vshll.u32 %v3672_v10, 16 }
 0x513   : > { %v3540_v9 = vpack.c.b16 %v9518_v32, %v9518_v32  ;;  %v3399_v27 = vor.u32 %v3397_v25, %v3396_v23  ;;  %v3652_v46 = vsel %vm9597_vm12, %v3396_v23, %v3556_v15  ;;  %v3702_v61 = vshrl.u32 %v9604_v8, 16 }
 0x514   : > { %v9619_v40 = vsel %vm758_vm4, %v3989_v26, %v3990_v43  ;;  %v3706_v22 = vrot.slane %v3704_v16, 1  ;;  %v3108_v45 = vmul.f32 %v9193_v39, %v3075_v34  ;;  %v3417_v42 = vrot.slane %v3415_v30, 7 }
 0x515   : > { %11991 = vst [vmem:[#allocation36_spill] sm:$0xff] %v9619_v40  ;;  %v9625_v32 = vsel %vm9597_vm12, %v3282_v19, %v3399_v27  ;;  %5381 = vmatmul.bf16.vlgmr.msrb.gmra.mxu3 %v9619_v40  ;;  %v9629_v36 = vsel %vm3633_vm10, %v3652_v46, 0  ;;  %v3710_v2 = vrot.slane %v3708_v7, 1  ;;  %v3268_v15 = vpack.c.b16 %v9488_v51, %v9488_v51 }
 0x516   : > { %5494 = vmatmul.bf16.vlgmr.msrb.gmra.mxu0 %v9625_v32  ;;  %v3707_v58 = vor.u32 %v3706_v22, %v3702_v61  ;;  %v3418_v23 = vshll.u32 %v9547_v0, 16  ;;  %v3566_v34 = vshll.u32 %v3540_v9, 16  ;;  %v3992_v25 = vrot.slane %v9625_v32, 1 }
 0x517   : > { %v3993_v26 = vrot.slane %v9629_v36, 1  ;;  %v3718_v16 = vshll.u32 %v9625_v32, 16  ;;  %v3109_v19 = vmul.f32 %v9193_v39, %v3076_v41  ;;  %v3141_v27 = vadd.f32 %v9200_v5, %v3108_v45 }
 0x518   : > { %v9636_v30 = vsel %vm448_vm0, %v3707_v58, %v3710_v2  ;;  %v3420_v7 = vor.u32 %v3418_v23, %v3417_v42  ;;  %v4038_v51 = vsel %vm813_vm5, %v3990_v43, 0  ;;  %v3712_v0 = vshrl.u32 %v3672_v10, 16 }
 0x519   : > { %11992 = vst [vmem:[#allocation50_spill] sm:$0xff] %v9636_v30  ;;  %5268 = vmatmul.bf16.vlgmr.msrb.gmra.mxu2 %v9636_v30  ;;  %v3716_v9 = vshrl.u32 %v9625_v32, 16  ;;  %v3720_v46 = vrot.slane %v3718_v16, 1  ;;  %v3722_v61 = vshll.u32 %v9629_v36, 16  ;;  %v3291_v22 = vshrl.u32 %v3268_v15, 16 }
 0x51a   : > { %v3568_v58 = vrot.slane %v3566_v34, 3  ;;  %v4136_v33 = vunpack.c.l.b16 %v9625_v32  ;;  %v9648_v56 = vunpack.c.l.b16 %v3672_v10  ;;  %v9651_v39 = vsel %vm758_vm4, %v3992_v25, %v3993_v26 }
 0x51b   : > { %11993 = vst [vmem:[#allocation51_spill] sm:$0xff] %v9651_v39  ;;  %v4085_v45 = vsel %vm7739_vm3, %v4038_v51, 0  ;;  %v3714_v23 = vor.u32 %v3712_v0, %v3710_v2  ;;  %v3721_v43 = vor.u32 %v3720_v46, %v3716_v9  ;;  %v3142_v4 = vadd.f32 %v9200_v5, %v3109_v19 }
 0x51c   : > { %v3173_v59 = vmax.f32 %v3141_v27, 0.0  ;;  %v3724_v16 = vrot.slane %v3722_v61, 1  ;;  %v9658_v15 = vsel %vm9597_vm12, %v3291_v22, %v3420_v7  ;;  %v4427_v34 = vpack.c.b16 %v4136_v33, %v9648_v56 }
 0x51d   : > { %11995 = vst [vmem:[#allocation44_spill] sm:$0xff] %v9658_v15  ;;  %v4133_v10 = vunpack.c.l.b16 %v9604_v8  ;;  %v4138_v25 = vunpack.c.l.b16 %v9651_v39  ;;  %v9663_v13 = vunpack.c.l.b16 %v4085_v45  ;;  %v4148_v51 = vunpack.c.l.b16 %v9629_v36 }
 0x51e   : > { %v9667_v2 = vsel %vm448_vm0, %v3721_v43, %v3724_v16  ;;  %v3941_v5 = vsel %vm7739_vm3, %v3714_v23, 0  ;;  %v3655_v19 = vsel %vm9597_vm12, %v3417_v42, %v3568_v58  ;;  %v3174_v27 = vmax.f32 %v3142_v4, 0.0  ;;  %v7265_v42 = vld [vmem:[%s11645_s3 + $0x130] sm:$0xff] }
 0x51f   : > { %11996 = vst [vmem:[#allocation52_spill] sm:$0xff] %v9663_v13  ;;  %v3429_v33 = vshrl.u32 %v9555_v17, 16  ;;  %v4429_v7 = vpack.c.b16 %v4138_v25, %v9663_v13  ;;  %v4137_v0 = vunpack.c.l.b16 %v9667_v2  ;;  %v9676_v9 = vunpack.c.l.b16 %v3941_v5  ;;  %5600 = vmatpush.bf16.msrb.mxu1 %v7265_v42 }
 0x520   : > { %11997 = vst [vmem:[#allocation47_spill] sm:$0xff] %v9667_v2  ;;  %v3205_v46 = vpack.c.bf16 %v3173_v59, %v3173_v59  ;;  %v4430_v61 = vpack.c.b16 %v4133_v10, %v4148_v51  ;;  %v3541_v22 = vpack.c.b16 %v9520_v6, %v9520_v6  ;;  %v3422_v4 = vshrl.u32 %v9551_v48, 16 }
 0x521   : > { %11998 = vst [vmem:[#allocation53_spill] sm:$0xff] %v9676_v9  ;;  %v3206_v58 = vpack.c.bf16 %v3174_v27, %v3174_v27  ;;  %v3431_v45 = vrot.slane %v3429_v33, 7  ;;  %v4428_v23 = vpack.c.b16 %v4137_v0, %v9676_v9  ;;  %v4041_v59 = vsel %vm813_vm5, %v3993_v26, 0 }
 0x522   : > { %5160 = vmatmul.bf16.gmra.mxu1 %v4427_v34  ;;  %v9685_v43 = vunpack.c.l.b16 %v3205_v46  ;;  %v3269_v6 = vpack.c.b16 %v9490_v24, %v9490_v24  ;;  %v3270_v34 = vpack.c.b16 %v9492_v21, %v9492_v21  ;;  %v3432_v10 = vshll.u32 %v9555_v17, 16 }
 0x523   : > { %v3542_v25 = vpack.c.b16 %v9522_v29, %v9522_v29  ;;  %v3570_v5 = vshll.u32 %v3541_v22, 16  ;;  %v3726_v27 = vshrl.u32 %v9629_v36, 16  ;;  %v9697_v33 = vsel %vm3633_vm10, %v3655_v19, 0 }
 0x524   : > { %v3424_v26 = vrot.slane %v3422_v4, 7  ;;  %v3363_v0 = vunpack.c.l.b16 %v3206_v58  ;;  %v3434_v24 = vor.u32 %v3432_v10, %v3431_v45  ;;  %v4142_v46 = vunpack.c.h.b16 %v9625_v32 }
 0x525   : > { %5386 = vmatmul.bf16.gmra.mxu3 %v4429_v7  ;;  %v3425_v7 = vshll.u32 %v9551_v48, 16  ;;  %v4086_v21 = vsel %vm7739_vm3, %v4041_v59, 0  ;;  %v3728_v17 = vor.u32 %v3726_v27, %v3724_v16  ;;  %v3297_v22 = vshrl.u32 %v3270_v34, 16 }
 0x526   : > { %5499 = vmatmul.bf16.gmra.mxu0 %v4430_v61  ;;  %v3294_v61 = vshrl.u32 %v3269_v6, 16  ;;  %v3574_v42 = vshll.u32 %v3542_v25, 16  ;;  %v11711_v36 = vunpack.c.l.b16 %v9697_v33  ;;  %v4144_v19 = vunpack.c.h.b16 %v9651_v39 }
 0x527   : > { %v3427_v29 = vor.u32 %v3425_v7, %v3424_v26  ;;  %v3572_v4 = vrot.slane %v3570_v5, 3  ;;  %v3379_v32 = vpack.c.b16 %v3363_v0, %v9685_v43  ;;  %v4436_v58 = vpack.c.b16 %v4148_v51, %v4142_v46 }
 0x528   : > { %v9715_v59 = vsel %vm9597_vm12, %v3297_v22, %v3434_v24  ;;  %v4139_v6 = vunpack.c.h.b16 %v9604_v8  ;;  %v3942_v34 = vsel %vm7739_vm3, %v3728_v17, 0  ;;  %v3576_v5 = vrot.slane %v3574_v42, 3 }
 0x529   : > { %5273 = vmatmul.bf16.gmra.mxu2 %v4428_v23  ;;  %v9705_v23 = vunpack.c.l.b16 %v4086_v21  ;;  %v9709_v48 = vsel %vm9597_vm12, %v3294_v61, %v3427_v29  ;;  %v3656_v10 = vsel %vm9597_vm12, %v3424_v26, %v3572_v4  ;;  %v3443_v7 = vshrl.u32 %v9563_v52, 16 }
 0x52a   : > { %v4169_v16 = vunpack.c.l.b16 %v9709_v48  ;;  %v4001_v25 = vrot.slane %v9709_v48, 1  ;;  %v9728_v27 = vsel %vm3633_vm10, %v3656_v10, 0  ;;  %v4143_v21 = vunpack.c.h.b16 %v9667_v2 }
 0x52b   : > { %11999 = vst [vmem:[#allocation54_spill] sm:$0xff] %v9705_v23  ;;  %v4438_v24 = vpack.c.b16 %v9705_v23, %v4144_v19  ;;  %v11712_v46 = vrot.slane %v9728_v27, 1  ;;  %v9734_v26 = vunpack.c.l.b16 %v3942_v34  ;;  %v3760_v61 = vshll.u32 %v9709_v48, 16 }
 0x52c   : > { %v9725_v51 = vpack.c.b16 %v4169_v16, %v11711_v36  ;;  %v4439_v29 = vpack.c.b16 %v9648_v56, %v4139_v6  ;;  %v3408_v22 = vshrl.u32 %v3379_v32, 16  ;;  %v3764_v19 = vshll.u32 %v9728_v27, 16 }
 0x52d   : > { %12001 = vst [vmem:[#allocation9_spill] sm:$0xff] %v9734_v26  ;;  %v9742_v42 = vsel %vm758_vm4, %v4001_v25, %v11712_v46  ;;  %v3758_v4 = vshrl.u32 %v9709_v48, 16  ;;  %v4172_v16 = vunpack.c.h.b16 %v9709_v48  ;;  %v3657_v34 = vsel %vm9597_vm12, %v3431_v45, %v3576_v5 }
 0x52e   : > { %12000 = vst [vmem:[#allocation5_spill] sm:$0xff] %v9725_v51  ;;  %v3445_v10 = vrot.slane %v3443_v7, 7  ;;  %v3539_v36 = vpack.c.b16 %v3363_v0, %v3363_v0  ;;  %v3543_v6 = vpack.c.b16 %v9524_v31, %v9524_v31  ;;  %v4437_v25 = vpack.c.b16 %v9734_v26, %v4143_v21 }
 0x52f   : > { %12002 = vst [vmem:[#allocation40_spill] sm:$0xff] %v9742_v42  ;;  %v9752_v17 = vrot.slane %v3764_v19, 1  ;;  %v3446_v45 = vshll.u32 %v9563_v52, 16  ;;  %v3544_v0 = vpack.c.b16 %v9526_v54, %v9526_v54  ;;  %v3410_v31 = vrot.slane %v3408_v22, 7 }
 0x530   : > { %v3271_v7 = vpack.c.b16 %v9494_v12, %v9494_v12  ;;  %v3436_v21 = vshrl.u32 %v9559_v50, 16  ;;  %v3562_v19 = vshll.u32 %v3539_v36, 16  ;;  %v3411_v52 = vshll.u32 %v3379_v32, 16 }
 0x531   : > { %v9773_v54 = vsel %vm3633_vm10, %v3657_v34, 0  ;;  %v3453_v39 = vshll.u32 %v9567_v20, 16 }
 0x532   : > { %5164 = vmatmul.bf16.gmra.mxu1 %v4436_v58  ;;  %v3762_v58 = vrot.slane %v3760_v61, 1  ;;  %v3272_v61 = vpack.c.b16 %v9496_v37, %v9496_v37  ;;  %v3267_v37 = vpack.c.b16 %v9685_v43, %v9685_v43  ;;  %v3438_v22 = vrot.slane %v3436_v21, 7 }
 0x533   : > { %v3564_v26 = vrot.slane %v3562_v19, 3 }
 0x534   : > { %v3763_v46 = vor.u32 %v3762_v58, %v3758_v4  ;;  %v3578_v4 = vshll.u32 %v3543_v6, 16  ;;  %v3439_v58 = vshll.u32 %v9559_v50, 16  ;;  %v3288_v43 = vshrl.u32 %v3267_v37, 16 }
 0x535   : > { %5390 = vmatmul.bf16.gmra.mxu3 %v4438_v24  ;;  %v12003_v24 = vunpack.c.l.b16 %v9728_v27  ;;  %v3457_v37 = vshrl.u32 %v9571_v49, 16 }
 0x536   : > { %5503 = vmatmul.bf16.gmra.mxu0 %v4439_v29  ;;  %v9765_v5 = vsel %vm448_vm0, %v3763_v46, %v9752_v17  ;;  %v3448_v29 = vor.u32 %v3446_v45, %v3445_v10  ;;  %v3303_v46 = vshrl.u32 %v3272_v61, 16  ;;  %v3441_v12 = vor.u32 %v3439_v58, %v3438_v22 }
 0x537   : > { %v9756_v23 = vpack.c.b16 %v12003_v24, %v4172_v16  ;;  %12005 = vst [vmem:[#allocation2_spill] sm:$0xff] %v9765_v5  ;;  %v3582_v16 = vshll.u32 %v3544_v0, 16  ;;  %v3300_v24 = vshrl.u32 %v3271_v7, 16  ;;  %v11716_v45 = vunpack.c.l.b16 %v9773_v54 }
 0x538   : > { %v3580_v36 = vrot.slane %v3578_v4, 3  ;;  %v9779_v6 = vsel %vm9597_vm12, %v3303_v46, %v3448_v29  ;;  %v3654_v29 = vsel %vm9597_vm12, %v3410_v31, %v3564_v26 }
 0x539   : > { %12004 = vst [vmem:[#allocation11_spill] sm:$0xff] %v9756_v23  ;;  %5277 = vmatmul.bf16.gmra.mxu2 %v4437_v25  ;;  %v3413_v25 = vor.u32 %v3411_v52, %v3410_v31  ;;  %v9783_v32 = vsel %vm9597_vm12, %v3300_v24, %v3441_v12  ;;  %v3584_v21 = vrot.slane %v3582_v16, 3  ;;  %v9815_v26 = vsel %vm3633_vm10, %v3654_v29, 0 }
 0x53a   : > { %v4187_v50 = vunpack.c.l.b16 %v9783_v32  ;;  %v3658_v34 = vsel %vm9597_vm12, %v3438_v22, %v3580_v36  ;;  %v4007_v7 = vrot.slane %v9783_v32, 1  ;;  %v3788_v52 = vshll.u32 %v9783_v32, 16 }
 0x53b   : > { %v9791_v61 = vsel %vm9597_vm12, %v3288_v43, %v3413_v25  ;;  %v9794_v0 = vsel %vm3633_vm10, %v3658_v34, 0  ;;  %v3786_v31 = vshrl.u32 %v9783_v32, 16  ;;  %v3545_v24 = vpack.c.b16 %v9528_v14, %v9528_v14 }
 0x53c   : > { %v9801_v19 = vpack.c.b16 %v4187_v50, %v11716_v45  ;;  %v11715_v4 = vrot.slane %v9794_v0, 1  ;;  %v3732_v22 = vshll.u32 %v9791_v61, 16  ;;  %v11717_v58 = vunpack.c.l.b16 %v9794_v0 }
 0x53d   : > { %v3790_v16 = vrot.slane %v3788_v52, 1  ;;  %v3792_v25 = vshll.u32 %v9794_v0, 16  ;;  %v4190_v12 = vunpack.c.h.b16 %v9783_v32  ;;  %v3659_v36 = vsel %vm9597_vm12, %v3445_v10, %v3584_v21 }
 0x53e   : > { %v9811_v46 = vsel %vm758_vm4, %v4007_v7, %v11715_v4  ;;  %v3274_v43 = vpack.c.b16 %v9500_v28, %v9500_v28  ;;  %v3459_v50 = vrot.slane %v3457_v37, 7  ;;  %v3995_v29 = vrot.slane %v9791_v61, 1 }
 0x53f   : > { %12006 = vst [vmem:[#allocation8_spill] sm:$0xff] %v9811_v46  ;;  %v3791_v34 = vor.u32 %v3790_v16, %v3786_v31  ;;  %v9827_v7 = vrot.slane %v3792_v25, 1  ;;  %v3996_v52 = vrot.slane %v9815_v26, 1  ;;  %v3734_v4 = vrot.slane %v3732_v22, 1 }
 0x540   : > { %v9833_v14 = vpack.c.b16 %v11717_v58, %v4190_v12  ;;  %v3460_v45 = vshll.u32 %v9571_v49, 16  ;;  %v3546_v10 = vpack.c.b16 %v9530_v53, %v9530_v53  ;;  %v3586_v21 = vshll.u32 %v3545_v24, 16 }
 0x541   : > { %v9841_v28 = vsel %vm448_vm0, %v3791_v34, %v9827_v7  ;;  %v4151_v37 = vunpack.c.l.b16 %v9791_v61  ;;  %v3730_v22 = vshrl.u32 %v9791_v61, 16  ;;  %v3736_v31 = vshll.u32 %v9815_v26, 16 }
 0x542   : > { %5168 = vmatmul.bf16.gmra.mxu1 %v9604_v8  ;;  %v3462_v16 = vor.u32 %v3460_v45, %v3459_v50  ;;  %v3273_v49 = vpack.c.b16 %v9498_v47, %v9498_v47  ;;  %v3450_v25 = vshrl.u32 %v9567_v20, 16  ;;  %v3309_v53 = vshrl.u32 %v3274_v43, 16 }
 0x543   : > { %v9850_v12 = vsel %vm758_vm4, %v3995_v29, %v3996_v52  ;;  %v3735_v58 = vor.u32 %v3734_v4, %v3730_v22  ;;  %v3590_v34 = vshll.u32 %v3546_v10, 16  ;;  %v9853_v24 = vsel %vm3633_vm10, %v3659_v36, 0 }
 0x544   : > { %12007 = vst [vmem:[#allocation4_spill] sm:$0xff] %v9850_v12  ;;  %v4160_v45 = vunpack.c.l.b16 %v9658_v15  ;;  %v3738_v47 = vrot.slane %v3736_v31, 1  ;;  %v3588_v8 = vrot.slane %v3586_v21, 3  ;;  %v4153_v43 = vunpack.c.l.b16 %v9850_v12 }
 0x545   : > { %5394 = vmatmul.bf16.gmra.mxu3 %v9619_v40  ;;  %v3452_v40 = vrot.slane %v3450_v25, 7  ;;  %v3306_v2 = vshrl.u32 %v3273_v49, 16  ;;  %v9863_v4 = vsel %vm9597_vm12, %v3309_v53, %v3462_v16  ;;  %v4157_v36 = vunpack.c.l.b16 %v9815_v26 }
 0x546   : > { %5507 = vmatmul.bf16.gmra.mxu0 %v9791_v61  ;;  %v9867_v10 = vsel %vm448_vm0, %v3735_v58, %v3738_v47  ;;  %v3471_v16 = vshrl.u32 %v9579_v18, 16 }
 0x547   : > { %v3455_v29 = vor.u32 %v3453_v39, %v3452_v40  ;;  %12009 = vst [vmem:[#allocation7_spill] sm:$0xff] %v9867_v10  ;;  %v3660_v20 = vsel %vm9597_vm12, %v3452_v40, %v3588_v8  ;;  %v9885_v8 = vpack.c.b16 %v4153_v43, %v9663_v13  ;;  %v4152_v40 = vunpack.c.l.b16 %v9867_v10 }
 0x548   : > { %v9878_v39 = vsel %vm3633_vm10, %v3660_v20, 0  ;;  %v4451_v49 = vpack.c.b16 %v4160_v45, %v4157_v36  ;;  %v7264_v45 = vld [vmem:[%s11645_s3 + $0x128] sm:$0xff]  ;;  %v4044_v13 = vsel %vm813_vm5, %v3996_v52, 0  ;;  %v3275_v52 = vpack.c.b16 %v9502_v57, %v9502_v57 }
 0x549   : > { %5281 = vmatmul.bf16.gmra.mxu2 %v9636_v30  ;;  %v9857_v30 = vpack.c.b16 %v4151_v37, %v9648_v56  ;;  %v11726_v56 = vunpack.c.l.b16 %v9853_v24  ;;  %v9875_v21 = vsel %vm9597_vm12, %v3306_v2, %v3455_v29  ;;  %v3592_v37 = vrot.slane %v3590_v34, 3  ;;  %12010 = vst [vmem:[#allocation22_spill] sm:$0xff] %v9885_v8  ;;  %5601 = vmatpush.bf16.msrb.mxu1 %v7264_v45 }
 0x54a   : > { %v4205_v22 = vunpack.c.l.b16 %v9875_v21  ;;  %v4013_v58 = vrot.slane %v9875_v21, 1  ;;  %v11725_v31 = vrot.slane %v9878_v39, 1  ;;  %v3816_v34 = vshll.u32 %v9875_v21, 16 }
 0x54b   : > { %12008 = vst [vmem:[#allocation19_spill] sm:$0xff] %v9857_v30  ;;  %v3820_v43 = vshll.u32 %v9878_v39, 16  ;;  %v4208_v29 = vunpack.c.h.b16 %v9875_v21  ;;  %v3814_v20 = vshrl.u32 %v9875_v21, 16  ;;  %v9911_v2 = vpack.c.b16 %v4152_v40, %v9676_v9 }
 0x54c   : > { %v9891_v25 = vpack.c.b16 %v4205_v22, %v11726_v56  ;;  %v9896_v53 = vsel %vm758_vm4, %v4013_v58, %v11725_v31  ;;  %v3818_v22 = vrot.slane %v3816_v34, 1  ;;  %v3661_v58 = vsel %vm9597_vm12, %v3459_v50, %v3592_v37 }
 0x54d   : > { %12012 = vst [vmem:[#allocation16_spill] sm:$0xff] %v9896_v53  ;;  %v3473_v31 = vrot.slane %v3471_v16, 7  ;;  %v3547_v56 = vpack.c.b16 %v9532_v55, %v9532_v55  ;;  %v3276_v50 = vpack.c.b16 %v9510_v38, %v9510_v38  ;;  %v3474_v37 = vshll.u32 %v9579_v18, 16 }
 0x54e   : > { %12011 = vst [vmem:[#allocation13_spill] sm:$0xff] %v9891_v25  ;;  %v9918_v25 = vrot.slane %v3820_v43, 1  ;;  %v3548_v55 = vpack.c.b16 %v9534_v3, %v9534_v3  ;;  %v3740_v16 = vshrl.u32 %v9815_v26, 16  ;;  %v3464_v40 = vshrl.u32 %v9575_v35, 16 }
 0x54f   : > { %12013 = vst [vmem:[#allocation3_spill] sm:$0xff] %v9911_v2  ;;  %v3476_v34 = vor.u32 %v3474_v37, %v3473_v31  ;;  %v3594_v38 = vshll.u32 %v3547_v56, 16  ;;  %v4154_v18 = vunpack.c.h.b16 %v9791_v61  ;;  %v4087_v3 = vsel %vm7739_vm3, %v4044_v13, 0 }
 0x550   : > { %v3742_v43 = vor.u32 %v3740_v16, %v3738_v47  ;;  %v3466_v26 = vrot.slane %v3464_v40, 7  ;;  %v3315_v45 = vshrl.u32 %v3276_v50, 16  ;;  %v4156_v57 = vunpack.c.h.b16 %v9850_v12 }
 0x551   : > { %v3312_v37 = vshrl.u32 %v3275_v52, 16  ;;  %v9944_v9 = vpack.c.b16 %v4157_v36, %v4154_v18  ;;  %v3596_v13 = vrot.slane %v3594_v38, 3  ;;  %v4155_v38 = vunpack.c.h.b16 %v9867_v10 }
 0x552   : > { %5173 = vmatmul.bf16.gmra.mxu1 %v9857_v30  ;;  %v3819_v30 = vor.u32 %v3818_v22, %v3814_v20  ;;  %v3598_v20 = vshll.u32 %v3548_v55, 16  ;;  %v9942_v22 = vunpack.c.l.b16 %v4087_v3  ;;  %v9949_v47 = vsel %vm9597_vm12, %v3315_v45, %v3476_v34 }
 0x553   : > { %12016 = vst [vmem:[#allocation31_spill] sm:$0xff] %v9944_v9  ;;  %v3485_v55 = vshrl.u32 %v9587_v11, 16  ;;  %v3662_v16 = vsel %vm9597_vm12, %v3466_v26, %v3596_v13  ;;  %v12020_v45 = vunpack.c.l.b16 %v9697_v33 }
 0x554   : > { %12015 = vst [vmem:[#allocation10_spill] sm:$0xff] %v9942_v22  ;;  %v3600_v40 = vrot.slane %v3598_v20, 3  ;;  %v9965_v34 = vpack.c.b16 %v9942_v22, %v4156_v57  ;;  %v9969_v18 = vsel %vm3633_vm10, %v3662_v16, 0 }
 0x555   : > { %5399 = vmatmul.bf16.gmra.mxu3 %v9885_v8  ;;  %v12014_v8 = vunpack.c.l.b16 %v9878_v39  ;;  %12017 = vst [vmem:[#allocation12_spill] sm:$0xff] %v9949_v47  ;;  %v3487_v16 = vrot.slane %v3485_v55, 7  ;;  %v3277_v55 = vpack.c.b16 %v9512_v44, %v9512_v44 }
 0x556   : > { %5512 = vmatmul.bf16.gmra.mxu0 %v4451_v49  ;;  %12018 = vst [vmem:[#allocation35_spill] sm:$0xff] %v9965_v34 }
 0x557   : > { %v9915_v49 = vpack.c.b16 %v12014_v8, %v4208_v29  ;;  %v9929_v8 = vsel %vm448_vm0, %v3819_v30, %v9918_v25  ;;  %v9938_v29 = vsel %vm3633_vm10, %v3661_v58, 0  ;;  %v3467_v30 = vshll.u32 %v9575_v35, 16 }
 0x558   : > { %v11732_v61 = vunpack.c.l.b16 %v9938_v29  ;;  %v4163_v58 = vunpack.c.h.b16 %v9658_v15  ;;  %v3943_v35 = vsel %vm7739_vm3, %v3742_v43, 0  ;;  %v3318_v22 = vshrl.u32 %v3277_v55, 16 }
 0x559   : > { %5286 = vmatmul.bf16.gmra.mxu2 %v9911_v2  ;;  %v3469_v56 = vor.u32 %v3467_v30, %v3466_v26  ;;  %v9971_v3 = vunpack.c.l.b16 %v3943_v35  ;;  %v11735_v30 = vunpack.c.l.b16 %v9969_v18  ;;  %v11733_v26 = vrot.slane %v9969_v18, 1 }
 0x55a   : > { %v4457_v20 = vpack.c.b16 %v12020_v45, %v4163_v58  ;;  %v3663_v58 = vsel %vm9597_vm12, %v3473_v31, %v3600_v40  ;;  %v3549_v45 = vpack.c.b16 %v9536_v63, %v9536_v63  ;;  %v3550_v63 = vpack.c.b16 %v9538_v60, %v9538_v60  ;;  %v12023_v40 = vld [vmem:[#allocation20_spill] sm:$0xff] }
 0x55b   : > { %v9956_v50 = vsel %vm9597_vm12, %v3312_v37, %v3469_v56  ;;  %12019 = vst [vmem:[#allocation18_spill] sm:$0xff] %v9971_v3  ;;  %v3848_v56 = vshll.u32 %v9969_v18, 16 }
 0x55c   : > { %v4223_v36 = vunpack.c.l.b16 %v9956_v50  ;;  %v4019_v52 = vrot.slane %v9956_v50, 1  ;;  %v3844_v57 = vshll.u32 %v9956_v50, 16  ;;  %v4226_v13 = vunpack.c.h.b16 %v9956_v50 }
 0x55d   : > { %v3842_v35 = vshrl.u32 %v9956_v50, 16 }
 0x55e   : > { %v9975_v43 = vpack.c.b16 %v4223_v36, %v11732_v61  ;;  %v9986_v37 = vsel %vm758_vm4, %v4019_v52, %v11733_v26  ;;  %v3846_v36 = vrot.slane %v3844_v57, 1  ;;  %v9996_v61 = vpack.c.b16 %v9971_v3, %v4155_v38 }
 0x55f   : > { %12021 = vst [vmem:[#allocation15_spill] sm:$0xff] %v9986_v37  ;;  %v10000_v52 = vpack.c.b16 %v11735_v30, %v4226_v13  ;;  %v3488_v57 = vshll.u32 %v9587_v11, 16  ;;  %v3478_v38 = vshrl.u32 %v12023_v40, 16  ;;  %v3602_v13 = vshll.u32 %v3549_v45, 16 }
 0x560   : > { %12022 = vst [vmem:[#allocation17_spill] sm:$0xff] %v9996_v61  ;;  %v3847_v26 = vor.u32 %v3846_v36, %v3842_v35  ;;  %v10019_v11 = vsel %vm3633_vm10, %v3663_v58, 0  ;;  %v3481_v36 = vshll.u32 %v12023_v40, 16  ;;  %v3606_v30 = vshll.u32 %v3550_v63, 16 }
 0x561   : > { %v3480_v35 = vrot.slane %v3478_v38, 7  ;;  %v11740_v3 = vunpack.c.l.b16 %v10019_v11  ;;  %v3604_v12 = vrot.slane %v3602_v13, 3  ;;  %v3998_v45 = vrot.slane %v9658_v15, 1 }
 0x562   : > { %5177 = vmatmul.bf16.gmra.mxu1 %v9944_v9  ;;  %v3608_v40 = vrot.slane %v3606_v30, 3  ;;  %v3750_v13 = vshll.u32 %v9697_v33, 16  ;;  %v12030_v30 = vld [vmem:[#allocation49_spill] sm:$0xff] }
 0x563   : > { %v3664_v63 = vsel %vm9597_vm12, %v3480_v35, %v3604_v12 }
 0x565   : > { %5403 = vmatmul.bf16.gmra.mxu3 %v9965_v34  ;;  %v10002_v34 = vrot.slane %v3848_v56, 1  ;;  %v3490_v56 = vor.u32 %v3488_v57, %v3487_v16  ;;  %v3999_v57 = vrot.slane %v9697_v33, 1 }
 0x566   : > { %5516 = vmatmul.bf16.gmra.mxu0 %v4457_v20  ;;  %v3278_v20 = vpack.c.b16 %v9514_v62, %v9514_v62  ;;  %v3746_v62 = vshll.u32 %v9658_v15, 16 }
 0x567   : > { %v10012_v31 = vsel %vm448_vm0, %v3847_v26, %v10002_v34  ;;  %v3483_v26 = vor.u32 %v3481_v36, %v3480_v35  ;;  %v12026_v36 = vld [vmem:[#allocation45_spill] sm:$0xff]  ;;  %v10050_v12 = vsel %vm758_vm4, %v3998_v45, %v3999_v57 }
 0x568   : > { %v3321_v60 = vshrl.u32 %v3278_v20, 16  ;;  %v3748_v58 = vrot.slane %v3746_v62, 1  ;;  %v10041_v62 = vsel %vm3633_vm10, %v3664_v63, 0  ;;  %12028 = vst [vmem:[#allocation46_spill] sm:$0xff] %v10050_v12 }
 0x569   : > { %5290 = vmatmul.bf16.gmra.mxu2 %v9996_v61  ;;  %v10031_v38 = vsel %vm9597_vm12, %v3318_v22, %v3483_v26  ;;  %12025 = vst [vmem:[#allocation43_spill] sm:$0xff] %v10041_v62  ;;  %v3499_v22 = vshrl.u32 %v12026_v36, 16  ;;  %v11744_v26 = vrot.slane %v10041_v62, 1 }
 0x56a   : > { %v10025_v44 = vsel %vm9597_vm12, %v3321_v60, %v3490_v56  ;;  %v4241_v20 = vunpack.c.l.b16 %v10031_v38  ;;  %v4025_v55 = vrot.slane %v10031_v38, 1  ;;  %v3744_v56 = vshrl.u32 %v9658_v15, 16 }
 0x56b   : > { %12024 = vst [vmem:[#allocation25_spill] sm:$0xff] %v10025_v44  ;;  %v4244_v45 = vunpack.c.h.b16 %v10031_v38  ;;  %v3870_v10 = vshrl.u32 %v10031_v38, 16 }
 0x56c   : > { %v10046_v60 = vpack.c.b16 %v4241_v20, %v11740_v3  ;;  %v3749_v35 = vor.u32 %v3748_v58, %v3744_v56  ;;  %v10057_v63 = vsel %vm758_vm4, %v4025_v55, %v11744_v26  ;;  %v3876_v20 = vshll.u32 %v10041_v62, 16  ;;  %v12031_v26 = vld [vmem:[#allocation39_spill] sm:$0xff] }
 0x56d   : > { %12029 = vst [vmem:[#allocation23_spill] sm:$0xff] %v10057_v63  ;;  %v3752_v3 = vrot.slane %v3750_v13, 1  ;;  %v3665_v58 = vsel %vm9597_vm12, %v3487_v16, %v3608_v40  ;;  %v3501_v56 = vrot.slane %v3499_v22, 7  ;;  %v3552_v61 = vpack.c.b16 %v12031_v26, %v12031_v26  ;;  %v12035_v40 = vld [vmem:[#allocation41_spill] sm:$0xff] }
 0x56e   : > { %12027 = vst [vmem:[#allocation28_spill] sm:$0xff] %v10046_v60  ;;  %v12033_v13 = vunpack.c.l.b16 %v10041_v62  ;;  %v3502_v16 = vshll.u32 %v12026_v36, 16  ;;  %v3280_v22 = vpack.c.b16 %v12035_v40, %v12035_v40  ;;  %v3754_v26 = vshrl.u32 %v9697_v33, 16 }
 0x56f   : > { %v10071_v9 = vsel %vm448_vm0, %v3749_v35, %v3752_v3  ;;  %v12036_v35 = vld [vmem:[#allocation48_spill] sm:$0xff] }
 0x570   : > { %12032 = vst [vmem:[#allocation14_spill] sm:$0xff] %v10071_v9  ;;  %v10076_v2 = vpack.c.b16 %v12033_v13, %v4244_v45  ;;  %v3279_v60 = vpack.c.b16 %v12036_v35, %v12036_v35  ;;  %v3504_v62 = vor.u32 %v3502_v16, %v3501_v56  ;;  %v3756_v40 = vor.u32 %v3754_v26, %v3752_v3 }
 0x571   : > { %v3327_v35 = vshrl.u32 %v3280_v22, 16 }
 0x572   : > { %5181 = vmatmul.bf16.gmra.mxu1 %v9658_v15  ;;  %v3872_v15 = vshll.u32 %v10031_v38, 16  ;;  %12034 = vst [vmem:[#allocation30_spill] sm:$0xff] %v10076_v2  ;;  %v3324_v16 = vshrl.u32 %v3279_v60, 16  ;;  %v3944_v3 = vsel %vm7739_vm3, %v3756_v40, 0 }
 0x574   : > { %v3874_v55 = vrot.slane %v3872_v15, 1 }
 0x575   : > { %5407 = vmatmul.bf16.gmra.mxu3 %v10050_v12  ;;  %v3551_v12 = vpack.c.b16 %v12030_v30, %v12030_v30  ;;  %v10082_v30 = vrot.slane %v3876_v20, 1 }
 0x576   : > { %5520 = vmatmul.bf16.gmra.mxu0 %v9709_v48  ;;  %v4047_v48 = vsel %vm813_vm5, %v3999_v57, 0  ;;  %v3875_v15 = vor.u32 %v3874_v55, %v3870_v10  ;;  %v12037_v57 = vld [vmem:[#allocation24_spill] sm:$0xff]  ;;  %v10095_v10 = vsel %vm3633_vm10, %v3665_v58, 0  ;;  %v3614_v55 = vshll.u32 %v3552_v61, 16 }
 0x577   : > { %v3492_v44 = vshrl.u32 %v12037_v57, 16  ;;  %v3610_v45 = vshll.u32 %v3551_v12, 16  ;;  %v4088_v36 = vsel %vm7739_vm3, %v4047_v48, 0  ;;  %v3495_v33 = vshll.u32 %v12037_v57, 16 }
 0x578   : > { %v10092_v13 = vsel %vm448_vm0, %v3875_v15, %v10082_v30  ;;  %v4171_v12 = vunpack.c.l.b16 %v9742_v42  ;;  %v11756_v48 = vunpack.c.l.b16 %v10095_v10  ;;  %v4178_v15 = vunpack.c.l.b16 %v9715_v59 }
 0x579   : > { %5294 = vmatmul.bf16.gmra.mxu2 %v10071_v9  ;;  %v3494_v20 = vrot.slane %v3492_v44, 7  ;;  %v10098_v9 = vunpack.c.l.b16 %v4088_v36  ;;  %v3612_v63 = vrot.slane %v3610_v45, 3  ;;  %v10111_v61 = vsel %vm9597_vm12, %v3327_v35, %v3504_v62 }
 0x57a   : > { %12039 = vst [vmem:[#allocation27_spill] sm:$0xff] %v10111_v61  ;;  %v3616_v22 = vrot.slane %v3614_v55, 3  ;;  %v10124_v45 = vunpack.c.l.b16 %v3944_v3  ;;  %v4170_v62 = vunpack.c.l.b16 %v9765_v5 }
 0x57b   : > { %12038 = vst [vmem:[#allocation21_spill] sm:$0xff] %v10098_v9  ;;  %v3497_v2 = vor.u32 %v3495_v33, %v3494_v20  ;;  %v3666_v58 = vsel %vm9597_vm12, %v3494_v20, %v3612_v63  ;;  %v10118_v26 = vpack.c.b16 %v4171_v12, %v10098_v9  ;;  %v12042_v63 = vunpack.c.l.b16 %v9728_v27 }
 0x57c   : > { %v10121_v57 = vsel %vm3633_vm10, %v3666_v58, 0  ;;  %12041 = vst [vmem:[#allocation29_spill] sm:$0xff] %v10124_v45  ;;  %v3768_v9 = vshrl.u32 %v9728_v27, 16 }
 0x57d   : > { %v10107_v44 = vsel %vm9597_vm12, %v3324_v16, %v3497_v2  ;;  %12040 = vst [vmem:[#allocation37_spill] sm:$0xff] %v10118_v26  ;;  %v11757_v40 = vrot.slane %v10121_v57, 1  ;;  %v4469_v20 = vpack.c.b16 %v4178_v15, %v12042_v63  ;;  %v11760_v33 = vunpack.c.l.b16 %v10121_v57  ;;  %v7263_v16 = vld [vmem:[%s11645_s3 + $0x120] sm:$0xff] }
 0x57e   : > { %v4259_v60 = vunpack.c.l.b16 %v10107_v44  ;;  %v4031_v2 = vrot.slane %v10107_v44, 1  ;;  %v3900_v55 = vshll.u32 %v10107_v44, 16  ;;  %v3904_v12 = vshll.u32 %v10121_v57, 16  ;;  %5602 = vmatpush.bf16.msrb.mxu1 %v7263_v16 }
 0x57f   : > { %v3898_v15 = vshrl.u32 %v10107_v44, 16  ;;  %v4262_v58 = vunpack.c.h.b16 %v10107_v44  ;;  %v10149_v63 = vpack.c.b16 %v4170_v62, %v10124_v45  ;;  %v4005_v45 = vrot.slane %v9773_v54, 1 }
 0x580   : > { %v10129_v36 = vpack.c.b16 %v4259_v60, %v11756_v48  ;;  %v10140_v35 = vsel %vm758_vm4, %v4031_v2, %v11757_v40  ;;  %v3902_v3 = vrot.slane %v3900_v55, 1  ;;  %v3667_v48 = vsel %vm9597_vm12, %v3501_v56, %v3616_v22 }
 0x581   : > { %12043 = vst [vmem:[#allocation42_spill] sm:$0xff] %v10140_v35  ;;  %v3906_v40 = vrot.slane %v3904_v12, 1  ;;  %v3770_v56 = vor.u32 %v3768_v9, %v9752_v17  ;;  %v4174_v12 = vunpack.c.h.b16 %v9742_v42  ;;  %v12051_v17 = vunpack.c.l.b16 %v9773_v54 }
 0x582   : > { %5186 = vmatmul.bf16.gmra.mxu1 %v9725_v51  ;;  %12044 = vst [vmem:[#allocation26_spill] sm:$0xff] %v10149_v63  ;;  %v3903_v2 = vor.u32 %v3902_v3, %v3898_v15  ;;  %v4181_v15 = vunpack.c.h.b16 %v9715_v59 }
 0x584   : > { %v10163_v62 = vsel %vm448_vm0, %v3903_v2, %v3906_v40  ;;  %v4475_v2 = vpack.c.b16 %v12051_v17, %v4181_v15  ;;  %v3774_v15 = vshll.u32 %v9715_v59, 16 }
 0x585   : > { %5412 = vmatmul.bf16.gmra.mxu3 %v10118_v26  ;;  %v12045_v26 = vrot.slane %v9728_v27, 1  ;;  %12046 = vst [vmem:[#allocation33_spill] sm:$0xff] %v10163_v62  ;;  %v4263_v41 = vunpack.c.h.b16 %v10163_v62 }
 0x586   : > { %5525 = vmatmul.bf16.gmra.mxu0 %v4469_v20  ;;  %v10155_v20 = vpack.c.b16 %v11760_v33, %v4262_v58  ;;  %v4173_v58 = vunpack.c.h.b16 %v9765_v5 }
 0x587   : > { %v4050_v55 = vsel %vm813_vm5, %v12045_v26, 0  ;;  %v3945_v26 = vsel %vm7739_vm3, %v3770_v56, 0  ;;  %v3908_v56 = vshrl.u32 %v10121_v57, 16 }
 0x588   : > { %v4089_v1 = vsel %vm7739_vm3, %v4050_v55, 0  ;;  %v10181_v9 = vunpack.c.l.b16 %v3945_v26  ;;  %v10187_v55 = vsel %vm3633_vm10, %v3667_v48, 0  ;;  %v3914_v48 = vshll.u32 %v10111_v61, 16 }
 0x589   : > { %5299 = vmatmul.bf16.gmra.mxu2 %v10149_v63  ;;  %v10169_v16 = vunpack.c.l.b16 %v4089_v1  ;;  %12052 = vst [vmem:[#allocation49_spill] sm:$0xff] %v10187_v55  ;;  %v3910_v26 = vor.u32 %v3908_v56, %v3906_v40  ;;  %v3918_v17 = vshll.u32 %v10187_v55, 16  ;;  %v11772_v40 = vrot.slane %v10187_v55, 1 }
 0x58a   : > { %12050 = vst [vmem:[#allocation45_spill] sm:$0xff] %v10181_v9  ;;  %v10191_v33 = vpack.c.b16 %v10181_v9, %v4173_v58  ;;  %v3912_v58 = vshrl.u32 %v10111_v61, 16  ;;  %v3922_v5 = vshrl.u32 %v10187_v55, 16 }
 0x58b   : > { %12047 = vst [vmem:[#allocation34_spill] sm:$0xff] %v10169_v16  ;;  %v10178_v3 = vpack.c.b16 %v10169_v16, %v4174_v12  ;;  %v3920_v42 = vrot.slane %v3918_v17, 1  ;;  %v11774_v17 = vunpack.c.l.b16 %v10163_v62 }
 0x58c   : > { %12053 = vst [vmem:[#allocation39_spill] sm:$0xff] %v10191_v33 }
 0x58d   : > { %12049 = vst [vmem:[#allocation20_spill] sm:$0xff] %v10178_v3 }
 0x58f   : > { %v5156_v22 = vpop.f32.mrf.mxu1 }
 0x592   : > { %5190 = vmatmul.bf16.gmra.mxu1 %v9756_v23  ;;  %v4004_v23 = vrot.slane %v9715_v59, 1 }
 0x593   : > { %v10175_v27 = vpop.f32.mrf.mxu0 }
 0x594   : > { %12048 = vst [vmem:[#allocation6_spill] sm:$0xff] %v10175_v27  ;;  %v11770_v27 = vunpack.c.l.b16 %v10187_v55 }
 0x595   : > { %5416 = vmatmul.bf16.gmra.mxu3 %v10178_v3  ;;  %v3955_v3 = vsel %vm7739_vm3, %v3910_v26, 0  ;;  %v4083_v26 = vsel %vm813_vm5, %v11772_v40, 0 }
 0x596   : > { %5529 = vmatmul.bf16.gmra.mxu0 %v4475_v2  ;;  %v10205_v9 = vpack.c.b16 %v4259_v60, %v11770_v27  ;;  %v11773_v60 = vunpack.c.l.b16 %v10140_v35 }
 0x597   : > { %v5158_v1 = vpop.f32.mrf.mxu1 }
 0x598   : > { %v5382_v12 = vpop.f32.mrf.mxu3  ;;  %12055 = vst [vmem:[#allocation48_spill] sm:$0xff] %v10205_v9  ;;  %v3924_v9 = vor.u32 %v3922_v5, %v3920_v42  ;;  %v3772_v5 = vshrl.u32 %v9715_v59, 16 }
 0x599   : > { %5303 = vmatmul.bf16.gmra.mxu2 %v10191_v33 }
 0x59b   : > { %v10195_v16 = vpop.f32.mrf.mxu0 }
 0x59c   : > { %12054 = vst [vmem:[#allocation41_spill] sm:$0xff] %v10195_v16  ;;  %v5269_v2 = vpop.f32.mrf.mxu2  ;;  %v3916_v16 = vrot.slane %v3914_v48, 1  ;;  %v3776_v48 = vrot.slane %v3774_v15, 1 }
 0x59d   : > { %v5270_v56 = vadd.f32 %v5269_v2, %v5156_v22  ;;  %v10218_v2 = vunpack.c.l.b16 %v3955_v3 }
 0x59e   : > { %v3917_v27 = vor.u32 %v3916_v16, %v3912_v58  ;;  %v3778_v16 = vshll.u32 %v9773_v54, 16 }
 0x59f   : > { %v5161_v33 = vpop.f32.mrf.mxu1  ;;  %v10214_v63 = vadd.f32 %v5382_v12, %v5270_v56  ;;  %v3956_v12 = vsel %vm7739_vm3, %v3924_v9, 0  ;;  %v3777_v9 = vor.u32 %v3776_v48, %v3772_v5  ;;  %v4053_v5 = vsel %vm813_vm5, %v4005_v45, 0 }
 0x5a0   : > { %v5384_v22 = vpop.f32.mrf.mxu3  ;;  %v4100_v33 = vsel %vm7739_vm3, %v4083_v26, 0  ;;  %v10224_v51 = vsel %vm448_vm0, %v3917_v27, %v3920_v42  ;;  %v10233_v15 = vunpack.c.l.b16 %v3956_v12  ;;  %v10241_v27 = vsel %vm758_vm4, %v4004_v23, %v4005_v45 }
 0x5a1   : > { %12056 = vst [vmem:[#allocation24_spill] sm:$0xff] %v10224_v51  ;;  %v10228_v56 = vunpack.c.l.b16 %v4100_v33  ;;  %v4269_v3 = vunpack.c.l.b16 %v10224_v51 }
 0x5a2   : > { %5194 = vmatmul.bf16.gmra.mxu1 %v9715_v59  ;;  %12058 = vst [vmem:[#allocation56_spill] sm:$0xff] %v10233_v15  ;;  %v10249_v40 = vpack.c.b16 %v11774_v17, %v10233_v15 }
 0x5a3   : > { %12057 = vst [vmem:[#allocation55_spill] sm:$0xff] %v10228_v56  ;;  %v5500_v58 = vpop.f32.mrf.mxu0  ;;  %v10238_v26 = vpack.c.b16 %v11773_v60, %v10228_v56  ;;  %v10244_v33 = vpack.c.b16 %v4269_v3, %v10218_v2  ;;  %v3780_v60 = vrot.slane %v3778_v16, 1  ;;  %v3782_v3 = vshrl.u32 %v9773_v54, 16 }
 0x5a4   : > { %v5271_v42 = vpop.f32.mrf.mxu2  ;;  %12061 = vst [vmem:[#allocation59_spill] sm:$0xff] %v10249_v40  ;;  %v7262_v40 = vld [vmem:[%s11645_s3 + $0x118] sm:$0xff] }
 0x5a5   : > { %12059 = vst [vmem:[#allocation57_spill] sm:$0xff] %v10238_v26  ;;  %v5272_v12 = vadd.f32 %v5271_v42, %v5158_v1  ;;  %5420 = vmatmul.bf16.gmra.mxu3 %v10241_v27  ;;  %v10256_v48 = vsel %vm448_vm0, %v3777_v9, %v3780_v60  ;;  %v3784_v42 = vor.u32 %v3782_v3, %v3780_v60  ;;  %v4188_v60 = vunpack.c.l.b16 %v9841_v28 }
 0x5a6   : > { %12060 = vst [vmem:[#allocation58_spill] sm:$0xff] %v10244_v33  ;;  %5533 = vmatmul.bf16.gmra.mxu0 %v9783_v32  ;;  %v4090_v32 = vsel %vm7739_vm3, %v4053_v5, 0  ;;  %v12064_v3 = vunpack.c.l.b16 %v9794_v0  ;;  %5603 = vmatpush.bf16.msrb.mxu1 %v7262_v40  ;;  %v4192_v40 = vunpack.c.h.b16 %v9811_v46 }
 0x5a7   : > { %v5162_v58 = vpop.f32.mrf.mxu1  ;;  %v10253_v26 = vadd.f32 %v5384_v22, %v5272_v12  ;;  %v10265_v22 = vunpack.c.l.b16 %v4090_v32  ;;  %v4189_v12 = vunpack.c.l.b16 %v9811_v46  ;;  %v3946_v45 = vsel %vm7739_vm3, %v3784_v42, 0 }
 0x5a8   : > { %v5387_v23 = vpop.f32.mrf.mxu3  ;;  %v10277_v5 = vunpack.c.l.b16 %v3946_v45 }
 0x5a9   : > { %5307 = vmatmul.bf16.gmra.mxu2 %v10256_v48  ;;  %v4196_v23 = vunpack.c.l.b16 %v9779_v6 }
 0x5ab   : > { %v10261_v17 = vpop.f32.mrf.mxu0  ;;  %v4487_v32 = vpack.c.b16 %v4196_v23, %v12064_v3  ;;  %v12065_v23 = vrot.slane %v9794_v0, 1 }
 0x5ac   : > { %v5274_v1 = vpop.f32.mrf.mxu2 }
 0x5ad   : > { %v10275_v1 = vpack.c.b16 %v4189_v12, %v10265_v22  ;;  %v10289_v12 = vpack.c.b16 %v4188_v60, %v10277_v5 }
 0x5af   : > { %v5165_v16 = vpop.f32.mrf.mxu1  ;;  %12063 = vst [vmem:[#allocation61_spill] sm:$0xff] %v10275_v1 }
 0x5b0   : > { %v5388_v9 = vpop.f32.mrf.mxu3 }
 0x5b2   : > { %5199 = vmatmul.bf16.gmra.mxu1 %v9801_v19 }
 0x5b3   : > { %v10272_v54 = vpop.f32.mrf.mxu0 }
 0x5b4   : > { %12062 = vst [vmem:[#allocation60_spill] sm:$0xff] %v10272_v54  ;;  %v5275_v56 = vpop.f32.mrf.mxu2 }
 0x5b5   : > { %v5276_v15 = vadd.f32 %v5275_v56, %v5162_v58  ;;  %5425 = vmatmul.bf16.gmra.mxu3 %v10275_v1  ;;  %v4056_v56 = vsel %vm813_vm5, %v12065_v23, 0  ;;  %v3796_v58 = vshrl.u32 %v9794_v0, 16  ;;  %v4199_v23 = vunpack.c.h.b16 %v9779_v6 }
 0x5b6   : > { %5538 = vmatmul.bf16.gmra.mxu0 %v4487_v32 }
 0x5b7   : > { %v5167_v42 = vpop.f32.mrf.mxu1  ;;  %v10286_v33 = vadd.f32 %v5388_v9, %v5276_v15  ;;  %v3798_v15 = vor.u32 %v3796_v58, %v9827_v7 }
 0x5b8   : > { %v5391_v45 = vpop.f32.mrf.mxu3  ;;  %v4091_v42 = vsel %vm7739_vm3, %v4056_v56, 0  ;;  %v12071_v56 = vunpack.c.l.b16 %v9853_v24 }
 0x5b9   : > { %5312 = vmatmul.bf16.gmra.mxu2 %v10289_v12  ;;  %v10302_v51 = vunpack.c.l.b16 %v4091_v42  ;;  %v3947_v0 = vsel %vm7739_vm3, %v3798_v15, 0 }
 0x5ba   : > { %v4493_v58 = vpack.c.b16 %v12071_v56, %v4199_v23  ;;  %v4010_v56 = vrot.slane %v9779_v6, 1 }
 0x5bb   : > { %v5506_v3 = vpop.f32.mrf.mxu0  ;;  %12067 = vst [vmem:[#allocation63_spill] sm:$0xff] %v10302_v51  ;;  %v10311_v7 = vpack.c.b16 %v10302_v51, %v4192_v40 }
 0x5bc   : > { %v5278_v32 = vpop.f32.mrf.mxu2 }
 0x5bd   : > { %v5279_v9 = vadd.f32 %v5278_v32, %v5165_v16  ;;  %12069 = vst [vmem:[#allocation65_spill] sm:$0xff] %v10311_v7  ;;  %v4191_v16 = vunpack.c.h.b16 %v9841_v28 }
 0x5bf   : > { %v5169_v60 = vpop.f32.mrf.mxu1  ;;  %v10299_v1 = vadd.f32 %v5391_v45, %v5279_v9  ;;  %v10314_v45 = vunpack.c.l.b16 %v3947_v0  ;;  %v3802_v0 = vshll.u32 %v9779_v6, 16 }
 0x5c0   : > { %v5393_v54 = vpop.f32.mrf.mxu3 }
 0x5c1   : > { %12066 = vst [vmem:[#allocation62_spill] sm:$0xff] %v10299_v1  ;;  %v10320_v42 = vpack.c.b16 %v10314_v45, %v4191_v16  ;;  %v3800_v16 = vshrl.u32 %v9779_v6, 16 }
 0x5c2   : > { %5203 = vmatmul.bf16.gmra.mxu1 %v9833_v14  ;;  %12070 = vst [vmem:[#allocation66_spill] sm:$0xff] %v10314_v45 }
 0x5c3   : > { %v10308_v3 = vpop.f32.mrf.mxu0 }
 0x5c4   : > { %12068 = vst [vmem:[#allocation64_spill] sm:$0xff] %v10308_v3  ;;  %v5280_v54 = vpop.f32.mrf.mxu2 }
 0x5c5   : > { %5429 = vmatmul.bf16.gmra.mxu3 %v10311_v7  ;;  %v3804_v54 = vrot.slane %v3802_v0, 1  ;;  %v3806_v7 = vshll.u32 %v9853_v24, 16 }
 0x5c6   : > { %5542 = vmatmul.bf16.gmra.mxu0 %v4493_v58  ;;  %v4011_v58 = vrot.slane %v9853_v24, 1 }
 0x5c7   : > { %v5171_v32 = vpop.f32.mrf.mxu1 }
 0x5c8   : > { %v5395_v15 = vpop.f32.mrf.mxu3  ;;  %v10334_v46 = vsel %vm758_vm4, %v4010_v56, %v4011_v58  ;;  %v3810_v56 = vshrl.u32 %v9853_v24, 16 }
 0x5c9   : > { %5316 = vmatmul.bf16.gmra.mxu2 %v10320_v42 }
 0x5cb   : > { %v10323_v9 = vpop.f32.mrf.mxu0 }
 0x5cc   : > { %12072 = vst [vmem:[#allocation67_spill] sm:$0xff] %v10323_v9  ;;  %v5282_v40 = vpop.f32.mrf.mxu2 }
 0x5cd   : > { %v5283_v3 = vadd.f32 %v5282_v40, %v5169_v60 }
 0x5cf   : > { %v5174_v51 = vpop.f32.mrf.mxu1  ;;  %v10326_v1 = vadd.f32 %v5395_v15, %v5283_v3  ;;  %v3808_v15 = vrot.slane %v3806_v7, 1 }
 0x5d0   : > { %v5397_v23 = vpop.f32.mrf.mxu3  ;;  %v3805_v51 = vor.u32 %v3804_v54, %v3800_v16  ;;  %v4207_v16 = vunpack.c.l.b16 %v9896_v53 }
 0x5d1   : > { %12073 = vst [vmem:[#allocation68_spill] sm:$0xff] %v10326_v1 }
 0x5d2   : > { %5207 = vmatmul.bf16.gmra.mxu1 %v9779_v6  ;;  %v10341_v1 = vsel %vm448_vm0, %v3805_v51, %v3808_v15 }
 0x5d3   : > { %v5513_v9 = vpop.f32.mrf.mxu0 }
 0x5d4   : > { %v5284_v45 = vpop.f32.mrf.mxu2  ;;  %v4059_v9 = vsel %vm813_vm5, %v4011_v58, 0 }
 0x5d5   : > { %v5285_v60 = vadd.f32 %v5284_v45, %v5171_v32  ;;  %5433 = vmatmul.bf16.gmra.mxu3 %v10334_v46  ;;  %v3812_v32 = vor.u32 %v3810_v56, %v3808_v15  ;;  %v4206_v15 = vunpack.c.l.b16 %v9929_v8  ;;  %v12080_v56 = vunpack.c.l.b16 %v9878_v39 }
 0x5d6   : > { %5546 = vmatmul.bf16.gmra.mxu0 %v9875_v21  ;;  %v4092_v21 = vsel %vm7739_vm3, %v4059_v9, 0 }
 0x5d7   : > { %v5175_v3 = vpop.f32.mrf.mxu1  ;;  %v10338_v40 = vadd.f32 %v5397_v23, %v5285_v60  ;;  %v10350_v23 = vunpack.c.l.b16 %v4092_v21  ;;  %v4214_v60 = vunpack.c.l.b16 %v9863_v4  ;;  %v3948_v58 = vsel %vm7739_vm3, %v3812_v32, 0 }
 0x5d8   : > { %v5400_v0 = vpop.f32.mrf.mxu3  ;;  %v10362_v9 = vunpack.c.l.b16 %v3948_v58 }
 0x5d9   : > { %12074 = vst [vmem:[#allocation69_spill] sm:$0xff] %v10338_v40  ;;  %5320 = vmatmul.bf16.gmra.mxu2 %v10341_v1  ;;  %v12077_v0 = vld [vmem:[#allocation13_spill] sm:$0xff]  ;;  %v4505_v21 = vpack.c.b16 %v4214_v60, %v12080_v56  ;;  %v12082_v60 = vrot.slane %v9878_v39, 1 }
 0x5da   : > { %12076 = vst [vmem:[#allocation71_spill] sm:$0xff] %v10350_v23 }
 0x5db   : > { %v10346_v54 = vpop.f32.mrf.mxu0 }
 0x5dc   : > { %12075 = vst [vmem:[#allocation70_spill] sm:$0xff] %v10346_v54  ;;  %v5287_v45 = vpop.f32.mrf.mxu2 }
 0x5dd   : > { %v10360_v45 = vpack.c.b16 %v4207_v16, %v10350_v23  ;;  %v10374_v16 = vpack.c.b16 %v4206_v15, %v10362_v9 }
 0x5df   : > { %v5178_v7 = vpop.f32.mrf.mxu1  ;;  %12079 = vst [vmem:[#allocation73_spill] sm:$0xff] %v10360_v45 }
 0x5e0   : > { %v5401_v51 = vpop.f32.mrf.mxu3 }
 0x5e2   : > { %5212 = vmatmul.bf16.gmra.mxu1 %v12077_v0 }
 0x5e3   : > { %v10357_v24 = vpop.f32.mrf.mxu0 }
 0x5e4   : > { %12078 = vst [vmem:[#allocation72_spill] sm:$0xff] %v10357_v24  ;;  %v5288_v54 = vpop.f32.mrf.mxu2  ;;  %v7261_v24 = vld [vmem:[%s11645_s3 + $0x110] sm:$0xff] }
 0x5e5   : > { %v5289_v40 = vadd.f32 %v5288_v54, %v5175_v3  ;;  %5438 = vmatmul.bf16.gmra.mxu3 %v10360_v45  ;;  %5604 = vmatpush.bf16.msrb.mxu1 %v7261_v24  ;;  %v4062_v3 = vsel %vm813_vm5, %v12082_v60, 0  ;;  %v3824_v54 = vshrl.u32 %v9878_v39, 16  ;;  %v4210_v24 = vunpack.c.h.b16 %v9896_v53 }
 0x5e6   : > { %5551 = vmatmul.bf16.gmra.mxu0 %v4505_v21  ;;  %v4217_v60 = vunpack.c.h.b16 %v9863_v4 }
 0x5e7   : > { %v5180_v32 = vpop.f32.mrf.mxu1  ;;  %v10371_v0 = vadd.f32 %v5401_v51, %v5289_v40  ;;  %v3826_v40 = vor.u32 %v3824_v54, %v9918_v25 }
 0x5e8   : > { %v5404_v58 = vpop.f32.mrf.mxu3  ;;  %v4093_v32 = vsel %vm7739_vm3, %v4062_v3, 0  ;;  %v12088_v3 = vunpack.c.l.b16 %v9938_v29 }
 0x5e9   : > { %12081 = vst [vmem:[#allocation74_spill] sm:$0xff] %v10371_v0  ;;  %5325 = vmatmul.bf16.gmra.mxu2 %v10374_v16  ;;  %v10387_v0 = vunpack.c.l.b16 %v4093_v32  ;;  %v3949_v39 = vsel %vm7739_vm3, %v3826_v40, 0 }
 0x5ea   : > { %v4511_v54 = vpack.c.b16 %v12088_v3, %v4217_v60  ;;  %v4016_v3 = vrot.slane %v9863_v4, 1 }
 0x5eb   : > { %v5519_v56 = vpop.f32.mrf.mxu0  ;;  %12084 = vst [vmem:[#allocation76_spill] sm:$0xff] %v10387_v0  ;;  %v10396_v25 = vpack.c.b16 %v10387_v0, %v4210_v24 }
 0x5ec   : > { %v5291_v21 = vpop.f32.mrf.mxu2 }
 0x5ed   : > { %v5292_v51 = vadd.f32 %v5291_v21, %v5178_v7  ;;  %12086 = vst [vmem:[#allocation78_spill] sm:$0xff] %v10396_v25  ;;  %v4209_v7 = vunpack.c.h.b16 %v9929_v8 }
 0x5ef   : > { %v5182_v15 = vpop.f32.mrf.mxu1  ;;  %v10384_v45 = vadd.f32 %v5404_v58, %v5292_v51  ;;  %v10399_v58 = vunpack.c.l.b16 %v3949_v39  ;;  %v3830_v39 = vshll.u32 %v9863_v4, 16 }
 0x5f0   : > { %v5406_v23 = vpop.f32.mrf.mxu3 }
 0x5f1   : > { %12083 = vst [vmem:[#allocation75_spill] sm:$0xff] %v10384_v45  ;;  %v10405_v32 = vpack.c.b16 %v10399_v58, %v4209_v7  ;;  %v3828_v7 = vshrl.u32 %v9863_v4, 16 }
 0x5f2   : > { %5216 = vmatmul.bf16.gmra.mxu1 %v9915_v49  ;;  %12087 = vst [vmem:[#allocation79_spill] sm:$0xff] %v10399_v58 }
 0x5f3   : > { %v10393_v56 = vpop.f32.mrf.mxu0 }
 0x5f4   : > { %12085 = vst [vmem:[#allocation77_spill] sm:$0xff] %v10393_v56  ;;  %v5293_v23 = vpop.f32.mrf.mxu2 }
 0x5f5   : > { %5442 = vmatmul.bf16.gmra.mxu3 %v10396_v25  ;;  %v3832_v23 = vrot.slane %v3830_v39, 1  ;;  %v3834_v25 = vshll.u32 %v9938_v29, 16 }
 0x5f6   : > { %5555 = vmatmul.bf16.gmra.mxu0 %v4511_v54  ;;  %v4017_v54 = vrot.slane %v9938_v29, 1 }
 0x5f7   : > { %v5184_v21 = vpop.f32.mrf.mxu1 }
 0x5f8   : > { %v5408_v40 = vpop.f32.mrf.mxu3  ;;  %v10419_v53 = vsel %vm758_vm4, %v4016_v3, %v4017_v54  ;;  %v3838_v3 = vshrl.u32 %v9938_v29, 16 }
 0x5f9   : > { %5329 = vmatmul.bf16.gmra.mxu2 %v10405_v32 }
 0x5fb   : > { %v10408_v51 = vpop.f32.mrf.mxu0 }
 0x5fc   : > { %12089 = vst [vmem:[#allocation80_spill] sm:$0xff] %v10408_v51  ;;  %v5295_v24 = vpop.f32.mrf.mxu2 }
 0x5fd   : > { %v5296_v56 = vadd.f32 %v5295_v24, %v5182_v15 }
 0x5ff   : > { %v5187_v0 = vpop.f32.mrf.mxu1  ;;  %v10411_v45 = vadd.f32 %v5408_v40, %v5296_v56  ;;  %v3836_v40 = vrot.slane %v3834_v25, 1 }
 0x600   : > { %v5410_v60 = vpop.f32.mrf.mxu3  ;;  %v3833_v0 = vor.u32 %v3832_v23, %v3828_v7  ;;  %v4225_v7 = vunpack.c.l.b16 %v9986_v37 }
 0x601   : > { %12090 = vst [vmem:[#allocation81_spill] sm:$0xff] %v10411_v45 }
 0x602   : > { %5220 = vmatmul.bf16.gmra.mxu1 %v9863_v4  ;;  %v10426_v45 = vsel %vm448_vm0, %v3833_v0, %v3836_v40 }
 0x603   : > { %v5526_v51 = vpop.f32.mrf.mxu0 }
 0x604   : > { %v5297_v58 = vpop.f32.mrf.mxu2  ;;  %v4065_v51 = vsel %vm813_vm5, %v4017_v54, 0 }
 0x605   : > { %v5298_v15 = vadd.f32 %v5297_v58, %v5184_v21  ;;  %5446 = vmatmul.bf16.gmra.mxu3 %v10419_v53  ;;  %v3840_v21 = vor.u32 %v3838_v3, %v3836_v40  ;;  %v4224_v40 = vunpack.c.l.b16 %v10012_v31  ;;  %v12096_v3 = vunpack.c.l.b16 %v9969_v18 }
 0x606   : > { %5559 = vmatmul.bf16.gmra.mxu0 %v9956_v50  ;;  %v4094_v50 = vsel %vm7739_vm3, %v4065_v51, 0 }
 0x607   : > { %v5188_v56 = vpop.f32.mrf.mxu1  ;;  %v10423_v24 = vadd.f32 %v5410_v60, %v5298_v15  ;;  %v10435_v60 = vunpack.c.l.b16 %v4094_v50  ;;  %v4232_v15 = vunpack.c.l.b16 %v9949_v47  ;;  %v3950_v54 = vsel %vm7739_vm3, %v3840_v21, 0 }
 0x608   : > { %v5413_v39 = vpop.f32.mrf.mxu3  ;;  %v10447_v51 = vunpack.c.l.b16 %v3950_v54 }
 0x609   : > { %12091 = vst [vmem:[#allocation82_spill] sm:$0xff] %v10423_v24  ;;  %5333 = vmatmul.bf16.gmra.mxu2 %v10426_v45  ;;  %v10445_v39 = vpack.c.b16 %v4225_v7, %v10435_v60 }
 0x60a   : > { %12093 = vst [vmem:[#allocation84_spill] sm:$0xff] %v10435_v60  ;;  %v10459_v7 = vpack.c.b16 %v4224_v40, %v10447_v51 }
 0x60b   : > { %v10431_v23 = vpop.f32.mrf.mxu0  ;;  %12095 = vst [vmem:[#allocation86_spill] sm:$0xff] %v10445_v39 }
 0x60c   : > { %12092 = vst [vmem:[#allocation83_spill] sm:$0xff] %v10431_v23  ;;  %v5300_v58 = vpop.f32.mrf.mxu2 }
 0x60d   : > { %v4523_v58 = vpack.c.b16 %v4232_v15, %v12096_v3  ;;  %v12098_v15 = vrot.slane %v9969_v18, 1  ;;  %v3852_v3 = vshrl.u32 %v9969_v18, 16 }
 0x60f   : > { %v5191_v25 = vpop.f32.mrf.mxu1 }
 0x610   : > { %v5414_v0 = vpop.f32.mrf.mxu3 }
 0x612   : > { %5225 = vmatmul.bf16.gmra.mxu1 %v9975_v43 }
 0x613   : > { %v10442_v29 = vpop.f32.mrf.mxu0 }
 0x614   : > { %12094 = vst [vmem:[#allocation85_spill] sm:$0xff] %v10442_v29  ;;  %v5301_v50 = vpop.f32.mrf.mxu2  ;;  %v7260_v29 = vld [vmem:[%s11645_s3 + $0x108] sm:$0xff] }
 0x615   : > { %v5302_v23 = vadd.f32 %v5301_v50, %v5188_v56  ;;  %5451 = vmatmul.bf16.gmra.mxu3 %v10445_v39  ;;  %5605 = vmatpush.bf16.msrb.mxu1 %v7260_v29  ;;  %v4068_v56 = vsel %vm813_vm5, %v12098_v15, 0  ;;  %v4228_v29 = vunpack.c.h.b16 %v9986_v37  ;;  %v4235_v15 = vunpack.c.h.b16 %v9949_v47 }
 0x616   : > { %5564 = vmatmul.bf16.gmra.mxu0 %v4523_v58 }
 0x617   : > { %v5193_v21 = vpop.f32.mrf.mxu1  ;;  %v10456_v24 = vadd.f32 %v5414_v0, %v5302_v23  ;;  %v3854_v23 = vor.u32 %v3852_v3, %v10002_v34 }
 0x618   : > { %v5417_v54 = vpop.f32.mrf.mxu3  ;;  %v4095_v21 = vsel %vm7739_vm3, %v4068_v56, 0  ;;  %v12104_v56 = vunpack.c.l.b16 %v10019_v11 }
 0x619   : > { %12097 = vst [vmem:[#allocation87_spill] sm:$0xff] %v10456_v24  ;;  %5338 = vmatmul.bf16.gmra.mxu2 %v10459_v7  ;;  %v10472_v24 = vunpack.c.l.b16 %v4095_v21  ;;  %v3951_v18 = vsel %vm7739_vm3, %v3854_v23, 0 }
 0x61a   : > { %v4529_v3 = vpack.c.b16 %v12104_v56, %v4235_v15  ;;  %v4022_v56 = vrot.slane %v9949_v47, 1 }
 0x61b   : > { %v5532_v58 = vpop.f32.mrf.mxu0  ;;  %12100 = vst [vmem:[#allocation89_spill] sm:$0xff] %v10472_v24  ;;  %v10481_v34 = vpack.c.b16 %v10472_v24, %v4228_v29 }
 0x61c   : > { %v5304_v50 = vpop.f32.mrf.mxu2 }
 0x61d   : > { %v5305_v0 = vadd.f32 %v5304_v50, %v5191_v25  ;;  %12102 = vst [vmem:[#allocation91_spill] sm:$0xff] %v10481_v34  ;;  %v4227_v25 = vunpack.c.h.b16 %v10012_v31 }
 0x61f   : > { %v5195_v40 = vpop.f32.mrf.mxu1  ;;  %v10469_v39 = vadd.f32 %v5417_v54, %v5305_v0  ;;  %v10484_v54 = vunpack.c.l.b16 %v3951_v18  ;;  %v3858_v18 = vshll.u32 %v9949_v47, 16 }
 0x620   : > { %v5419_v60 = vpop.f32.mrf.mxu3 }
 0x621   : > { %12099 = vst [vmem:[#allocation88_spill] sm:$0xff] %v10469_v39  ;;  %v10490_v21 = vpack.c.b16 %v10484_v54, %v4227_v25  ;;  %v3856_v25 = vshrl.u32 %v9949_v47, 16 }
 0x622   : > { %5229 = vmatmul.bf16.gmra.mxu1 %v10000_v52  ;;  %12103 = vst [vmem:[#allocation92_spill] sm:$0xff] %v10484_v54 }
 0x623   : > { %v10478_v58 = vpop.f32.mrf.mxu0 }
 0x624   : > { %12101 = vst [vmem:[#allocation90_spill] sm:$0xff] %v10478_v58  ;;  %v5306_v60 = vpop.f32.mrf.mxu2 }
 0x625   : > { %5455 = vmatmul.bf16.gmra.mxu3 %v10481_v34  ;;  %v3860_v60 = vrot.slane %v3858_v18, 1  ;;  %v3862_v34 = vshll.u32 %v10019_v11, 16 }
 0x626   : > { %5568 = vmatmul.bf16.gmra.mxu0 %v4529_v3  ;;  %v4023_v3 = vrot.slane %v10019_v11, 1 }
 0x627   : > { %v5197_v50 = vpop.f32.mrf.mxu1 }
 0x628   : > { %v5421_v23 = vpop.f32.mrf.mxu3  ;;  %v10504_v37 = vsel %vm758_vm4, %v4022_v56, %v4023_v3  ;;  %v3866_v56 = vshrl.u32 %v10019_v11, 16 }
 0x629   : > { %5342 = vmatmul.bf16.gmra.mxu2 %v10490_v21  ;;  %12107 = vst [vmem:[#allocation95_spill] sm:$0xff] %v10504_v37 }
 0x62b   : > { %v10493_v0 = vpop.f32.mrf.mxu0 }
 0x62c   : > { %12105 = vst [vmem:[#allocation93_spill] sm:$0xff] %v10493_v0  ;;  %v5308_v29 = vpop.f32.mrf.mxu2 }
 0x62d   : > { %v5309_v58 = vadd.f32 %v5308_v29, %v5195_v40 }
 0x62f   : > { %v5200_v24 = vpop.f32.mrf.mxu1  ;;  %v10496_v39 = vadd.f32 %v5421_v23, %v5309_v58  ;;  %v3864_v23 = vrot.slane %v3862_v34, 1 }
 0x630   : > { %v5423_v15 = vpop.f32.mrf.mxu3  ;;  %v3861_v24 = vor.u32 %v3860_v60, %v3856_v25  ;;  %v12112_v25 = vld [vmem:[#allocation23_spill] sm:$0xff] }
 0x631   : > { %12106 = vst [vmem:[#allocation94_spill] sm:$0xff] %v10496_v39 }
 0x632   : > { %5233 = vmatmul.bf16.gmra.mxu1 %v9949_v47  ;;  %v10511_v39 = vsel %vm448_vm0, %v3861_v24, %v3864_v23 }
 0x633   : > { %v5539_v0 = vpop.f32.mrf.mxu0  ;;  %12109 = vst [vmem:[#allocation97_spill] sm:$0xff] %v10511_v39 }
 0x634   : > { %v5310_v54 = vpop.f32.mrf.mxu2  ;;  %v4071_v0 = vsel %vm813_vm5, %v4023_v3, 0 }
 0x635   : > { %v5311_v40 = vadd.f32 %v5310_v54, %v5197_v50  ;;  %5459 = vmatmul.bf16.gmra.mxu3 %v10504_v37  ;;  %v3868_v50 = vor.u32 %v3866_v56, %v3864_v23  ;;  %v12114_v37 = vld [vmem:[#allocation28_spill] sm:$0xff]  ;;  %v4242_v23 = vunpack.c.l.b16 %v10092_v13  ;;  %v12118_v56 = vld [vmem:[#allocation43_spill] sm:$0xff] }
 0x636   : > { %5572 = vmatmul.bf16.gmra.mxu0 %v10031_v38  ;;  %v4096_v38 = vsel %vm7739_vm3, %v4071_v0, 0 }
 0x637   : > { %v5201_v58 = vpop.f32.mrf.mxu1  ;;  %v10508_v29 = vadd.f32 %v5423_v15, %v5311_v40  ;;  %v10520_v15 = vunpack.c.l.b16 %v4096_v38  ;;  %v4243_v40 = vunpack.c.l.b16 %v12112_v25  ;;  %v3952_v3 = vsel %vm7739_vm3, %v3868_v50, 0 }
 0x638   : > { %v5426_v18 = vpop.f32.mrf.mxu3  ;;  %v10532_v0 = vunpack.c.l.b16 %v3952_v3  ;;  %v12119_v38 = vunpack.c.l.b16 %v12118_v56 }
 0x639   : > { %12108 = vst [vmem:[#allocation96_spill] sm:$0xff] %v10508_v29  ;;  %5346 = vmatmul.bf16.gmra.mxu2 %v10511_v39  ;;  %v12113_v18 = vld [vmem:[#allocation25_spill] sm:$0xff] }
 0x63a   : > { %12111 = vst [vmem:[#allocation99_spill] sm:$0xff] %v10520_v15  ;;  %v4250_v29 = vunpack.c.l.b16 %v12113_v18 }
 0x63b   : > { %v10516_v60 = vpop.f32.mrf.mxu0  ;;  %12117 = vst [vmem:[#allocation101_spill] sm:$0xff] %v10532_v0 }
 0x63c   : > { %12110 = vst [vmem:[#allocation98_spill] sm:$0xff] %v10516_v60  ;;  %v5313_v54 = vpop.f32.mrf.mxu2  ;;  %v4541_v60 = vpack.c.b16 %v4250_v29, %v12119_v38  ;;  %v12121_v29 = vrot.slane %v12118_v56, 1 }
 0x63d   : > { %v10530_v54 = vpack.c.b16 %v4243_v40, %v10520_v15  ;;  %v10544_v40 = vpack.c.b16 %v4242_v23, %v10532_v0 }
 0x63f   : > { %v5204_v34 = vpop.f32.mrf.mxu1  ;;  %12116 = vst [vmem:[#allocation100_spill] sm:$0xff] %v10530_v54 }
 0x640   : > { %v5427_v24 = vpop.f32.mrf.mxu3 }
 0x642   : > { %5238 = vmatmul.bf16.gmra.mxu1 %v12114_v37 }
 0x643   : > { %v10527_v11 = vpop.f32.mrf.mxu0 }
 0x644   : > { %12115 = vst [vmem:[#allocation25_spill] sm:$0xff] %v10527_v11  ;;  %v5314_v39 = vpop.f32.mrf.mxu2  ;;  %v7259_v11 = vld [vmem:[%s11645_s3 + $0x100] sm:$0xff] }
 0x645   : > { %v5315_v47 = vadd.f32 %v5314_v39, %v5201_v58  ;;  %5464 = vmatmul.bf16.gmra.mxu3 %v10530_v54  ;;  %5606 = vmatpush.bf16.msrb.mxu1 %v7259_v11  ;;  %v4074_v39 = vsel %vm813_vm5, %v12121_v29, 0  ;;  %v3880_v58 = vshrl.u32 %v12118_v56, 16  ;;  %v4246_v11 = vunpack.c.h.b16 %v12112_v25 }
 0x646   : > { %5577 = vmatmul.bf16.gmra.mxu0 %v4541_v60  ;;  %v4253_v29 = vunpack.c.h.b16 %v12113_v18 }
 0x647   : > { %v5206_v50 = vpop.f32.mrf.mxu1  ;;  %v10541_v37 = vadd.f32 %v5427_v24, %v5315_v47  ;;  %v3882_v47 = vor.u32 %v3880_v58, %v10082_v30 }
 0x648   : > { %v5430_v3 = vpop.f32.mrf.mxu3  ;;  %v4097_v50 = vsel %vm7739_vm3, %v4074_v39, 0  ;;  %v12128_v39 = vunpack.c.l.b16 %v10095_v10 }
 0x649   : > { %12120 = vst [vmem:[#allocation43_spill] sm:$0xff] %v10541_v37  ;;  %5351 = vmatmul.bf16.gmra.mxu2 %v10544_v40  ;;  %v10557_v37 = vunpack.c.l.b16 %v4097_v50  ;;  %v3953_v56 = vsel %vm7739_vm3, %v3882_v47, 0  ;;  %v7290_v50 = vld [vmem:[%s11645_s3 + $0x1f8] sm:$0xff] }
 0x64a   : > { %v4547_v58 = vpack.c.b16 %v12128_v39, %v4253_v29  ;;  %5938 = vmatpush.bf16.msra.mxu0 %v7290_v50  ;;  %v7281_v39 = vld [vmem:[%s11645_s3 + $0x1b0] sm:$0xff] }
 0x64b   : > { %v5545_v60 = vpop.f32.mrf.mxu0  ;;  %12123 = vst [vmem:[#allocation103_spill] sm:$0xff] %v10557_v37  ;;  %v10566_v30 = vpack.c.b16 %v10557_v37, %v4246_v11  ;;  %v7280_v37 = vld [vmem:[%s11645_s3 + $0x1a8] sm:$0xff] }
 0x64c   : > { %v5317_v38 = vpop.f32.mrf.mxu2  ;;  %v12124_v60 = vld [vmem:[#allocation30_spill] sm:$0xff] }
 0x64d   : > { %v5318_v24 = vadd.f32 %v5317_v38, %v5204_v34  ;;  %12126 = vst [vmem:[#allocation104_spill] sm:$0xff] %v10566_v30  ;;  %v4245_v34 = vunpack.c.h.b16 %v10092_v13 }
 0x64f   : > { %v5208_v23 = vpop.f32.mrf.mxu1  ;;  %v10554_v54 = vadd.f32 %v5430_v3, %v5318_v24  ;;  %v10569_v3 = vunpack.c.l.b16 %v3953_v56  ;;  %v7282_v24 = vld [vmem:[%s11645_s3 + $0x1b8] sm:$0xff]  ;;  %v7289_v56 = vld [vmem:[%s11645_s3 + $0x1f0] sm:$0xff] }
 0x650   : > { %v5432_v15 = vpop.f32.mrf.mxu3  ;;  %5825 = vmatpush.bf16.msra.mxu3 %v7282_v24  ;;  %5939 = vmatpush.bf16.msra.mxu0 %v7289_v56  ;;  %v7288_v24 = vld [vmem:[%s11645_s3 + $0x1e8] sm:$0xff]  ;;  %v4029_v56 = vrot.slane %v10095_v10, 1 }
 0x651   : > { %12122 = vst [vmem:[#allocation102_spill] sm:$0xff] %v10554_v54  ;;  %v10578_v47 = vpack.c.b16 %v10569_v3, %v4245_v34  ;;  %v7274_v34 = vld [vmem:[%s11645_s3 + $0x178] sm:$0xff] }
 0x652   : > { %5242 = vmatmul.bf16.gmra.mxu1 %v12124_v60  ;;  %12127 = vst [vmem:[#allocation105_spill] sm:$0xff] %v10569_v3  ;;  %5712 = vmatpush.bf16.msra.mxu2 %v7274_v34 }
 0x653   : > { %v10563_v0 = vpop.f32.mrf.mxu0 }
 0x654   : > { %12125 = vst [vmem:[#allocation30_spill] sm:$0xff] %v10563_v0  ;;  %v5319_v15 = vpop.f32.mrf.mxu2  ;;  %5826 = vmatpush.bf16.msra.mxu3 %v7281_v39  ;;  %v7273_v0 = vld [vmem:[%s11645_s3 + $0x170] sm:$0xff]  ;;  %5940 = vmatpush.bf16.msra.mxu0 %v7288_v24 }
 0x655   : > { %5468 = vmatmul.bf16.gmra.mxu3 %v10566_v30  ;;  %v3886_v15 = vshll.u32 %v12113_v18, 16 }
 0x656   : > { %5581 = vmatmul.bf16.gmra.mxu0 %v4547_v58  ;;  %5713 = vmatpush.bf16.msra.mxu2 %v7273_v0  ;;  %v7279_v0 = vld [vmem:[%s11645_s3 + $0x1a0] sm:$0xff] }
 0x657   : > { %v5210_v38 = vpop.f32.mrf.mxu1  ;;  %v3888_v34 = vrot.slane %v3886_v15, 1 }
 0x658   : > { %v5434_v11 = vpop.f32.mrf.mxu3  ;;  %5827 = vmatpush.bf16.msra.mxu3 %v7280_v37  ;;  %v7272_v37 = vld [vmem:[%s11645_s3 + $0x168] sm:$0xff] }
 0x659   : > { %5355 = vmatmul.bf16.gmra.mxu2 %v10578_v47 }
 0x65a   : > { %5714 = vmatpush.bf16.msra.mxu2 %v7272_v37 }
 0x65b   : > { %v10584_v29 = vpop.f32.mrf.mxu0 }
 0x65c   : > { %12129 = vst [vmem:[#allocation106_spill] sm:$0xff] %v10584_v29  ;;  %v5321_v58 = vpop.f32.mrf.mxu2  ;;  %5828 = vmatpush.bf16.msra.mxu3 %v7279_v0  ;;  %v7284_v0 = vld [vmem:[%s11645_s3 + $0x1c8] sm:$0xff] }
 0x65d   : > { %v5322_v50 = vadd.f32 %v5321_v58, %v5208_v23  ;;  %v4028_v23 = vrot.slane %v12113_v18, 1  ;;  %v7287_v58 = vld [vmem:[%s11645_s3 + $0x1e0] sm:$0xff] }
 0x65e   : > { %5941 = vmatpush.bf16.msra.mxu0 %v7287_v58 }
 0x65f   : > { %v5213_v30 = vpop.f32.mrf.mxu1  ;;  %v10599_v29 = vadd.f32 %v5434_v11, %v5322_v50  ;;  %v3890_v11 = vshll.u32 %v10095_v10, 16 }
 0x660   : > { %v5436_v3 = vpop.f32.mrf.mxu3  ;;  %v3884_v30 = vshrl.u32 %v12113_v18, 16 }
 0x661   : > { %12130 = vst [vmem:[#allocation107_spill] sm:$0xff] %v10599_v29  ;;  %v10616_v29 = vsel %vm758_vm4, %v4028_v23, %v4029_v56  ;;  %v3892_v25 = vrot.slane %v3890_v11, 1  ;;  %v7286_v23 = vld [vmem:[%s11645_s3 + $0x1d8] sm:$0xff] }
 0x662   : > { %5246 = vmatmul.bf16.gmra.mxu1 %v12113_v18  ;;  %v3889_v54 = vor.u32 %v3888_v34, %v3884_v30  ;;  %v7278_v11 = vld [vmem:[%s11645_s3 + $0x198] sm:$0xff]  ;;  %5942 = vmatpush.bf16.msra.mxu0 %v7286_v23 }
 0x663   : > { %v5552_v39 = vpop.f32.mrf.mxu0  ;;  %5829 = vmatpush.bf16.msra.mxu3 %v7278_v11  ;;  %v7269_v11 = vld [vmem:[%s11645_s3 + $0x150] sm:$0xff] }
 0x664   : > { %v5323_v50 = vpop.f32.mrf.mxu2  ;;  %v10632_v30 = vsel %vm448_vm0, %v3889_v54, %v3892_v25  ;;  %v4077_v39 = vsel %vm813_vm5, %v4029_v56, 0  ;;  %v7285_v54 = vld [vmem:[%s11645_s3 + $0x1d0] sm:$0xff]  ;;  %v7270_v56 = vld [vmem:[%s11645_s3 + $0x158] sm:$0xff] }
 0x665   : > { %v5324_v15 = vadd.f32 %v5323_v50, %v5210_v38  ;;  %5472 = vmatmul.bf16.gmra.mxu3 %v10616_v29 }
 0x666   : > { %5585 = vmatmul.bf16.gmra.mxu0 %v10107_v44  ;;  %v7271_v44 = vld [vmem:[%s11645_s3 + $0x160] sm:$0xff] }
 0x667   : > { %v5214_v24 = vpop.f32.mrf.mxu1  ;;  %v10629_v38 = vadd.f32 %v5436_v3, %v5324_v15  ;;  %v3894_v3 = vshrl.u32 %v10095_v10, 16  ;;  %v4098_v15 = vsel %vm7739_vm3, %v4077_v39, 0  ;;  %5715 = vmatpush.bf16.msra.mxu2 %v7271_v44  ;;  %v7277_v10 = vld [vmem:[%s11645_s3 + $0x190] sm:$0xff]  ;;  %5943 = vmatpush.bf16.msra.mxu0 %v7285_v54 }
 0x668   : > { %v5439_v34 = vpop.f32.mrf.mxu3  ;;  %5830 = vmatpush.bf16.msra.mxu3 %v7277_v10  ;;  %v12137_v10 = vunpack.c.l.b16 %v10121_v57 }
 0x669   : > { %12131 = vst [vmem:[#allocation108_spill] sm:$0xff] %v10629_v38  ;;  %5359 = vmatmul.bf16.gmra.mxu2 %v10632_v30  ;;  %v3896_v37 = vor.u32 %v3894_v3, %v3892_v25  ;;  %v10659_v34 = vunpack.c.l.b16 %v4098_v15  ;;  %v4268_v25 = vunpack.c.l.b16 %v10111_v61  ;;  %v7276_v3 = vld [vmem:[%s11645_s3 + $0x188] sm:$0xff] }
 0x66b   : > { %v10643_v58 = vpop.f32.mrf.mxu0  ;;  %12133 = vst [vmem:[#allocation110_spill] sm:$0xff] %v10659_v34  ;;  %v3954_v44 = vsel %vm7739_vm3, %v3896_v37, 0  ;;  %5716 = vmatpush.bf16.msra.mxu2 %v7270_v56  ;;  %5944 = vmatpush.bf16.msra.mxu0 %v7284_v0  ;;  %v7283_v56 = vld [vmem:[%s11645_s3 + $0x1c0] sm:$0xff]  ;;  %v7268_v0 = vld [vmem:[%s11645_s3 + $0x148] sm:$0xff] }
 0x66c   : > { %12132 = vst [vmem:[#allocation109_spill] sm:$0xff] %v10643_v58  ;;  %v5326_v50 = vpop.f32.mrf.mxu2  ;;  %v10678_v37 = vunpack.c.l.b16 %v3954_v44  ;;  %v4559_v58 = vpack.c.b16 %v4268_v25, %v12137_v10  ;;  %5831 = vmatpush.bf16.msra.mxu3 %v7276_v3  ;;  %v7298_v25 = vld [vmem:[%s11645_s3 + $0x238] sm:$0xff]  ;;  %v12139_v3 = vunpack.c.l.b16 %v10163_v62 }
 0x66d   : > { %v12135_v50 = vunpack.c.l.b16 %v10140_v35  ;;  %6051 = vmatpush.bf16.msra.mxu1 %v7298_v25 }
 0x66e   : > { %v10700_v10 = vpack.c.b16 %v12139_v3, %v10678_v37  ;;  %v4264_v3 = vunpack.c.h.b16 %v10140_v35 }
 0x66f   : > { %v5217_v23 = vpop.f32.mrf.mxu1  ;;  %v10676_v15 = vpack.c.b16 %v12135_v50, %v10659_v34  ;;  %5717 = vmatpush.bf16.msra.mxu2 %v7269_v11  ;;  %v7275_v50 = vld [vmem:[%s11645_s3 + $0x180] sm:$0xff]  ;;  %5945 = vmatpush.bf16.msra.mxu0 %v7283_v56 }
 0x670   : > { %v5440_v39 = vpop.f32.mrf.mxu3  ;;  %5832 = vmatpush.bf16.msra.mxu3 %v7275_v50 }
 0x671   : > { %12136 = vst [vmem:[#allocation112_spill] sm:$0xff] %v10676_v15 }
 0x672   : > { %5251 = vmatmul.bf16.gmra.mxu1 %v10129_v36 }
 0x673   : > { %v10671_v54 = vpop.f32.mrf.mxu0  ;;  %5718 = vmatpush.bf16.msra.mxu2 %v7268_v0 }
 0x674   : > { %12134 = vst [vmem:[#allocation111_spill] sm:$0xff] %v10671_v54  ;;  %v5327_v38 = vpop.f32.mrf.mxu2 }
 0x675   : > { %v5328_v44 = vadd.f32 %v5327_v38, %v5214_v24  ;;  %5477 = vmatmul.bf16.gmra.mxu3 %v10676_v15  ;;  %v7267_v24 = vld [vmem:[%s11645_s3 + $0x140] sm:$0xff]  ;;  %v12140_v38 = vrot.slane %v10121_v57, 1  ;;  %v4271_v57 = vunpack.c.h.b16 %v10111_v61 }
 0x676   : > { %5590 = vmatmul.bf16.gmra.mxu0 %v4559_v58 }
 0x677   : > { %v5219_v54 = vpop.f32.mrf.mxu1  ;;  %v10695_v11 = vadd.f32 %v5440_v39, %v5328_v44  ;;  %v4080_v58 = vsel %vm813_vm5, %v12140_v38, 0  ;;  %5719 = vmatpush.bf16.msra.mxu2 %v7267_v24 }
 0x678   : > { %v5443_v34 = vpop.f32.mrf.mxu3  ;;  %v4099_v56 = vsel %vm7739_vm3, %v4080_v58, 0 }
 0x679   : > { %12138 = vst [vmem:[#allocation113_spill] sm:$0xff] %v10695_v11  ;;  %5364 = vmatmul.bf16.gmra.mxu2 %v10700_v10  ;;  %v10714_v15 = vunpack.c.l.b16 %v4099_v56 }
 0x67b   : > { %v5558_v39 = vpop.f32.mrf.mxu0  ;;  %12142 = vst [vmem:[#allocation115_spill] sm:$0xff] %v10714_v15  ;;  %v10721_v38 = vpack.c.b16 %v10714_v15, %v4264_v3 }
 0x67c   : > { %v5330_v54 = vpop.f32.mrf.mxu2 }
 0x67d   : > { %v5331_v44 = vadd.f32 %v5330_v54, %v5217_v23  ;;  %12144 = vst [vmem:[#allocation117_spill] sm:$0xff] %v10721_v38  ;;  %v12145_v23 = vunpack.c.l.b16 %v10187_v55 }
 0x67f   : > { %v5221_v0 = vpop.f32.mrf.mxu1  ;;  %v10711_v50 = vadd.f32 %v5443_v34, %v5331_v44  ;;  %v4565_v34 = vpack.c.b16 %v12145_v23, %v4271_v57  ;;  %v12148_v57 = vld [vmem:[#allocation47_spill] sm:$0xff] }
 0x680   : > { %v5445_v11 = vpop.f32.mrf.mxu3 }
 0x681   : > { %12141 = vst [vmem:[#allocation114_spill] sm:$0xff] %v10711_v50  ;;  %v10728_v11 = vpack.c.b16 %v10218_v2, %v4263_v41  ;;  %v12150_v2 = vld [vmem:[#allocation50_spill] sm:$0xff] }
 0x682   : > { %5255 = vmatmul.bf16.gmra.mxu1 %v10155_v20 }
 0x683   : > { %v10718_v25 = vpop.f32.mrf.mxu0 }
 0x684   : > { %12143 = vst [vmem:[#allocation116_spill] sm:$0xff] %v10718_v25  ;;  %v5332_v24 = vpop.f32.mrf.mxu2 }
 0x685   : > { %5481 = vmatmul.bf16.gmra.mxu3 %v10721_v38  ;;  %v12149_v38 = vld [vmem:[#allocation32_spill] sm:$0xff] }
 0x686   : > { %5594 = vmatmul.bf16.gmra.mxu0 %v4565_v34 }
 0x687   : > { %v5223_v58 = vpop.f32.mrf.mxu1 }
 0x688   : > { %v5447_v39 = vpop.f32.mrf.mxu3 }
 0x689   : > { %5368 = vmatmul.bf16.gmra.mxu2 %v10728_v11 }
 0x68b   : > { %v10731_v54 = vpop.f32.mrf.mxu0 }
 0x68c   : > { %12146 = vst [vmem:[#allocation118_spill] sm:$0xff] %v10731_v54  ;;  %v5334_v56 = vpop.f32.mrf.mxu2  ;;  %v12152_v54 = vld [vmem:[#allocation51_spill] sm:$0xff] }
 0x68d   : > { %v5335_v44 = vadd.f32 %v5334_v56, %v5221_v0 }
 0x68f   : > { %v5226_v3 = vpop.f32.mrf.mxu1  ;;  %v10733_v25 = vadd.f32 %v5447_v39, %v5335_v44  ;;  %v4134_v39 = vunpack.c.l.b16 %v12150_v2 }
 0x690   : > { %v5449_v15 = vpop.f32.mrf.mxu3  ;;  %v12154_v3 = vld [vmem:[#allocation9_spill] sm:$0xff] }
 0x691   : > { %12147 = vst [vmem:[#allocation119_spill] sm:$0xff] %v10733_v25 }
 0x692   : > { %5607 = vmatmul.bf16.vlgmr.msrb.gmra.mxu1 %v12148_v57  ;;  %v4431_v57 = vpack.c.b16 %v4134_v39, %v12154_v3  ;;  %v12160_v39 = vld [vmem:[#allocation54_spill] sm:$0xff] }
 0x693   : > { %v5565_v23 = vpop.f32.mrf.mxu0 }
 0x694   : > { %v5336_v24 = vpop.f32.mrf.mxu2 }
 0x695   : > { %v5337_v34 = vadd.f32 %v5336_v24, %v5223_v58  ;;  %5833 = vmatmul.bf16.vlgmr.msra.gmra.mxu3 %v12149_v38  ;;  %v12156_v38 = vld [vmem:[#allocation36_spill] sm:$0xff] }
 0x696   : > { %5946 = vmatmul.bf16.vlgmr.msra.gmra.mxu0 %v12150_v2  ;;  %v4135_v24 = vunpack.c.l.b16 %v12156_v38 }
 0x697   : > { %v5227_v41 = vpop.f32.mrf.mxu1  ;;  %v10738_v55 = vadd.f32 %v5449_v15, %v5337_v34  ;;  %v12157_v34 = vld [vmem:[#allocation19_spill] sm:$0xff] }
 0x698   : > { %v5452_v50 = vpop.f32.mrf.mxu3  ;;  %v4432_v3 = vpack.c.b16 %v4135_v24, %v12160_v39 }
 0x699   : > { %12151 = vst [vmem:[#allocation47_spill] sm:$0xff] %v10738_v55  ;;  %5720 = vmatmul.bf16.vlgmr.msra.gmra.mxu2 %v12152_v54  ;;  %v12158_v50 = vld [vmem:[#allocation3_spill] sm:$0xff]  ;;  %v4140_v55 = vunpack.c.h.b16 %v12150_v2  ;;  %v12166_v2 = vld [vmem:[#allocation52_spill] sm:$0xff] }
 0x69b   : > { %v10741_v0 = vpop.f32.mrf.mxu0 }
 0x69c   : > { %12153 = vst [vmem:[#allocation32_spill] sm:$0xff] %v10741_v0  ;;  %v5339_v56 = vpop.f32.mrf.mxu2 }
 0x69d   : > { %v7297_v56 = vld [vmem:[%s11645_s3 + $0x230] sm:$0xff] }
 0x69e   : > { %6052 = vmatpush.bf16.msra.mxu1 %v7297_v56  ;;  %v12165_v56 = vld [vmem:[#allocation17_spill] sm:$0xff] }
 0x69f   : > { %v5230_v44 = vpop.f32.mrf.mxu1 }
 0x6a0   : > { %v5453_v23 = vpop.f32.mrf.mxu3 }
 0x6a2   : > { %5612 = vmatmul.bf16.gmra.mxu1 %v4431_v57 }
 0x6a3   : > { %v10745_v58 = vpop.f32.mrf.mxu0 }
 0x6a4   : > { %12155 = vst [vmem:[#allocation50_spill] sm:$0xff] %v10745_v58  ;;  %v5340_v25 = vpop.f32.mrf.mxu2 }
 0x6a5   : > { %v5341_v15 = vadd.f32 %v5340_v25, %v5227_v41  ;;  %5838 = vmatmul.bf16.gmra.mxu3 %v12157_v34 }
 0x6a6   : > { %5951 = vmatmul.bf16.gmra.mxu0 %v12158_v50  ;;  %v12162_v50 = vld [vmem:[#allocation53_spill] sm:$0xff] }
 0x6a7   : > { %v5232_v54 = vpop.f32.mrf.mxu1  ;;  %v10753_v0 = vadd.f32 %v5453_v23, %v5341_v15  ;;  %v4141_v23 = vunpack.c.h.b16 %v12156_v38  ;;  %v12164_v15 = vld [vmem:[#allocation31_spill] sm:$0xff] }
 0x6a8   : > { %v5456_v57 = vpop.f32.mrf.mxu3  ;;  %v4440_v54 = vpack.c.b16 %v12162_v50, %v4140_v55  ;;  %v12169_v50 = vld [vmem:[#allocation7_spill] sm:$0xff] }
 0x6a9   : > { %12159 = vst [vmem:[#allocation51_spill] sm:$0xff] %v10753_v0  ;;  %5725 = vmatmul.bf16.gmra.mxu2 %v4432_v3  ;;  %v4441_v39 = vpack.c.b16 %v12166_v2, %v4141_v23 }
 0x6ab   : > { %v5571_v58 = vpop.f32.mrf.mxu0 }
 0x6ac   : > { %v5343_v25 = vpop.f32.mrf.mxu2 }
 0x6ad   : > { %v5344_v41 = vadd.f32 %v5343_v25, %v5230_v44 }
 0x6af   : > { %v5234_v34 = vpop.f32.mrf.mxu1  ;;  %v10757_v35 = vadd.f32 %v5456_v57, %v5344_v41 }
 0x6b0   : > { %v5458_v61 = vpop.f32.mrf.mxu3 }
 0x6b1   : > { %12161 = vst [vmem:[#allocation9_spill] sm:$0xff] %v10757_v35 }
 0x6b2   : > { %5616 = vmatmul.bf16.gmra.mxu1 %v4440_v54 }
 0x6b3   : > { %v10760_v62 = vpop.f32.mrf.mxu0 }
 0x6b4   : > { %12163 = vst [vmem:[#allocation19_spill] sm:$0xff] %v10760_v62  ;;  %v5345_v24 = vpop.f32.mrf.mxu2  ;;  %v12170_v62 = vld [vmem:[#allocation44_spill] sm:$0xff] }
 0x6b5   : > { %5842 = vmatmul.bf16.gmra.mxu3 %v12164_v15 }
 0x6b6   : > { %5955 = vmatmul.bf16.gmra.mxu0 %v12165_v56  ;;  %v12171_v56 = vld [vmem:[#allocation14_spill] sm:$0xff] }
 0x6b7   : > { %v5236_v58 = vpop.f32.mrf.mxu1 }
 0x6b8   : > { %v5460_v44 = vpop.f32.mrf.mxu3 }
 0x6b9   : > { %5729 = vmatmul.bf16.gmra.mxu2 %v4441_v39 }
 0x6bb   : > { %v10766_v3 = vpop.f32.mrf.mxu0 }
 0x6bc   : > { %12167 = vst [vmem:[#allocation3_spill] sm:$0xff] %v10766_v3  ;;  %v5347_v57 = vpop.f32.mrf.mxu2  ;;  %v12173_v3 = vld [vmem:[#allocation4_spill] sm:$0xff] }
 0x6bd   : > { %v5348_v55 = vadd.f32 %v5347_v57, %v5234_v34 }
 0x6bf   : > { %v5239_v61 = vpop.f32.mrf.mxu1  ;;  %v10768_v25 = vadd.f32 %v5460_v44, %v5348_v55  ;;  %v4161_v44 = vunpack.c.l.b16 %v12171_v56 }
 0x6c0   : > { %v5462_v41 = vpop.f32.mrf.mxu3  ;;  %v12175_v61 = vld [vmem:[#allocation18_spill] sm:$0xff] }
 0x6c1   : > { %12168 = vst [vmem:[#allocation54_spill] sm:$0xff] %v10768_v25 }
 0x6c2   : > { %5620 = vmatmul.bf16.gmra.mxu1 %v12169_v50  ;;  %v4452_v50 = vpack.c.b16 %v4161_v44, %v12175_v61  ;;  %v12180_v44 = vld [vmem:[#allocation10_spill] sm:$0xff] }
 0x6c3   : > { %v5578_v54 = vpop.f32.mrf.mxu0 }
 0x6c4   : > { %v5349_v24 = vpop.f32.mrf.mxu2 }
 0x6c5   : > { %v5350_v15 = vadd.f32 %v5349_v24, %v5236_v58  ;;  %5846 = vmatmul.bf16.gmra.mxu3 %v12170_v62  ;;  %v12177_v62 = vld [vmem:[#allocation46_spill] sm:$0xff] }
 0x6c6   : > { %5959 = vmatmul.bf16.gmra.mxu0 %v12171_v56  ;;  %v4162_v24 = vunpack.c.l.b16 %v12177_v62 }
 0x6c7   : > { %v5240_v23 = vpop.f32.mrf.mxu1  ;;  %v10773_v2 = vadd.f32 %v5462_v41, %v5350_v15  ;;  %v12178_v15 = vld [vmem:[#allocation5_spill] sm:$0xff] }
 0x6c8   : > { %v5465_v39 = vpop.f32.mrf.mxu3  ;;  %v4453_v61 = vpack.c.b16 %v4162_v24, %v12180_v44 }
 0x6c9   : > { %12172 = vst [vmem:[#allocation53_spill] sm:$0xff] %v10773_v2  ;;  %5733 = vmatmul.bf16.gmra.mxu2 %v12173_v3  ;;  %v12179_v39 = vld [vmem:[#allocation26_spill] sm:$0xff]  ;;  %v4164_v2 = vunpack.c.h.b16 %v12171_v56  ;;  %v12184_v56 = vld [vmem:[#allocation21_spill] sm:$0xff] }
 0x6cb   : > { %v10776_v34 = vpop.f32.mrf.mxu0 }
 0x6cc   : > { %12174 = vst [vmem:[#allocation31_spill] sm:$0xff] %v10776_v34  ;;  %v5352_v57 = vpop.f32.mrf.mxu2 }
 0x6cd   : > { %v7296_v57 = vld [vmem:[%s11645_s3 + $0x228] sm:$0xff] }
 0x6ce   : > { %6053 = vmatpush.bf16.msra.mxu1 %v7296_v57  ;;  %v12183_v57 = vld [vmem:[#allocation39_spill] sm:$0xff] }
 0x6cf   : > { %v5243_v55 = vpop.f32.mrf.mxu1 }
 0x6d0   : > { %v5466_v54 = vpop.f32.mrf.mxu3 }
 0x6d2   : > { %5625 = vmatmul.bf16.gmra.mxu1 %v4452_v50 }
 0x6d3   : > { %v10780_v58 = vpop.f32.mrf.mxu0 }
 0x6d4   : > { %12176 = vst [vmem:[#allocation17_spill] sm:$0xff] %v10780_v58  ;;  %v5353_v25 = vpop.f32.mrf.mxu2 }
 0x6d5   : > { %v5354_v41 = vadd.f32 %v5353_v25, %v5240_v23  ;;  %5851 = vmatmul.bf16.gmra.mxu3 %v12178_v15 }
 0x6d6   : > { %5964 = vmatmul.bf16.gmra.mxu0 %v12179_v39  ;;  %v12181_v39 = vld [vmem:[#allocation29_spill] sm:$0xff] }
 0x6d7   : > { %v5245_v3 = vpop.f32.mrf.mxu1  ;;  %v10788_v34 = vadd.f32 %v5466_v54, %v5354_v41  ;;  %v4165_v54 = vunpack.c.h.b16 %v12177_v62  ;;  %v12182_v41 = vld [vmem:[#allocation11_spill] sm:$0xff] }
 0x6d8   : > { %v5469_v50 = vpop.f32.mrf.mxu3  ;;  %v4458_v3 = vpack.c.b16 %v12181_v39, %v4164_v2  ;;  %v12186_v39 = vld [vmem:[#allocation2_spill] sm:$0xff] }
 0x6d9   : > { %5738 = vmatmul.bf16.gmra.mxu2 %v4453_v61  ;;  %v4459_v44 = vpack.c.b16 %v12184_v56, %v4165_v54 }
 0x6db   : > { %v5584_v58 = vpop.f32.mrf.mxu0 }
 0x6dc   : > { %v5356_v25 = vpop.f32.mrf.mxu2 }
 0x6dd   : > { %v5357_v23 = vadd.f32 %v5356_v25, %v5243_v55 }
 0x6df   : > { %v5247_v15 = vpop.f32.mrf.mxu1  ;;  %v10792_v35 = vadd.f32 %v5469_v50, %v5357_v23 }
 0x6e0   : > { %v5471_v0 = vpop.f32.mrf.mxu3 }
 0x6e2   : > { %5629 = vmatmul.bf16.gmra.mxu1 %v4458_v3 }
 0x6e3   : > { %v10795_v38 = vpop.f32.mrf.mxu0 }
 0x6e4   : > { %v5358_v24 = vpop.f32.mrf.mxu2 }
 0x6e5   : > { %5855 = vmatmul.bf16.gmra.mxu3 %v12182_v41 }
 0x6e6   : > { %5968 = vmatmul.bf16.gmra.mxu0 %v12183_v57 }
 0x6e7   : > { %v5249_v58 = vpop.f32.mrf.mxu1 }
 0x6e8   : > { %v5473_v55 = vpop.f32.mrf.mxu3 }
 0x6e9   : > { %5742 = vmatmul.bf16.gmra.mxu2 %v4459_v44  ;;  %v12187_v44 = vld [vmem:[#allocation40_spill] sm:$0xff] }
 0x6eb   : > { %v10801_v61 = vpop.f32.mrf.mxu0 }
 0x6ec   : > { %12185 = vst [vmem:[#allocation52_spill] sm:$0xff] %v10801_v61  ;;  %v5360_v50 = vpop.f32.mrf.mxu2 }
 0x6ed   : > { %v5361_v2 = vadd.f32 %v5360_v50, %v5247_v15 }
 0x6ef   : > { %v5252_v0 = vpop.f32.mrf.mxu1  ;;  %v10803_v25 = vadd.f32 %v5473_v55, %v5361_v2  ;;  %v4179_v55 = vunpack.c.l.b16 %v10256_v48 }
 0x6f0   : > { %v5475_v23 = vpop.f32.mrf.mxu3  ;;  %v12189_v0 = vld [vmem:[#allocation45_spill] sm:$0xff] }
 0x6f2   : > { %5633 = vmatmul.bf16.gmra.mxu1 %v12186_v39  ;;  %v4470_v39 = vpack.c.b16 %v4179_v55, %v12189_v0  ;;  %v12191_v55 = vld [vmem:[#allocation34_spill] sm:$0xff] }
 0x6f3   : > { %v5591_v3 = vpop.f32.mrf.mxu0 }
 0x6f4   : > { %v5362_v24 = vpop.f32.mrf.mxu2 }
 0x6f5   : > { %v5363_v41 = vadd.f32 %v5362_v24, %v5249_v58  ;;  %5859 = vmatmul.bf16.gmra.mxu3 %v9715_v59  ;;  %v4180_v59 = vunpack.c.l.b16 %v10241_v27 }
 0x6f6   : > { %5972 = vmatmul.bf16.gmra.mxu0 %v10256_v48 }
 0x6f7   : > { %v5253_v54 = vpop.f32.mrf.mxu1  ;;  %v10808_v57 = vadd.f32 %v5475_v23, %v5363_v41 }
 0x6f8   : > { %v5478_v56 = vpop.f32.mrf.mxu3 }
 0x6f9   : > { %5746 = vmatmul.bf16.gmra.mxu2 %v12187_v44  ;;  %v7295_v56 = vld [vmem:[%s11645_s3 + $0x220] sm:$0xff] }
 0x6fa   : > { %6054 = vmatpush.bf16.msra.mxu1 %v7295_v56  ;;  %v4183_v56 = vunpack.c.h.b16 %v10241_v27 }
 0x6fb   : > { %v10811_v15 = vpop.f32.mrf.mxu0 }
 0x6fc   : > { %12188 = vst [vmem:[#allocation7_spill] sm:$0xff] %v10811_v15  ;;  %v5365_v50 = vpop.f32.mrf.mxu2 }
 0x6fd   : > { %v4471_v50 = vpack.c.b16 %v4180_v59, %v12191_v55 }
 0x6ff   : > { %v5256_v2 = vpop.f32.mrf.mxu1 }
 0x700   : > { %v5479_v3 = vpop.f32.mrf.mxu3 }
 0x702   : > { %5638 = vmatmul.bf16.gmra.mxu1 %v4470_v39 }
 0x703   : > { %v10815_v58 = vpop.f32.mrf.mxu0 }
 0x704   : > { %12190 = vst [vmem:[#allocation44_spill] sm:$0xff] %v10815_v58  ;;  %v5366_v24 = vpop.f32.mrf.mxu2  ;;  %v4182_v58 = vunpack.c.h.b16 %v10256_v48  ;;  %v12193_v48 = vld [vmem:[#allocation41_spill] sm:$0xff] }
 0x705   : > { %v5367_v23 = vadd.f32 %v5366_v24, %v5253_v54  ;;  %5864 = vmatmul.bf16.gmra.mxu3 %v9801_v19  ;;  %v12192_v19 = vld [vmem:[#allocation6_spill] sm:$0xff] }
 0x706   : > { %5977 = vmatmul.bf16.gmra.mxu0 %v10289_v12  ;;  %v5496_v12 = vadd.f32 %v12192_v19, %v10214_v63 }
 0x707   : > { %v5258_v41 = vpop.f32.mrf.mxu1  ;;  %v10823_v44 = vadd.f32 %v5479_v3, %v5367_v23  ;;  %v4476_v3 = vpack.c.b16 %v10277_v5, %v4182_v58 }
 0x708   : > { %v5482_v0 = vpop.f32.mrf.mxu3 }
 0x709   : > { %5751 = vmatmul.bf16.gmra.mxu2 %v4471_v50 }
 0x70b   : > { %v5597_v39 = vpop.f32.mrf.mxu0 }
 0x70c   : > { %v5369_v54 = vpop.f32.mrf.mxu2 }
 0x70d   : > { %v5370_v24 = vadd.f32 %v5369_v54, %v5256_v2  ;;  %v5498_v2 = vadd.f32 %v12193_v48, %v10253_v26 }
 0x70f   : > { %v5608_v41 = vpop.f32.mrf.mxu1  ;;  %v10829_v15 = vadd.f32 %v5482_v0, %v5370_v24  ;;  %v4477_v0 = vpack.c.b16 %v10265_v22, %v4183_v56  ;;  %v5502_v22 = vadd.f32 %v10261_v17, %v10286_v33  ;;  %v12194_v56 = vld [vmem:[#allocation8_spill] sm:$0xff]  ;;  %v12197_v17 = vld [vmem:[#allocation66_spill] sm:$0xff] }
 0x710   : > { %v5609_v61 = vadd.f32 %v5608_v41, %v5496_v12  ;;  %v5484_v23 = vpop.f32.mrf.mxu3 }
 0x712   : > { %5642 = vmatmul.bf16.gmra.mxu1 %v4476_v3 }
 0x713   : > { %v10832_v59 = vpop.f32.mrf.mxu0 }
 0x714   : > { %v5371_v55 = vpop.f32.mrf.mxu2 }
 0x715   : > { %5868 = vmatmul.bf16.gmra.mxu3 %v9833_v14 }
 0x716   : > { %5981 = vmatmul.bf16.gmra.mxu0 %v10320_v42 }
 0x717   : > { %v5610_v63 = vpop.f32.mrf.mxu1 }
 0x718   : > { %v5611_v50 = vadd.f32 %v5610_v63, %v5498_v2  ;;  %v5834_v39 = vpop.f32.mrf.mxu3  ;;  %v12195_v2 = vld [vmem:[#allocation62_spill] sm:$0xff]  ;;  %v12196_v63 = vld [vmem:[#allocation60_spill] sm:$0xff] }
 0x719   : > { %5755 = vmatmul.bf16.gmra.mxu2 %v4477_v0 }
 0x71b   : > { %v10840_v5 = vpop.f32.mrf.mxu0 }
 0x71c   : > { %v5721_v58 = vpop.f32.mrf.mxu2 }
 0x71d   : > { %v5722_v54 = vadd.f32 %v5721_v58, %v5609_v61 }
 0x71f   : > { %v5613_v24 = vpop.f32.mrf.mxu1  ;;  %v10842_v19 = vadd.f32 %v5834_v39, %v5722_v54  ;;  %v4198_v54 = vunpack.c.l.b16 %v10334_v46 }
 0x720   : > { %v5836_v12 = vpop.f32.mrf.mxu3 }
 0x722   : > { %5646 = vmatmul.bf16.gmra.mxu1 %v9841_v28  ;;  %v4197_v28 = vunpack.c.l.b16 %v10341_v1 }
 0x723   : > { %v5952_v14 = vpop.f32.mrf.mxu0 }
 0x724   : > { %v5723_v26 = vpop.f32.mrf.mxu2  ;;  %v4488_v33 = vpack.c.b16 %v4197_v28, %v12197_v17  ;;  %v12198_v14 = vld [vmem:[#allocation13_spill] sm:$0xff] }
 0x725   : > { %v5724_v41 = vadd.f32 %v5723_v26, %v5611_v50  ;;  %5872 = vmatmul.bf16.gmra.mxu3 %v9779_v6  ;;  %v5505_v6 = vadd.f32 %v12196_v63, %v12195_v2  ;;  %v12200_v63 = vld [vmem:[#allocation68_spill] sm:$0xff] }
 0x726   : > { %5985 = vmatmul.bf16.gmra.mxu0 %v10341_v1 }
 0x727   : > { %v5614_v42 = vpop.f32.mrf.mxu1  ;;  %v10849_v3 = vadd.f32 %v5836_v12, %v5724_v41  ;;  %v7294_v41 = vld [vmem:[%s11645_s3 + $0x218] sm:$0xff] }
 0x728   : > { %v5615_v61 = vadd.f32 %v5614_v42, %v5502_v22  ;;  %v5839_v23 = vpop.f32.mrf.mxu3  ;;  %v12199_v42 = vld [vmem:[#allocation63_spill] sm:$0xff]  ;;  %6055 = vmatpush.bf16.msra.mxu1 %v7294_v41 }
 0x729   : > { %5759 = vmatmul.bf16.gmra.mxu2 %v12194_v56  ;;  %v4489_v23 = vpack.c.b16 %v4198_v54, %v12199_v42 }
 0x72b   : > { %v10852_v55 = vpop.f32.mrf.mxu0 }
 0x72c   : > { %v5726_v48 = vpop.f32.mrf.mxu2 }
 0x72d   : > { %v4200_v48 = vunpack.c.h.b16 %v10341_v1  ;;  %v12202_v1 = vld [vmem:[#allocation69_spill] sm:$0xff] }
 0x72f   : > { %v5617_v50 = vpop.f32.mrf.mxu1 }
 0x730   : > { %v5618_v0 = vadd.f32 %v5617_v50, %v5505_v6  ;;  %v5840_v39 = vpop.f32.mrf.mxu3  ;;  %v12201_v6 = vld [vmem:[#allocation64_spill] sm:$0xff] }
 0x732   : > { %5651 = vmatmul.bf16.gmra.mxu1 %v4488_v33 }
 0x733   : > { %v10858_v58 = vpop.f32.mrf.mxu0 }
 0x734   : > { %v5727_v24 = vpop.f32.mrf.mxu2 }
 0x735   : > { %v5728_v12 = vadd.f32 %v5727_v24, %v5615_v61  ;;  %5877 = vmatmul.bf16.gmra.mxu3 %v12198_v14 }
 0x736   : > { %5990 = vmatmul.bf16.gmra.mxu0 %v10374_v16  ;;  %v5509_v16 = vadd.f32 %v12201_v6, %v12200_v63 }
 0x737   : > { %v5619_v26 = vpop.f32.mrf.mxu1  ;;  %v10866_v22 = vadd.f32 %v5840_v39, %v5728_v12  ;;  %v4494_v39 = vpack.c.b16 %v10362_v9, %v4200_v48  ;;  %v4201_v12 = vunpack.c.h.b16 %v10334_v46 }
 0x738   : > { %v5843_v56 = vpop.f32.mrf.mxu3 }
 0x739   : > { %5764 = vmatmul.bf16.gmra.mxu2 %v4489_v23  ;;  %v12204_v23 = vld [vmem:[#allocation71_spill] sm:$0xff] }
 0x73b   : > { %v5958_v28 = vpop.f32.mrf.mxu0 }
 0x73c   : > { %v5730_v61 = vpop.f32.mrf.mxu2 }
 0x73d   : > { %v5731_v2 = vadd.f32 %v5730_v61, %v5618_v0  ;;  %v12203_v0 = vld [vmem:[#allocation67_spill] sm:$0xff] }
 0x73e   : > { %v5511_v26 = vadd.f32 %v12203_v0, %v12202_v1  ;;  %v12207_v0 = vld [vmem:[#allocation16_spill] sm:$0xff] }
 0x73f   : > { %v5621_v50 = vpop.f32.mrf.mxu1  ;;  %v10872_v17 = vadd.f32 %v5843_v56, %v5731_v2  ;;  %v4495_v56 = vpack.c.b16 %v12204_v23, %v4201_v12  ;;  %v12209_v23 = vld [vmem:[#allocation72_spill] sm:$0xff] }
 0x740   : > { %v5622_v33 = vadd.f32 %v5621_v50, %v5509_v16  ;;  %v5845_v24 = vpop.f32.mrf.mxu3 }
 0x742   : > { %5655 = vmatmul.bf16.gmra.mxu1 %v4494_v39  ;;  %v12206_v39 = vld [vmem:[#allocation70_spill] sm:$0xff] }
 0x743   : > { %v10875_v54 = vpop.f32.mrf.mxu0 }
 0x744   : > { %v5732_v14 = vpop.f32.mrf.mxu2 }
 0x745   : > { %5881 = vmatmul.bf16.gmra.mxu3 %v9915_v49 }
 0x746   : > { %5994 = vmatmul.bf16.gmra.mxu0 %v10405_v32  ;;  %v12205_v32 = vld [vmem:[#allocation74_spill] sm:$0xff] }
 0x747   : > { %v5623_v41 = vpop.f32.mrf.mxu1  ;;  %v5515_v24 = vadd.f32 %v12206_v39, %v12205_v32  ;;  %v7293_v39 = vld [vmem:[%s11645_s3 + $0x210] sm:$0xff] }
 0x748   : > { %v5624_v42 = vadd.f32 %v5623_v41, %v5511_v26  ;;  %v5847_v28 = vpop.f32.mrf.mxu3  ;;  %6056 = vmatpush.bf16.msra.mxu1 %v7293_v39 }
 0x749   : > { %5768 = vmatmul.bf16.gmra.mxu2 %v4495_v56 }
 0x74b   : > { %v10883_v9 = vpop.f32.mrf.mxu0 }
 0x74c   : > { %v5734_v48 = vpop.f32.mrf.mxu2 }
 0x74d   : > { %v5735_v61 = vadd.f32 %v5734_v48, %v5622_v33  ;;  %v12210_v48 = vld [vmem:[#allocation79_spill] sm:$0xff] }
 0x74f   : > { %v5626_v2 = vpop.f32.mrf.mxu1  ;;  %v10885_v63 = vadd.f32 %v5847_v28, %v5735_v61 }
 0x750   : > { %v5849_v6 = vpop.f32.mrf.mxu3 }
 0x752   : > { %5659 = vmatmul.bf16.gmra.mxu1 %v9929_v8  ;;  %v4215_v8 = vunpack.c.l.b16 %v10426_v45 }
 0x753   : > { %v5965_v49 = vpop.f32.mrf.mxu0 }
 0x754   : > { %v5736_v16 = vpop.f32.mrf.mxu2  ;;  %v4506_v61 = vpack.c.b16 %v4215_v8, %v12210_v48  ;;  %v4216_v49 = vunpack.c.l.b16 %v10419_v53 }
 0x755   : > { %v5737_v50 = vadd.f32 %v5736_v16, %v5624_v42  ;;  %5885 = vmatmul.bf16.gmra.mxu3 %v9863_v4  ;;  %v12208_v42 = vld [vmem:[#allocation75_spill] sm:$0xff] }
 0x756   : > { %5998 = vmatmul.bf16.gmra.mxu0 %v10426_v45  ;;  %v5518_v4 = vadd.f32 %v12209_v23, %v12208_v42  ;;  %v12213_v23 = vld [vmem:[#allocation77_spill] sm:$0xff] }
 0x757   : > { %v5627_v12 = vpop.f32.mrf.mxu1  ;;  %v10892_v14 = vadd.f32 %v5849_v6, %v5737_v50 }
 0x758   : > { %v5628_v33 = vadd.f32 %v5627_v12, %v5515_v24  ;;  %v5852_v1 = vpop.f32.mrf.mxu3  ;;  %v12211_v12 = vld [vmem:[#allocation76_spill] sm:$0xff] }
 0x759   : > { %5772 = vmatmul.bf16.gmra.mxu2 %v12207_v0  ;;  %v4507_v1 = vpack.c.b16 %v4216_v49, %v12211_v12 }
 0x75b   : > { %v10895_v26 = vpop.f32.mrf.mxu0 }
 0x75c   : > { %v5739_v41 = vpop.f32.mrf.mxu2 }
 0x75d   : > { %v4218_v41 = vunpack.c.h.b16 %v10426_v45  ;;  %v12214_v45 = vld [vmem:[#allocation82_spill] sm:$0xff] }
 0x75f   : > { %v5630_v56 = vpop.f32.mrf.mxu1 }
 0x760   : > { %v5631_v28 = vadd.f32 %v5630_v56, %v5518_v4  ;;  %v5853_v2 = vpop.f32.mrf.mxu3 }
 0x762   : > { %5664 = vmatmul.bf16.gmra.mxu1 %v4506_v61  ;;  %v4512_v61 = vpack.c.b16 %v10447_v51, %v4218_v41 }
 0x763   : > { %v10901_v6 = vpop.f32.mrf.mxu0 }
 0x764   : > { %v5740_v16 = vpop.f32.mrf.mxu2 }
 0x765   : > { %v5741_v50 = vadd.f32 %v5740_v16, %v5628_v33  ;;  %5890 = vmatmul.bf16.gmra.mxu3 %v9975_v43  ;;  %v12212_v43 = vld [vmem:[#allocation81_spill] sm:$0xff]  ;;  %v4219_v16 = vunpack.c.h.b16 %v10419_v53 }
 0x766   : > { %6003 = vmatmul.bf16.gmra.mxu0 %v10459_v7  ;;  %v5522_v7 = vadd.f32 %v12213_v23, %v12212_v43 }
 0x767   : > { %v5632_v32 = vpop.f32.mrf.mxu1  ;;  %v10909_v24 = vadd.f32 %v5853_v2, %v5741_v50 }
 0x768   : > { %v5856_v0 = vpop.f32.mrf.mxu3 }
 0x769   : > { %5777 = vmatmul.bf16.gmra.mxu2 %v4507_v1  ;;  %v12216_v1 = vld [vmem:[#allocation84_spill] sm:$0xff] }
 0x76b   : > { %v5971_v8 = vpop.f32.mrf.mxu0 }
 0x76c   : > { %v5743_v33 = vpop.f32.mrf.mxu2 }
 0x76d   : > { %v5744_v42 = vadd.f32 %v5743_v33, %v5631_v28  ;;  %v12215_v28 = vld [vmem:[#allocation80_spill] sm:$0xff] }
 0x76e   : > { %v5524_v32 = vadd.f32 %v12215_v28, %v12214_v45 }
 0x76f   : > { %v5634_v4 = vpop.f32.mrf.mxu1  ;;  %v10915_v56 = vadd.f32 %v5856_v0, %v5744_v42  ;;  %v4513_v0 = vpack.c.b16 %v12216_v1, %v4219_v16 }
 0x770   : > { %v5635_v48 = vadd.f32 %v5634_v4, %v5522_v7  ;;  %v5858_v2 = vpop.f32.mrf.mxu3 }
 0x771   : > { %v12219_v2 = vld [vmem:[#allocation83_spill] sm:$0xff] }
 0x772   : > { %5668 = vmatmul.bf16.gmra.mxu1 %v4512_v61  ;;  %v12218_v61 = vld [vmem:[#allocation87_spill] sm:$0xff] }
 0x773   : > { %v10918_v49 = vpop.f32.mrf.mxu0  ;;  %v5528_v16 = vadd.f32 %v12219_v2, %v12218_v61 }
 0x774   : > { %v5745_v50 = vpop.f32.mrf.mxu2 }
 0x775   : > { %5894 = vmatmul.bf16.gmra.mxu3 %v10000_v52  ;;  %v12220_v50 = vld [vmem:[#allocation97_spill] sm:$0xff] }
 0x776   : > { %6007 = vmatmul.bf16.gmra.mxu0 %v10490_v21  ;;  %v12217_v21 = vld [vmem:[#allocation12_spill] sm:$0xff] }
 0x777   : > { %v5636_v39 = vpop.f32.mrf.mxu1 }
 0x778   : > { %v5637_v12 = vadd.f32 %v5636_v39, %v5524_v32  ;;  %v5860_v8 = vpop.f32.mrf.mxu3  ;;  %v12221_v39 = vld [vmem:[#allocation15_spill] sm:$0xff] }
 0x779   : > { %5781 = vmatmul.bf16.gmra.mxu2 %v4513_v0 }
 0x77b   : > { %v10926_v51 = vpop.f32.mrf.mxu0 }
 0x77c   : > { %v5747_v41 = vpop.f32.mrf.mxu2 }
 0x77d   : > { %v5748_v33 = vadd.f32 %v5747_v41, %v5635_v48 }
 0x77f   : > { %v5639_v42 = vpop.f32.mrf.mxu1  ;;  %v10928_v43 = vadd.f32 %v5860_v8, %v5748_v33  ;;  %v12224_v8 = vld [vmem:[#allocation85_spill] sm:$0xff] }
 0x780   : > { %v5862_v23 = vpop.f32.mrf.mxu3 }
 0x782   : > { %5672 = vmatmul.bf16.gmra.mxu1 %v10012_v31  ;;  %v4233_v31 = vunpack.c.l.b16 %v12220_v50 }
 0x783   : > { %v5978_v52 = vpop.f32.mrf.mxu0 }
 0x784   : > { %v5749_v7 = vpop.f32.mrf.mxu2  ;;  %v12225_v52 = vld [vmem:[#allocation92_spill] sm:$0xff] }
 0x785   : > { %v5750_v4 = vadd.f32 %v5749_v7, %v5637_v12  ;;  %5898 = vmatmul.bf16.gmra.mxu3 %v12217_v21  ;;  %v12223_v12 = vld [vmem:[#allocation88_spill] sm:$0xff]  ;;  %v4524_v7 = vpack.c.b16 %v4233_v31, %v12225_v52  ;;  %v12229_v31 = vld [vmem:[#allocation89_spill] sm:$0xff] }
 0x786   : > { %6011 = vmatmul.bf16.gmra.mxu0 %v12220_v50  ;;  %v5531_v41 = vadd.f32 %v12224_v8, %v12223_v12 }
 0x787   : > { %v5640_v45 = vpop.f32.mrf.mxu1  ;;  %v10935_v28 = vadd.f32 %v5862_v23, %v5750_v4  ;;  %v12227_v4 = vld [vmem:[#allocation95_spill] sm:$0xff] }
 0x788   : > { %v5641_v48 = vadd.f32 %v5640_v45, %v5528_v16  ;;  %v5865_v32 = vpop.f32.mrf.mxu3  ;;  %v4234_v61 = vunpack.c.l.b16 %v12227_v4  ;;  %v12228_v45 = vld [vmem:[#allocation28_spill] sm:$0xff] }
 0x789   : > { %5785 = vmatmul.bf16.gmra.mxu2 %v12221_v39  ;;  %v7292_v39 = vld [vmem:[%s11645_s3 + $0x208] sm:$0xff] }
 0x78a   : > { %v4525_v12 = vpack.c.b16 %v4234_v61, %v12229_v31  ;;  %6057 = vmatpush.bf16.msra.mxu1 %v7292_v39  ;;  %v4237_v39 = vunpack.c.h.b16 %v12227_v4 }
 0x78b   : > { %v10938_v1 = vpop.f32.mrf.mxu0 }
 0x78c   : > { %12222 = vst [vmem:[#allocation14_spill] sm:$0xff] %v10938_v1  ;;  %v5752_v0 = vpop.f32.mrf.mxu2  ;;  %v12232_v1 = vld [vmem:[#allocation101_spill] sm:$0xff] }
 0x78f   : > { %v5643_v33 = vpop.f32.mrf.mxu1 }
 0x790   : > { %v5644_v42 = vadd.f32 %v5643_v33, %v5531_v41  ;;  %v5866_v21 = vpop.f32.mrf.mxu3  ;;  %v4236_v33 = vunpack.c.h.b16 %v12220_v50  ;;  %v12233_v50 = vld [vmem:[#allocation96_spill] sm:$0xff] }
 0x792   : > { %5677 = vmatmul.bf16.gmra.mxu1 %v4524_v7  ;;  %v12230_v7 = vld [vmem:[#allocation94_spill] sm:$0xff] }
 0x793   : > { %v10944_v23 = vpop.f32.mrf.mxu0 }
 0x794   : > { %12226 = vst [vmem:[#allocation4_spill] sm:$0xff] %v10944_v23  ;;  %v5753_v2 = vpop.f32.mrf.mxu2 }
 0x795   : > { %v5754_v16 = vadd.f32 %v5753_v2, %v5641_v48  ;;  %5903 = vmatmul.bf16.gmra.mxu3 %v12228_v45  ;;  %v12231_v2 = vld [vmem:[#allocation90_spill] sm:$0xff] }
 0x796   : > { %6016 = vmatmul.bf16.gmra.mxu0 %v10544_v40  ;;  %v5535_v40 = vadd.f32 %v12231_v2, %v12230_v7 }
 0x797   : > { %v5645_v32 = vpop.f32.mrf.mxu1  ;;  %v10952_v0 = vadd.f32 %v5866_v21, %v5754_v16  ;;  %v4530_v21 = vpack.c.b16 %v12232_v1, %v4236_v33 }
 0x798   : > { %v5869_v8 = vpop.f32.mrf.mxu3 }
 0x799   : > { %5790 = vmatmul.bf16.gmra.mxu2 %v4525_v12 }
 0x79b   : > { %v5984_v41 = vpop.f32.mrf.mxu0 }
 0x79c   : > { %v5756_v48 = vpop.f32.mrf.mxu2 }
 0x79d   : > { %v5757_v52 = vadd.f32 %v5756_v48, %v5644_v42  ;;  %v12234_v42 = vld [vmem:[#allocation93_spill] sm:$0xff]  ;;  %v12235_v48 = vld [vmem:[#allocation99_spill] sm:$0xff] }
 0x79e   : > { %v5537_v12 = vadd.f32 %v12234_v42, %v12233_v50  ;;  %v12237_v50 = vld [vmem:[#allocation98_spill] sm:$0xff] }
 0x79f   : > { %v5647_v45 = vpop.f32.mrf.mxu1  ;;  %v10958_v32 = vadd.f32 %v5869_v8, %v5757_v52  ;;  %v4531_v52 = vpack.c.b16 %v12235_v48, %v4237_v39  ;;  %v12238_v48 = vld [vmem:[#allocation23_spill] sm:$0xff] }
 0x7a0   : > { %v5648_v23 = vadd.f32 %v5647_v45, %v5535_v40  ;;  %v5871_v16 = vpop.f32.mrf.mxu3 }
 0x7a2   : > { %5681 = vmatmul.bf16.gmra.mxu1 %v4530_v21 }
 0x7a3   : > { %v10961_v61 = vpop.f32.mrf.mxu0 }
 0x7a4   : > { %v5758_v31 = vpop.f32.mrf.mxu2 }
 0x7a5   : > { %5907 = vmatmul.bf16.gmra.mxu3 %v12124_v60 }
 0x7a6   : > { %6020 = vmatmul.bf16.gmra.mxu0 %v10578_v47  ;;  %v12236_v47 = vld [vmem:[#allocation43_spill] sm:$0xff] }
 0x7a7   : > { %v5649_v41 = vpop.f32.mrf.mxu1  ;;  %v5541_v39 = vadd.f32 %v12237_v50, %v12236_v47 }
 0x7a8   : > { %v5650_v8 = vadd.f32 %v5649_v41, %v5537_v12  ;;  %v5873_v7 = vpop.f32.mrf.mxu3 }
 0x7a9   : > { %5794 = vmatmul.bf16.gmra.mxu2 %v4531_v52 }
 0x7ab   : > { %v10969_v1 = vpop.f32.mrf.mxu0 }
 0x7ac   : > { %v5760_v33 = vpop.f32.mrf.mxu2 }
 0x7ad   : > { %v5761_v2 = vadd.f32 %v5760_v33, %v5648_v23  ;;  %v12241_v33 = vld [vmem:[#allocation25_spill] sm:$0xff] }
 0x7af   : > { %v5652_v40 = vpop.f32.mrf.mxu1  ;;  %v10971_v45 = vadd.f32 %v5873_v7, %v5761_v2 }
 0x7b0   : > { %v5875_v21 = vpop.f32.mrf.mxu3 }
 0x7b2   : > { %5685 = vmatmul.bf16.gmra.mxu1 %v10092_v13  ;;  %v4251_v13 = vunpack.c.l.b16 %v10632_v30 }
 0x7b3   : > { %v5991_v60 = vpop.f32.mrf.mxu0 }
 0x7b4   : > { %v5762_v16 = vpop.f32.mrf.mxu2  ;;  %v12242_v60 = vld [vmem:[#allocation105_spill] sm:$0xff] }
 0x7b5   : > { %v5763_v31 = vadd.f32 %v5762_v16, %v5650_v8  ;;  %5911 = vmatmul.bf16.gmra.mxu3 %v12113_v18  ;;  %v12240_v8 = vld [vmem:[#allocation102_spill] sm:$0xff]  ;;  %v4542_v16 = vpack.c.b16 %v4251_v13, %v12242_v60  ;;  %v12244_v13 = vld [vmem:[#allocation103_spill] sm:$0xff] }
 0x7b6   : > { %6024 = vmatmul.bf16.gmra.mxu0 %v10632_v30  ;;  %v5544_v18 = vadd.f32 %v12241_v33, %v12240_v8  ;;  %v12246_v60 = vld [vmem:[#allocation30_spill] sm:$0xff] }
 0x7b7   : > { %v5653_v42 = vpop.f32.mrf.mxu1  ;;  %v10978_v12 = vadd.f32 %v5875_v21, %v5763_v31  ;;  %v4252_v31 = vunpack.c.l.b16 %v10616_v29 }
 0x7b8   : > { %v5654_v23 = vadd.f32 %v5653_v42, %v5541_v39  ;;  %v5878_v41 = vpop.f32.mrf.mxu3 }
 0x7b9   : > { %5798 = vmatmul.bf16.gmra.mxu2 %v12238_v48  ;;  %v7291_v41 = vld [vmem:[%s11645_s3 + $0x200] sm:$0xff] }
 0x7ba   : > { %6058 = vmatpush.bf16.msra.mxu1 %v7291_v41  ;;  %v4255_v41 = vunpack.c.h.b16 %v10616_v29 }
 0x7bb   : > { %v10981_v52 = vpop.f32.mrf.mxu0 }
 0x7bc   : > { %12239 = vst [vmem:[#allocation18_spill] sm:$0xff] %v10981_v52  ;;  %v5765_v7 = vpop.f32.mrf.mxu2 }
 0x7bd   : > { %v4543_v7 = vpack.c.b16 %v4252_v31, %v12244_v13 }
 0x7bf   : > { %v5656_v2 = vpop.f32.mrf.mxu1 }
 0x7c0   : > { %v5657_v40 = vadd.f32 %v5656_v2, %v5544_v18  ;;  %v5879_v47 = vpop.f32.mrf.mxu3  ;;  %v4254_v18 = vunpack.c.h.b16 %v10632_v30  ;;  %v12249_v30 = vld [vmem:[#allocation108_spill] sm:$0xff] }
 0x7c2   : > { %5690 = vmatmul.bf16.gmra.mxu1 %v4542_v16 }
 0x7c3   : > { %v10987_v21 = vpop.f32.mrf.mxu0 }
 0x7c4   : > { %12243 = vst [vmem:[#allocation46_spill] sm:$0xff] %v10987_v21  ;;  %v5766_v50 = vpop.f32.mrf.mxu2 }
 0x7c5   : > { %v5767_v39 = vadd.f32 %v5766_v50, %v5654_v23  ;;  %5916 = vmatmul.bf16.gmra.mxu3 %v10129_v36  ;;  %v12245_v36 = vld [vmem:[#allocation107_spill] sm:$0xff] }
 0x7c6   : > { %6029 = vmatmul.bf16.gmra.mxu0 %v10700_v10  ;;  %v5548_v10 = vadd.f32 %v12246_v60, %v12245_v36 }
 0x7c7   : > { %v5658_v42 = vpop.f32.mrf.mxu1  ;;  %v10995_v48 = vadd.f32 %v5879_v47, %v5767_v39  ;;  %v4548_v47 = vpack.c.b16 %v10678_v37, %v4254_v18 }
 0x7c8   : > { %v5882_v8 = vpop.f32.mrf.mxu3 }
 0x7c9   : > { %5803 = vmatmul.bf16.gmra.mxu2 %v4543_v7 }
 0x7cb   : > { %v5997_v33 = vpop.f32.mrf.mxu0 }
 0x7cc   : > { %v5769_v23 = vpop.f32.mrf.mxu2 }
 0x7cd   : > { %v5770_v2 = vadd.f32 %v5769_v23, %v5657_v40  ;;  %v12250_v40 = vld [vmem:[#allocation106_spill] sm:$0xff] }
 0x7ce   : > { %v5550_v7 = vadd.f32 %v12250_v40, %v12249_v30  ;;  %v12251_v23 = vld [vmem:[#allocation110_spill] sm:$0xff] }
 0x7cf   : > { %v5660_v16 = vpop.f32.mrf.mxu1  ;;  %v11001_v50 = vadd.f32 %v5882_v8, %v5770_v2  ;;  %v4549_v2 = vpack.c.b16 %v12251_v23, %v4255_v41  ;;  %v12258_v23 = vld [vmem:[#allocation24_spill] sm:$0xff] }
 0x7d0   : > { %v5661_v42 = vadd.f32 %v5660_v16, %v5548_v10  ;;  %v5884_v39 = vpop.f32.mrf.mxu3 }
 0x7d1   : > { %12247 = vst [vmem:[#allocation5_spill] sm:$0xff] %v11001_v50  ;;  %v12254_v39 = vld [vmem:[#allocation33_spill] sm:$0xff] }
 0x7d2   : > { %5694 = vmatmul.bf16.gmra.mxu1 %v4548_v47 }
 0x7d3   : > { %v11004_v31 = vpop.f32.mrf.mxu0 }
 0x7d4   : > { %12248 = vst [vmem:[#allocation26_spill] sm:$0xff] %v11004_v31  ;;  %v5771_v13 = vpop.f32.mrf.mxu2  ;;  %v12255_v31 = vld [vmem:[#allocation27_spill] sm:$0xff] }
 0x7d5   : > { %5920 = vmatmul.bf16.gmra.mxu3 %v10155_v20 }
 0x7d6   : > { %6033 = vmatmul.bf16.gmra.mxu0 %v10728_v11 }
 0x7d7   : > { %v5662_v33 = vpop.f32.mrf.mxu1 }
 0x7d8   : > { %v5663_v8 = vadd.f32 %v5662_v33, %v5550_v7  ;;  %v5886_v36 = vpop.f32.mrf.mxu3  ;;  %v12256_v7 = vld [vmem:[#allocation113_spill] sm:$0xff] }
 0x7d9   : > { %5807 = vmatmul.bf16.gmra.mxu2 %v4549_v2  ;;  %v12257_v33 = vld [vmem:[#allocation109_spill] sm:$0xff] }
 0x7da   : > { %v5554_v41 = vadd.f32 %v12257_v33, %v12256_v7  ;;  %v12264_v33 = vld [vmem:[#allocation49_spill] sm:$0xff] }
 0x7db   : > { %v11012_v37 = vpop.f32.mrf.mxu0  ;;  %v12265_v50 = vrot.slane %v12264_v33, 1 }
 0x7dc   : > { %12252 = vst [vmem:[#allocation10_spill] sm:$0xff] %v11012_v37  ;;  %v5773_v18 = vpop.f32.mrf.mxu2 }
 0x7dd   : > { %v5774_v60 = vadd.f32 %v5773_v18, %v5661_v42 }
 0x7df   : > { %v5665_v10 = vpop.f32.mrf.mxu1  ;;  %v11014_v16 = vadd.f32 %v5886_v36, %v5774_v60  ;;  %v12260_v36 = vld [vmem:[#allocation42_spill] sm:$0xff] }
 0x7e0   : > { %v5888_v47 = vpop.f32.mrf.mxu3 }
 0x7e1   : > { %12253 = vst [vmem:[#allocation29_spill] sm:$0xff] %v11014_v16 }
 0x7e2   : > { %5698 = vmatmul.bf16.gmra.mxu1 %v12254_v39  ;;  %v4034_v39 = vrot.slane %v12255_v31, 1 }
 0x7e3   : > { %v6004_v13 = vpop.f32.mrf.mxu0 }
 0x7e4   : > { %v5775_v30 = vpop.f32.mrf.mxu2  ;;  %v12263_v13 = vld [vmem:[#allocation111_spill] sm:$0xff] }
 0x7e5   : > { %v5776_v40 = vadd.f32 %v5775_v30, %v5663_v8  ;;  %5924 = vmatmul.bf16.gmra.mxu3 %v12255_v31  ;;  %v12262_v8 = vld [vmem:[#allocation114_spill] sm:$0xff]  ;;  %v12268_v31 = vld [vmem:[#allocation48_spill] sm:$0xff] }
 0x7e6   : > { %6037 = vmatmul.bf16.gmra.mxu0 %v12258_v23  ;;  %v5557_v30 = vadd.f32 %v12263_v13, %v12262_v8  ;;  %v12270_v13 = vld [vmem:[#allocation115_spill] sm:$0xff] }
 0x7e7   : > { %v5666_v2 = vpop.f32.mrf.mxu1  ;;  %v11021_v37 = vadd.f32 %v5888_v47, %v5776_v40  ;;  %v11032_v47 = vsel %vm758_vm4, %v4034_v39, %v12265_v50  ;;  %v12266_v40 = vld [vmem:[#allocation58_spill] sm:$0xff]  ;;  %v4272_v50 = vunpack.c.h.b16 %v12258_v23  ;;  %v12275_v23 = vld [vmem:[#allocation47_spill] sm:$0xff] }
 0x7e8   : > { %v5667_v42 = vadd.f32 %v5666_v2, %v5554_v41  ;;  %v5891_v18 = vpop.f32.mrf.mxu3  ;;  %v4270_v2 = vunpack.c.l.b16 %v11032_v47 }
 0x7e9   : > { %12259 = vst [vmem:[#allocation11_spill] sm:$0xff] %v11021_v37  ;;  %5811 = vmatmul.bf16.gmra.mxu2 %v12260_v36  ;;  %v12272_v37 = vld [vmem:[#allocation116_spill] sm:$0xff] }
 0x7eb   : > { %v11024_v60 = vpop.f32.mrf.mxu0 }
 0x7ec   : > { %12261 = vst [vmem:[#allocation39_spill] sm:$0xff] %v11024_v60  ;;  %v5778_v10 = vpop.f32.mrf.mxu2  ;;  %v12271_v60 = vld [vmem:[#allocation119_spill] sm:$0xff] }
 0x7ed   : > { %v12269_v10 = vld [vmem:[#allocation59_spill] sm:$0xff]  ;;  %v5561_v52 = vadd.f32 %v12272_v37, %v12271_v60 }
 0x7ef   : > { %v5669_v16 = vpop.f32.mrf.mxu1 }
 0x7f0   : > { %v5670_v21 = vadd.f32 %v5669_v16, %v5557_v30  ;;  %v5892_v7 = vpop.f32.mrf.mxu3  ;;  %v4561_v30 = vpack.c.b16 %v4270_v2, %v12270_v13  ;;  %v4273_v2 = vunpack.c.h.b16 %v11032_v47 }
 0x7f2   : > { %5703 = vmatmul.bf16.gmra.mxu1 %v12266_v40 }
 0x7f3   : > { %v11035_v41 = vpop.f32.mrf.mxu0 }
 0x7f4   : > { %12267 = vst [vmem:[#allocation21_spill] sm:$0xff] %v11035_v41  ;;  %v5779_v18 = vpop.f32.mrf.mxu2 }
 0x7f5   : > { %v5780_v36 = vadd.f32 %v5779_v18, %v5667_v42  ;;  %5929 = vmatmul.bf16.gmra.mxu3 %v12268_v31 }
 0x7f6   : > { %6042 = vmatmul.bf16.gmra.mxu0 %v12269_v10  ;;  %v12273_v10 = vld [vmem:[#allocation56_spill] sm:$0xff] }
 0x7f7   : > { %v5671_v8 = vpop.f32.mrf.mxu1  ;;  %v11040_v16 = vadd.f32 %v5892_v7, %v5780_v36 }
 0x7f8   : > { %v5895_v33 = vpop.f32.mrf.mxu3  ;;  %v4566_v8 = vpack.c.b16 %v12273_v10, %v4272_v50 }
 0x7f9   : > { %5816 = vmatmul.bf16.gmra.mxu2 %v4561_v30 }
 0x7fb   : > { %v6010_v39 = vpop.f32.mrf.mxu0 }
 0x7fc   : > { %v5782_v40 = vpop.f32.mrf.mxu2 }
 0x7fd   : > { %v5783_v41 = vadd.f32 %v5782_v40, %v5670_v21  ;;  %v12276_v21 = vld [vmem:[#allocation118_spill] sm:$0xff] }
 0x7fe   : > { %v5563_v30 = vadd.f32 %v12276_v21, %v12275_v23  ;;  %v12281_v21 = vld [vmem:[#allocation32_spill] sm:$0xff] }
 0x7ff   : > { %v5673_v42 = vpop.f32.mrf.mxu1  ;;  %v11046_v18 = vadd.f32 %v5895_v33, %v5783_v41  ;;  %v12277_v41 = vld [vmem:[#allocation55_spill] sm:$0xff] }
 0x800   : > { %v5674_v31 = vadd.f32 %v5673_v42, %v5561_v52  ;;  %v5897_v7 = vpop.f32.mrf.mxu3  ;;  %v4567_v52 = vpack.c.b16 %v12277_v41, %v4273_v2 }
 0x802   : > { %5707 = vmatmul.bf16.gmra.mxu1 %v4566_v8 }
 0x803   : > { %v11049_v36 = vpop.f32.mrf.mxu0 }
 0x804   : > { %12274 = vst [vmem:[#allocation2_spill] sm:$0xff] %v11049_v36  ;;  %v5784_v13 = vpop.f32.mrf.mxu2 }
 0x805   : > { %5933 = vmatmul.bf16.gmra.mxu3 %v10155_v20  ;;  %v12279_v20 = vld [vmem:[#allocation36_spill] sm:$0xff] }
 0x806   : > { %6046 = vmatmul.bf16.gmra.mxu0 %v10728_v11  ;;  %v12280_v11 = vld [vmem:[#allocation51_spill] sm:$0xff] }
 0x807   : > { %v5675_v37 = vpop.f32.mrf.mxu1 }
 0x808   : > { %v5676_v60 = vadd.f32 %v5675_v37, %v5563_v30  ;;  %v5899_v33 = vpop.f32.mrf.mxu3  ;;  %v5567_v30 = vadd.f32 %v12281_v21, %v12280_v11 }
 0x809   : > { %5820 = vmatmul.bf16.gmra.mxu2 %v4567_v52 }
 0x80b   : > { %v11057_v50 = vpop.f32.mrf.mxu0 }
 0x80c   : > { %12278 = vst [vmem:[#allocation40_spill] sm:$0xff] %v11057_v50  ;;  %v5786_v39 = vpop.f32.mrf.mxu2 }
 0x80d   : > { %v5787_v40 = vadd.f32 %v5786_v39, %v5674_v31  ;;  %v12284_v39 = vld [vmem:[#allocation9_spill] sm:$0xff] }
 0x80f   : > { %v5678_v42 = vpop.f32.mrf.mxu1  ;;  %v11059_v10 = vadd.f32 %v5899_v33, %v5787_v40  ;;  %v12285_v33 = vld [vmem:[#allocation50_spill] sm:$0xff] }
 0x810   : > { %v5901_v8 = vpop.f32.mrf.mxu3  ;;  %v5570_v40 = vadd.f32 %v12285_v33, %v12284_v39 }
 0x812   : > { %6059 = vmatmul.bf16.vlgmr.msra.gmra.mxu1 %v12279_v20 }
 0x813   : > { %v6017_v7 = vpop.f32.mrf.mxu0 }
 0x814   : > { %v5788_v13 = vpop.f32.mrf.mxu2  ;;  %v12286_v7 = vld [vmem:[#allocation22_spill] sm:$0xff] }
 0x815   : > { %v5789_v23 = vadd.f32 %v5788_v13, %v5676_v60 }
 0x817   : > { %v5679_v37 = vpop.f32.mrf.mxu1  ;;  %v11064_v2 = vadd.f32 %v5901_v8, %v5789_v23 }
 0x818   : > { %v5680_v41 = vadd.f32 %v5679_v37, %v5567_v30  ;;  %v5904_v52 = vpop.f32.mrf.mxu3 }
 0x819   : > { %12282 = vst [vmem:[#allocation45_spill] sm:$0xff] %v11064_v2 }
 0x81b   : > { %v11066_v50 = vpop.f32.mrf.mxu0 }
 0x81c   : > { %12283 = vst [vmem:[#allocation34_spill] sm:$0xff] %v11066_v50  ;;  %v5791_v31 = vpop.f32.mrf.mxu2  ;;  %v12290_v50 = vld [vmem:[#allocation19_spill] sm:$0xff] }
 0x81d   : > { %v12289_v31 = vld [vmem:[#allocation54_spill] sm:$0xff] }
 0x81e   : > { %v5574_v2 = vadd.f32 %v12290_v50, %v12289_v31 }
 0x81f   : > { %v5682_v42 = vpop.f32.mrf.mxu1 }
 0x820   : > { %v5683_v36 = vadd.f32 %v5682_v42, %v5570_v40  ;;  %v5905_v20 = vpop.f32.mrf.mxu3 }
 0x822   : > { %6064 = vmatmul.bf16.gmra.mxu1 %v12286_v7  ;;  %v12291_v7 = vld [vmem:[#allocation35_spill] sm:$0xff] }
 0x823   : > { %v11071_v60 = vpop.f32.mrf.mxu0 }
 0x824   : > { %12287 = vst [vmem:[#allocation6_spill] sm:$0xff] %v11071_v60  ;;  %v5792_v13 = vpop.f32.mrf.mxu2 }
 0x825   : > { %v5793_v11 = vadd.f32 %v5792_v13, %v5680_v41  ;;  %v12292_v13 = vld [vmem:[#allocation53_spill] sm:$0xff] }
 0x827   : > { %v5684_v21 = vpop.f32.mrf.mxu1  ;;  %v11073_v8 = vadd.f32 %v5905_v20, %v5793_v11  ;;  %v12293_v20 = vld [vmem:[#allocation3_spill] sm:$0xff] }
 0x828   : > { %v5908_v23 = vpop.f32.mrf.mxu3  ;;  %v5576_v11 = vadd.f32 %v12293_v20, %v12292_v13 }
 0x829   : > { %12288 = vst [vmem:[#allocation41_spill] sm:$0xff] %v11073_v8 }
 0x82b   : > { %v6023_v30 = vpop.f32.mrf.mxu0 }
 0x82c   : > { %v5795_v37 = vpop.f32.mrf.mxu2 }
 0x82d   : > { %v5796_v52 = vadd.f32 %v5795_v37, %v5683_v36 }
 0x82f   : > { %v5686_v39 = vpop.f32.mrf.mxu1  ;;  %v11077_v33 = vadd.f32 %v5908_v23, %v5796_v52 }
 0x830   : > { %v5687_v40 = vadd.f32 %v5686_v39, %v5574_v2  ;;  %v5910_v42 = vpop.f32.mrf.mxu3 }
 0x832   : > { %6068 = vmatmul.bf16.gmra.mxu1 %v12291_v7  ;;  %v12295_v7 = vld [vmem:[#allocation31_spill] sm:$0xff] }
 0x833   : > { %v11080_v60 = vpop.f32.mrf.mxu0 }
 0x834   : > { %v5797_v41 = vpop.f32.mrf.mxu2 }
 0x835   : > { %v5580_v41 = vadd.f32 %v12295_v7, %v10788_v34 }
 0x837   : > { %v5688_v21 = vpop.f32.mrf.mxu1 }
 0x838   : > { %v5689_v30 = vadd.f32 %v5688_v21, %v5576_v11  ;;  %v5912_v8 = vpop.f32.mrf.mxu3 }
 0x83b   : > { %v11084_v36 = vpop.f32.mrf.mxu0 }
 0x83c   : > { %12294 = vst [vmem:[#allocation8_spill] sm:$0xff] %v11084_v36  ;;  %v5799_v37 = vpop.f32.mrf.mxu2 }
 0x83d   : > { %v5800_v50 = vadd.f32 %v5799_v37, %v5687_v40 }
 0x83f   : > { %v5691_v31 = vpop.f32.mrf.mxu1  ;;  %v11086_v23 = vadd.f32 %v5912_v8, %v5800_v50  ;;  %v12296_v8 = vld [vmem:[#allocation17_spill] sm:$0xff] }
 0x840   : > { %v5914_v2 = vpop.f32.mrf.mxu3  ;;  %v5583_v37 = vadd.f32 %v12296_v8, %v10792_v35 }
 0x842   : > { %6072 = vmatmul.bf16.gmra.mxu1 %v12177_v62 }
 0x843   : > { %v6030_v52 = vpop.f32.mrf.mxu0 }
 0x844   : > { %v5801_v39 = vpop.f32.mrf.mxu2  ;;  %v12297_v52 = vld [vmem:[#allocation37_spill] sm:$0xff] }
 0x845   : > { %v5802_v42 = vadd.f32 %v5801_v39, %v5689_v30 }
 0x847   : > { %v5692_v13 = vpop.f32.mrf.mxu1  ;;  %v11091_v20 = vadd.f32 %v5914_v2, %v5802_v42 }
 0x848   : > { %v5693_v11 = vadd.f32 %v5692_v13, %v5580_v41  ;;  %v5917_v21 = vpop.f32.mrf.mxu3 }
 0x84b   : > { %v11093_v36 = vpop.f32.mrf.mxu0 }
 0x84c   : > { %v5804_v40 = vpop.f32.mrf.mxu2 }
 0x84d   : > { %v5587_v40 = vadd.f32 %v10795_v38, %v10803_v25 }
 0x84f   : > { %v5695_v50 = vpop.f32.mrf.mxu1 }
 0x850   : > { %v5696_v31 = vadd.f32 %v5695_v50, %v5583_v37  ;;  %v5918_v62 = vpop.f32.mrf.mxu3 }
 0x852   : > { %6077 = vmatmul.bf16.gmra.mxu1 %v12297_v52  ;;  %v12299_v52 = vld [vmem:[#allocation20_spill] sm:$0xff] }
 0x853   : > { %v11098_v30 = vpop.f32.mrf.mxu0 }
 0x854   : > { %12298 = vst [vmem:[#allocation62_spill] sm:$0xff] %v11098_v30  ;;  %v5805_v39 = vpop.f32.mrf.mxu2 }
 0x855   : > { %v5806_v34 = vadd.f32 %v5805_v39, %v5693_v11 }
 0x857   : > { %v5697_v7 = vpop.f32.mrf.mxu1  ;;  %v11100_v2 = vadd.f32 %v5918_v62, %v5806_v34  ;;  %v12300_v62 = vld [vmem:[#allocation52_spill] sm:$0xff] }
 0x858   : > { %v5921_v42 = vpop.f32.mrf.mxu3  ;;  %v5589_v39 = vadd.f32 %v12300_v62, %v10808_v57 }
 0x85b   : > { %v6036_v41 = vpop.f32.mrf.mxu0 }
 0x85c   : > { %v5808_v13 = vpop.f32.mrf.mxu2 }
 0x85d   : > { %v5809_v21 = vadd.f32 %v5808_v13, %v5696_v31 }
 0x85f   : > { %v5699_v35 = vpop.f32.mrf.mxu1  ;;  %v11104_v8 = vadd.f32 %v5921_v42, %v5809_v21 }
 0x860   : > { %v5700_v37 = vadd.f32 %v5699_v35, %v5587_v40  ;;  %v5923_v50 = vpop.f32.mrf.mxu3 }
 0x862   : > { %6081 = vmatmul.bf16.gmra.mxu1 %v12299_v52  ;;  %v12302_v52 = vld [vmem:[#allocation7_spill] sm:$0xff] }
 0x863   : > { %v11107_v30 = vpop.f32.mrf.mxu0 }
 0x864   : > { %v5810_v11 = vpop.f32.mrf.mxu2 }
 0x865   : > { %v5593_v11 = vadd.f32 %v12302_v52, %v10823_v44 }
 0x867   : > { %v5701_v34 = vpop.f32.mrf.mxu1 }
 0x868   : > { %v5702_v7 = vadd.f32 %v5701_v34, %v5589_v39  ;;  %v5925_v41 = vpop.f32.mrf.mxu3 }
 0x86b   : > { %v11111_v31 = vpop.f32.mrf.mxu0 }
 0x86c   : > { %12301 = vst [vmem:[#allocation60_spill] sm:$0xff] %v11111_v31  ;;  %v5812_v13 = vpop.f32.mrf.mxu2 }
 0x86d   : > { %v5813_v38 = vadd.f32 %v5812_v13, %v5700_v37 }
 0x86f   : > { %v5704_v25 = vpop.f32.mrf.mxu1  ;;  %v11113_v42 = vadd.f32 %v5925_v41, %v5813_v38  ;;  %v12303_v41 = vld [vmem:[#allocation44_spill] sm:$0xff] }
 0x870   : > { %v5927_v21 = vpop.f32.mrf.mxu3  ;;  %v5596_v13 = vadd.f32 %v12303_v41, %v10829_v15 }
 0x872   : > { %6085 = vmatmul.bf16.gmra.mxu1 %v10241_v27 }
 0x873   : > { %v6043_v40 = vpop.f32.mrf.mxu0 }
 0x874   : > { %v5814_v35 = vpop.f32.mrf.mxu2  ;;  %v12304_v40 = vld [vmem:[#allocation61_spill] sm:$0xff] }
 0x875   : > { %v5815_v50 = vadd.f32 %v5814_v35, %v5702_v7 }
 0x877   : > { %v5705_v57 = vpop.f32.mrf.mxu1  ;;  %v11118_v62 = vadd.f32 %v5927_v21, %v5815_v50 }
 0x878   : > { %v5706_v39 = vadd.f32 %v5705_v57, %v5593_v11  ;;  %v5930_v34 = vpop.f32.mrf.mxu3 }
 0x87b   : > { %v11120_v31 = vpop.f32.mrf.mxu0 }
 0x87c   : > { %v5817_v37 = vpop.f32.mrf.mxu2 }
 0x87d   : > { %v5948_v37 = vadd.f32 %v10832_v59, %v10842_v19  ;;  %v5954_v59 = vadd.f32 %v10852_v55, %v10866_v22  ;;  %v5963_v55 = vadd.f32 %v10883_v9, %v10892_v14  ;;  %v5974_v14 = vadd.f32 %v10918_v49, %v10928_v43  ;;  %v12312_v49 = vld [vmem:[#allocation4_spill] sm:$0xff] }
 0x87e   : > { %v5983_v43 = vadd.f32 %v12312_v49, %v10958_v32 }
 0x87f   : > { %v5708_v38 = vpop.f32.mrf.mxu1 }
 0x880   : > { %v5709_v25 = vadd.f32 %v5708_v38, %v5596_v13  ;;  %v5931_v27 = vpop.f32.mrf.mxu3 }
 0x882   : > { %6090 = vmatmul.bf16.gmra.mxu1 %v12304_v40  ;;  %v12306_v40 = vld [vmem:[#allocation65_spill] sm:$0xff] }
 0x883   : > { %v11125_v7 = vpop.f32.mrf.mxu0 }
 0x884   : > { %12305 = vst [vmem:[#allocation66_spill] sm:$0xff] %v11125_v7  ;;  %v5818_v35 = vpop.f32.mrf.mxu2 }
 0x885   : > { %v5819_v44 = vadd.f32 %v5818_v35, %v5706_v39  ;;  %v5950_v39 = vadd.f32 %v10840_v5, %v10849_v3  ;;  %v5961_v3 = vadd.f32 %v10875_v54, %v10885_v63  ;;  %v5970_v54 = vadd.f32 %v10901_v6, %v10915_v56  ;;  %v12311_v56 = vld [vmem:[#allocation14_spill] sm:$0xff] }
 0x887   : > { %v5710_v52 = vpop.f32.mrf.mxu1  ;;  %v11127_v21 = vadd.f32 %v5931_v27, %v5819_v44 }
 0x888   : > { %v5934_v50 = vpop.f32.mrf.mxu3  ;;  %v5957_v52 = vadd.f32 %v10858_v58, %v10872_v17  ;;  %v5967_v17 = vadd.f32 %v10895_v26, %v10909_v24  ;;  %v5976_v26 = vadd.f32 %v10926_v51, %v10935_v28  ;;  %v5987_v28 = vadd.f32 %v10961_v61, %v10971_v45  ;;  %v12316_v61 = vld [vmem:[#allocation5_spill] sm:$0xff]  ;;  %v12317_v45 = vld [vmem:[#allocation46_spill] sm:$0xff] }
 0x88b   : > { %v6049_v11 = vpop.f32.mrf.mxu0 }
 0x88c   : > { %v5821_v57 = vpop.f32.mrf.mxu2  ;;  %v12307_v11 = vld [vmem:[#allocation73_spill] sm:$0xff] }
 0x88d   : > { %v5822_v34 = vadd.f32 %v5821_v57, %v5709_v25 }
 0x88f   : > { %v6060_v15 = vpop.f32.mrf.mxu1  ;;  %v11131_v41 = vadd.f32 %v5934_v50, %v5822_v34  ;;  %v12308_v34 = vld [vmem:[#allocation78_spill] sm:$0xff] }
 0x890   : > { %v11133_v13 = vadd.f32 %v6060_v15, %v5948_v37  ;;  %v5936_v38 = vpop.f32.mrf.mxu3 }
 0x892   : > { %6094 = vmatmul.bf16.gmra.mxu1 %v12306_v40 }
 0x894   : > { %v5823_v7 = vpop.f32.mrf.mxu2 }
 0x897   : > { %v6062_v27 = vpop.f32.mrf.mxu1 }
 0x898   : > { %v11138_v35 = vadd.f32 %v6062_v27, %v5950_v39  ;;  %v12309_v39 = vld [vmem:[#allocation86_spill] sm:$0xff] }
 0x89f   : > { %v6065_v44 = vpop.f32.mrf.mxu1 }
 0x8a0   : > { %v12310_v44 = vld [vmem:[#allocation91_spill] sm:$0xff] }
 0x8a2   : > { %6098 = vmatmul.bf16.gmra.mxu1 %v10334_v46 }
 0x8a7   : > { %v6066_v19 = vpop.f32.mrf.mxu1 }
 0x8a8   : > { %v11143_v25 = vadd.f32 %v6066_v19, %v5954_v59  ;;  %v5980_v19 = vadd.f32 %v12311_v56, %v10952_v0  ;;  %v5989_v0 = vadd.f32 %v10969_v1, %v10978_v12  ;;  %v12319_v12 = vld [vmem:[#allocation29_spill] sm:$0xff] }
 0x8af   : > { %v6069_v50 = vpop.f32.mrf.mxu1 }
 0x8b0   : > { %v11147_v7 = vadd.f32 %v6069_v50, %v5957_v52 }
 0x8b2   : > { %6103 = vmatmul.bf16.gmra.mxu1 %v12307_v11 }
 0x8b7   : > { %v6071_v5 = vpop.f32.mrf.mxu1 }
 0x8bf   : > { %v6073_v57 = vpop.f32.mrf.mxu1 }
 0x8c0   : > { %v11152_v46 = vadd.f32 %v6073_v57, %v5961_v3  ;;  %v12313_v3 = vld [vmem:[#allocation100_spill] sm:$0xff] }
 0x8c2   : > { %6107 = vmatmul.bf16.gmra.mxu1 %v12308_v34  ;;  %v12314_v34 = vld [vmem:[#allocation104_spill] sm:$0xff] }
 0x8c7   : > { %v6075_v22 = vpop.f32.mrf.mxu1 }
 0x8c8   : > { %v11157_v37 = vadd.f32 %v6075_v22, %v5963_v55 }
 0x8cf   : > { %v6078_v58 = vpop.f32.mrf.mxu1 }
 0x8d0   : > { %v12315_v58 = vld [vmem:[#allocation18_spill] sm:$0xff] }
 0x8d2   : > { %6111 = vmatmul.bf16.gmra.mxu1 %v10419_v53 }
 0x8d7   : > { %v6079_v15 = vpop.f32.mrf.mxu1 }
 0x8d8   : > { %v11162_v38 = vadd.f32 %v6079_v15, %v5967_v17  ;;  %v5993_v17 = vadd.f32 %v12315_v58, %v10995_v48  ;;  %v12322_v48 = vld [vmem:[#allocation11_spill] sm:$0xff]  ;;  %v12327_v58 = vld [vmem:[#allocation2_spill] sm:$0xff] }
 0x8df   : > { %v6082_v63 = vpop.f32.mrf.mxu1 }
 0x8e0   : > { %v11166_v40 = vadd.f32 %v6082_v63, %v5970_v54  ;;  %v5996_v63 = vadd.f32 %v12317_v45, %v12316_v61  ;;  %v12329_v61 = vld [vmem:[#allocation40_spill] sm:$0xff] }
 0x8e2   : > { %6116 = vmatmul.bf16.gmra.mxu1 %v12309_v39 }
 0x8e7   : > { %v6084_v9 = vpop.f32.mrf.mxu1 }
 0x8ef   : > { %v6086_v27 = vpop.f32.mrf.mxu1 }
 0x8f0   : > { %v11171_v53 = vadd.f32 %v6086_v27, %v5974_v14  ;;  %v12318_v14 = vld [vmem:[#allocation112_spill] sm:$0xff]  ;;  %v12320_v27 = vld [vmem:[#allocation26_spill] sm:$0xff] }
 0x8f2   : > { %6120 = vmatmul.bf16.gmra.mxu1 %v12310_v44  ;;  %v6000_v44 = vadd.f32 %v12320_v27, %v12319_v12 }
 0x8f7   : > { %v6088_v24 = vpop.f32.mrf.mxu1 }
 0x8f8   : > { %v11176_v59 = vadd.f32 %v6088_v24, %v5976_v26  ;;  %v12321_v24 = vld [vmem:[#allocation117_spill] sm:$0xff] }
 0x8ff   : > { %v6091_v6 = vpop.f32.mrf.mxu1 }
 0x900   : > { %v12323_v6 = vld [vmem:[#allocation10_spill] sm:$0xff] }
 0x901   : > { %v6002_v56 = vadd.f32 %v12323_v6, %v12322_v48 }
 0x902   : > { %6124 = vmatmul.bf16.gmra.mxu1 %v12227_v4 }
 0x907   : > { %v6092_v52 = vpop.f32.mrf.mxu1 }
 0x908   : > { %v11181_v50 = vadd.f32 %v6092_v52, %v5980_v19 }
 0x90f   : > { %v6095_v11 = vpop.f32.mrf.mxu1 }
 0x910   : > { %v11185_v5 = vadd.f32 %v6095_v11, %v5983_v43  ;;  %v12324_v43 = vld [vmem:[#allocation39_spill] sm:$0xff] }
 0x911   : > { %v6006_v11 = vadd.f32 %v12324_v43, %v11040_v16  ;;  %v12328_v16 = vld [vmem:[#allocation45_spill] sm:$0xff]  ;;  %v6164_v43 = vadd.f32 %v11138_v35, %v11133_v13 }
 0x912   : > { %6129 = vmatmul.bf16.gmra.mxu1 %v12313_v3  ;;  %v6015_v45 = vadd.f32 %v12329_v61, %v12328_v16 }
 0x917   : > { %v6097_v51 = vpop.f32.mrf.mxu1 }
 0x91f   : > { %v6099_v57 = vpop.f32.mrf.mxu1 }
 0x920   : > { %v11190_v4 = vadd.f32 %v6099_v57, %v5987_v28  ;;  %v12325_v28 = vld [vmem:[#allocation21_spill] sm:$0xff] }
 0x921   : > { %v6009_v57 = vadd.f32 %v12325_v28, %v11046_v18  ;;  %v12333_v28 = vld [vmem:[#allocation8_spill] sm:$0xff] }
 0x922   : > { %6133 = vmatmul.bf16.gmra.mxu1 %v12314_v34 }
 0x927   : > { %v6101_v55 = vpop.f32.mrf.mxu1 }
 0x928   : > { %v11195_v22 = vadd.f32 %v6101_v55, %v5989_v0  ;;  %v12326_v55 = vld [vmem:[#allocation57_spill] sm:$0xff] }
 0x92f   : > { %v6104_v32 = vpop.f32.mrf.mxu1 }
 0x932   : > { %6137 = vmatmul.bf16.gmra.mxu1 %v10616_v29 }
 0x937   : > { %v6105_v15 = vpop.f32.mrf.mxu1 }
 0x938   : > { %v11200_v54 = vadd.f32 %v6105_v15, %v5993_v17  ;;  %v6013_v17 = vadd.f32 %v12327_v58, %v11059_v10  ;;  %v12332_v10 = vld [vmem:[#allocation6_spill] sm:$0xff] }
 0x93f   : > { %v6108_v39 = vpop.f32.mrf.mxu1 }
 0x940   : > { %v11204_v9 = vadd.f32 %v6108_v39, %v5996_v63 }
 0x942   : > { %6142 = vmatmul.bf16.gmra.mxu1 %v12318_v14  ;;  %v12330_v14 = vld [vmem:[#allocation41_spill] sm:$0xff] }
 0x947   : > { %v6110_v1 = vpop.f32.mrf.mxu1 }
 0x948   : > { %v12331_v1 = vld [vmem:[#allocation34_spill] sm:$0xff] }
 0x949   : > { %v6019_v12 = vadd.f32 %v12331_v1, %v12330_v14 }
 0x94f   : > { %v6112_v26 = vpop.f32.mrf.mxu1 }
 0x950   : > { %v11209_v29 = vadd.f32 %v6112_v26, %v6000_v44  ;;  %v6022_v26 = vadd.f32 %v12332_v10, %v11077_v33  ;;  %v6028_v33 = vadd.f32 %v12333_v28, %v11091_v20 }
 0x952   : > { %6146 = vmatmul.bf16.gmra.mxu1 %v12321_v24 }
 0x957   : > { %v6114_v19 = vpop.f32.mrf.mxu1 }
 0x958   : > { %v11214_v52 = vadd.f32 %v6114_v19, %v6002_v56  ;;  %v6026_v56 = vadd.f32 %v11080_v60, %v11086_v23 }
 0x95f   : > { %v6117_v49 = vpop.f32.mrf.mxu1 }
 0x962   : > { %6150 = vmatmul.bf16.gmra.mxu1 %v11032_v47 }
 0x967   : > { %v6118_v3 = vpop.f32.mrf.mxu1 }
 0x968   : > { %v11219_v51 = vadd.f32 %v6118_v3, %v6006_v11  ;;  %v6165_v11 = vadd.f32 %v6164_v43, %v11143_v25 }
 0x96a   : > { %v6166_v3 = vadd.f32 %v6165_v11, %v11147_v7  ;;  %v6032_v11 = vadd.f32 %v11093_v36, %v11100_v2  ;;  %v12335_v2 = vld [vmem:[#allocation60_spill] sm:$0xff] }
 0x96f   : > { %v6121_v34 = vpop.f32.mrf.mxu1 }
 0x970   : > { %v11223_v0 = vadd.f32 %v6121_v34, %v6009_v57  ;;  %v6167_v34 = vadd.f32 %v6166_v3, %v11152_v46 }
 0x972   : > { %6155 = vmatmul.bf16.gmra.mxu1 %v12326_v55  ;;  %v6168_v60 = vadd.f32 %v6167_v34, %v11157_v37 }
 0x974   : > { %v6169_v23 = vadd.f32 %v6168_v60, %v11162_v38 }
 0x977   : > { %v6123_v32 = vpop.f32.mrf.mxu1 }
 0x978   : > { %v6170_v32 = vadd.f32 %v6169_v23, %v11166_v40 }
 0x97f   : > { %v6125_v15 = vpop.f32.mrf.mxu1 }
 0x980   : > { %v11228_v47 = vadd.f32 %v6125_v15, %v6013_v17  ;;  %v6171_v17 = vadd.f32 %v6170_v32, %v11171_v53  ;;  %v6039_v32 = vadd.f32 %v11107_v30, %v11113_v42  ;;  %v12336_v30 = vld [vmem:[#allocation66_spill] sm:$0xff] }
 0x981   : > { %v6048_v42 = vadd.f32 %v12336_v30, %v11131_v41 }
 0x982   : > { %6159 = vmatmul.bf16.gmra.mxu1 %v12321_v24  ;;  %v6172_v15 = vadd.f32 %v6171_v17, %v11176_v59 }
 0x984   : > { %v6173_v16 = vadd.f32 %v6172_v15, %v11181_v50  ;;  %v6041_v15 = vadd.f32 %v12335_v2, %v11118_v62 }
 0x986   : > { %v6174_v20 = vadd.f32 %v6173_v16, %v11185_v5 }
 0x987   : > { %v6127_v63 = vpop.f32.mrf.mxu1 }
 0x988   : > { %v11233_v39 = vadd.f32 %v6127_v63, %v6015_v45  ;;  %v6175_v45 = vadd.f32 %v6174_v20, %v11190_v4 }
 0x98a   : > { %v6176_v63 = vadd.f32 %v6175_v45, %v11195_v22 }
 0x98f   : > { %v6130_v18 = vpop.f32.mrf.mxu1 }
 0x990   : > { %v6177_v18 = vadd.f32 %v6176_v63, %v11200_v54  ;;  %v6045_v63 = vadd.f32 %v11120_v31, %v11127_v21 }
 0x992   : > { %v6178_v14 = vadd.f32 %v6177_v18, %v11204_v9 }
 0x997   : > { %v6131_v27 = vpop.f32.mrf.mxu1 }
 0x998   : > { %v11237_v44 = vadd.f32 %v6131_v27, %v6019_v12  ;;  %v6179_v12 = vadd.f32 %v6178_v14, %v11209_v29 }
 0x99a   : > { %v6180_v27 = vadd.f32 %v6179_v12, %v11214_v52 }
 0x99c   : > { %v6181_v10 = vadd.f32 %v6180_v27, %v11219_v51 }
 0x99f   : > { %v6134_v48 = vpop.f32.mrf.mxu1 }
 0x9a0   : > { %v11241_v6 = vadd.f32 %v6134_v48, %v6022_v26  ;;  %v6182_v26 = vadd.f32 %v6181_v10, %v11223_v0 }
 0x9a7   : > { %v6136_v24 = vpop.f32.mrf.mxu1 }
 0x9a8   : > { %v6183_v24 = vadd.f32 %v6182_v26, %v11228_v47 }
 0x9af   : > { %v6138_v19 = vpop.f32.mrf.mxu1 }
 0x9b0   : > { %v11245_v49 = vadd.f32 %v6138_v19, %v6026_v56  ;;  %v6184_v56 = vadd.f32 %v6183_v24, %v11233_v39 }
 0x9b2   : > { %v6185_v19 = vadd.f32 %v6184_v56, %v11237_v44 }
 0x9b4   : > { %v6186_v43 = vadd.f32 %v6185_v19, %v11241_v6 }
 0x9b6   : > { %v6187_v28 = vadd.f32 %v6186_v43, %v11245_v49 }
 0x9b7   : > { %v6140_v57 = vpop.f32.mrf.mxu1 }
 0x9b8   : > { %v11254_v55 = vadd.f32 %v6140_v57, %v6028_v33  ;;  %v12334_v57 = vld [vmem:[#allocation62_spill] sm:$0xff] }
 0x9b9   : > { %v6035_v34 = vadd.f32 %v12334_v57, %v11104_v8 }
 0x9ba   : > { %v6188_v60 = vadd.f32 %v6187_v28, %v11254_v55 }
 0x9bf   : > { %v6143_v58 = vpop.f32.mrf.mxu1 }
 0x9c7   : > { %v6144_v61 = vpop.f32.mrf.mxu1 }
 0x9c8   : > { %v11278_v33 = vadd.f32 %v6144_v61, %v6032_v11  ;;  %v12337_v11 = vld [vmem:[#allocation38_spill] sm:$0xff] }
 0x9ca   : > { %v6189_v58 = vadd.f32 %v6188_v60, %v11278_v33 }
 0x9cf   : > { %v6147_v1 = vpop.f32.mrf.mxu1 }
 0x9d0   : > { %v11283_v23 = vadd.f32 %v6147_v1, %v6035_v34 }
 0x9d2   : > { %v6190_v36 = vadd.f32 %v6189_v58, %v11283_v23 }
 0x9d7   : > { %v6149_v48 = vpop.f32.mrf.mxu1 }
 0x9df   : > { %v6151_v3 = vpop.f32.mrf.mxu1 }
 0x9e0   : > { %v6152_v17 = vadd.f32 %v6151_v3, %v6039_v32 }
 0x9e2   : > { %v6191_v20 = vadd.f32 %v6190_v36, %v6152_v17 }
 0x9e7   : > { %v6153_v16 = vpop.f32.mrf.mxu1 }
 0x9e8   : > { %v6154_v61 = vadd.f32 %v6153_v16, %v6041_v15 }
 0x9ea   : > { %v6192_v45 = vadd.f32 %v6191_v20, %v6154_v61 }
 0x9ef   : > { %v6156_v8 = vpop.f32.mrf.mxu1 }
 0x9f7   : > { %v6157_v18 = vpop.f32.mrf.mxu1 }
 0x9f8   : > { %v6158_v14 = vadd.f32 %v6157_v18, %v6045_v63 }
 0x9fa   : > { %v6193_v1 = vadd.f32 %v6192_v45, %v6158_v14 }
 0x9ff   : > { %v6160_v12 = vpop.f32.mrf.mxu1 }
 0xa00   : > { %v6161_v27 = vadd.f32 %v6160_v12, %v6048_v42 }
 0xa02   : > { %v6194_v10 = vadd.f32 %v6193_v1, %v6161_v27 }
 0xa04   : > { %v6195_v26 = vrot.slane %v6194_v10, 4 }
 0xa06   : > { %v6196_v48 = vadd.f32 %v6195_v26, %v6194_v10 }
 0xa07   : > { %v6162_v62 = vpop.f32.mrf.mxu1 }
 0xa08   : > { %v6197_v24 = vrot.slane %v6196_v48, 2 }
 0xa0a   : > { %v6198_v56 = vadd.f32 %v6197_v24, %v6196_v48 }
 0xa0c   : > { %v6199_v19 = vrot.slane %v6198_v56, 1 }
 0xa0e   : > { %v6200_v43 = vadd.f32 %v6199_v19, %v6198_v56 }
 0xa10   : > { %v11296_v3 = vmul.f32 %v6200_v43, %v12337_v11 }
 0xa12   : > { %v11299_v31 = vsub.f32 %v6152_v17, %v11296_v3  ;;  %v11302_v21 = vsub.f32 %v6154_v61, %v11296_v3  ;;  %v11305_v41 = vsub.f32 %v6158_v14, %v11296_v3  ;;  %v11308_v28 = vsub.f32 %v6161_v27, %v11296_v3 }
 0xa13   : > { %v11312_v57 = vsub.f32 %v11133_v13, %v11296_v3  ;;  %v11316_v34 = vsub.f32 %v11138_v35, %v11296_v3  ;;  %v11320_v60 = vsub.f32 %v11143_v25, %v11296_v3  ;;  %v11328_v17 = vsub.f32 %v11147_v7, %v11296_v3 }
 0xa14   : > { %v11332_v13 = vsub.f32 %v11152_v46, %v11296_v3  ;;  %v11338_v25 = vsub.f32 %v11157_v37, %v11296_v3  ;;  %v11344_v7 = vsub.f32 %v11162_v38, %v11296_v3  ;;  %v11350_v20 = vsub.f32 %v11166_v40, %v11296_v3 }
 0xa15   : > { %v6234_v32 = vmul.f32 %v11312_v57, %v11312_v57  ;;  %v6235_v58 = vmul.f32 %v11316_v34, %v11316_v34  ;;  %v6236_v35 = vmul.f32 %v11320_v60, %v11320_v60  ;;  %v6237_v2 = vmul.f32 %v11328_v17, %v11328_v17 }
 0xa16   : > { %v6238_v46 = vmul.f32 %v11332_v13, %v11332_v13  ;;  %v6239_v37 = vmul.f32 %v11338_v25, %v11338_v25  ;;  %v11356_v45 = vsub.f32 %v11171_v53, %v11296_v3  ;;  %v6240_v38 = vmul.f32 %v11344_v7, %v11344_v7 }
 0xa17   : > { %v6266_v36 = vadd.f32 %v6235_v58, %v6234_v32  ;;  %v11362_v63 = vsub.f32 %v11176_v59, %v11296_v3  ;;  %v6241_v40 = vmul.f32 %v11350_v20, %v11350_v20  ;;  %v11368_v14 = vsub.f32 %v11181_v50, %v11296_v3 }
 0xa18   : > { %v6242_v53 = vmul.f32 %v11356_v45, %v11356_v45  ;;  %v11374_v30 = vsub.f32 %v11185_v5, %v11296_v3  ;;  %v11380_v12 = vsub.f32 %v11190_v4, %v11296_v3  ;;  %v11386_v10 = vsub.f32 %v11195_v22, %v11296_v3 }
 0xa19   : > { %v6267_v15 = vadd.f32 %v6266_v36, %v6236_v35  ;;  %v6243_v59 = vmul.f32 %v11362_v63, %v11362_v63  ;;  %v6244_v50 = vmul.f32 %v11368_v14, %v11368_v14  ;;  %v11392_v48 = vsub.f32 %v11200_v54, %v11296_v3 }
 0xa1a   : > { %v6245_v5 = vmul.f32 %v11374_v30, %v11374_v30  ;;  %v6246_v4 = vmul.f32 %v11380_v12, %v11380_v12  ;;  %v11398_v24 = vsub.f32 %v11204_v9, %v11296_v3  ;;  %v6247_v22 = vmul.f32 %v11386_v10, %v11386_v10 }
 0xa1b   : > { %v6268_v16 = vadd.f32 %v6267_v15, %v6237_v2  ;;  %v11404_v19 = vsub.f32 %v11209_v29, %v11296_v3  ;;  %v6248_v54 = vmul.f32 %v11392_v48, %v11392_v48  ;;  %v11410_v32 = vsub.f32 %v11214_v52, %v11296_v3 }
 0xa1c   : > { %v6249_v9 = vmul.f32 %v11398_v24, %v11398_v24  ;;  %v11416_v35 = vsub.f32 %v11219_v51, %v11296_v3  ;;  %v11422_v2 = vsub.f32 %v11223_v0, %v11296_v3 }
 0xa1d   : > { %v6269_v61 = vadd.f32 %v6268_v16, %v6238_v46  ;;  %v6250_v29 = vmul.f32 %v11404_v19, %v11404_v19  ;;  %v6251_v52 = vmul.f32 %v11410_v32, %v11410_v32  ;;  %v11428_v46 = vsub.f32 %v11228_v47, %v11296_v3 }
 0xa1e   : > { %v6252_v51 = vmul.f32 %v11416_v35, %v11416_v35  ;;  %v6253_v0 = vmul.f32 %v11422_v2, %v11422_v2 }
 0xa1f   : > { %v6270_v8 = vadd.f32 %v6269_v61, %v6239_v37  ;;  %v11434_v37 = vsub.f32 %v11233_v39, %v11296_v3  ;;  %v6254_v47 = vmul.f32 %v11428_v46, %v11428_v46 }
 0xa21   : > { %v6271_v18 = vadd.f32 %v6270_v8, %v6240_v38  ;;  %v11440_v38 = vsub.f32 %v11237_v44, %v11296_v3  ;;  %v6255_v39 = vmul.f32 %v11434_v37, %v11434_v37 }
 0xa23   : > { %v6272_v1 = vadd.f32 %v6271_v18, %v6241_v40  ;;  %v11446_v40 = vsub.f32 %v11241_v6, %v11296_v3  ;;  %v6256_v44 = vmul.f32 %v11440_v38, %v11440_v38 }
 0xa25   : > { %v6273_v42 = vadd.f32 %v6272_v1, %v6242_v53  ;;  %v11452_v53 = vsub.f32 %v11245_v49, %v11296_v3  ;;  %v6257_v6 = vmul.f32 %v11446_v40, %v11446_v40 }
 0xa27   : > { %v6274_v27 = vadd.f32 %v6273_v42, %v6243_v59  ;;  %v11458_v59 = vsub.f32 %v11254_v55, %v11296_v3  ;;  %v6258_v49 = vmul.f32 %v11452_v53, %v11452_v53 }
 0xa29   : > { %v6275_v26 = vadd.f32 %v6274_v27, %v6244_v50  ;;  %v11464_v50 = vsub.f32 %v11278_v33, %v11296_v3  ;;  %v6259_v55 = vmul.f32 %v11458_v59, %v11458_v59 }
 0xa2b   : > { %v6276_v62 = vadd.f32 %v6275_v26, %v6245_v5  ;;  %v11470_v5 = vsub.f32 %v11283_v23, %v11296_v3  ;;  %v6263_v23 = vmul.f32 %v11302_v21, %v11302_v21 }
 0xa2d   : > { %v6277_v56 = vadd.f32 %v6276_v62, %v6246_v4  ;;  %v6260_v4 = vmul.f32 %v11464_v50, %v11464_v50  ;;  %v6261_v33 = vmul.f32 %v11470_v5, %v11470_v5 }
 0xa2f   : > { %v6278_v43 = vadd.f32 %v6277_v56, %v6247_v22  ;;  %v6262_v56 = vmul.f32 %v11299_v31, %v11299_v31 }
 0xa31   : > { %v6279_v58 = vadd.f32 %v6278_v43, %v6248_v54  ;;  %v6264_v43 = vmul.f32 %v11305_v41, %v11305_v41 }
 0xa33   : > { %v6280_v36 = vadd.f32 %v6279_v58, %v6249_v9  ;;  %v6265_v58 = vmul.f32 %v11308_v28, %v11308_v28 }
 0xa35   : > { %v6281_v15 = vadd.f32 %v6280_v36, %v6250_v29 }
 0xa37   : > { %v6282_v16 = vadd.f32 %v6281_v15, %v6251_v52 }
 0xa39   : > { %v6283_v61 = vadd.f32 %v6282_v16, %v6252_v51 }
 0xa3b   : > { %v6284_v8 = vadd.f32 %v6283_v61, %v6253_v0 }
 0xa3d   : > { %v6285_v18 = vadd.f32 %v6284_v8, %v6254_v47 }
 0xa3f   : > { %v6286_v1 = vadd.f32 %v6285_v18, %v6255_v39 }
 0xa41   : > { %v6287_v42 = vadd.f32 %v6286_v1, %v6256_v44 }
 0xa43   : > { %v6288_v27 = vadd.f32 %v6287_v42, %v6257_v6 }
 0xa45   : > { %v6289_v26 = vadd.f32 %v6288_v27, %v6258_v49  ;;  %v11492_v27 = vld [vmem:[%s11646_s4 + $0x2] ss:$0 sm:$0xff] }
 0xa47   : > { %v6290_v62 = vadd.f32 %v6289_v26, %v6259_v55  ;;  %v11499_v55 = vld [vmem:[%s11646_s4 + $0x3] ss:$0 sm:$0xff] }
 0xa49   : > { %v6291_v22 = vadd.f32 %v6290_v62, %v6260_v4 }
 0xa4b   : > { %v6292_v54 = vadd.f32 %v6291_v22, %v6261_v33 }
 0xa4d   : > { %v6293_v3 = vadd.f32 %v6292_v54, %v6262_v56 }
 0xa4f   : > { %v6294_v9 = vadd.f32 %v6293_v3, %v6263_v23 }
 0xa51   : > { %v6295_v29 = vadd.f32 %v6294_v9, %v6264_v43 }
 0xa53   : > { %v6296_v36 = vadd.f32 %v6295_v29, %v6265_v58 }
 0xa55   : > { %v6297_v52 = vrot.slane %v6296_v36, 4 }
 0xa57   : > { %v6298_v15 = vadd.f32 %v6297_v52, %v6296_v36 }
 0xa59   : > { %v6299_v51 = vrot.slane %v6298_v15, 2 }
 0xa5b   : > { %v6300_v16 = vadd.f32 %v6299_v51, %v6298_v15 }
 0xa5d   : > { %v6301_v0 = vrot.slane %v6300_v16, 1 }
 0xa5f   : > { %v6302_v61 = vadd.f32 %v6301_v0, %v6300_v16 }
 0xa61   : > { %v6303_v47 = vmul.f32 %v6302_v61, %v12337_v11 }
 0xa63   : > { %v6304_v8 = vadd.f32 1e-05, %v6303_v47 }
 0xa65   : > { %7526 = vrsqrt.f32 %v6304_v8  ;;  %vm6311_vm14 = vweird.f32 %v6304_v8 }
 0xa6b   : > { %v7527_v39 = vpop.eup %7526 }
 0xa6c   : > { %v6306_v18 = vmul.f32 %v7527_v39, %v6304_v8  ;;  %vm6312_vm13 = vweird.f32 %v7527_v39 }
 0xa6d   : > { %vm6313_vm15 = vmor %vm6311_vm14, %vm6312_vm13 }
 0xa6e   : > { %v6307_v44 = vmul.f32 %v7527_v39, %v6306_v18 }
 0xa70   : > { %v6308_v1 = vmul.f32 0.5, %v6307_v44 }
 0xa72   : > { %v6309_v6 = vsub.f32 1.5, %v6308_v1 }
 0xa74   : > { %v6310_v42 = vmul.f32 %v7527_v39, %v6309_v6 }
 0xa76   : > { %v11487_v49 = vsel %vm6313_vm15, %v7527_v39, %v6310_v42 }
 0xa77   : > { %v6331_v11 = vmul.f32 %v11487_v49, %v11404_v19  ;;  %v6315_v26 = vmul.f32 %v11487_v49, %v11312_v57  ;;  %v6332_v33 = vmul.f32 %v11487_v49, %v11410_v32  ;;  %v6316_v19 = vmul.f32 %v11487_v49, %v11316_v34 }
 0xa78   : > { %v6333_v23 = vmul.f32 %v11487_v49, %v11416_v35  ;;  %v6317_v43 = vmul.f32 %v11487_v49, %v11320_v60  ;;  %v6318_v58 = vmul.f32 %v11487_v49, %v11328_v17  ;;  %v6334_v29 = vmul.f32 %v11487_v49, %v11422_v2 }
 0xa79   : > { %v6364_v4 = vmul.f32 %v11492_v27, %v6331_v11  ;;  %v6348_v62 = vmul.f32 %v11492_v27, %v6315_v26  ;;  %v6365_v54 = vmul.f32 %v11492_v27, %v6332_v33  ;;  %v6349_v57 = vmul.f32 %v11492_v27, %v6316_v19 }
 0xa7a   : > { %v6366_v34 = vmul.f32 %v11492_v27, %v6333_v23  ;;  %v6350_v9 = vmul.f32 %v11492_v27, %v6317_v43  ;;  %v6367_v60 = vmul.f32 %v11492_v27, %v6334_v29  ;;  %v6351_v52 = vmul.f32 %v11492_v27, %v6318_v58 }
 0xa7b   : > { %v6397_v22 = vadd.f32 %v11499_v55, %v6364_v4  ;;  %v6381_v56 = vadd.f32 %v11499_v55, %v6348_v62  ;;  %v6398_v3 = vadd.f32 %v11499_v55, %v6365_v54  ;;  %v6382_v32 = vadd.f32 %v11499_v55, %v6349_v57 }
 0xa7c   : > { %v6399_v35 = vadd.f32 %v11499_v55, %v6366_v34  ;;  %v6383_v36 = vadd.f32 %v11499_v55, %v6350_v9  ;;  %v6319_v15 = vmul.f32 %v11487_v49, %v11332_v13  ;;  %v6335_v51 = vmul.f32 %v11487_v49, %v11428_v46 }
 0xa7d   : > { %6445 = vxpose.xlu1.b32.start [1/16] (narrow) %v6397_v22, 8  ;;  %6413 = vxpose.xlu0.b32.start [1/16] (narrow) %v6381_v56, 8  ;;  %v6400_v17 = vadd.f32 %v11499_v55, %v6367_v60  ;;  %v6384_v2 = vadd.f32 %v11499_v55, %v6351_v52  ;;  %v6336_v61 = vmul.f32 %v11487_v49, %v11434_v37  ;;  %v6477_v52 = vld [vmem:[%s239_s29] sm:$0xff] }
 0xa7e   : > { %v6368_v16 = vmul.f32 %v11492_v27, %v6335_v51  ;;  %v6352_v0 = vmul.f32 %v11492_v27, %v6319_v15  ;;  %v6320_v46 = vmul.f32 %v11487_v49, %v11338_v25  ;;  %v6337_v18 = vmul.f32 %v11487_v49, %v11440_v38  ;;  %6479 = vst [vmem:[#allocation1] ss:$2 sm:$0xff] %v6477_v52 }
 0xa7f   : > { %v6369_v8 = vmul.f32 %v11492_v27, %v6336_v61  ;;  %v6321_v1 = vmul.f32 %v11487_v49, %v11344_v7  ;;  %v6322_v42 = vmul.f32 %v11487_v49, %v11350_v20  ;;  %v6338_v11 = vmul.f32 %v11487_v49, %v11446_v40 }
 0xa80   : > { %v6401_v47 = vadd.f32 %v11499_v55, %v6368_v16  ;;  %v6385_v13 = vadd.f32 %v11499_v55, %v6352_v0  ;;  %v6353_v39 = vmul.f32 %v11492_v27, %v6320_v46  ;;  %v6370_v25 = vmul.f32 %v11492_v27, %v6337_v18 }
 0xa81   : > { %v6402_v44 = vadd.f32 %v11499_v55, %v6369_v8  ;;  %v6354_v6 = vmul.f32 %v11492_v27, %v6321_v1  ;;  %v6371_v7 = vmul.f32 %v11492_v27, %v6338_v11  ;;  %v6355_v4 = vmul.f32 %v11492_v27, %v6322_v42 }
 0xa82   : > { %v6386_v37 = vadd.f32 %v11499_v55, %v6353_v39  ;;  %v6403_v38 = vadd.f32 %v11499_v55, %v6370_v25  ;;  %v6323_v62 = vmul.f32 %v11487_v49, %v11356_v45  ;;  %v6339_v33 = vmul.f32 %v11487_v49, %v11452_v53 }
 0xa83   : > { %v6387_v26 = vadd.f32 %v11499_v55, %v6354_v6  ;;  %v6404_v20 = vadd.f32 %v11499_v55, %v6371_v7  ;;  %v6388_v40 = vadd.f32 %v11499_v55, %v6355_v4  ;;  %v6340_v19 = vmul.f32 %v11487_v49, %v11458_v59 }
 0xa84   : > { %v6372_v22 = vmul.f32 %v11492_v27, %v6339_v33  ;;  %v6356_v56 = vmul.f32 %v11492_v27, %v6323_v62  ;;  %v6324_v53 = vmul.f32 %v11487_v49, %v11362_v63  ;;  %v6325_v43 = vmul.f32 %v11487_v49, %v11368_v14 }
 0xa85   : > { %6446 = vxpose.xlu1.b32.cont [2/16] (narrow) %v6398_v3, 8  ;;  %6414 = vxpose.xlu0.b32.cont [2/16] (narrow) %v6382_v32, 8  ;;  %v6373_v57 = vmul.f32 %v11492_v27, %v6340_v19  ;;  %v6341_v3 = vmul.f32 %v11487_v49, %v11464_v50  ;;  %v6326_v9 = vmul.f32 %v11487_v49, %v11374_v30  ;;  %v6480_v25 = vld.sshfl [vmem:[#allocation1] sm:$0xff pattern:$0x75316420] }
 0xa86   : > { %v6405_v54 = vadd.f32 %v11499_v55, %v6372_v22  ;;  %v6389_v45 = vadd.f32 %v11499_v55, %v6356_v56  ;;  %v6357_v23 = vmul.f32 %v11492_v27, %v6324_v53  ;;  %v6358_v34 = vmul.f32 %v11492_v27, %v6325_v43 }
 0xa87   : > { %v6406_v32 = vadd.f32 %v11499_v55, %v6373_v57  ;;  %v6374_v63 = vmul.f32 %v11492_v27, %v6341_v3  ;;  %v6342_v50 = vmul.f32 %v11487_v49, %v11470_v5  ;;  %v6327_v30 = vmul.f32 %v11487_v49, %v11380_v12 }
 0xa88   : > { %v6390_v59 = vadd.f32 %v11499_v55, %v6357_v23  ;;  %v6391_v29 = vadd.f32 %v11499_v55, %v6358_v34  ;;  %v6343_v5 = vmul.f32 %v11487_v49, %v11299_v31  ;;  %v6328_v31 = vmul.f32 %v11487_v49, %v11386_v10 }
 0xa89   : > { %v6407_v58 = vadd.f32 %v11499_v55, %v6374_v63  ;;  %v6375_v14 = vmul.f32 %v11492_v27, %v6342_v50  ;;  %v6360_v51 = vmul.f32 %v11492_v27, %v6327_v30  ;;  %v6345_v61 = vmul.f32 %v11487_v49, %v11305_v41 }
 0xa8a   : > { %v6376_v15 = vmul.f32 %v11492_v27, %v6343_v5  ;;  %v6361_v0 = vmul.f32 %v11492_v27, %v6328_v31  ;;  %v6346_v8 = vmul.f32 %v11487_v49, %v11308_v28  ;;  %v6330_v39 = vmul.f32 %v11487_v49, %v11398_v24  ;;  %v6481_v28 = vld.sshfl [vmem:[#allocation1 + $0x8] sm:$0xff pattern:$0x75316420] }
 0xa8b   : > { %v6378_v10 = vmul.f32 %v11492_v27, %v6345_v61 }
 0xa8c   : > { %v6409_v12 = vadd.f32 %v11499_v55, %v6376_v15 }
 0xa8d   : > { %6447 = vxpose.xlu1.b32.cont [3/16] (narrow) %v6399_v35, 8  ;;  %6415 = vxpose.xlu0.b32.cont [3/16] (narrow) %v6383_v36, 8  ;;  %v6359_v35 = vmul.f32 %v11492_v27, %v6326_v9  ;;  %v6408_v36 = vadd.f32 %v11499_v55, %v6375_v14  ;;  %v6411_v41 = vadd.f32 %v11499_v55, %v6378_v10 }
 0xa8f   : > { %v6392_v60 = vadd.f32 %v11499_v55, %v6359_v35 }
 0xa95   : > { %6448 = vxpose.xlu1.b32.cont [4/16] (narrow) %v6400_v17, 8  ;;  %6416 = vxpose.xlu0.b32.cont [4/16] (narrow) %v6384_v2, 8  ;;  %v6344_v17 = vmul.f32 %v11487_v49, %v11302_v21  ;;  %v6393_v2 = vadd.f32 %v11499_v55, %v6360_v51  ;;  %v6394_v21 = vadd.f32 %v11499_v55, %v6361_v0 }
 0xa97   : > { %v6377_v16 = vmul.f32 %v11492_v27, %v6344_v17 }
 0xa9d   : > { %6449 = vxpose.xlu1.b32.cont [5/16] (narrow) %v6401_v47, 8  ;;  %6417 = vxpose.xlu0.b32.cont [5/16] (narrow) %v6385_v13, 8  ;;  %v6410_v47 = vadd.f32 %v11499_v55, %v6377_v16  ;;  %v6329_v13 = vmul.f32 %v11487_v49, %v11392_v48  ;;  %v6379_v48 = vmul.f32 %v11492_v27, %v6346_v8 }
 0xa9f   : > { %v6362_v46 = vmul.f32 %v11492_v27, %v6329_v13 }
 0xaa1   : > { %v6395_v18 = vadd.f32 %v11499_v55, %v6362_v46 }
 0xaa5   : > { %6450 = vxpose.xlu1.b32.cont [6/16] (narrow) %v6402_v44, 8  ;;  %6418 = vxpose.xlu0.b32.cont [6/16] (narrow) %v6386_v37, 8  ;;  %v6363_v44 = vmul.f32 %v11492_v27, %v6330_v39  ;;  %v6412_v37 = vadd.f32 %v11499_v55, %v6379_v48 }
 0xaa7   : > { %v6396_v1 = vadd.f32 %v11499_v55, %v6363_v44 }
 0xaad   : > { %6451 = vxpose.xlu1.b32.cont [7/16] (narrow) %v6403_v38, 8  ;;  %6419 = vxpose.xlu0.b32.cont [7/16] (narrow) %v6387_v26, 8 }
 0xab5   : > { %6452 = vxpose.xlu1.b32.cont [8/16] (narrow) %v6404_v20, 8  ;;  %6420 = vxpose.xlu0.b32.cont [8/16] (narrow) %v6388_v40, 8 }
 0xabd   : > { %6453 = vxpose.xlu1.b32.cont [9/16] (narrow) %v6405_v54, 8  ;;  %6421 = vxpose.xlu0.b32.cont [9/16] (narrow) %v6389_v45, 8 }
 0xac5   : > { %6454 = vxpose.xlu1.b32.cont [10/16] (narrow) %v6406_v32, 8  ;;  %6422 = vxpose.xlu0.b32.cont [10/16] (narrow) %v6390_v59, 8 }
 0xacd   : > { %6455 = vxpose.xlu1.b32.cont [11/16] (narrow) %v6407_v58, 8  ;;  %6423 = vxpose.xlu0.b32.cont [11/16] (narrow) %v6391_v29, 8 }
 0xad5   : > { %6456 = vxpose.xlu1.b32.cont [12/16] (narrow) %v6408_v36, 8  ;;  %6424 = vxpose.xlu0.b32.cont [12/16] (narrow) %v6392_v60, 8 }
 0xadd   : > { %6457 = vxpose.xlu1.b32.cont [13/16] (narrow) %v6409_v12, 8  ;;  %6425 = vxpose.xlu0.b32.cont [13/16] (narrow) %v6393_v2, 8 }
 0xae5   : > { %6458 = vxpose.xlu1.b32.cont [14/16] (narrow) %v6410_v47, 8  ;;  %6426 = vxpose.xlu0.b32.cont [14/16] (narrow) %v6394_v21, 8 }
 0xaed   : > { %6459 = vxpose.xlu1.b32.cont [15/16] (narrow) %v6411_v41, 8  ;;  %6427 = vxpose.xlu0.b32.cont [15/16] (narrow) %v6395_v18, 8 }
 0xaf5   : > { %6460 = vxpose.xlu1.b32.end [16/16] (narrow) %v6412_v37, 8  ;;  %6428 = vxpose.xlu0.b32.end [16/16] (narrow) %v6396_v1, 8 }
 0xb21   : > { %v6461_v24 = vpop.trf.xlu1  ;;  %v6429_v49 = vpop.trf.xlu0 }
 0xb22   : > { %v6485_v6 = vadd.f32 %v6481_v28, %v6461_v24  ;;  %v6484_v42 = vadd.f32 %v6480_v25, %v6429_v49 }
 0xb24   : > { %v6488_v11 = vrot.slane %v6485_v6, 4 }
 0xb26   : > { %v6490_v27 = vsel %vm737_vm1, %v6484_v42, %v6488_v11 }
 0xb27   : > { %6492 = vst [vmem:[%s244_s7] sm:$0xff] %v6490_v27 }
 0xb28 PF: > { %s15_s18 = sadd.s32 1, %s7561_s18  }
 0xb29   : > { %p12_p4 = scmp.ge.s32.totalorder %s15_s18, 4  }
 0xb2b   :  { %14 = sbr.rel (!%p12_p4) target bundleno = 1 (0x1), region = 73 }

</bundles_post_ra>
